<compile_context>
chip_gen: v6e
topology: v6e:2x2x1
jax: 0.10.0
libtpu: 0.0.40
codegen_flags: <defaults>
</compile_context>

<pallas_src>
import functools
import math

import jax
import jax.numpy as jnp
from jax import lax
from jax.experimental import pallas as pl
from jax.experimental.pallas import tpu as pltpu

BLOCK_CONFIG = (6, 12, 24, 16)   # DenseNet-121
GROWTH = 32
BN_SIZE = 4
NUM_INIT_FEATURES = 64


def _round_up(x, m):
    return ((x + m - 1) // m) * m


# ----------------------------------------------------------------------------
# Pallas kernels
# ----------------------------------------------------------------------------
def _matmul_kernel(a_ref, b_ref, s_ref, t_ref, o_ref, *, relu):
    """Tiled MXU matmul: bf16 operands, f32 accumulation directly into the
    VMEM-resident output block, fused scale/shift (+ReLU) epilogue."""
    k = pl.program_id(2)

    @pl.when(k == 0)
    def _():
        o_ref[...] = jnp.zeros_like(o_ref)

    o_ref[...] += jnp.dot(a_ref[...], b_ref[...],
                          preferred_element_type=jnp.float32)

    @pl.when(k == pl.num_programs(2) - 1)
    def _():
        y = o_ref[...] * s_ref[...] + t_ref[...]
        if relu:
            y = jnp.maximum(y, 0.0)
        o_ref[...] = y


def _bn_kernel(x_ref, s_ref, t_ref, o_ref, *, relu):
    y = x_ref[...] * s_ref[...] + t_ref[...]
    if relu:
        y = jnp.maximum(y, 0.0)
    o_ref[...] = y


def _reduce_kernel(x_ref, o_ref, *, op):
    # reduce over the leading (window/tap) axis of a (T, TR, Cp) block
    if op == "max":
        o_ref[...] = jnp.max(x_ref[...], axis=0)
    else:
        o_ref[...] = jnp.mean(x_ref[...], axis=0)


# ----------------------------------------------------------------------------
# Pallas wrappers
# ----------------------------------------------------------------------------
def pallas_matmul(a, b, scale=None, shift=None, relu=False):
    """(M,K) @ (K,N), bf16 MXU operands / f32 accumulation, with an optional
    fused per-output-channel scale/shift (+ReLU) epilogue.

    Used for: conv-as-matmul (+ folded BatchNorm of the *following* BN layer),
    and the final fc (shift = bias)."""
    M, K = a.shape
    _, N = b.shape

    # --- tile sizes (bf16 operands -> M rounded to 16; lanes to 128) ---
    if M > 256:
        TM = 256
        Mp = _round_up(M, TM)
    else:
        TM = _round_up(max(M, 16), 16)
        Mp = TM

    Kp = _round_up(K, 128)
    if Kp >= 256:
        Kp = _round_up(Kp, 256)   # deeper K tiles better fill the 256x256 MXU
        TK = 256
    else:
        TK = Kp                   # 128

    if N > 256:
        TN = 256
        Np = _round_up(N, TN)
    else:
        TN = _round_up(N, 128)
        Np = TN

    # pad + cast in one expression so XLA fuses it into a single copy
    ap = jnp.pad(a, ((0, Mp - M), (0, Kp - K))).astype(jnp.bfloat16)
    bp = jnp.pad(b, ((0, Kp - K), (0, Np - N))).astype(jnp.bfloat16)

    if scale is None:
        sp = jnp.ones((1, Np), jnp.float32)
    else:
        sp = jnp.pad(scale.reshape(1, N), ((0, 0), (0, Np - N)))
    if shift is None:
        tp = jnp.zeros((1, Np), jnp.float32)
    else:
        tp = jnp.pad(shift.reshape(1, N), ((0, 0), (0, Np - N)))

    grid = (Mp // TM, Np // TN, Kp // TK)
    cost = pl.CostEstimate(
        flops=2 * Mp * Np * Kp,
        transcendentals=0,
        bytes_accessed=Mp * Kp * 2 + Kp * Np * 2 + Mp * Np * 4,
    )

    out = pl.pallas_call(
        functools.partial(_matmul_kernel, relu=relu),
        out_shape=jax.ShapeDtypeStruct((Mp, Np), jnp.float32),
        grid=grid,
        in_specs=[
            pl.BlockSpec((TM, TK), lambda i, j, k: (i, k)),
            pl.BlockSpec((TK, TN), lambda i, j, k: (k, j)),
            pl.BlockSpec((1, TN), lambda i, j, k: (0, j)),
            pl.BlockSpec((1, TN), lambda i, j, k: (0, j)),
        ],
        out_specs=pl.BlockSpec((TM, TN), lambda i, j, k: (i, j)),
        compiler_params=pltpu.CompilerParams(
            dimension_semantics=("parallel", "parallel", "arbitrary"),
            vmem_limit_bytes=32 * 1024 * 1024),
        cost_estimate=cost,
    )(ap, bp, sp, tp)
    return out[:M, :N]


def bn_act(x, scale, shift, relu=True):
    """Standalone folded BatchNorm (per-channel scale/shift) + optional ReLU,
    NHWC, row-tiled so it pipelines and scales past the VMEM limit."""
    N, H, W, C = x.shape
    M = N * H * W
    Cp = _round_up(C, 128)

    Mp8 = _round_up(M, 8)
    if Mp8 <= 512:
        TR, Mp = Mp8, Mp8
    else:
        TR = 512
        Mp = _round_up(M, TR)

    x2 = jnp.pad(x.reshape(M, C), ((0, Mp - M), (0, Cp - C)))
    s = jnp.pad(scale, ((0, 0), (0, Cp - C)))
    t = jnp.pad(shift, ((0, 0), (0, Cp - C)))

    y = pl.pallas_call(
        functools.partial(_bn_kernel, relu=relu),
        out_shape=jax.ShapeDtypeStruct((Mp, Cp), jnp.float32),
        grid=(Mp // TR,),
        in_specs=[
            pl.BlockSpec((TR, Cp), lambda i: (i, 0)),
            pl.BlockSpec((1, Cp), lambda i: (0, 0)),
            pl.BlockSpec((1, Cp), lambda i: (0, 0)),
        ],
        out_specs=pl.BlockSpec((TR, Cp), lambda i: (i, 0)),
        compiler_params=pltpu.CompilerParams(
            dimension_semantics=("parallel",)),
    )(x2, s, t)
    return y[:M, :C].reshape(N, H, W, C)


def _window_reduce(stacked, op):
    """Reduce a (T, M, C) stack of pooling-window taps over T, row-tiled over
    M with a ~2 MiB per-step VMEM budget."""
    T, M, C = stacked.shape
    Cp = _round_up(C, 128)

    budget_rows = max(8, (2 * 1024 * 1024) // (T * Cp * 4))
    budget_rows = max(8, (budget_rows // 8) * 8)
    TR = min(512, _round_up(M, 8), budget_rows)
    Mp = _round_up(M, TR)

    xs = jnp.pad(stacked, ((0, 0), (0, Mp - M), (0, Cp - C)))
    y = pl.pallas_call(
        functools.partial(_reduce_kernel, op=op),
        out_shape=jax.ShapeDtypeStruct((Mp, Cp), jnp.float32),
        grid=(Mp // TR,),
        in_specs=[pl.BlockSpec((T, TR, Cp), lambda i: (0, i, 0))],
        out_specs=pl.BlockSpec((TR, Cp), lambda i: (i, 0)),
        compiler_params=pltpu.CompilerParams(
            dimension_semantics=("parallel",)),
    )(xs)
    return y[:M, :C]


def conv2d(x, w, stride=1, pad=0, scale=None, shift=None, relu=False):
    """NHWC conv via im2col (glue) + Pallas matmul with optional fused BN/ReLU
    epilogue. w layout: (kh, kw, cin, cout)."""
    N, H, W, C = x.shape
    kh, kw, cin, cout = w.shape
    if pad:
        x = jnp.pad(x, ((0, 0), (pad, pad), (pad, pad), (0, 0)))
    Hp, Wp = H + 2 * pad, W + 2 * pad
    OH = (Hp - kh) // stride + 1
    OW = (Wp - kw) // stride + 1

    if kh == 1 and kw == 1 and stride == 1:
        a = x.reshape(N * OH * OW, C)
    else:
        # TODO(synk): im2col materializes a kh*kw-wider A matrix in HBM; an
        # in-kernel shifted-tap grid axis would cut this traffic further.
        cols = []
        for i in range(kh):
            for j in range(kw):
                cols.append(lax.slice(
                    x,
                    (0, i, j, 0),
                    (N, i + (OH - 1) * stride + 1, j + (OW - 1) * stride + 1, C),
                    (1, stride, stride, 1)))
        a = jnp.concatenate(cols, axis=-1).reshape(N * OH * OW, kh * kw * C)

    b = w.reshape(kh * kw * cin, cout)
    y = pallas_matmul(a, b, scale=scale, shift=shift, relu=relu)
    return y.reshape(N, OH, OW, cout)


def max_pool_3x3_s2_p1(x):
    N, H, W, C = x.shape
    neg = jnp.finfo(x.dtype).min
    xp = jnp.pad(x, ((0, 0), (1, 1), (1, 1), (0, 0)), constant_values=neg)
    OH = (H + 2 - 3) // 2 + 1
    OW = (W + 2 - 3) // 2 + 1
    wins = [xp[:, i:i + 2 * (OH - 1) + 1:2, j:j + 2 * (OW - 1) + 1:2, :]
            for i in range(3) for j in range(3)]
    stk = jnp.stack(wins, axis=0).reshape(9, N * OH * OW, C)
    y = _window_reduce(stk, "max")
    return y.reshape(N, OH, OW, C)


def avg_pool_2x2_s2(x):
    N, H, W, C = x.shape
    OH, OW = H // 2, W // 2
    wins = [x[:, i:2 * OH:2, j:2 * OW:2, :] for i in range(2) for j in range(2)]
    stk = jnp.stack(wins, axis=0).reshape(4, N * OH * OW, C)
    y = _window_reduce(stk, "mean")
    return y.reshape(N, OH, OW, C)


def global_avg_pool(x):
    # AdaptiveAvgPool2d((1,1)) == mean over H*W
    N, H, W, C = x.shape
    stk = jnp.transpose(x.reshape(N, H * W, C), (1, 0, 2))  # (H*W, N, C)
    return _window_reduce(stk, "mean")                      # (N, C)


# ----------------------------------------------------------------------------
# Parameters (deterministic synthetic init, shapes = torchvision densenet121)
# ----------------------------------------------------------------------------
def init_params(key, num_classes):
    keys = iter(jax.random.split(key, 2048))

    def nk():
        return next(keys)

    def conv_w(kh, kw, cin, cout):
        w = jax.random.normal(nk(), (kh, kw, cin, cout), jnp.float32)
        return w * math.sqrt(2.0 / (kh * kw * cin))

    def bn(c):
        gamma = 1.0 + 0.1 * jax.random.normal(nk(), (c,), jnp.float32)
        beta = 0.1 * jax.random.normal(nk(), (c,), jnp.float32)
        rmean = 0.05 * jax.random.normal(nk(), (c,), jnp.float32)
        rvar = 1.0 + 0.1 * jax.random.uniform(nk(), (c,), jnp.float32)
        scale = gamma / jnp.sqrt(rvar + 1e-5)
        shift = beta - rmean * scale
        return scale.reshape(1, c), shift.reshape(1, c)

    p = {"conv0": conv_w(7, 7, 3, NUM_INIT_FEATURES), "norm0": bn(NUM_INIT_FEATURES)}
    nf = NUM_INIT_FEATURES
    blocks, trans = [], []
    for bi, num_layers in enumerate(BLOCK_CONFIG):
        layers = []
        for li in range(num_layers):
            cin = nf + li * GROWTH
            layers.append({
                "norm1": bn(cin),
                "conv1": conv_w(1, 1, cin, BN_SIZE * GROWTH),
                "norm2": bn(BN_SIZE * GROWTH),
                "conv2": conv_w(3, 3, BN_SIZE * GROWTH, GROWTH),
            })
        blocks.append(layers)
        nf = nf + num_layers * GROWTH
        if bi != len(BLOCK_CONFIG) - 1:
            trans.append({"norm": bn(nf), "conv": conv_w(1, 1, nf, nf // 2)})
            nf = nf // 2
    p["blocks"] = blocks
    p["trans"] = trans
    p["norm5"] = bn(nf)  # nf == 1024
    p["fc_w"] = jax.random.normal(nk(), (nf, num_classes), jnp.float32) / math.sqrt(nf)
    p["fc_b"] = 0.01 * jax.random.normal(nk(), (num_classes,), jnp.float32)
    return p


# ----------------------------------------------------------------------------
# Forward
# ----------------------------------------------------------------------------
@jax.jit
def densenet121_forward(params, x_nchw):
    x = jnp.transpose(x_nchw, (0, 2, 3, 1)).astype(jnp.float32)  # NCHW -> NHWC

    # stem: conv0 -> norm0 -> relu0 (BN+ReLU fused into conv epilogue) -> maxpool0
    s0, t0 = params["norm0"]
    x = conv2d(x, params["conv0"], stride=2, pad=3, scale=s0, shift=t0, relu=True)
    x = max_pool_3x3_s2_p1(x)

    # dense blocks + transitions
    # TODO(synk): the growing concat still re-copies the feature map each layer
    # (O(L^2) traffic); a pre-padded channel slab would remove those copies.
    for bi, num_layers in enumerate(BLOCK_CONFIG):
        for li in range(num_layers):
            lp = params["blocks"][bi][li]
            y = bn_act(x, *lp["norm1"], relu=True)            # norm1 + relu1
            s2, t2 = lp["norm2"]
            y = conv2d(y, lp["conv1"], stride=1, pad=0,       # conv1 -> norm2 -> relu2
                       scale=s2, shift=t2, relu=True)         # fused into one kernel
            y = conv2d(y, lp["conv2"], stride=1, pad=1)       # 3x3 -> growth 32
            x = jnp.concatenate([x, y], axis=-1)
        if bi != len(BLOCK_CONFIG) - 1:
            tp = params["trans"][bi]
            x = bn_act(x, *tp["norm"], relu=True)
            x = conv2d(x, tp["conv"], stride=1, pad=0)
            x = avg_pool_2x2_s2(x)

    # features end with norm5; this module applies NO ReLU after it
    x = bn_act(x, *params["norm5"], relu=False)

    x = global_avg_pool(x)                                    # (N, 1024) == avgpool + view
    logits = pallas_matmul(x, params["fc_w"], shift=params["fc_b"])   # fc (+bias fused)
    return logits


if __name__ == "__main__":
    key = jax.random.PRNGKey(0)
    pkey, xkey = jax.random.split(key)

    num_classes = 20
    embed_dim = 32  # present in the PyTorch __init__ but unused in forward
    params = init_params(pkey, num_classes)

    # NCHW input, small but deep enough for the 32x total downsampling
    x = jax.random.normal(xkey, (2, 3, 32, 32), jnp.float32)

    out = densenet121_forward(params, x)
    out = jax.block_until_ready(out)

    assert out.shape == (2, num_classes), out.shape
    assert bool(jnp.all(jnp.isfinite(out)))
    print("KERNEL_OK")
</pallas_src>

<mosaic_0001>
module attributes {stable_mosaic.version = 11 : i64} {
  func.func @_matmul_kernel(%arg0: i32, %arg1: i32, %arg2: i32, %arg3: memref<256x256xbf16, #tpu.memory_space<vmem>>, %arg4: memref<256x128xbf16, #tpu.memory_space<vmem>>, %arg5: memref<1x128xf32, #tpu.memory_space<vmem>>, %arg6: memref<1x128xf32, #tpu.memory_space<vmem>>, %arg7: memref<256x128xf32, #tpu.memory_space<vmem>>) attributes {dimension_semantics = [#tpu.dimension_semantics<parallel>, #tpu.dimension_semantics<parallel>, #tpu.dimension_semantics<arbitrary>], iteration_bounds = array<i64: 2, 1, 1>, scalar_prefetch = 0 : i64, scratch_operands = 0 : i64, tpu.core_type = #tpu.core_type<tc>, window_params = [{transform_indices = @transform_0, window_bounds = array<i64: 256, 256>}, {transform_indices = @transform_1, window_bounds = array<i64: 256, 128>}, {transform_indices = @transform_2, window_bounds = array<i64: 1, 128>}, {transform_indices = @transform_3, window_bounds = array<i64: 1, 128>}, {transform_indices = @transform_4, window_bounds = array<i64: 256, 128>}]} {
    %c0_i32 = arith.constant 0 : i32
    %0 = arith.cmpi eq, %arg2, %c0_i32 : i32
    %1 = arith.extui %0 : i1 to i32
    %c0_i32_0 = arith.constant 0 : i32
    %2 = arith.cmpi ne, %1, %c0_i32_0 : i32
    scf.if %2 {
      %cst_10 = arith.constant 0.000000e+00 : f32
      %12 = vector.broadcast %cst_10 : f32 to vector<256x128xf32>
      %c0_11 = arith.constant 0 : index
      %c0_12 = arith.constant 0 : index
      %13 = vector.load %arg7[%c0_11, %c0_12] : memref<256x128xf32, #tpu.memory_space<vmem>>, vector<256x128xf32>
      tpu.vector_store %arg7[%c0_11, %c0_12], %12 {strides = array<i32>} : memref<256x128xf32, #tpu.memory_space<vmem>>, vector<256x128xf32>,
    } else {
    }
    %c0 = arith.constant 0 : index
    %c0_1 = arith.constant 0 : index
    %3 = vector.load %arg7[%c0, %c0_1] : memref<256x128xf32, #tpu.memory_space<vmem>>, vector<256x128xf32>
    %c0_2 = arith.constant 0 : index
    %c0_3 = arith.constant 0 : index
    %4 = vector.load %arg3[%c0_2, %c0_3] : memref<256x256xbf16, #tpu.memory_space<vmem>>, vector<256x256xbf16>
    %c0_4 = arith.constant 0 : index
    %c0_5 = arith.constant 0 : index
    %5 = vector.load %arg4[%c0_4, %c0_5] : memref<256x128xbf16, #tpu.memory_space<vmem>>, vector<256x128xbf16>
    %cst = arith.constant dense<0.000000e+00> : vector<256x128xf32>
    %6 = tpu.matmul %4, %5, %cst {dimension_numbers = #tpu.dot_dimension_numbers<[1], [0], [0], [1], [0, 0, 1, 1], [], []>} : vector<256x256xbf16>, vector<256x128xbf16>, vector<256x128xf32> -> vector<256x128xf32>
    %7 = arith.addf %3, %6 : vector<256x128xf32>
    %c0_6 = arith.constant 0 : index
    %c0_7 = arith.constant 0 : index
    %8 = vector.load %arg7[%c0_6, %c0_7] : memref<256x128xf32, #tpu.memory_space<vmem>>, vector<256x128xf32>
    tpu.vector_store %arg7[%c0_6, %c0_7], %7 {strides = array<i32>} : memref<256x128xf32, #tpu.memory_space<vmem>>, vector<256x128xf32>,
    %c0_i32_8 = arith.constant 0 : i32
    %9 = arith.cmpi eq, %arg2, %c0_i32_8 : i32
    %10 = arith.extui %9 : i1 to i32
    %c0_i32_9 = arith.constant 0 : i32
    %11 = arith.cmpi ne, %10, %c0_i32_9 : i32
    scf.if %11 {
      %c0_10 = arith.constant 0 : index
      %c0_11 = arith.constant 0 : index
      %12 = vector.load %arg7[%c0_10, %c0_11] : memref<256x128xf32, #tpu.memory_space<vmem>>, vector<256x128xf32>
      %c0_12 = arith.constant 0 : index
      %c0_13 = arith.constant 0 : index
      %13 = vector.load %arg5[%c0_12, %c0_13] : memref<1x128xf32, #tpu.memory_space<vmem>>, vector<1x128xf32>
      %14 = vector.broadcast %13 : vector<1x128xf32> to vector<256x128xf32>
      %15 = arith.mulf %12, %14 : vector<256x128xf32>
      %c0_14 = arith.constant 0 : index
      %c0_15 = arith.constant 0 : index
      %16 = vector.load %arg6[%c0_14, %c0_15] : memref<1x128xf32, #tpu.memory_space<vmem>>, vector<1x128xf32>
      %17 = vector.broadcast %16 : vector<1x128xf32> to vector<256x128xf32>
      %18 = arith.addf %15, %17 : vector<256x128xf32>
      %cst_16 = arith.constant 0.000000e+00 : f32
      %19 = vector.broadcast %cst_16 : f32 to vector<256x128xf32>
      %20 = arith.maximumf %18, %19 : vector<256x128xf32>
      %c0_17 = arith.constant 0 : index
      %c0_18 = arith.constant 0 : index
      %21 = vector.load %arg7[%c0_17, %c0_18] : memref<256x128xf32, #tpu.memory_space<vmem>>, vector<256x128xf32>
      tpu.vector_store %arg7[%c0_17, %c0_18], %20 {strides = array<i32>} : memref<256x128xf32, #tpu.memory_space<vmem>>, vector<256x128xf32>,
    } else {
    }
    return
  }
  func.func @transform_0(%arg0: i32, %arg1: i32, %arg2: i32) -> (i32, i32) {
    %c0_i32 = arith.constant 0 : i32
    return %arg0, %arg2 : i32, i32
  }
  func.func @transform_1(%arg0: i32, %arg1: i32, %arg2: i32) -> (i32, i32) {
    %c0_i32 = arith.constant 0 : i32
    return %arg2, %arg1 : i32, i32
  }
  func.func @transform_2(%arg0: i32, %arg1: i32, %arg2: i32) -> (i32, i32) {
    %c0_i32 = arith.constant 0 : i32
    %c0_i32_0 = arith.constant 0 : i32
    return %c0_i32, %arg1 : i32, i32
  }
  func.func @transform_3(%arg0: i32, %arg1: i32, %arg2: i32) -> (i32, i32) {
    %c0_i32 = arith.constant 0 : i32
    %c0_i32_0 = arith.constant 0 : i32
    return %c0_i32, %arg1 : i32, i32
  }
  func.func @transform_4(%arg0: i32, %arg1: i32, %arg2: i32) -> (i32, i32) {
    %c0_i32 = arith.constant 0 : i32
    return %arg0, %arg1 : i32, i32
  }
}

module attributes {stable_mosaic.version = 11 : i64} {
  func.func @_reduce_kernel(%arg0: i32, %arg1: memref<9x128x128xf32, #tpu.memory_space<vmem>>, %arg2: memref<128x128xf32, #tpu.memory_space<vmem>>) attributes {dimension_semantics = [#tpu.dimension_semantics<parallel>], iteration_bounds = array<i64: 1>, scalar_prefetch = 0 : i64, scratch_operands = 0 : i64, tpu.core_type = #tpu.core_type<tc>, window_params = [{transform_indices = @transform_0, window_bounds = array<i64: 9, 128, 128>}, {transform_indices = @transform_1, window_bounds = array<i64: 128, 128>}]} {
    %c0 = arith.constant 0 : index
    %c0_0 = arith.constant 0 : index
    %c0_1 = arith.constant 0 : index
    %0 = vector.load %arg1[%c0, %c0_0, %c0_1] : memref<9x128x128xf32, #tpu.memory_space<vmem>>, vector<9x128x128xf32>
    %cst = arith.constant dense<0xFF800000> : vector<128x128xf32>
    %1 = vector.multi_reduction <maximumf>, %0, %cst [0] : vector<9x128x128xf32> to vector<128x128xf32>
    %c0_2 = arith.constant 0 : index
    %c0_3 = arith.constant 0 : index
    %2 = vector.load %arg2[%c0_2, %c0_3] : memref<128x128xf32, #tpu.memory_space<vmem>>, vector<128x128xf32>
    tpu.vector_store %arg2[%c0_2, %c0_3], %1 {strides = array<i32>} : memref<128x128xf32, #tpu.memory_space<vmem>>, vector<128x128xf32>,
    return
  }
  func.func @transform_0(%arg0: i32) -> (i32, i32, i32) {
    %c0_i32 = arith.constant 0 : i32
    %c0_i32_0 = arith.constant 0 : i32
    %c0_i32_1 = arith.constant 0 : i32
    return %c0_i32, %arg0, %c0_i32_0 : i32, i32, i32
  }
  func.func @transform_1(%arg0: i32) -> (i32, i32) {
    %c0_i32 = arith.constant 0 : i32
    %c0_i32_0 = arith.constant 0 : i32
    return %arg0, %c0_i32 : i32, i32
  }
}

module attributes {stable_mosaic.version = 11 : i64} {
  func.func @_bn_kernel(%arg0: i32, %arg1: memref<128x128xf32, #tpu.memory_space<vmem>>, %arg2: memref<1x128xf32, #tpu.memory_space<vmem>>, %arg3: memref<1x128xf32, #tpu.memory_space<vmem>>, %arg4: memref<128x128xf32, #tpu.memory_space<vmem>>) attributes {dimension_semantics = [#tpu.dimension_semantics<parallel>], iteration_bounds = array<i64: 1>, scalar_prefetch = 0 : i64, scratch_operands = 0 : i64, tpu.core_type = #tpu.core_type<tc>, window_params = [{transform_indices = @transform_0, window_bounds = array<i64: 128, 128>}, {pipeline_mode = #tpu.pipeline_mode<synchronous>, transform_indices = @transform_1, window_bounds = array<i64: 1, 128>}, {pipeline_mode = #tpu.pipeline_mode<synchronous>, transform_indices = @transform_2, window_bounds = array<i64: 1, 128>}, {transform_indices = @transform_3, window_bounds = array<i64: 128, 128>}]} {
    %c0 = arith.constant 0 : index
    %c0_0 = arith.constant 0 : index
    %0 = vector.load %arg1[%c0, %c0_0] : memref<128x128xf32, #tpu.memory_space<vmem>>, vector<128x128xf32>
    %c0_1 = arith.constant 0 : index
    %c0_2 = arith.constant 0 : index
    %1 = vector.load %arg2[%c0_1, %c0_2] : memref<1x128xf32, #tpu.memory_space<vmem>>, vector<1x128xf32>
    %2 = vector.broadcast %1 : vector<1x128xf32> to vector<128x128xf32>
    %3 = arith.mulf %0, %2 : vector<128x128xf32>
    %c0_3 = arith.constant 0 : index
    %c0_4 = arith.constant 0 : index
    %4 = vector.load %arg3[%c0_3, %c0_4] : memref<1x128xf32, #tpu.memory_space<vmem>>, vector<1x128xf32>
    %5 = vector.broadcast %4 : vector<1x128xf32> to vector<128x128xf32>
    %6 = arith.addf %3, %5 : vector<128x128xf32>
    %cst = arith.constant 0.000000e+00 : f32
    %7 = vector.broadcast %cst : f32 to vector<128x128xf32>
    %8 = arith.maximumf %6, %7 : vector<128x128xf32>
    %c0_5 = arith.constant 0 : index
    %c0_6 = arith.constant 0 : index
    %9 = vector.load %arg4[%c0_5, %c0_6] : memref<128x128xf32, #tpu.memory_space<vmem>>, vector<128x128xf32>
    tpu.vector_store %arg4[%c0_5, %c0_6], %8 {strides = array<i32>} : memref<128x128xf32, #tpu.memory_space<vmem>>, vector<128x128xf32>,
    return
  }
  func.func @transform_0(%arg0: i32) -> (i32, i32) {
    %c0_i32 = arith.constant 0 : i32
    %c0_i32_0 = arith.constant 0 : i32
    return %arg0, %c0_i32 : i32, i32
  }
  func.func @transform_1(%arg0: i32) -> (i32, i32) {
    %c0_i32 = arith.constant 0 : i32
    %c0_i32_0 = arith.constant 0 : i32
    %c0_i32_1 = arith.constant 0 : i32
    return %c0_i32, %c0_i32_0 : i32, i32
  }
  func.func @transform_2(%arg0: i32) -> (i32, i32) {
    %c0_i32 = arith.constant 0 : i32
    %c0_i32_0 = arith.constant 0 : i32
    %c0_i32_1 = arith.constant 0 : i32
    return %c0_i32, %c0_i32_0 : i32, i32
  }
  func.func @transform_3(%arg0: i32) -> (i32, i32) {
    %c0_i32 = arith.constant 0 : i32
    %c0_i32_0 = arith.constant 0 : i32
    return %arg0, %c0_i32 : i32, i32
  }
}

module attributes {stable_mosaic.version = 11 : i64} {
  func.func @_matmul_kernel(%arg0: i32, %arg1: i32, %arg2: i32, %arg3: memref<128x128xbf16, #tpu.memory_space<vmem>>, %arg4: memref<128x128xbf16, #tpu.memory_space<vmem>>, %arg5: memref<1x128xf32, #tpu.memory_space<vmem>>, %arg6: memref<1x128xf32, #tpu.memory_space<vmem>>, %arg7: memref<128x128xf32, #tpu.memory_space<vmem>>) attributes {dimension_semantics = [#tpu.dimension_semantics<parallel>, #tpu.dimension_semantics<parallel>, #tpu.dimension_semantics<arbitrary>], iteration_bounds = array<i64: 1, 1, 1>, scalar_prefetch = 0 : i64, scratch_operands = 0 : i64, tpu.core_type = #tpu.core_type<tc>, window_params = [{transform_indices = @transform_0, window_bounds = array<i64: 128, 128>}, {transform_indices = @transform_1, window_bounds = array<i64: 128, 128>}, {transform_indices = @transform_2, window_bounds = array<i64: 1, 128>}, {transform_indices = @transform_3, window_bounds = array<i64: 1, 128>}, {transform_indices = @transform_4, window_bounds = array<i64: 128, 128>}]} {
    %c0_i32 = arith.constant 0 : i32
    %0 = arith.cmpi eq, %arg2, %c0_i32 : i32
    %1 = arith.extui %0 : i1 to i32
    %c0_i32_0 = arith.constant 0 : i32
    %2 = arith.cmpi ne, %1, %c0_i32_0 : i32
    scf.if %2 {
      %cst_10 = arith.constant 0.000000e+00 : f32
      %12 = vector.broadcast %cst_10 : f32 to vector<128x128xf32>
      %c0_11 = arith.constant 0 : index
      %c0_12 = arith.constant 0 : index
      %13 = vector.load %arg7[%c0_11, %c0_12] : memref<128x128xf32, #tpu.memory_space<vmem>>, vector<128x128xf32>
      tpu.vector_store %arg7[%c0_11, %c0_12], %12 {strides = array<i32>} : memref<128x128xf32, #tpu.memory_space<vmem>>, vector<128x128xf32>,
    } else {
    }
    %c0 = arith.constant 0 : index
    %c0_1 = arith.constant 0 : index
    %3 = vector.load %arg7[%c0, %c0_1] : memref<128x128xf32, #tpu.memory_space<vmem>>, vector<128x128xf32>
    %c0_2 = arith.constant 0 : index
    %c0_3 = arith.constant 0 : index
    %4 = vector.load %arg3[%c0_2, %c0_3] : memref<128x128xbf16, #tpu.memory_space<vmem>>, vector<128x128xbf16>
    %c0_4 = arith.constant 0 : index
    %c0_5 = arith.constant 0 : index
    %5 = vector.load %arg4[%c0_4, %c0_5] : memref<128x128xbf16, #tpu.memory_space<vmem>>, vector<128x128xbf16>
    %cst = arith.constant dense<0.000000e+00> : vector<128x128xf32>
    %6 = tpu.matmul %4, %5, %cst {dimension_numbers = #tpu.dot_dimension_numbers<[1], [0], [0], [1], [0, 0, 1, 1], [], []>} : vector<128x128xbf16>, vector<128x128xbf16>, vector<128x128xf32> -> vector<128x128xf32>
    %7 = arith.addf %3, %6 : vector<128x128xf32>
    %c0_6 = arith.constant 0 : index
    %c0_7 = arith.constant 0 : index
    %8 = vector.load %arg7[%c0_6, %c0_7] : memref<128x128xf32, #tpu.memory_space<vmem>>, vector<128x128xf32>
    tpu.vector_store %arg7[%c0_6, %c0_7], %7 {strides = array<i32>} : memref<128x128xf32, #tpu.memory_space<vmem>>, vector<128x128xf32>,
    %c0_i32_8 = arith.constant 0 : i32
    %9 = arith.cmpi eq, %arg2, %c0_i32_8 : i32
    %10 = arith.extui %9 : i1 to i32
    %c0_i32_9 = arith.constant 0 : i32
    %11 = arith.cmpi ne, %10, %c0_i32_9 : i32
    scf.if %11 {
      %c0_10 = arith.constant 0 : index
      %c0_11 = arith.constant 0 : index
      %12 = vector.load %arg7[%c0_10, %c0_11] : memref<128x128xf32, #tpu.memory_space<vmem>>, vector<128x128xf32>
      %c0_12 = arith.constant 0 : index
      %c0_13 = arith.constant 0 : index
      %13 = vector.load %arg5[%c0_12, %c0_13] : memref<1x128xf32, #tpu.memory_space<vmem>>, vector<1x128xf32>
      %14 = vector.broadcast %13 : vector<1x128xf32> to vector<128x128xf32>
      %15 = arith.mulf %12, %14 : vector<128x128xf32>
      %c0_14 = arith.constant 0 : index
      %c0_15 = arith.constant 0 : index
      %16 = vector.load %arg6[%c0_14, %c0_15] : memref<1x128xf32, #tpu.memory_space<vmem>>, vector<1x128xf32>
      %17 = vector.broadcast %16 : vector<1x128xf32> to vector<128x128xf32>
      %18 = arith.addf %15, %17 : vector<128x128xf32>
      %cst_16 = arith.constant 0.000000e+00 : f32
      %19 = vector.broadcast %cst_16 : f32 to vector<128x128xf32>
      %20 = arith.maximumf %18, %19 : vector<128x128xf32>
      %c0_17 = arith.constant 0 : index
      %c0_18 = arith.constant 0 : index
      %21 = vector.load %arg7[%c0_17, %c0_18] : memref<128x128xf32, #tpu.memory_space<vmem>>, vector<128x128xf32>
      tpu.vector_store %arg7[%c0_17, %c0_18], %20 {strides = array<i32>} : memref<128x128xf32, #tpu.memory_space<vmem>>, vector<128x128xf32>,
    } else {
    }
    return
  }
  func.func @transform_0(%arg0: i32, %arg1: i32, %arg2: i32) -> (i32, i32) {
    %c0_i32 = arith.constant 0 : i32
    return %arg0, %arg2 : i32, i32
  }
  func.func @transform_1(%arg0: i32, %arg1: i32, %arg2: i32) -> (i32, i32) {
    %c0_i32 = arith.constant 0 : i32
    return %arg2, %arg1 : i32, i32
  }
  func.func @transform_2(%arg0: i32, %arg1: i32, %arg2: i32) -> (i32, i32) {
    %c0_i32 = arith.constant 0 : i32
    %c0_i32_0 = arith.constant 0 : i32
    return %c0_i32, %arg1 : i32, i32
  }
  func.func @transform_3(%arg0: i32, %arg1: i32, %arg2: i32) -> (i32, i32) {
    %c0_i32 = arith.constant 0 : i32
    %c0_i32_0 = arith.constant 0 : i32
    return %c0_i32, %arg1 : i32, i32
  }
  func.func @transform_4(%arg0: i32, %arg1: i32, %arg2: i32) -> (i32, i32) {
    %c0_i32 = arith.constant 0 : i32
    return %arg0, %arg1 : i32, i32
  }
}

module attributes {stable_mosaic.version = 11 : i64} {
  func.func @_matmul_kernel(%arg0: i32, %arg1: i32, %arg2: i32, %arg3: memref<128x256xbf16, #tpu.memory_space<vmem>>, %arg4: memref<256x128xbf16, #tpu.memory_space<vmem>>, %arg5: memref<1x128xf32, #tpu.memory_space<vmem>>, %arg6: memref<1x128xf32, #tpu.memory_space<vmem>>, %arg7: memref<128x128xf32, #tpu.memory_space<vmem>>) attributes {dimension_semantics = [#tpu.dimension_semantics<parallel>, #tpu.dimension_semantics<parallel>, #tpu.dimension_semantics<arbitrary>], iteration_bounds = array<i64: 1, 1, 5>, scalar_prefetch = 0 : i64, scratch_operands = 0 : i64, tpu.core_type = #tpu.core_type<tc>, window_params = [{transform_indices = @transform_0, window_bounds = array<i64: 128, 256>}, {transform_indices = @transform_1, window_bounds = array<i64: 256, 128>}, {transform_indices = @transform_2, window_bounds = array<i64: 1, 128>}, {transform_indices = @transform_3, window_bounds = array<i64: 1, 128>}, {transform_indices = @transform_4, window_bounds = array<i64: 128, 128>}]} {
    %c0_i32 = arith.constant 0 : i32
    %0 = arith.cmpi eq, %arg2, %c0_i32 : i32
    %1 = arith.extui %0 : i1 to i32
    %c0_i32_0 = arith.constant 0 : i32
    %2 = arith.cmpi ne, %1, %c0_i32_0 : i32
    scf.if %2 {
      %cst_9 = arith.constant 0.000000e+00 : f32
      %12 = vector.broadcast %cst_9 : f32 to vector<128x128xf32>
      %c0_10 = arith.constant 0 : index
      %c0_11 = arith.constant 0 : index
      %13 = vector.load %arg7[%c0_10, %c0_11] : memref<128x128xf32, #tpu.memory_space<vmem>>, vector<128x128xf32>
      tpu.vector_store %arg7[%c0_10, %c0_11], %12 {strides = array<i32>} : memref<128x128xf32, #tpu.memory_space<vmem>>, vector<128x128xf32>,
    } else {
    }
    %c0 = arith.constant 0 : index
    %c0_1 = arith.constant 0 : index
    %3 = vector.load %arg7[%c0, %c0_1] : memref<128x128xf32, #tpu.memory_space<vmem>>, vector<128x128xf32>
    %c0_2 = arith.constant 0 : index
    %c0_3 = arith.constant 0 : index
    %4 = vector.load %arg3[%c0_2, %c0_3] : memref<128x256xbf16, #tpu.memory_space<vmem>>, vector<128x256xbf16>
    %c0_4 = arith.constant 0 : index
    %c0_5 = arith.constant 0 : index
    %5 = vector.load %arg4[%c0_4, %c0_5] : memref<256x128xbf16, #tpu.memory_space<vmem>>, vector<256x128xbf16>
    %cst = arith.constant dense<0.000000e+00> : vector<128x128xf32>
    %6 = tpu.matmul %4, %5, %cst {dimension_numbers = #tpu.dot_dimension_numbers<[1], [0], [0], [1], [0, 0, 1, 1], [], []>} : vector<128x256xbf16>, vector<256x128xbf16>, vector<128x128xf32> -> vector<128x128xf32>
    %7 = arith.addf %3, %6 : vector<128x128xf32>
    %c0_6 = arith.constant 0 : index
    %c0_7 = arith.constant 0 : index
    %8 = vector.load %arg7[%c0_6, %c0_7] : memref<128x128xf32, #tpu.memory_space<vmem>>, vector<128x128xf32>
    tpu.vector_store %arg7[%c0_6, %c0_7], %7 {strides = array<i32>} : memref<128x128xf32, #tpu.memory_space<vmem>>, vector<128x128xf32>,
    %c4_i32 = arith.constant 4 : i32
    %9 = arith.cmpi eq, %arg2, %c4_i32 : i32
    %10 = arith.extui %9 : i1 to i32
    %c0_i32_8 = arith.constant 0 : i32
    %11 = arith.cmpi ne, %10, %c0_i32_8 : i32
    scf.if %11 {
      %c0_9 = arith.constant 0 : index
      %c0_10 = arith.constant 0 : index
      %12 = vector.load %arg7[%c0_9, %c0_10] : memref<128x128xf32, #tpu.memory_space<vmem>>, vector<128x128xf32>
      %c0_11 = arith.constant 0 : index
      %c0_12 = arith.constant 0 : index
      %13 = vector.load %arg5[%c0_11, %c0_12] : memref<1x128xf32, #tpu.memory_space<vmem>>, vector<1x128xf32>
      %14 = vector.broadcast %13 : vector<1x128xf32> to vector<128x128xf32>
      %15 = arith.mulf %12, %14 : vector<128x128xf32>
      %c0_13 = arith.constant 0 : index
      %c0_14 = arith.constant 0 : index
      %16 = vector.load %arg6[%c0_13, %c0_14] : memref<1x128xf32, #tpu.memory_space<vmem>>, vector<1x128xf32>
      %17 = vector.broadcast %16 : vector<1x128xf32> to vector<128x128xf32>
      %18 = arith.addf %15, %17 : vector<128x128xf32>
      %c0_15 = arith.constant 0 : index
      %c0_16 = arith.constant 0 : index
      %19 = vector.load %arg7[%c0_15, %c0_16] : memref<128x128xf32, #tpu.memory_space<vmem>>, vector<128x128xf32>
      tpu.vector_store %arg7[%c0_15, %c0_16], %18 {strides = array<i32>} : memref<128x128xf32, #tpu.memory_space<vmem>>, vector<128x128xf32>,
    } else {
    }
    return
  }
  func.func @transform_0(%arg0: i32, %arg1: i32, %arg2: i32) -> (i32, i32) {
    %c0_i32 = arith.constant 0 : i32
    return %arg0, %arg2 : i32, i32
  }
  func.func @transform_1(%arg0: i32, %arg1: i32, %arg2: i32) -> (i32, i32) {
    %c0_i32 = arith.constant 0 : i32
    return %arg2, %arg1 : i32, i32
  }
  func.func @transform_2(%arg0: i32, %arg1: i32, %arg2: i32) -> (i32, i32) {
    %c0_i32 = arith.constant 0 : i32
    %c0_i32_0 = arith.constant 0 : i32
    return %c0_i32, %arg1 : i32, i32
  }
  func.func @transform_3(%arg0: i32, %arg1: i32, %arg2: i32) -> (i32, i32) {
    %c0_i32 = arith.constant 0 : i32
    %c0_i32_0 = arith.constant 0 : i32
    return %c0_i32, %arg1 : i32, i32
  }
  func.func @transform_4(%arg0: i32, %arg1: i32, %arg2: i32) -> (i32, i32) {
    %c0_i32 = arith.constant 0 : i32
    return %arg0, %arg1 : i32, i32
  }
}

module attributes {stable_mosaic.version = 11 : i64} {
  func.func @_bn_kernel(%arg0: i32, %arg1: memref<128x256xf32, #tpu.memory_space<vmem>>, %arg2: memref<1x256xf32, #tpu.memory_space<vmem>>, %arg3: memref<1x256xf32, #tpu.memory_space<vmem>>, %arg4: memref<128x256xf32, #tpu.memory_space<vmem>>) attributes {dimension_semantics = [#tpu.dimension_semantics<parallel>], iteration_bounds = array<i64: 1>, scalar_prefetch = 0 : i64, scratch_operands = 0 : i64, tpu.core_type = #tpu.core_type<tc>, window_params = [{transform_indices = @transform_0, window_bounds = array<i64: 128, 256>}, {pipeline_mode = #tpu.pipeline_mode<synchronous>, transform_indices = @transform_1, window_bounds = array<i64: 1, 256>}, {pipeline_mode = #tpu.pipeline_mode<synchronous>, transform_indices = @transform_2, window_bounds = array<i64: 1, 256>}, {transform_indices = @transform_3, window_bounds = array<i64: 128, 256>}]} {
    %c0 = arith.constant 0 : index
    %c0_0 = arith.constant 0 : index
    %0 = vector.load %arg1[%c0, %c0_0] : memref<128x256xf32, #tpu.memory_space<vmem>>, vector<128x256xf32>
    %c0_1 = arith.constant 0 : index
    %c0_2 = arith.constant 0 : index
    %1 = vector.load %arg2[%c0_1, %c0_2] : memref<1x256xf32, #tpu.memory_space<vmem>>, vector<1x256xf32>
    %2 = vector.broadcast %1 : vector<1x256xf32> to vector<128x256xf32>
    %3 = arith.mulf %0, %2 : vector<128x256xf32>
    %c0_3 = arith.constant 0 : index
    %c0_4 = arith.constant 0 : index
    %4 = vector.load %arg3[%c0_3, %c0_4] : memref<1x256xf32, #tpu.memory_space<vmem>>, vector<1x256xf32>
    %5 = vector.broadcast %4 : vector<1x256xf32> to vector<128x256xf32>
    %6 = arith.addf %3, %5 : vector<128x256xf32>
    %cst = arith.constant 0.000000e+00 : f32
    %7 = vector.broadcast %cst : f32 to vector<128x256xf32>
    %8 = arith.maximumf %6, %7 : vector<128x256xf32>
    %c0_5 = arith.constant 0 : index
    %c0_6 = arith.constant 0 : index
    %9 = vector.load %arg4[%c0_5, %c0_6] : memref<128x256xf32, #tpu.memory_space<vmem>>, vector<128x256xf32>
    tpu.vector_store %arg4[%c0_5, %c0_6], %8 {strides = array<i32>} : memref<128x256xf32, #tpu.memory_space<vmem>>, vector<128x256xf32>,
    return
  }
  func.func @transform_0(%arg0: i32) -> (i32, i32) {
    %c0_i32 = arith.constant 0 : i32
    %c0_i32_0 = arith.constant 0 : i32
    return %arg0, %c0_i32 : i32, i32
  }
  func.func @transform_1(%arg0: i32) -> (i32, i32) {
    %c0_i32 = arith.constant 0 : i32
    %c0_i32_0 = arith.constant 0 : i32
    %c0_i32_1 = arith.constant 0 : i32
    return %c0_i32, %c0_i32_0 : i32, i32
  }
  func.func @transform_2(%arg0: i32) -> (i32, i32) {
    %c0_i32 = arith.constant 0 : i32
    %c0_i32_0 = arith.constant 0 : i32
    %c0_i32_1 = arith.constant 0 : i32
    return %c0_i32, %c0_i32_0 : i32, i32
  }
  func.func @transform_3(%arg0: i32) -> (i32, i32) {
    %c0_i32 = arith.constant 0 : i32
    %c0_i32_0 = arith.constant 0 : i32
    return %arg0, %c0_i32 : i32, i32
  }
}

module attributes {stable_mosaic.version = 11 : i64} {
  func.func @_matmul_kernel(%arg0: i32, %arg1: i32, %arg2: i32, %arg3: memref<128x256xbf16, #tpu.memory_space<vmem>>, %arg4: memref<256x128xbf16, #tpu.memory_space<vmem>>, %arg5: memref<1x128xf32, #tpu.memory_space<vmem>>, %arg6: memref<1x128xf32, #tpu.memory_space<vmem>>, %arg7: memref<128x128xf32, #tpu.memory_space<vmem>>) attributes {dimension_semantics = [#tpu.dimension_semantics<parallel>, #tpu.dimension_semantics<parallel>, #tpu.dimension_semantics<arbitrary>], iteration_bounds = array<i64: 1, 1, 1>, scalar_prefetch = 0 : i64, scratch_operands = 0 : i64, tpu.core_type = #tpu.core_type<tc>, window_params = [{transform_indices = @transform_0, window_bounds = array<i64: 128, 256>}, {transform_indices = @transform_1, window_bounds = array<i64: 256, 128>}, {transform_indices = @transform_2, window_bounds = array<i64: 1, 128>}, {transform_indices = @transform_3, window_bounds = array<i64: 1, 128>}, {transform_indices = @transform_4, window_bounds = array<i64: 128, 128>}]} {
    %c0_i32 = arith.constant 0 : i32
    %0 = arith.cmpi eq, %arg2, %c0_i32 : i32
    %1 = arith.extui %0 : i1 to i32
    %c0_i32_0 = arith.constant 0 : i32
    %2 = arith.cmpi ne, %1, %c0_i32_0 : i32
    scf.if %2 {
      %cst_10 = arith.constant 0.000000e+00 : f32
      %12 = vector.broadcast %cst_10 : f32 to vector<128x128xf32>
      %c0_11 = arith.constant 0 : index
      %c0_12 = arith.constant 0 : index
      %13 = vector.load %arg7[%c0_11, %c0_12] : memref<128x128xf32, #tpu.memory_space<vmem>>, vector<128x128xf32>
      tpu.vector_store %arg7[%c0_11, %c0_12], %12 {strides = array<i32>} : memref<128x128xf32, #tpu.memory_space<vmem>>, vector<128x128xf32>,
    } else {
    }
    %c0 = arith.constant 0 : index
    %c0_1 = arith.constant 0 : index
    %3 = vector.load %arg7[%c0, %c0_1] : memref<128x128xf32, #tpu.memory_space<vmem>>, vector<128x128xf32>
    %c0_2 = arith.constant 0 : index
    %c0_3 = arith.constant 0 : index
    %4 = vector.load %arg3[%c0_2, %c0_3] : memref<128x256xbf16, #tpu.memory_space<vmem>>, vector<128x256xbf16>
    %c0_4 = arith.constant 0 : index
    %c0_5 = arith.constant 0 : index
    %5 = vector.load %arg4[%c0_4, %c0_5] : memref<256x128xbf16, #tpu.memory_space<vmem>>, vector<256x128xbf16>
    %cst = arith.constant dense<0.000000e+00> : vector<128x128xf32>
    %6 = tpu.matmul %4, %5, %cst {dimension_numbers = #tpu.dot_dimension_numbers<[1], [0], [0], [1], [0, 0, 1, 1], [], []>} : vector<128x256xbf16>, vector<256x128xbf16>, vector<128x128xf32> -> vector<128x128xf32>
    %7 = arith.addf %3, %6 : vector<128x128xf32>
    %c0_6 = arith.constant 0 : index
    %c0_7 = arith.constant 0 : index
    %8 = vector.load %arg7[%c0_6, %c0_7] : memref<128x128xf32, #tpu.memory_space<vmem>>, vector<128x128xf32>
    tpu.vector_store %arg7[%c0_6, %c0_7], %7 {strides = array<i32>} : memref<128x128xf32, #tpu.memory_space<vmem>>, vector<128x128xf32>,
    %c0_i32_8 = arith.constant 0 : i32
    %9 = arith.cmpi eq, %arg2, %c0_i32_8 : i32
    %10 = arith.extui %9 : i1 to i32
    %c0_i32_9 = arith.constant 0 : i32
    %11 = arith.cmpi ne, %10, %c0_i32_9 : i32
    scf.if %11 {
      %c0_10 = arith.constant 0 : index
      %c0_11 = arith.constant 0 : index
      %12 = vector.load %arg7[%c0_10, %c0_11] : memref<128x128xf32, #tpu.memory_space<vmem>>, vector<128x128xf32>
      %c0_12 = arith.constant 0 : index
      %c0_13 = arith.constant 0 : index
      %13 = vector.load %arg5[%c0_12, %c0_13] : memref<1x128xf32, #tpu.memory_space<vmem>>, vector<1x128xf32>
      %14 = vector.broadcast %13 : vector<1x128xf32> to vector<128x128xf32>
      %15 = arith.mulf %12, %14 : vector<128x128xf32>
      %c0_14 = arith.constant 0 : index
      %c0_15 = arith.constant 0 : index
      %16 = vector.load %arg6[%c0_14, %c0_15] : memref<1x128xf32, #tpu.memory_space<vmem>>, vector<1x128xf32>
      %17 = vector.broadcast %16 : vector<1x128xf32> to vector<128x128xf32>
      %18 = arith.addf %15, %17 : vector<128x128xf32>
      %cst_16 = arith.constant 0.000000e+00 : f32
      %19 = vector.broadcast %cst_16 : f32 to vector<128x128xf32>
      %20 = arith.maximumf %18, %19 : vector<128x128xf32>
      %c0_17 = arith.constant 0 : index
      %c0_18 = arith.constant 0 : index
      %21 = vector.load %arg7[%c0_17, %c0_18] : memref<128x128xf32, #tpu.memory_space<vmem>>, vector<128x128xf32>
      tpu.vector_store %arg7[%c0_17, %c0_18], %20 {strides = array<i32>} : memref<128x128xf32, #tpu.memory_space<vmem>>, vector<128x128xf32>,
    } else {
    }
    return
  }
  func.func @transform_0(%arg0: i32, %arg1: i32, %arg2: i32) -> (i32, i32) {
    %c0_i32 = arith.constant 0 : i32
    return %arg0, %arg2 : i32, i32
  }
  func.func @transform_1(%arg0: i32, %arg1: i32, %arg2: i32) -> (i32, i32) {
    %c0_i32 = arith.constant 0 : i32
    return %arg2, %arg1 : i32, i32
  }
  func.func @transform_2(%arg0: i32, %arg1: i32, %arg2: i32) -> (i32, i32) {
    %c0_i32 = arith.constant 0 : i32
    %c0_i32_0 = arith.constant 0 : i32
    return %c0_i32, %arg1 : i32, i32
  }
  func.func @transform_3(%arg0: i32, %arg1: i32, %arg2: i32) -> (i32, i32) {
    %c0_i32 = arith.constant 0 : i32
    %c0_i32_0 = arith.constant 0 : i32
    return %c0_i32, %arg1 : i32, i32
  }
  func.func @transform_4(%arg0: i32, %arg1: i32, %arg2: i32) -> (i32, i32) {
    %c0_i32 = arith.constant 0 : i32
    return %arg0, %arg1 : i32, i32
  }
}

module attributes {stable_mosaic.version = 11 : i64} {
  func.func @_matmul_kernel(%arg0: i32, %arg1: i32, %arg2: i32, %arg3: memref<128x256xbf16, #tpu.memory_space<vmem>>, %arg4: memref<256x128xbf16, #tpu.memory_space<vmem>>, %arg5: memref<1x128xf32, #tpu.memory_space<vmem>>, %arg6: memref<1x128xf32, #tpu.memory_space<vmem>>, %arg7: memref<128x128xf32, #tpu.memory_space<vmem>>) attributes {dimension_semantics = [#tpu.dimension_semantics<parallel>, #tpu.dimension_semantics<parallel>, #tpu.dimension_semantics<arbitrary>], iteration_bounds = array<i64: 1, 1, 1>, scalar_prefetch = 0 : i64, scratch_operands = 0 : i64, tpu.core_type = #tpu.core_type<tc>, window_params = [{transform_indices = @transform_0, window_bounds = array<i64: 128, 256>}, {transform_indices = @transform_1, window_bounds = array<i64: 256, 128>}, {transform_indices = @transform_2, window_bounds = array<i64: 1, 128>}, {transform_indices = @transform_3, window_bounds = array<i64: 1, 128>}, {transform_indices = @transform_4, window_bounds = array<i64: 128, 128>}]} {
    %c0_i32 = arith.constant 0 : i32
    %0 = arith.cmpi eq, %arg2, %c0_i32 : i32
    %1 = arith.extui %0 : i1 to i32
    %c0_i32_0 = arith.constant 0 : i32
    %2 = arith.cmpi ne, %1, %c0_i32_0 : i32
    scf.if %2 {
      %cst_10 = arith.constant 0.000000e+00 : f32
      %12 = vector.broadcast %cst_10 : f32 to vector<128x128xf32>
      %c0_11 = arith.constant 0 : index
      %c0_12 = arith.constant 0 : index
      %13 = vector.load %arg7[%c0_11, %c0_12] : memref<128x128xf32, #tpu.memory_space<vmem>>, vector<128x128xf32>
      tpu.vector_store %arg7[%c0_11, %c0_12], %12 {strides = array<i32>} : memref<128x128xf32, #tpu.memory_space<vmem>>, vector<128x128xf32>,
    } else {
    }
    %c0 = arith.constant 0 : index
    %c0_1 = arith.constant 0 : index
    %3 = vector.load %arg7[%c0, %c0_1] : memref<128x128xf32, #tpu.memory_space<vmem>>, vector<128x128xf32>
    %c0_2 = arith.constant 0 : index
    %c0_3 = arith.constant 0 : index
    %4 = vector.load %arg3[%c0_2, %c0_3] : memref<128x256xbf16, #tpu.memory_space<vmem>>, vector<128x256xbf16>
    %c0_4 = arith.constant 0 : index
    %c0_5 = arith.constant 0 : index
    %5 = vector.load %arg4[%c0_4, %c0_5] : memref<256x128xbf16, #tpu.memory_space<vmem>>, vector<256x128xbf16>
    %cst = arith.constant dense<0.000000e+00> : vector<128x128xf32>
    %6 = tpu.matmul %4, %5, %cst {dimension_numbers = #tpu.dot_dimension_numbers<[1], [0], [0], [1], [0, 0, 1, 1], [], []>} : vector<128x256xbf16>, vector<256x128xbf16>, vector<128x128xf32> -> vector<128x128xf32>
    %7 = arith.addf %3, %6 : vector<128x128xf32>
    %c0_6 = arith.constant 0 : index
    %c0_7 = arith.constant 0 : index
    %8 = vector.load %arg7[%c0_6, %c0_7] : memref<128x128xf32, #tpu.memory_space<vmem>>, vector<128x128xf32>
    tpu.vector_store %arg7[%c0_6, %c0_7], %7 {strides = array<i32>} : memref<128x128xf32, #tpu.memory_space<vmem>>, vector<128x128xf32>,
    %c0_i32_8 = arith.constant 0 : i32
    %9 = arith.cmpi eq, %arg2, %c0_i32_8 : i32
    %10 = arith.extui %9 : i1 to i32
    %c0_i32_9 = arith.constant 0 : i32
    %11 = arith.cmpi ne, %10, %c0_i32_9 : i32
    scf.if %11 {
      %c0_10 = arith.constant 0 : index
      %c0_11 = arith.constant 0 : index
      %12 = vector.load %arg7[%c0_10, %c0_11] : memref<128x128xf32, #tpu.memory_space<vmem>>, vector<128x128xf32>
      %c0_12 = arith.constant 0 : index
      %c0_13 = arith.constant 0 : index
      %13 = vector.load %arg5[%c0_12, %c0_13] : memref<1x128xf32, #tpu.memory_space<vmem>>, vector<1x128xf32>
      %14 = vector.broadcast %13 : vector<1x128xf32> to vector<128x128xf32>
      %15 = arith.mulf %12, %14 : vector<128x128xf32>
      %c0_14 = arith.constant 0 : index
      %c0_15 = arith.constant 0 : index
      %16 = vector.load %arg6[%c0_14, %c0_15] : memref<1x128xf32, #tpu.memory_space<vmem>>, vector<1x128xf32>
      %17 = vector.broadcast %16 : vector<1x128xf32> to vector<128x128xf32>
      %18 = arith.addf %15, %17 : vector<128x128xf32>
      %c0_16 = arith.constant 0 : index
      %c0_17 = arith.constant 0 : index
      %19 = vector.load %arg7[%c0_16, %c0_17] : memref<128x128xf32, #tpu.memory_space<vmem>>, vector<128x128xf32>
      tpu.vector_store %arg7[%c0_16, %c0_17], %18 {strides = array<i32>} : memref<128x128xf32, #tpu.memory_space<vmem>>, vector<128x128xf32>,
    } else {
    }
    return
  }
  func.func @transform_0(%arg0: i32, %arg1: i32, %arg2: i32) -> (i32, i32) {
    %c0_i32 = arith.constant 0 : i32
    return %arg0, %arg2 : i32, i32
  }
  func.func @transform_1(%arg0: i32, %arg1: i32, %arg2: i32) -> (i32, i32) {
    %c0_i32 = arith.constant 0 : i32
    return %arg2, %arg1 : i32, i32
  }
  func.func @transform_2(%arg0: i32, %arg1: i32, %arg2: i32) -> (i32, i32) {
    %c0_i32 = arith.constant 0 : i32
    %c0_i32_0 = arith.constant 0 : i32
    return %c0_i32, %arg1 : i32, i32
  }
  func.func @transform_3(%arg0: i32, %arg1: i32, %arg2: i32) -> (i32, i32) {
    %c0_i32 = arith.constant 0 : i32
    %c0_i32_0 = arith.constant 0 : i32
    return %c0_i32, %arg1 : i32, i32
  }
  func.func @transform_4(%arg0: i32, %arg1: i32, %arg2: i32) -> (i32, i32) {
    %c0_i32 = arith.constant 0 : i32
    return %arg0, %arg1 : i32, i32
  }
}

module attributes {stable_mosaic.version = 11 : i64} {
  func.func @_reduce_kernel(%arg0: i32, %arg1: memref<4x32x128xf32, #tpu.memory_space<vmem>>, %arg2: memref<32x128xf32, #tpu.memory_space<vmem>>) attributes {dimension_semantics = [#tpu.dimension_semantics<parallel>], iteration_bounds = array<i64: 1>, scalar_prefetch = 0 : i64, scratch_operands = 0 : i64, tpu.core_type = #tpu.core_type<tc>, window_params = [{transform_indices = @transform_0, window_bounds = array<i64: 4, 32, 128>}, {transform_indices = @transform_1, window_bounds = array<i64: 32, 128>}]} {
    %c0 = arith.constant 0 : index
    %c0_0 = arith.constant 0 : index
    %c0_1 = arith.constant 0 : index
    %0 = vector.load %arg1[%c0, %c0_0, %c0_1] : memref<4x32x128xf32, #tpu.memory_space<vmem>>, vector<4x32x128xf32>
    %cst = arith.constant dense<0.000000e+00> : vector<32x128xf32>
    %1 = vector.multi_reduction <add>, %0, %cst [0] : vector<4x32x128xf32> to vector<32x128xf32>
    %cst_2 = arith.constant 4.000000e+00 : f32
    %2 = vector.broadcast %cst_2 : f32 to vector<32x128xf32>
    %3 = arith.divf %1, %2 : vector<32x128xf32>
    %c0_3 = arith.constant 0 : index
    %c0_4 = arith.constant 0 : index
    %4 = vector.load %arg2[%c0_3, %c0_4] : memref<32x128xf32, #tpu.memory_space<vmem>>, vector<32x128xf32>
    tpu.vector_store %arg2[%c0_3, %c0_4], %3 {strides = array<i32>} : memref<32x128xf32, #tpu.memory_space<vmem>>, vector<32x128xf32>,
    return
  }
  func.func @transform_0(%arg0: i32) -> (i32, i32, i32) {
    %c0_i32 = arith.constant 0 : i32
    %c0_i32_0 = arith.constant 0 : i32
    %c0_i32_1 = arith.constant 0 : i32
    return %c0_i32, %arg0, %c0_i32_0 : i32, i32, i32
  }
  func.func @transform_1(%arg0: i32) -> (i32, i32) {
    %c0_i32 = arith.constant 0 : i32
    %c0_i32_0 = arith.constant 0 : i32
    return %arg0, %c0_i32 : i32, i32
  }
}

module attributes {stable_mosaic.version = 11 : i64} {
  func.func @_bn_kernel(%arg0: i32, %arg1: memref<32x128xf32, #tpu.memory_space<vmem>>, %arg2: memref<1x128xf32, #tpu.memory_space<vmem>>, %arg3: memref<1x128xf32, #tpu.memory_space<vmem>>, %arg4: memref<32x128xf32, #tpu.memory_space<vmem>>) attributes {dimension_semantics = [#tpu.dimension_semantics<parallel>], iteration_bounds = array<i64: 1>, scalar_prefetch = 0 : i64, scratch_operands = 0 : i64, tpu.core_type = #tpu.core_type<tc>, window_params = [{transform_indices = @transform_0, window_bounds = array<i64: 32, 128>}, {pipeline_mode = #tpu.pipeline_mode<synchronous>, transform_indices = @transform_1, window_bounds = array<i64: 1, 128>}, {pipeline_mode = #tpu.pipeline_mode<synchronous>, transform_indices = @transform_2, window_bounds = array<i64: 1, 128>}, {transform_indices = @transform_3, window_bounds = array<i64: 32, 128>}]} {
    %c0 = arith.constant 0 : index
    %c0_0 = arith.constant 0 : index
    %0 = vector.load %arg1[%c0, %c0_0] : memref<32x128xf32, #tpu.memory_space<vmem>>, vector<32x128xf32>
    %c0_1 = arith.constant 0 : index
    %c0_2 = arith.constant 0 : index
    %1 = vector.load %arg2[%c0_1, %c0_2] : memref<1x128xf32, #tpu.memory_space<vmem>>, vector<1x128xf32>
    %2 = vector.broadcast %1 : vector<1x128xf32> to vector<32x128xf32>
    %3 = arith.mulf %0, %2 : vector<32x128xf32>
    %c0_3 = arith.constant 0 : index
    %c0_4 = arith.constant 0 : index
    %4 = vector.load %arg3[%c0_3, %c0_4] : memref<1x128xf32, #tpu.memory_space<vmem>>, vector<1x128xf32>
    %5 = vector.broadcast %4 : vector<1x128xf32> to vector<32x128xf32>
    %6 = arith.addf %3, %5 : vector<32x128xf32>
    %cst = arith.constant 0.000000e+00 : f32
    %7 = vector.broadcast %cst : f32 to vector<32x128xf32>
    %8 = arith.maximumf %6, %7 : vector<32x128xf32>
    %c0_5 = arith.constant 0 : index
    %c0_6 = arith.constant 0 : index
    %9 = vector.load %arg4[%c0_5, %c0_6] : memref<32x128xf32, #tpu.memory_space<vmem>>, vector<32x128xf32>
    tpu.vector_store %arg4[%c0_5, %c0_6], %8 {strides = array<i32>} : memref<32x128xf32, #tpu.memory_space<vmem>>, vector<32x128xf32>,
    return
  }
  func.func @transform_0(%arg0: i32) -> (i32, i32) {
    %c0_i32 = arith.constant 0 : i32
    %c0_i32_0 = arith.constant 0 : i32
    return %arg0, %c0_i32 : i32, i32
  }
  func.func @transform_1(%arg0: i32) -> (i32, i32) {
    %c0_i32 = arith.constant 0 : i32
    %c0_i32_0 = arith.constant 0 : i32
    %c0_i32_1 = arith.constant 0 : i32
    return %c0_i32, %c0_i32_0 : i32, i32
  }
  func.func @transform_2(%arg0: i32) -> (i32, i32) {
    %c0_i32 = arith.constant 0 : i32
    %c0_i32_0 = arith.constant 0 : i32
    %c0_i32_1 = arith.constant 0 : i32
    return %c0_i32, %c0_i32_0 : i32, i32
  }
  func.func @transform_3(%arg0: i32) -> (i32, i32) {
    %c0_i32 = arith.constant 0 : i32
    %c0_i32_0 = arith.constant 0 : i32
    return %arg0, %c0_i32 : i32, i32
  }
}

module attributes {stable_mosaic.version = 11 : i64} {
  func.func @_matmul_kernel(%arg0: i32, %arg1: i32, %arg2: i32, %arg3: memref<32x128xbf16, #tpu.memory_space<vmem>>, %arg4: memref<128x128xbf16, #tpu.memory_space<vmem>>, %arg5: memref<1x128xf32, #tpu.memory_space<vmem>>, %arg6: memref<1x128xf32, #tpu.memory_space<vmem>>, %arg7: memref<32x128xf32, #tpu.memory_space<vmem>>) attributes {dimension_semantics = [#tpu.dimension_semantics<parallel>, #tpu.dimension_semantics<parallel>, #tpu.dimension_semantics<arbitrary>], iteration_bounds = array<i64: 1, 1, 1>, scalar_prefetch = 0 : i64, scratch_operands = 0 : i64, tpu.core_type = #tpu.core_type<tc>, window_params = [{transform_indices = @transform_0, window_bounds = array<i64: 32, 128>}, {transform_indices = @transform_1, window_bounds = array<i64: 128, 128>}, {transform_indices = @transform_2, window_bounds = array<i64: 1, 128>}, {transform_indices = @transform_3, window_bounds = array<i64: 1, 128>}, {transform_indices = @transform_4, window_bounds = array<i64: 32, 128>}]} {
    %c0_i32 = arith.constant 0 : i32
    %0 = arith.cmpi eq, %arg2, %c0_i32 : i32
    %1 = arith.extui %0 : i1 to i32
    %c0_i32_0 = arith.constant 0 : i32
    %2 = arith.cmpi ne, %1, %c0_i32_0 : i32
    scf.if %2 {
      %cst_10 = arith.constant 0.000000e+00 : f32
      %12 = vector.broadcast %cst_10 : f32 to vector<32x128xf32>
      %c0_11 = arith.constant 0 : index
      %c0_12 = arith.constant 0 : index
      %13 = vector.load %arg7[%c0_11, %c0_12] : memref<32x128xf32, #tpu.memory_space<vmem>>, vector<32x128xf32>
      tpu.vector_store %arg7[%c0_11, %c0_12], %12 {strides = array<i32>} : memref<32x128xf32, #tpu.memory_space<vmem>>, vector<32x128xf32>,
    } else {
    }
    %c0 = arith.constant 0 : index
    %c0_1 = arith.constant 0 : index
    %3 = vector.load %arg7[%c0, %c0_1] : memref<32x128xf32, #tpu.memory_space<vmem>>, vector<32x128xf32>
    %c0_2 = arith.constant 0 : index
    %c0_3 = arith.constant 0 : index
    %4 = vector.load %arg3[%c0_2, %c0_3] : memref<32x128xbf16, #tpu.memory_space<vmem>>, vector<32x128xbf16>
    %c0_4 = arith.constant 0 : index
    %c0_5 = arith.constant 0 : index
    %5 = vector.load %arg4[%c0_4, %c0_5] : memref<128x128xbf16, #tpu.memory_space<vmem>>, vector<128x128xbf16>
    %cst = arith.constant dense<0.000000e+00> : vector<32x128xf32>
    %6 = tpu.matmul %4, %5, %cst {dimension_numbers = #tpu.dot_dimension_numbers<[1], [0], [0], [1], [0, 0, 1, 1], [], []>} : vector<32x128xbf16>, vector<128x128xbf16>, vector<32x128xf32> -> vector<32x128xf32>
    %7 = arith.addf %3, %6 : vector<32x128xf32>
    %c0_6 = arith.constant 0 : index
    %c0_7 = arith.constant 0 : index
    %8 = vector.load %arg7[%c0_6, %c0_7] : memref<32x128xf32, #tpu.memory_space<vmem>>, vector<32x128xf32>
    tpu.vector_store %arg7[%c0_6, %c0_7], %7 {strides = array<i32>} : memref<32x128xf32, #tpu.memory_space<vmem>>, vector<32x128xf32>,
    %c0_i32_8 = arith.constant 0 : i32
    %9 = arith.cmpi eq, %arg2, %c0_i32_8 : i32
    %10 = arith.extui %9 : i1 to i32
    %c0_i32_9 = arith.constant 0 : i32
    %11 = arith.cmpi ne, %10, %c0_i32_9 : i32
    scf.if %11 {
      %c0_10 = arith.constant 0 : index
      %c0_11 = arith.constant 0 : index
      %12 = vector.load %arg7[%c0_10, %c0_11] : memref<32x128xf32, #tpu.memory_space<vmem>>, vector<32x128xf32>
      %c0_12 = arith.constant 0 : index
      %c0_13 = arith.constant 0 : index
      %13 = vector.load %arg5[%c0_12, %c0_13] : memref<1x128xf32, #tpu.memory_space<vmem>>, vector<1x128xf32>
      %14 = vector.broadcast %13 : vector<1x128xf32> to vector<32x128xf32>
      %15 = arith.mulf %12, %14 : vector<32x128xf32>
      %c0_14 = arith.constant 0 : index
      %c0_15 = arith.constant 0 : index
      %16 = vector.load %arg6[%c0_14, %c0_15] : memref<1x128xf32, #tpu.memory_space<vmem>>, vector<1x128xf32>
      %17 = vector.broadcast %16 : vector<1x128xf32> to vector<32x128xf32>
      %18 = arith.addf %15, %17 : vector<32x128xf32>
      %cst_16 = arith.constant 0.000000e+00 : f32
      %19 = vector.broadcast %cst_16 : f32 to vector<32x128xf32>
      %20 = arith.maximumf %18, %19 : vector<32x128xf32>
      %c0_17 = arith.constant 0 : index
      %c0_18 = arith.constant 0 : index
      %21 = vector.load %arg7[%c0_17, %c0_18] : memref<32x128xf32, #tpu.memory_space<vmem>>, vector<32x128xf32>
      tpu.vector_store %arg7[%c0_17, %c0_18], %20 {strides = array<i32>} : memref<32x128xf32, #tpu.memory_space<vmem>>, vector<32x128xf32>,
    } else {
    }
    return
  }
  func.func @transform_0(%arg0: i32, %arg1: i32, %arg2: i32) -> (i32, i32) {
    %c0_i32 = arith.constant 0 : i32
    return %arg0, %arg2 : i32, i32
  }
  func.func @transform_1(%arg0: i32, %arg1: i32, %arg2: i32) -> (i32, i32) {
    %c0_i32 = arith.constant 0 : i32
    return %arg2, %arg1 : i32, i32
  }
  func.func @transform_2(%arg0: i32, %arg1: i32, %arg2: i32) -> (i32, i32) {
    %c0_i32 = arith.constant 0 : i32
    %c0_i32_0 = arith.constant 0 : i32
    return %c0_i32, %arg1 : i32, i32
  }
  func.func @transform_3(%arg0: i32, %arg1: i32, %arg2: i32) -> (i32, i32) {
    %c0_i32 = arith.constant 0 : i32
    %c0_i32_0 = arith.constant 0 : i32
    return %c0_i32, %arg1 : i32, i32
  }
  func.func @transform_4(%arg0: i32, %arg1: i32, %arg2: i32) -> (i32, i32) {
    %c0_i32 = arith.constant 0 : i32
    return %arg0, %arg1 : i32, i32
  }
}

module attributes {stable_mosaic.version = 11 : i64} {
  func.func @_matmul_kernel(%arg0: i32, %arg1: i32, %arg2: i32, %arg3: memref<32x256xbf16, #tpu.memory_space<vmem>>, %arg4: memref<256x128xbf16, #tpu.memory_space<vmem>>, %arg5: memref<1x128xf32, #tpu.memory_space<vmem>>, %arg6: memref<1x128xf32, #tpu.memory_space<vmem>>, %arg7: memref<32x128xf32, #tpu.memory_space<vmem>>) attributes {dimension_semantics = [#tpu.dimension_semantics<parallel>, #tpu.dimension_semantics<parallel>, #tpu.dimension_semantics<arbitrary>], iteration_bounds = array<i64: 1, 1, 5>, scalar_prefetch = 0 : i64, scratch_operands = 0 : i64, tpu.core_type = #tpu.core_type<tc>, window_params = [{transform_indices = @transform_0, window_bounds = array<i64: 32, 256>}, {transform_indices = @transform_1, window_bounds = array<i64: 256, 128>}, {transform_indices = @transform_2, window_bounds = array<i64: 1, 128>}, {transform_indices = @transform_3, window_bounds = array<i64: 1, 128>}, {transform_indices = @transform_4, window_bounds = array<i64: 32, 128>}]} {
    %c0_i32 = arith.constant 0 : i32
    %0 = arith.cmpi eq, %arg2, %c0_i32 : i32
    %1 = arith.extui %0 : i1 to i32
    %c0_i32_0 = arith.constant 0 : i32
    %2 = arith.cmpi ne, %1, %c0_i32_0 : i32
    scf.if %2 {
      %cst_9 = arith.constant 0.000000e+00 : f32
      %12 = vector.broadcast %cst_9 : f32 to vector<32x128xf32>
      %c0_10 = arith.constant 0 : index
      %c0_11 = arith.constant 0 : index
      %13 = vector.load %arg7[%c0_10, %c0_11] : memref<32x128xf32, #tpu.memory_space<vmem>>, vector<32x128xf32>
      tpu.vector_store %arg7[%c0_10, %c0_11], %12 {strides = array<i32>} : memref<32x128xf32, #tpu.memory_space<vmem>>, vector<32x128xf32>,
    } else {
    }
    %c0 = arith.constant 0 : index
    %c0_1 = arith.constant 0 : index
    %3 = vector.load %arg7[%c0, %c0_1] : memref<32x128xf32, #tpu.memory_space<vmem>>, vector<32x128xf32>
    %c0_2 = arith.constant 0 : index
    %c0_3 = arith.constant 0 : index
    %4 = vector.load %arg3[%c0_2, %c0_3] : memref<32x256xbf16, #tpu.memory_space<vmem>>, vector<32x256xbf16>
    %c0_4 = arith.constant 0 : index
    %c0_5 = arith.constant 0 : index
    %5 = vector.load %arg4[%c0_4, %c0_5] : memref<256x128xbf16, #tpu.memory_space<vmem>>, vector<256x128xbf16>
    %cst = arith.constant dense<0.000000e+00> : vector<32x128xf32>
    %6 = tpu.matmul %4, %5, %cst {dimension_numbers = #tpu.dot_dimension_numbers<[1], [0], [0], [1], [0, 0, 1, 1], [], []>} : vector<32x256xbf16>, vector<256x128xbf16>, vector<32x128xf32> -> vector<32x128xf32>
    %7 = arith.addf %3, %6 : vector<32x128xf32>
    %c0_6 = arith.constant 0 : index
    %c0_7 = arith.constant 0 : index
    %8 = vector.load %arg7[%c0_6, %c0_7] : memref<32x128xf32, #tpu.memory_space<vmem>>, vector<32x128xf32>
    tpu.vector_store %arg7[%c0_6, %c0_7], %7 {strides = array<i32>} : memref<32x128xf32, #tpu.memory_space<vmem>>, vector<32x128xf32>,
    %c4_i32 = arith.constant 4 : i32
    %9 = arith.cmpi eq, %arg2, %c4_i32 : i32
    %10 = arith.extui %9 : i1 to i32
    %c0_i32_8 = arith.constant 0 : i32
    %11 = arith.cmpi ne, %10, %c0_i32_8 : i32
    scf.if %11 {
      %c0_9 = arith.constant 0 : index
      %c0_10 = arith.constant 0 : index
      %12 = vector.load %arg7[%c0_9, %c0_10] : memref<32x128xf32, #tpu.memory_space<vmem>>, vector<32x128xf32>
      %c0_11 = arith.constant 0 : index
      %c0_12 = arith.constant 0 : index
      %13 = vector.load %arg5[%c0_11, %c0_12] : memref<1x128xf32, #tpu.memory_space<vmem>>, vector<1x128xf32>
      %14 = vector.broadcast %13 : vector<1x128xf32> to vector<32x128xf32>
      %15 = arith.mulf %12, %14 : vector<32x128xf32>
      %c0_13 = arith.constant 0 : index
      %c0_14 = arith.constant 0 : index
      %16 = vector.load %arg6[%c0_13, %c0_14] : memref<1x128xf32, #tpu.memory_space<vmem>>, vector<1x128xf32>
      %17 = vector.broadcast %16 : vector<1x128xf32> to vector<32x128xf32>
      %18 = arith.addf %15, %17 : vector<32x128xf32>
      %c0_15 = arith.constant 0 : index
      %c0_16 = arith.constant 0 : index
      %19 = vector.load %arg7[%c0_15, %c0_16] : memref<32x128xf32, #tpu.memory_space<vmem>>, vector<32x128xf32>
      tpu.vector_store %arg7[%c0_15, %c0_16], %18 {strides = array<i32>} : memref<32x128xf32, #tpu.memory_space<vmem>>, vector<32x128xf32>,
    } else {
    }
    return
  }
  func.func @transform_0(%arg0: i32, %arg1: i32, %arg2: i32) -> (i32, i32) {
    %c0_i32 = arith.constant 0 : i32
    return %arg0, %arg2 : i32, i32
  }
  func.func @transform_1(%arg0: i32, %arg1: i32, %arg2: i32) -> (i32, i32) {
    %c0_i32 = arith.constant 0 : i32
    return %arg2, %arg1 : i32, i32
  }
  func.func @transform_2(%arg0: i32, %arg1: i32, %arg2: i32) -> (i32, i32) {
    %c0_i32 = arith.constant 0 : i32
    %c0_i32_0 = arith.constant 0 : i32
    return %c0_i32, %arg1 : i32, i32
  }
  func.func @transform_3(%arg0: i32, %arg1: i32, %arg2: i32) -> (i32, i32) {
    %c0_i32 = arith.constant 0 : i32
    %c0_i32_0 = arith.constant 0 : i32
    return %c0_i32, %arg1 : i32, i32
  }
  func.func @transform_4(%arg0: i32, %arg1: i32, %arg2: i32) -> (i32, i32) {
    %c0_i32 = arith.constant 0 : i32
    return %arg0, %arg1 : i32, i32
  }
}

module attributes {stable_mosaic.version = 11 : i64} {
  func.func @_matmul_kernel(%arg0: i32, %arg1: i32, %arg2: i32, %arg3: memref<32x256xbf16, #tpu.memory_space<vmem>>, %arg4: memref<256x128xbf16, #tpu.memory_space<vmem>>, %arg5: memref<1x128xf32, #tpu.memory_space<vmem>>, %arg6: memref<1x128xf32, #tpu.memory_space<vmem>>, %arg7: memref<32x128xf32, #tpu.memory_space<vmem>>) attributes {dimension_semantics = [#tpu.dimension_semantics<parallel>, #tpu.dimension_semantics<parallel>, #tpu.dimension_semantics<arbitrary>], iteration_bounds = array<i64: 1, 1, 1>, scalar_prefetch = 0 : i64, scratch_operands = 0 : i64, tpu.core_type = #tpu.core_type<tc>, window_params = [{transform_indices = @transform_0, window_bounds = array<i64: 32, 256>}, {transform_indices = @transform_1, window_bounds = array<i64: 256, 128>}, {transform_indices = @transform_2, window_bounds = array<i64: 1, 128>}, {transform_indices = @transform_3, window_bounds = array<i64: 1, 128>}, {transform_indices = @transform_4, window_bounds = array<i64: 32, 128>}]} {
    %c0_i32 = arith.constant 0 : i32
    %0 = arith.cmpi eq, %arg2, %c0_i32 : i32
    %1 = arith.extui %0 : i1 to i32
    %c0_i32_0 = arith.constant 0 : i32
    %2 = arith.cmpi ne, %1, %c0_i32_0 : i32
    scf.if %2 {
      %cst_10 = arith.constant 0.000000e+00 : f32
      %12 = vector.broadcast %cst_10 : f32 to vector<32x128xf32>
      %c0_11 = arith.constant 0 : index
      %c0_12 = arith.constant 0 : index
      %13 = vector.load %arg7[%c0_11, %c0_12] : memref<32x128xf32, #tpu.memory_space<vmem>>, vector<32x128xf32>
      tpu.vector_store %arg7[%c0_11, %c0_12], %12 {strides = array<i32>} : memref<32x128xf32, #tpu.memory_space<vmem>>, vector<32x128xf32>,
    } else {
    }
    %c0 = arith.constant 0 : index
    %c0_1 = arith.constant 0 : index
    %3 = vector.load %arg7[%c0, %c0_1] : memref<32x128xf32, #tpu.memory_space<vmem>>, vector<32x128xf32>
    %c0_2 = arith.constant 0 : index
    %c0_3 = arith.constant 0 : index
    %4 = vector.load %arg3[%c0_2, %c0_3] : memref<32x256xbf16, #tpu.memory_space<vmem>>, vector<32x256xbf16>
    %c0_4 = arith.constant 0 : index
    %c0_5 = arith.constant 0 : index
    %5 = vector.load %arg4[%c0_4, %c0_5] : memref<256x128xbf16, #tpu.memory_space<vmem>>, vector<256x128xbf16>
    %cst = arith.constant dense<0.000000e+00> : vector<32x128xf32>
    %6 = tpu.matmul %4, %5, %cst {dimension_numbers = #tpu.dot_dimension_numbers<[1], [0], [0], [1], [0, 0, 1, 1], [], []>} : vector<32x256xbf16>, vector<256x128xbf16>, vector<32x128xf32> -> vector<32x128xf32>
    %7 = arith.addf %3, %6 : vector<32x128xf32>
    %c0_6 = arith.constant 0 : index
    %c0_7 = arith.constant 0 : index
    %8 = vector.load %arg7[%c0_6, %c0_7] : memref<32x128xf32, #tpu.memory_space<vmem>>, vector<32x128xf32>
    tpu.vector_store %arg7[%c0_6, %c0_7], %7 {strides = array<i32>} : memref<32x128xf32, #tpu.memory_space<vmem>>, vector<32x128xf32>,
    %c0_i32_8 = arith.constant 0 : i32
    %9 = arith.cmpi eq, %arg2, %c0_i32_8 : i32
    %10 = arith.extui %9 : i1 to i32
    %c0_i32_9 = arith.constant 0 : i32
    %11 = arith.cmpi ne, %10, %c0_i32_9 : i32
    scf.if %11 {
      %c0_10 = arith.constant 0 : index
      %c0_11 = arith.constant 0 : index
      %12 = vector.load %arg7[%c0_10, %c0_11] : memref<32x128xf32, #tpu.memory_space<vmem>>, vector<32x128xf32>
      %c0_12 = arith.constant 0 : index
      %c0_13 = arith.constant 0 : index
      %13 = vector.load %arg5[%c0_12, %c0_13] : memref<1x128xf32, #tpu.memory_space<vmem>>, vector<1x128xf32>
      %14 = vector.broadcast %13 : vector<1x128xf32> to vector<32x128xf32>
      %15 = arith.mulf %12, %14 : vector<32x128xf32>
      %c0_14 = arith.constant 0 : index
      %c0_15 = arith.constant 0 : index
      %16 = vector.load %arg6[%c0_14, %c0_15] : memref<1x128xf32, #tpu.memory_space<vmem>>, vector<1x128xf32>
      %17 = vector.broadcast %16 : vector<1x128xf32> to vector<32x128xf32>
      %18 = arith.addf %15, %17 : vector<32x128xf32>
      %cst_16 = arith.constant 0.000000e+00 : f32
      %19 = vector.broadcast %cst_16 : f32 to vector<32x128xf32>
      %20 = arith.maximumf %18, %19 : vector<32x128xf32>
      %c0_17 = arith.constant 0 : index
      %c0_18 = arith.constant 0 : index
      %21 = vector.load %arg7[%c0_17, %c0_18] : memref<32x128xf32, #tpu.memory_space<vmem>>, vector<32x128xf32>
      tpu.vector_store %arg7[%c0_17, %c0_18], %20 {strides = array<i32>} : memref<32x128xf32, #tpu.memory_space<vmem>>, vector<32x128xf32>,
    } else {
    }
    return
  }
  func.func @transform_0(%arg0: i32, %arg1: i32, %arg2: i32) -> (i32, i32) {
    %c0_i32 = arith.constant 0 : i32
    return %arg0, %arg2 : i32, i32
  }
  func.func @transform_1(%arg0: i32, %arg1: i32, %arg2: i32) -> (i32, i32) {
    %c0_i32 = arith.constant 0 : i32
    return %arg2, %arg1 : i32, i32
  }
  func.func @transform_2(%arg0: i32, %arg1: i32, %arg2: i32) -> (i32, i32) {
    %c0_i32 = arith.constant 0 : i32
    %c0_i32_0 = arith.constant 0 : i32
    return %c0_i32, %arg1 : i32, i32
  }
  func.func @transform_3(%arg0: i32, %arg1: i32, %arg2: i32) -> (i32, i32) {
    %c0_i32 = arith.constant 0 : i32
    %c0_i32_0 = arith.constant 0 : i32
    return %c0_i32, %arg1 : i32, i32
  }
  func.func @transform_4(%arg0: i32, %arg1: i32, %arg2: i32) -> (i32, i32) {
    %c0_i32 = arith.constant 0 : i32
    return %arg0, %arg1 : i32, i32
  }
}

module attributes {stable_mosaic.version = 11 : i64} {
  func.func @_bn_kernel(%arg0: i32, %arg1: memref<32x256xf32, #tpu.memory_space<vmem>>, %arg2: memref<1x256xf32, #tpu.memory_space<vmem>>, %arg3: memref<1x256xf32, #tpu.memory_space<vmem>>, %arg4: memref<32x256xf32, #tpu.memory_space<vmem>>) attributes {dimension_semantics = [#tpu.dimension_semantics<parallel>], iteration_bounds = array<i64: 1>, scalar_prefetch = 0 : i64, scratch_operands = 0 : i64, tpu.core_type = #tpu.core_type<tc>, window_params = [{transform_indices = @transform_0, window_bounds = array<i64: 32, 256>}, {pipeline_mode = #tpu.pipeline_mode<synchronous>, transform_indices = @transform_1, window_bounds = array<i64: 1, 256>}, {pipeline_mode = #tpu.pipeline_mode<synchronous>, transform_indices = @transform_2, window_bounds = array<i64: 1, 256>}, {transform_indices = @transform_3, window_bounds = array<i64: 32, 256>}]} {
    %c0 = arith.constant 0 : index
    %c0_0 = arith.constant 0 : index
    %0 = vector.load %arg1[%c0, %c0_0] : memref<32x256xf32, #tpu.memory_space<vmem>>, vector<32x256xf32>
    %c0_1 = arith.constant 0 : index
    %c0_2 = arith.constant 0 : index
    %1 = vector.load %arg2[%c0_1, %c0_2] : memref<1x256xf32, #tpu.memory_space<vmem>>, vector<1x256xf32>
    %2 = vector.broadcast %1 : vector<1x256xf32> to vector<32x256xf32>
    %3 = arith.mulf %0, %2 : vector<32x256xf32>
    %c0_3 = arith.constant 0 : index
    %c0_4 = arith.constant 0 : index
    %4 = vector.load %arg3[%c0_3, %c0_4] : memref<1x256xf32, #tpu.memory_space<vmem>>, vector<1x256xf32>
    %5 = vector.broadcast %4 : vector<1x256xf32> to vector<32x256xf32>
    %6 = arith.addf %3, %5 : vector<32x256xf32>
    %cst = arith.constant 0.000000e+00 : f32
    %7 = vector.broadcast %cst : f32 to vector<32x256xf32>
    %8 = arith.maximumf %6, %7 : vector<32x256xf32>
    %c0_5 = arith.constant 0 : index
    %c0_6 = arith.constant 0 : index
    %9 = vector.load %arg4[%c0_5, %c0_6] : memref<32x256xf32, #tpu.memory_space<vmem>>, vector<32x256xf32>
    tpu.vector_store %arg4[%c0_5, %c0_6], %8 {strides = array<i32>} : memref<32x256xf32, #tpu.memory_space<vmem>>, vector<32x256xf32>,
    return
  }
  func.func @transform_0(%arg0: i32) -> (i32, i32) {
    %c0_i32 = arith.constant 0 : i32
    %c0_i32_0 = arith.constant 0 : i32
    return %arg0, %c0_i32 : i32, i32
  }
  func.func @transform_1(%arg0: i32) -> (i32, i32) {
    %c0_i32 = arith.constant 0 : i32
    %c0_i32_0 = arith.constant 0 : i32
    %c0_i32_1 = arith.constant 0 : i32
    return %c0_i32, %c0_i32_0 : i32, i32
  }
  func.func @transform_2(%arg0: i32) -> (i32, i32) {
    %c0_i32 = arith.constant 0 : i32
    %c0_i32_0 = arith.constant 0 : i32
    %c0_i32_1 = arith.constant 0 : i32
    return %c0_i32, %c0_i32_0 : i32, i32
  }
  func.func @transform_3(%arg0: i32) -> (i32, i32) {
    %c0_i32 = arith.constant 0 : i32
    %c0_i32_0 = arith.constant 0 : i32
    return %arg0, %c0_i32 : i32, i32
  }
}

module attributes {stable_mosaic.version = 11 : i64} {
  func.func @_bn_kernel(%arg0: i32, %arg1: memref<32x384xf32, #tpu.memory_space<vmem>>, %arg2: memref<1x384xf32, #tpu.memory_space<vmem>>, %arg3: memref<1x384xf32, #tpu.memory_space<vmem>>, %arg4: memref<32x384xf32, #tpu.memory_space<vmem>>) attributes {dimension_semantics = [#tpu.dimension_semantics<parallel>], iteration_bounds = array<i64: 1>, scalar_prefetch = 0 : i64, scratch_operands = 0 : i64, tpu.core_type = #tpu.core_type<tc>, window_params = [{transform_indices = @transform_0, window_bounds = array<i64: 32, 384>}, {pipeline_mode = #tpu.pipeline_mode<synchronous>, transform_indices = @transform_1, window_bounds = array<i64: 1, 384>}, {pipeline_mode = #tpu.pipeline_mode<synchronous>, transform_indices = @transform_2, window_bounds = array<i64: 1, 384>}, {transform_indices = @transform_3, window_bounds = array<i64: 32, 384>}]} {
    %c0 = arith.constant 0 : index
    %c0_0 = arith.constant 0 : index
    %0 = vector.load %arg1[%c0, %c0_0] : memref<32x384xf32, #tpu.memory_space<vmem>>, vector<32x384xf32>
    %c0_1 = arith.constant 0 : index
    %c0_2 = arith.constant 0 : index
    %1 = vector.load %arg2[%c0_1, %c0_2] : memref<1x384xf32, #tpu.memory_space<vmem>>, vector<1x384xf32>
    %2 = vector.broadcast %1 : vector<1x384xf32> to vector<32x384xf32>
    %3 = arith.mulf %0, %2 : vector<32x384xf32>
    %c0_3 = arith.constant 0 : index
    %c0_4 = arith.constant 0 : index
    %4 = vector.load %arg3[%c0_3, %c0_4] : memref<1x384xf32, #tpu.memory_space<vmem>>, vector<1x384xf32>
    %5 = vector.broadcast %4 : vector<1x384xf32> to vector<32x384xf32>
    %6 = arith.addf %3, %5 : vector<32x384xf32>
    %cst = arith.constant 0.000000e+00 : f32
    %7 = vector.broadcast %cst : f32 to vector<32x384xf32>
    %8 = arith.maximumf %6, %7 : vector<32x384xf32>
    %c0_5 = arith.constant 0 : index
    %c0_6 = arith.constant 0 : index
    %9 = vector.load %arg4[%c0_5, %c0_6] : memref<32x384xf32, #tpu.memory_space<vmem>>, vector<32x384xf32>
    tpu.vector_store %arg4[%c0_5, %c0_6], %8 {strides = array<i32>} : memref<32x384xf32, #tpu.memory_space<vmem>>, vector<32x384xf32>,
    return
  }
  func.func @transform_0(%arg0: i32) -> (i32, i32) {
    %c0_i32 = arith.constant 0 : i32
    %c0_i32_0 = arith.constant 0 : i32
    return %arg0, %c0_i32 : i32, i32
  }
  func.func @transform_1(%arg0: i32) -> (i32, i32) {
    %c0_i32 = arith.constant 0 : i32
    %c0_i32_0 = arith.constant 0 : i32
    %c0_i32_1 = arith.constant 0 : i32
    return %c0_i32, %c0_i32_0 : i32, i32
  }
  func.func @transform_2(%arg0: i32) -> (i32, i32) {
    %c0_i32 = arith.constant 0 : i32
    %c0_i32_0 = arith.constant 0 : i32
    %c0_i32_1 = arith.constant 0 : i32
    return %c0_i32, %c0_i32_0 : i32, i32
  }
  func.func @transform_3(%arg0: i32) -> (i32, i32) {
    %c0_i32 = arith.constant 0 : i32
    %c0_i32_0 = arith.constant 0 : i32
    return %arg0, %c0_i32 : i32, i32
  }
}

module attributes {stable_mosaic.version = 11 : i64} {
  func.func @_matmul_kernel(%arg0: i32, %arg1: i32, %arg2: i32, %arg3: memref<32x256xbf16, #tpu.memory_space<vmem>>, %arg4: memref<256x128xbf16, #tpu.memory_space<vmem>>, %arg5: memref<1x128xf32, #tpu.memory_space<vmem>>, %arg6: memref<1x128xf32, #tpu.memory_space<vmem>>, %arg7: memref<32x128xf32, #tpu.memory_space<vmem>>) attributes {dimension_semantics = [#tpu.dimension_semantics<parallel>, #tpu.dimension_semantics<parallel>, #tpu.dimension_semantics<arbitrary>], iteration_bounds = array<i64: 1, 1, 2>, scalar_prefetch = 0 : i64, scratch_operands = 0 : i64, tpu.core_type = #tpu.core_type<tc>, window_params = [{transform_indices = @transform_0, window_bounds = array<i64: 32, 256>}, {transform_indices = @transform_1, window_bounds = array<i64: 256, 128>}, {transform_indices = @transform_2, window_bounds = array<i64: 1, 128>}, {transform_indices = @transform_3, window_bounds = array<i64: 1, 128>}, {transform_indices = @transform_4, window_bounds = array<i64: 32, 128>}]} {
    %c0_i32 = arith.constant 0 : i32
    %0 = arith.cmpi eq, %arg2, %c0_i32 : i32
    %1 = arith.extui %0 : i1 to i32
    %c0_i32_0 = arith.constant 0 : i32
    %2 = arith.cmpi ne, %1, %c0_i32_0 : i32
    scf.if %2 {
      %cst_9 = arith.constant 0.000000e+00 : f32
      %12 = vector.broadcast %cst_9 : f32 to vector<32x128xf32>
      %c0_10 = arith.constant 0 : index
      %c0_11 = arith.constant 0 : index
      %13 = vector.load %arg7[%c0_10, %c0_11] : memref<32x128xf32, #tpu.memory_space<vmem>>, vector<32x128xf32>
      tpu.vector_store %arg7[%c0_10, %c0_11], %12 {strides = array<i32>} : memref<32x128xf32, #tpu.memory_space<vmem>>, vector<32x128xf32>,
    } else {
    }
    %c0 = arith.constant 0 : index
    %c0_1 = arith.constant 0 : index
    %3 = vector.load %arg7[%c0, %c0_1] : memref<32x128xf32, #tpu.memory_space<vmem>>, vector<32x128xf32>
    %c0_2 = arith.constant 0 : index
    %c0_3 = arith.constant 0 : index
    %4 = vector.load %arg3[%c0_2, %c0_3] : memref<32x256xbf16, #tpu.memory_space<vmem>>, vector<32x256xbf16>
    %c0_4 = arith.constant 0 : index
    %c0_5 = arith.constant 0 : index
    %5 = vector.load %arg4[%c0_4, %c0_5] : memref<256x128xbf16, #tpu.memory_space<vmem>>, vector<256x128xbf16>
    %cst = arith.constant dense<0.000000e+00> : vector<32x128xf32>
    %6 = tpu.matmul %4, %5, %cst {dimension_numbers = #tpu.dot_dimension_numbers<[1], [0], [0], [1], [0, 0, 1, 1], [], []>} : vector<32x256xbf16>, vector<256x128xbf16>, vector<32x128xf32> -> vector<32x128xf32>
    %7 = arith.addf %3, %6 : vector<32x128xf32>
    %c0_6 = arith.constant 0 : index
    %c0_7 = arith.constant 0 : index
    %8 = vector.load %arg7[%c0_6, %c0_7] : memref<32x128xf32, #tpu.memory_space<vmem>>, vector<32x128xf32>
    tpu.vector_store %arg7[%c0_6, %c0_7], %7 {strides = array<i32>} : memref<32x128xf32, #tpu.memory_space<vmem>>, vector<32x128xf32>,
    %c1_i32 = arith.constant 1 : i32
    %9 = arith.cmpi eq, %arg2, %c1_i32 : i32
    %10 = arith.extui %9 : i1 to i32
    %c0_i32_8 = arith.constant 0 : i32
    %11 = arith.cmpi ne, %10, %c0_i32_8 : i32
    scf.if %11 {
      %c0_9 = arith.constant 0 : index
      %c0_10 = arith.constant 0 : index
      %12 = vector.load %arg7[%c0_9, %c0_10] : memref<32x128xf32, #tpu.memory_space<vmem>>, vector<32x128xf32>
      %c0_11 = arith.constant 0 : index
      %c0_12 = arith.constant 0 : index
      %13 = vector.load %arg5[%c0_11, %c0_12] : memref<1x128xf32, #tpu.memory_space<vmem>>, vector<1x128xf32>
      %14 = vector.broadcast %13 : vector<1x128xf32> to vector<32x128xf32>
      %15 = arith.mulf %12, %14 : vector<32x128xf32>
      %c0_13 = arith.constant 0 : index
      %c0_14 = arith.constant 0 : index
      %16 = vector.load %arg6[%c0_13, %c0_14] : memref<1x128xf32, #tpu.memory_space<vmem>>, vector<1x128xf32>
      %17 = vector.broadcast %16 : vector<1x128xf32> to vector<32x128xf32>
      %18 = arith.addf %15, %17 : vector<32x128xf32>
      %cst_15 = arith.constant 0.000000e+00 : f32
      %19 = vector.broadcast %cst_15 : f32 to vector<32x128xf32>
      %20 = arith.maximumf %18, %19 : vector<32x128xf32>
      %c0_16 = arith.constant 0 : index
      %c0_17 = arith.constant 0 : index
      %21 = vector.load %arg7[%c0_16, %c0_17] : memref<32x128xf32, #tpu.memory_space<vmem>>, vector<32x128xf32>
      tpu.vector_store %arg7[%c0_16, %c0_17], %20 {strides = array<i32>} : memref<32x128xf32, #tpu.memory_space<vmem>>, vector<32x128xf32>,
    } else {
    }
    return
  }
  func.func @transform_0(%arg0: i32, %arg1: i32, %arg2: i32) -> (i32, i32) {
    %c0_i32 = arith.constant 0 : i32
    return %arg0, %arg2 : i32, i32
  }
  func.func @transform_1(%arg0: i32, %arg1: i32, %arg2: i32) -> (i32, i32) {
    %c0_i32 = arith.constant 0 : i32
    return %arg2, %arg1 : i32, i32
  }
  func.func @transform_2(%arg0: i32, %arg1: i32, %arg2: i32) -> (i32, i32) {
    %c0_i32 = arith.constant 0 : i32
    %c0_i32_0 = arith.constant 0 : i32
    return %c0_i32, %arg1 : i32, i32
  }
  func.func @transform_3(%arg0: i32, %arg1: i32, %arg2: i32) -> (i32, i32) {
    %c0_i32 = arith.constant 0 : i32
    %c0_i32_0 = arith.constant 0 : i32
    return %c0_i32, %arg1 : i32, i32
  }
  func.func @transform_4(%arg0: i32, %arg1: i32, %arg2: i32) -> (i32, i32) {
    %c0_i32 = arith.constant 0 : i32
    return %arg0, %arg1 : i32, i32
  }
}

module attributes {stable_mosaic.version = 11 : i64} {
  func.func @_bn_kernel(%arg0: i32, %arg1: memref<32x512xf32, #tpu.memory_space<vmem>>, %arg2: memref<1x512xf32, #tpu.memory_space<vmem>>, %arg3: memref<1x512xf32, #tpu.memory_space<vmem>>, %arg4: memref<32x512xf32, #tpu.memory_space<vmem>>) attributes {dimension_semantics = [#tpu.dimension_semantics<parallel>], iteration_bounds = array<i64: 1>, scalar_prefetch = 0 : i64, scratch_operands = 0 : i64, tpu.core_type = #tpu.core_type<tc>, window_params = [{transform_indices = @transform_0, window_bounds = array<i64: 32, 512>}, {pipeline_mode = #tpu.pipeline_mode<synchronous>, transform_indices = @transform_1, window_bounds = array<i64: 1, 512>}, {pipeline_mode = #tpu.pipeline_mode<synchronous>, transform_indices = @transform_2, window_bounds = array<i64: 1, 512>}, {transform_indices = @transform_3, window_bounds = array<i64: 32, 512>}]} {
    %c0 = arith.constant 0 : index
    %c0_0 = arith.constant 0 : index
    %0 = vector.load %arg1[%c0, %c0_0] : memref<32x512xf32, #tpu.memory_space<vmem>>, vector<32x512xf32>
    %c0_1 = arith.constant 0 : index
    %c0_2 = arith.constant 0 : index
    %1 = vector.load %arg2[%c0_1, %c0_2] : memref<1x512xf32, #tpu.memory_space<vmem>>, vector<1x512xf32>
    %2 = vector.broadcast %1 : vector<1x512xf32> to vector<32x512xf32>
    %3 = arith.mulf %0, %2 : vector<32x512xf32>
    %c0_3 = arith.constant 0 : index
    %c0_4 = arith.constant 0 : index
    %4 = vector.load %arg3[%c0_3, %c0_4] : memref<1x512xf32, #tpu.memory_space<vmem>>, vector<1x512xf32>
    %5 = vector.broadcast %4 : vector<1x512xf32> to vector<32x512xf32>
    %6 = arith.addf %3, %5 : vector<32x512xf32>
    %cst = arith.constant 0.000000e+00 : f32
    %7 = vector.broadcast %cst : f32 to vector<32x512xf32>
    %8 = arith.maximumf %6, %7 : vector<32x512xf32>
    %c0_5 = arith.constant 0 : index
    %c0_6 = arith.constant 0 : index
    %9 = vector.load %arg4[%c0_5, %c0_6] : memref<32x512xf32, #tpu.memory_space<vmem>>, vector<32x512xf32>
    tpu.vector_store %arg4[%c0_5, %c0_6], %8 {strides = array<i32>} : memref<32x512xf32, #tpu.memory_space<vmem>>, vector<32x512xf32>,
    return
  }
  func.func @transform_0(%arg0: i32) -> (i32, i32) {
    %c0_i32 = arith.constant 0 : i32
    %c0_i32_0 = arith.constant 0 : i32
    return %arg0, %c0_i32 : i32, i32
  }
  func.func @transform_1(%arg0: i32) -> (i32, i32) {
    %c0_i32 = arith.constant 0 : i32
    %c0_i32_0 = arith.constant 0 : i32
    %c0_i32_1 = arith.constant 0 : i32
    return %c0_i32, %c0_i32_0 : i32, i32
  }
  func.func @transform_2(%arg0: i32) -> (i32, i32) {
    %c0_i32 = arith.constant 0 : i32
    %c0_i32_0 = arith.constant 0 : i32
    %c0_i32_1 = arith.constant 0 : i32
    return %c0_i32, %c0_i32_0 : i32, i32
  }
  func.func @transform_3(%arg0: i32) -> (i32, i32) {
    %c0_i32 = arith.constant 0 : i32
    %c0_i32_0 = arith.constant 0 : i32
    return %arg0, %c0_i32 : i32, i32
  }
}

module attributes {stable_mosaic.version = 11 : i64} {
  func.func @_matmul_kernel(%arg0: i32, %arg1: i32, %arg2: i32, %arg3: memref<32x256xbf16, #tpu.memory_space<vmem>>, %arg4: memref<256x256xbf16, #tpu.memory_space<vmem>>, %arg5: memref<1x256xf32, #tpu.memory_space<vmem>>, %arg6: memref<1x256xf32, #tpu.memory_space<vmem>>, %arg7: memref<32x256xf32, #tpu.memory_space<vmem>>) attributes {dimension_semantics = [#tpu.dimension_semantics<parallel>, #tpu.dimension_semantics<parallel>, #tpu.dimension_semantics<arbitrary>], iteration_bounds = array<i64: 1, 1, 2>, scalar_prefetch = 0 : i64, scratch_operands = 0 : i64, tpu.core_type = #tpu.core_type<tc>, window_params = [{transform_indices = @transform_0, window_bounds = array<i64: 32, 256>}, {transform_indices = @transform_1, window_bounds = array<i64: 256, 256>}, {transform_indices = @transform_2, window_bounds = array<i64: 1, 256>}, {transform_indices = @transform_3, window_bounds = array<i64: 1, 256>}, {transform_indices = @transform_4, window_bounds = array<i64: 32, 256>}]} {
    %c0_i32 = arith.constant 0 : i32
    %0 = arith.cmpi eq, %arg2, %c0_i32 : i32
    %1 = arith.extui %0 : i1 to i32
    %c0_i32_0 = arith.constant 0 : i32
    %2 = arith.cmpi ne, %1, %c0_i32_0 : i32
    scf.if %2 {
      %cst_9 = arith.constant 0.000000e+00 : f32
      %12 = vector.broadcast %cst_9 : f32 to vector<32x256xf32>
      %c0_10 = arith.constant 0 : index
      %c0_11 = arith.constant 0 : index
      %13 = vector.load %arg7[%c0_10, %c0_11] : memref<32x256xf32, #tpu.memory_space<vmem>>, vector<32x256xf32>
      tpu.vector_store %arg7[%c0_10, %c0_11], %12 {strides = array<i32>} : memref<32x256xf32, #tpu.memory_space<vmem>>, vector<32x256xf32>,
    } else {
    }
    %c0 = arith.constant 0 : index
    %c0_1 = arith.constant 0 : index
    %3 = vector.load %arg7[%c0, %c0_1] : memref<32x256xf32, #tpu.memory_space<vmem>>, vector<32x256xf32>
    %c0_2 = arith.constant 0 : index
    %c0_3 = arith.constant 0 : index
    %4 = vector.load %arg3[%c0_2, %c0_3] : memref<32x256xbf16, #tpu.memory_space<vmem>>, vector<32x256xbf16>
    %c0_4 = arith.constant 0 : index
    %c0_5 = arith.constant 0 : index
    %5 = vector.load %arg4[%c0_4, %c0_5] : memref<256x256xbf16, #tpu.memory_space<vmem>>, vector<256x256xbf16>
    %cst = arith.constant dense<0.000000e+00> : vector<32x256xf32>
    %6 = tpu.matmul %4, %5, %cst {dimension_numbers = #tpu.dot_dimension_numbers<[1], [0], [0], [1], [0, 0, 1, 1], [], []>} : vector<32x256xbf16>, vector<256x256xbf16>, vector<32x256xf32> -> vector<32x256xf32>
    %7 = arith.addf %3, %6 : vector<32x256xf32>
    %c0_6 = arith.constant 0 : index
    %c0_7 = arith.constant 0 : index
    %8 = vector.load %arg7[%c0_6, %c0_7] : memref<32x256xf32, #tpu.memory_space<vmem>>, vector<32x256xf32>
    tpu.vector_store %arg7[%c0_6, %c0_7], %7 {strides = array<i32>} : memref<32x256xf32, #tpu.memory_space<vmem>>, vector<32x256xf32>,
    %c1_i32 = arith.constant 1 : i32
    %9 = arith.cmpi eq, %arg2, %c1_i32 : i32
    %10 = arith.extui %9 : i1 to i32
    %c0_i32_8 = arith.constant 0 : i32
    %11 = arith.cmpi ne, %10, %c0_i32_8 : i32
    scf.if %11 {
      %c0_9 = arith.constant 0 : index
      %c0_10 = arith.constant 0 : index
      %12 = vector.load %arg7[%c0_9, %c0_10] : memref<32x256xf32, #tpu.memory_space<vmem>>, vector<32x256xf32>
      %c0_11 = arith.constant 0 : index
      %c0_12 = arith.constant 0 : index
      %13 = vector.load %arg5[%c0_11, %c0_12] : memref<1x256xf32, #tpu.memory_space<vmem>>, vector<1x256xf32>
      %14 = vector.broadcast %13 : vector<1x256xf32> to vector<32x256xf32>
      %15 = arith.mulf %12, %14 : vector<32x256xf32>
      %c0_13 = arith.constant 0 : index
      %c0_14 = arith.constant 0 : index
      %16 = vector.load %arg6[%c0_13, %c0_14] : memref<1x256xf32, #tpu.memory_space<vmem>>, vector<1x256xf32>
      %17 = vector.broadcast %16 : vector<1x256xf32> to vector<32x256xf32>
      %18 = arith.addf %15, %17 : vector<32x256xf32>
      %c0_15 = arith.constant 0 : index
      %c0_16 = arith.constant 0 : index
      %19 = vector.load %arg7[%c0_15, %c0_16] : memref<32x256xf32, #tpu.memory_space<vmem>>, vector<32x256xf32>
      tpu.vector_store %arg7[%c0_15, %c0_16], %18 {strides = array<i32>} : memref<32x256xf32, #tpu.memory_space<vmem>>, vector<32x256xf32>,
    } else {
    }
    return
  }
  func.func @transform_0(%arg0: i32, %arg1: i32, %arg2: i32) -> (i32, i32) {
    %c0_i32 = arith.constant 0 : i32
    return %arg0, %arg2 : i32, i32
  }
  func.func @transform_1(%arg0: i32, %arg1: i32, %arg2: i32) -> (i32, i32) {
    %c0_i32 = arith.constant 0 : i32
    return %arg2, %arg1 : i32, i32
  }
  func.func @transform_2(%arg0: i32, %arg1: i32, %arg2: i32) -> (i32, i32) {
    %c0_i32 = arith.constant 0 : i32
    %c0_i32_0 = arith.constant 0 : i32
    return %c0_i32, %arg1 : i32, i32
  }
  func.func @transform_3(%arg0: i32, %arg1: i32, %arg2: i32) -> (i32, i32) {
    %c0_i32 = arith.constant 0 : i32
    %c0_i32_0 = arith.constant 0 : i32
    return %c0_i32, %arg1 : i32, i32
  }
  func.func @transform_4(%arg0: i32, %arg1: i32, %arg2: i32) -> (i32, i32) {
    %c0_i32 = arith.constant 0 : i32
    return %arg0, %arg1 : i32, i32
  }
}

module attributes {stable_mosaic.version = 11 : i64} {
  func.func @_reduce_kernel(%arg0: i32, %arg1: memref<4x8x256xf32, #tpu.memory_space<vmem>>, %arg2: memref<8x256xf32, #tpu.memory_space<vmem>>) attributes {dimension_semantics = [#tpu.dimension_semantics<parallel>], iteration_bounds = array<i64: 1>, scalar_prefetch = 0 : i64, scratch_operands = 0 : i64, tpu.core_type = #tpu.core_type<tc>, window_params = [{transform_indices = @transform_0, window_bounds = array<i64: 4, 8, 256>}, {transform_indices = @transform_1, window_bounds = array<i64: 8, 256>}]} {
    %c0 = arith.constant 0 : index
    %c0_0 = arith.constant 0 : index
    %c0_1 = arith.constant 0 : index
    %0 = vector.load %arg1[%c0, %c0_0, %c0_1] : memref<4x8x256xf32, #tpu.memory_space<vmem>>, vector<4x8x256xf32>
    %cst = arith.constant dense<0.000000e+00> : vector<8x256xf32>
    %1 = vector.multi_reduction <add>, %0, %cst [0] : vector<4x8x256xf32> to vector<8x256xf32>
    %cst_2 = arith.constant 4.000000e+00 : f32
    %2 = vector.broadcast %cst_2 : f32 to vector<8x256xf32>
    %3 = arith.divf %1, %2 : vector<8x256xf32>
    %c0_3 = arith.constant 0 : index
    %c0_4 = arith.constant 0 : index
    %4 = vector.load %arg2[%c0_3, %c0_4] : memref<8x256xf32, #tpu.memory_space<vmem>>, vector<8x256xf32>
    tpu.vector_store %arg2[%c0_3, %c0_4], %3 {strides = array<i32>} : memref<8x256xf32, #tpu.memory_space<vmem>>, vector<8x256xf32>,
    return
  }
  func.func @transform_0(%arg0: i32) -> (i32, i32, i32) {
    %c0_i32 = arith.constant 0 : i32
    %c0_i32_0 = arith.constant 0 : i32
    %c0_i32_1 = arith.constant 0 : i32
    return %c0_i32, %arg0, %c0_i32_0 : i32, i32, i32
  }
  func.func @transform_1(%arg0: i32) -> (i32, i32) {
    %c0_i32 = arith.constant 0 : i32
    %c0_i32_0 = arith.constant 0 : i32
    return %arg0, %c0_i32 : i32, i32
  }
}

module attributes {stable_mosaic.version = 11 : i64} {
  func.func @_bn_kernel(%arg0: i32, %arg1: memref<8x256xf32, #tpu.memory_space<vmem>>, %arg2: memref<1x256xf32, #tpu.memory_space<vmem>>, %arg3: memref<1x256xf32, #tpu.memory_space<vmem>>, %arg4: memref<8x256xf32, #tpu.memory_space<vmem>>) attributes {dimension_semantics = [#tpu.dimension_semantics<parallel>], iteration_bounds = array<i64: 1>, scalar_prefetch = 0 : i64, scratch_operands = 0 : i64, tpu.core_type = #tpu.core_type<tc>, window_params = [{transform_indices = @transform_0, window_bounds = array<i64: 8, 256>}, {pipeline_mode = #tpu.pipeline_mode<synchronous>, transform_indices = @transform_1, window_bounds = array<i64: 1, 256>}, {pipeline_mode = #tpu.pipeline_mode<synchronous>, transform_indices = @transform_2, window_bounds = array<i64: 1, 256>}, {transform_indices = @transform_3, window_bounds = array<i64: 8, 256>}]} {
    %c0 = arith.constant 0 : index
    %c0_0 = arith.constant 0 : index
    %0 = vector.load %arg1[%c0, %c0_0] : memref<8x256xf32, #tpu.memory_space<vmem>>, vector<8x256xf32>
    %c0_1 = arith.constant 0 : index
    %c0_2 = arith.constant 0 : index
    %1 = vector.load %arg2[%c0_1, %c0_2] : memref<1x256xf32, #tpu.memory_space<vmem>>, vector<1x256xf32>
    %2 = vector.broadcast %1 : vector<1x256xf32> to vector<8x256xf32>
    %3 = arith.mulf %0, %2 : vector<8x256xf32>
    %c0_3 = arith.constant 0 : index
    %c0_4 = arith.constant 0 : index
    %4 = vector.load %arg3[%c0_3, %c0_4] : memref<1x256xf32, #tpu.memory_space<vmem>>, vector<1x256xf32>
    %5 = vector.broadcast %4 : vector<1x256xf32> to vector<8x256xf32>
    %6 = arith.addf %3, %5 : vector<8x256xf32>
    %cst = arith.constant 0.000000e+00 : f32
    %7 = vector.broadcast %cst : f32 to vector<8x256xf32>
    %8 = arith.maximumf %6, %7 : vector<8x256xf32>
    %c0_5 = arith.constant 0 : index
    %c0_6 = arith.constant 0 : index
    %9 = vector.load %arg4[%c0_5, %c0_6] : memref<8x256xf32, #tpu.memory_space<vmem>>, vector<8x256xf32>
    tpu.vector_store %arg4[%c0_5, %c0_6], %8 {strides = array<i32>} : memref<8x256xf32, #tpu.memory_space<vmem>>, vector<8x256xf32>,
    return
  }
  func.func @transform_0(%arg0: i32) -> (i32, i32) {
    %c0_i32 = arith.constant 0 : i32
    %c0_i32_0 = arith.constant 0 : i32
    return %arg0, %c0_i32 : i32, i32
  }
  func.func @transform_1(%arg0: i32) -> (i32, i32) {
    %c0_i32 = arith.constant 0 : i32
    %c0_i32_0 = arith.constant 0 : i32
    %c0_i32_1 = arith.constant 0 : i32
    return %c0_i32, %c0_i32_0 : i32, i32
  }
  func.func @transform_2(%arg0: i32) -> (i32, i32) {
    %c0_i32 = arith.constant 0 : i32
    %c0_i32_0 = arith.constant 0 : i32
    %c0_i32_1 = arith.constant 0 : i32
    return %c0_i32, %c0_i32_0 : i32, i32
  }
  func.func @transform_3(%arg0: i32) -> (i32, i32) {
    %c0_i32 = arith.constant 0 : i32
    %c0_i32_0 = arith.constant 0 : i32
    return %arg0, %c0_i32 : i32, i32
  }
}

module attributes {stable_mosaic.version = 11 : i64} {
  func.func @_matmul_kernel(%arg0: i32, %arg1: i32, %arg2: i32, %arg3: memref<16x256xbf16, #tpu.memory_space<vmem>>, %arg4: memref<256x128xbf16, #tpu.memory_space<vmem>>, %arg5: memref<1x128xf32, #tpu.memory_space<vmem>>, %arg6: memref<1x128xf32, #tpu.memory_space<vmem>>, %arg7: memref<16x128xf32, #tpu.memory_space<vmem>>) attributes {dimension_semantics = [#tpu.dimension_semantics<parallel>, #tpu.dimension_semantics<parallel>, #tpu.dimension_semantics<arbitrary>], iteration_bounds = array<i64: 1, 1, 1>, scalar_prefetch = 0 : i64, scratch_operands = 0 : i64, tpu.core_type = #tpu.core_type<tc>, window_params = [{transform_indices = @transform_0, window_bounds = array<i64: 16, 256>}, {transform_indices = @transform_1, window_bounds = array<i64: 256, 128>}, {transform_indices = @transform_2, window_bounds = array<i64: 1, 128>}, {transform_indices = @transform_3, window_bounds = array<i64: 1, 128>}, {transform_indices = @transform_4, window_bounds = array<i64: 16, 128>}]} {
    %c0_i32 = arith.constant 0 : i32
    %0 = arith.cmpi eq, %arg2, %c0_i32 : i32
    %1 = arith.extui %0 : i1 to i32
    %c0_i32_0 = arith.constant 0 : i32
    %2 = arith.cmpi ne, %1, %c0_i32_0 : i32
    scf.if %2 {
      %cst_10 = arith.constant 0.000000e+00 : f32
      %12 = vector.broadcast %cst_10 : f32 to vector<16x128xf32>
      %c0_11 = arith.constant 0 : index
      %c0_12 = arith.constant 0 : index
      %13 = vector.load %arg7[%c0_11, %c0_12] : memref<16x128xf32, #tpu.memory_space<vmem>>, vector<16x128xf32>
      tpu.vector_store %arg7[%c0_11, %c0_12], %12 {strides = array<i32>} : memref<16x128xf32, #tpu.memory_space<vmem>>, vector<16x128xf32>,
    } else {
    }
    %c0 = arith.constant 0 : index
    %c0_1 = arith.constant 0 : index
    %3 = vector.load %arg7[%c0, %c0_1] : memref<16x128xf32, #tpu.memory_space<vmem>>, vector<16x128xf32>
    %c0_2 = arith.constant 0 : index
    %c0_3 = arith.constant 0 : index
    %4 = vector.load %arg3[%c0_2, %c0_3] : memref<16x256xbf16, #tpu.memory_space<vmem>>, vector<16x256xbf16>
    %c0_4 = arith.constant 0 : index
    %c0_5 = arith.constant 0 : index
    %5 = vector.load %arg4[%c0_4, %c0_5] : memref<256x128xbf16, #tpu.memory_space<vmem>>, vector<256x128xbf16>
    %cst = arith.constant dense<0.000000e+00> : vector<16x128xf32>
    %6 = tpu.matmul %4, %5, %cst {dimension_numbers = #tpu.dot_dimension_numbers<[1], [0], [0], [1], [0, 0, 1, 1], [], []>} : vector<16x256xbf16>, vector<256x128xbf16>, vector<16x128xf32> -> vector<16x128xf32>
    %7 = arith.addf %3, %6 : vector<16x128xf32>
    %c0_6 = arith.constant 0 : index
    %c0_7 = arith.constant 0 : index
    %8 = vector.load %arg7[%c0_6, %c0_7] : memref<16x128xf32, #tpu.memory_space<vmem>>, vector<16x128xf32>
    tpu.vector_store %arg7[%c0_6, %c0_7], %7 {strides = array<i32>} : memref<16x128xf32, #tpu.memory_space<vmem>>, vector<16x128xf32>,
    %c0_i32_8 = arith.constant 0 : i32
    %9 = arith.cmpi eq, %arg2, %c0_i32_8 : i32
    %10 = arith.extui %9 : i1 to i32
    %c0_i32_9 = arith.constant 0 : i32
    %11 = arith.cmpi ne, %10, %c0_i32_9 : i32
    scf.if %11 {
      %c0_10 = arith.constant 0 : index
      %c0_11 = arith.constant 0 : index
      %12 = vector.load %arg7[%c0_10, %c0_11] : memref<16x128xf32, #tpu.memory_space<vmem>>, vector<16x128xf32>
      %c0_12 = arith.constant 0 : index
      %c0_13 = arith.constant 0 : index
      %13 = vector.load %arg5[%c0_12, %c0_13] : memref<1x128xf32, #tpu.memory_space<vmem>>, vector<1x128xf32>
      %14 = vector.broadcast %13 : vector<1x128xf32> to vector<16x128xf32>
      %15 = arith.mulf %12, %14 : vector<16x128xf32>
      %c0_14 = arith.constant 0 : index
      %c0_15 = arith.constant 0 : index
      %16 = vector.load %arg6[%c0_14, %c0_15] : memref<1x128xf32, #tpu.memory_space<vmem>>, vector<1x128xf32>
      %17 = vector.broadcast %16 : vector<1x128xf32> to vector<16x128xf32>
      %18 = arith.addf %15, %17 : vector<16x128xf32>
      %cst_16 = arith.constant 0.000000e+00 : f32
      %19 = vector.broadcast %cst_16 : f32 to vector<16x128xf32>
      %20 = arith.maximumf %18, %19 : vector<16x128xf32>
      %c0_17 = arith.constant 0 : index
      %c0_18 = arith.constant 0 : index
      %21 = vector.load %arg7[%c0_17, %c0_18] : memref<16x128xf32, #tpu.memory_space<vmem>>, vector<16x128xf32>
      tpu.vector_store %arg7[%c0_17, %c0_18], %20 {strides = array<i32>} : memref<16x128xf32, #tpu.memory_space<vmem>>, vector<16x128xf32>,
    } else {
    }
    return
  }
  func.func @transform_0(%arg0: i32, %arg1: i32, %arg2: i32) -> (i32, i32) {
    %c0_i32 = arith.constant 0 : i32
    return %arg0, %arg2 : i32, i32
  }
  func.func @transform_1(%arg0: i32, %arg1: i32, %arg2: i32) -> (i32, i32) {
    %c0_i32 = arith.constant 0 : i32
    return %arg2, %arg1 : i32, i32
  }
  func.func @transform_2(%arg0: i32, %arg1: i32, %arg2: i32) -> (i32, i32) {
    %c0_i32 = arith.constant 0 : i32
    %c0_i32_0 = arith.constant 0 : i32
    return %c0_i32, %arg1 : i32, i32
  }
  func.func @transform_3(%arg0: i32, %arg1: i32, %arg2: i32) -> (i32, i32) {
    %c0_i32 = arith.constant 0 : i32
    %c0_i32_0 = arith.constant 0 : i32
    return %c0_i32, %arg1 : i32, i32
  }
  func.func @transform_4(%arg0: i32, %arg1: i32, %arg2: i32) -> (i32, i32) {
    %c0_i32 = arith.constant 0 : i32
    return %arg0, %arg1 : i32, i32
  }
}

module attributes {stable_mosaic.version = 11 : i64} {
  func.func @_matmul_kernel(%arg0: i32, %arg1: i32, %arg2: i32, %arg3: memref<16x256xbf16, #tpu.memory_space<vmem>>, %arg4: memref<256x128xbf16, #tpu.memory_space<vmem>>, %arg5: memref<1x128xf32, #tpu.memory_space<vmem>>, %arg6: memref<1x128xf32, #tpu.memory_space<vmem>>, %arg7: memref<16x128xf32, #tpu.memory_space<vmem>>) attributes {dimension_semantics = [#tpu.dimension_semantics<parallel>, #tpu.dimension_semantics<parallel>, #tpu.dimension_semantics<arbitrary>], iteration_bounds = array<i64: 1, 1, 5>, scalar_prefetch = 0 : i64, scratch_operands = 0 : i64, tpu.core_type = #tpu.core_type<tc>, window_params = [{transform_indices = @transform_0, window_bounds = array<i64: 16, 256>}, {transform_indices = @transform_1, window_bounds = array<i64: 256, 128>}, {transform_indices = @transform_2, window_bounds = array<i64: 1, 128>}, {transform_indices = @transform_3, window_bounds = array<i64: 1, 128>}, {transform_indices = @transform_4, window_bounds = array<i64: 16, 128>}]} {
    %c0_i32 = arith.constant 0 : i32
    %0 = arith.cmpi eq, %arg2, %c0_i32 : i32
    %1 = arith.extui %0 : i1 to i32
    %c0_i32_0 = arith.constant 0 : i32
    %2 = arith.cmpi ne, %1, %c0_i32_0 : i32
    scf.if %2 {
      %cst_9 = arith.constant 0.000000e+00 : f32
      %12 = vector.broadcast %cst_9 : f32 to vector<16x128xf32>
      %c0_10 = arith.constant 0 : index
      %c0_11 = arith.constant 0 : index
      %13 = vector.load %arg7[%c0_10, %c0_11] : memref<16x128xf32, #tpu.memory_space<vmem>>, vector<16x128xf32>
      tpu.vector_store %arg7[%c0_10, %c0_11], %12 {strides = array<i32>} : memref<16x128xf32, #tpu.memory_space<vmem>>, vector<16x128xf32>,
    } else {
    }
    %c0 = arith.constant 0 : index
    %c0_1 = arith.constant 0 : index
    %3 = vector.load %arg7[%c0, %c0_1] : memref<16x128xf32, #tpu.memory_space<vmem>>, vector<16x128xf32>
    %c0_2 = arith.constant 0 : index
    %c0_3 = arith.constant 0 : index
    %4 = vector.load %arg3[%c0_2, %c0_3] : memref<16x256xbf16, #tpu.memory_space<vmem>>, vector<16x256xbf16>
    %c0_4 = arith.constant 0 : index
    %c0_5 = arith.constant 0 : index
    %5 = vector.load %arg4[%c0_4, %c0_5] : memref<256x128xbf16, #tpu.memory_space<vmem>>, vector<256x128xbf16>
    %cst = arith.constant dense<0.000000e+00> : vector<16x128xf32>
    %6 = tpu.matmul %4, %5, %cst {dimension_numbers = #tpu.dot_dimension_numbers<[1], [0], [0], [1], [0, 0, 1, 1], [], []>} : vector<16x256xbf16>, vector<256x128xbf16>, vector<16x128xf32> -> vector<16x128xf32>
    %7 = arith.addf %3, %6 : vector<16x128xf32>
    %c0_6 = arith.constant 0 : index
    %c0_7 = arith.constant 0 : index
    %8 = vector.load %arg7[%c0_6, %c0_7] : memref<16x128xf32, #tpu.memory_space<vmem>>, vector<16x128xf32>
    tpu.vector_store %arg7[%c0_6, %c0_7], %7 {strides = array<i32>} : memref<16x128xf32, #tpu.memory_space<vmem>>, vector<16x128xf32>,
    %c4_i32 = arith.constant 4 : i32
    %9 = arith.cmpi eq, %arg2, %c4_i32 : i32
    %10 = arith.extui %9 : i1 to i32
    %c0_i32_8 = arith.constant 0 : i32
    %11 = arith.cmpi ne, %10, %c0_i32_8 : i32
    scf.if %11 {
      %c0_9 = arith.constant 0 : index
      %c0_10 = arith.constant 0 : index
      %12 = vector.load %arg7[%c0_9, %c0_10] : memref<16x128xf32, #tpu.memory_space<vmem>>, vector<16x128xf32>
      %c0_11 = arith.constant 0 : index
      %c0_12 = arith.constant 0 : index
      %13 = vector.load %arg5[%c0_11, %c0_12] : memref<1x128xf32, #tpu.memory_space<vmem>>, vector<1x128xf32>
      %14 = vector.broadcast %13 : vector<1x128xf32> to vector<16x128xf32>
      %15 = arith.mulf %12, %14 : vector<16x128xf32>
      %c0_13 = arith.constant 0 : index
      %c0_14 = arith.constant 0 : index
      %16 = vector.load %arg6[%c0_13, %c0_14] : memref<1x128xf32, #tpu.memory_space<vmem>>, vector<1x128xf32>
      %17 = vector.broadcast %16 : vector<1x128xf32> to vector<16x128xf32>
      %18 = arith.addf %15, %17 : vector<16x128xf32>
      %c0_15 = arith.constant 0 : index
      %c0_16 = arith.constant 0 : index
      %19 = vector.load %arg7[%c0_15, %c0_16] : memref<16x128xf32, #tpu.memory_space<vmem>>, vector<16x128xf32>
      tpu.vector_store %arg7[%c0_15, %c0_16], %18 {strides = array<i32>} : memref<16x128xf32, #tpu.memory_space<vmem>>, vector<16x128xf32>,
    } else {
    }
    return
  }
  func.func @transform_0(%arg0: i32, %arg1: i32, %arg2: i32) -> (i32, i32) {
    %c0_i32 = arith.constant 0 : i32
    return %arg0, %arg2 : i32, i32
  }
  func.func @transform_1(%arg0: i32, %arg1: i32, %arg2: i32) -> (i32, i32) {
    %c0_i32 = arith.constant 0 : i32
    return %arg2, %arg1 : i32, i32
  }
  func.func @transform_2(%arg0: i32, %arg1: i32, %arg2: i32) -> (i32, i32) {
    %c0_i32 = arith.constant 0 : i32
    %c0_i32_0 = arith.constant 0 : i32
    return %c0_i32, %arg1 : i32, i32
  }
  func.func @transform_3(%arg0: i32, %arg1: i32, %arg2: i32) -> (i32, i32) {
    %c0_i32 = arith.constant 0 : i32
    %c0_i32_0 = arith.constant 0 : i32
    return %c0_i32, %arg1 : i32, i32
  }
  func.func @transform_4(%arg0: i32, %arg1: i32, %arg2: i32) -> (i32, i32) {
    %c0_i32 = arith.constant 0 : i32
    return %arg0, %arg1 : i32, i32
  }
}

module attributes {stable_mosaic.version = 11 : i64} {
  func.func @_bn_kernel(%arg0: i32, %arg1: memref<8x384xf32, #tpu.memory_space<vmem>>, %arg2: memref<1x384xf32, #tpu.memory_space<vmem>>, %arg3: memref<1x384xf32, #tpu.memory_space<vmem>>, %arg4: memref<8x384xf32, #tpu.memory_space<vmem>>) attributes {dimension_semantics = [#tpu.dimension_semantics<parallel>], iteration_bounds = array<i64: 1>, scalar_prefetch = 0 : i64, scratch_operands = 0 : i64, tpu.core_type = #tpu.core_type<tc>, window_params = [{transform_indices = @transform_0, window_bounds = array<i64: 8, 384>}, {pipeline_mode = #tpu.pipeline_mode<synchronous>, transform_indices = @transform_1, window_bounds = array<i64: 1, 384>}, {pipeline_mode = #tpu.pipeline_mode<synchronous>, transform_indices = @transform_2, window_bounds = array<i64: 1, 384>}, {transform_indices = @transform_3, window_bounds = array<i64: 8, 384>}]} {
    %c0 = arith.constant 0 : index
    %c0_0 = arith.constant 0 : index
    %0 = vector.load %arg1[%c0, %c0_0] : memref<8x384xf32, #tpu.memory_space<vmem>>, vector<8x384xf32>
    %c0_1 = arith.constant 0 : index
    %c0_2 = arith.constant 0 : index
    %1 = vector.load %arg2[%c0_1, %c0_2] : memref<1x384xf32, #tpu.memory_space<vmem>>, vector<1x384xf32>
    %2 = vector.broadcast %1 : vector<1x384xf32> to vector<8x384xf32>
    %3 = arith.mulf %0, %2 : vector<8x384xf32>
    %c0_3 = arith.constant 0 : index
    %c0_4 = arith.constant 0 : index
    %4 = vector.load %arg3[%c0_3, %c0_4] : memref<1x384xf32, #tpu.memory_space<vmem>>, vector<1x384xf32>
    %5 = vector.broadcast %4 : vector<1x384xf32> to vector<8x384xf32>
    %6 = arith.addf %3, %5 : vector<8x384xf32>
    %cst = arith.constant 0.000000e+00 : f32
    %7 = vector.broadcast %cst : f32 to vector<8x384xf32>
    %8 = arith.maximumf %6, %7 : vector<8x384xf32>
    %c0_5 = arith.constant 0 : index
    %c0_6 = arith.constant 0 : index
    %9 = vector.load %arg4[%c0_5, %c0_6] : memref<8x384xf32, #tpu.memory_space<vmem>>, vector<8x384xf32>
    tpu.vector_store %arg4[%c0_5, %c0_6], %8 {strides = array<i32>} : memref<8x384xf32, #tpu.memory_space<vmem>>, vector<8x384xf32>,
    return
  }
  func.func @transform_0(%arg0: i32) -> (i32, i32) {
    %c0_i32 = arith.constant 0 : i32
    %c0_i32_0 = arith.constant 0 : i32
    return %arg0, %c0_i32 : i32, i32
  }
  func.func @transform_1(%arg0: i32) -> (i32, i32) {
    %c0_i32 = arith.constant 0 : i32
    %c0_i32_0 = arith.constant 0 : i32
    %c0_i32_1 = arith.constant 0 : i32
    return %c0_i32, %c0_i32_0 : i32, i32
  }
  func.func @transform_2(%arg0: i32) -> (i32, i32) {
    %c0_i32 = arith.constant 0 : i32
    %c0_i32_0 = arith.constant 0 : i32
    %c0_i32_1 = arith.constant 0 : i32
    return %c0_i32, %c0_i32_0 : i32, i32
  }
  func.func @transform_3(%arg0: i32) -> (i32, i32) {
    %c0_i32 = arith.constant 0 : i32
    %c0_i32_0 = arith.constant 0 : i32
    return %arg0, %c0_i32 : i32, i32
  }
}

module attributes {stable_mosaic.version = 11 : i64} {
  func.func @_matmul_kernel(%arg0: i32, %arg1: i32, %arg2: i32, %arg3: memref<16x256xbf16, #tpu.memory_space<vmem>>, %arg4: memref<256x128xbf16, #tpu.memory_space<vmem>>, %arg5: memref<1x128xf32, #tpu.memory_space<vmem>>, %arg6: memref<1x128xf32, #tpu.memory_space<vmem>>, %arg7: memref<16x128xf32, #tpu.memory_space<vmem>>) attributes {dimension_semantics = [#tpu.dimension_semantics<parallel>, #tpu.dimension_semantics<parallel>, #tpu.dimension_semantics<arbitrary>], iteration_bounds = array<i64: 1, 1, 2>, scalar_prefetch = 0 : i64, scratch_operands = 0 : i64, tpu.core_type = #tpu.core_type<tc>, window_params = [{transform_indices = @transform_0, window_bounds = array<i64: 16, 256>}, {transform_indices = @transform_1, window_bounds = array<i64: 256, 128>}, {transform_indices = @transform_2, window_bounds = array<i64: 1, 128>}, {transform_indices = @transform_3, window_bounds = array<i64: 1, 128>}, {transform_indices = @transform_4, window_bounds = array<i64: 16, 128>}]} {
    %c0_i32 = arith.constant 0 : i32
    %0 = arith.cmpi eq, %arg2, %c0_i32 : i32
    %1 = arith.extui %0 : i1 to i32
    %c0_i32_0 = arith.constant 0 : i32
    %2 = arith.cmpi ne, %1, %c0_i32_0 : i32
    scf.if %2 {
      %cst_9 = arith.constant 0.000000e+00 : f32
      %12 = vector.broadcast %cst_9 : f32 to vector<16x128xf32>
      %c0_10 = arith.constant 0 : index
      %c0_11 = arith.constant 0 : index
      %13 = vector.load %arg7[%c0_10, %c0_11] : memref<16x128xf32, #tpu.memory_space<vmem>>, vector<16x128xf32>
      tpu.vector_store %arg7[%c0_10, %c0_11], %12 {strides = array<i32>} : memref<16x128xf32, #tpu.memory_space<vmem>>, vector<16x128xf32>,
    } else {
    }
    %c0 = arith.constant 0 : index
    %c0_1 = arith.constant 0 : index
    %3 = vector.load %arg7[%c0, %c0_1] : memref<16x128xf32, #tpu.memory_space<vmem>>, vector<16x128xf32>
    %c0_2 = arith.constant 0 : index
    %c0_3 = arith.constant 0 : index
    %4 = vector.load %arg3[%c0_2, %c0_3] : memref<16x256xbf16, #tpu.memory_space<vmem>>, vector<16x256xbf16>
    %c0_4 = arith.constant 0 : index
    %c0_5 = arith.constant 0 : index
    %5 = vector.load %arg4[%c0_4, %c0_5] : memref<256x128xbf16, #tpu.memory_space<vmem>>, vector<256x128xbf16>
    %cst = arith.constant dense<0.000000e+00> : vector<16x128xf32>
    %6 = tpu.matmul %4, %5, %cst {dimension_numbers = #tpu.dot_dimension_numbers<[1], [0], [0], [1], [0, 0, 1, 1], [], []>} : vector<16x256xbf16>, vector<256x128xbf16>, vector<16x128xf32> -> vector<16x128xf32>
    %7 = arith.addf %3, %6 : vector<16x128xf32>
    %c0_6 = arith.constant 0 : index
    %c0_7 = arith.constant 0 : index
    %8 = vector.load %arg7[%c0_6, %c0_7] : memref<16x128xf32, #tpu.memory_space<vmem>>, vector<16x128xf32>
    tpu.vector_store %arg7[%c0_6, %c0_7], %7 {strides = array<i32>} : memref<16x128xf32, #tpu.memory_space<vmem>>, vector<16x128xf32>,
    %c1_i32 = arith.constant 1 : i32
    %9 = arith.cmpi eq, %arg2, %c1_i32 : i32
    %10 = arith.extui %9 : i1 to i32
    %c0_i32_8 = arith.constant 0 : i32
    %11 = arith.cmpi ne, %10, %c0_i32_8 : i32
    scf.if %11 {
      %c0_9 = arith.constant 0 : index
      %c0_10 = arith.constant 0 : index
      %12 = vector.load %arg7[%c0_9, %c0_10] : memref<16x128xf32, #tpu.memory_space<vmem>>, vector<16x128xf32>
      %c0_11 = arith.constant 0 : index
      %c0_12 = arith.constant 0 : index
      %13 = vector.load %arg5[%c0_11, %c0_12] : memref<1x128xf32, #tpu.memory_space<vmem>>, vector<1x128xf32>
      %14 = vector.broadcast %13 : vector<1x128xf32> to vector<16x128xf32>
      %15 = arith.mulf %12, %14 : vector<16x128xf32>
      %c0_13 = arith.constant 0 : index
      %c0_14 = arith.constant 0 : index
      %16 = vector.load %arg6[%c0_13, %c0_14] : memref<1x128xf32, #tpu.memory_space<vmem>>, vector<1x128xf32>
      %17 = vector.broadcast %16 : vector<1x128xf32> to vector<16x128xf32>
      %18 = arith.addf %15, %17 : vector<16x128xf32>
      %cst_15 = arith.constant 0.000000e+00 : f32
      %19 = vector.broadcast %cst_15 : f32 to vector<16x128xf32>
      %20 = arith.maximumf %18, %19 : vector<16x128xf32>
      %c0_16 = arith.constant 0 : index
      %c0_17 = arith.constant 0 : index
      %21 = vector.load %arg7[%c0_16, %c0_17] : memref<16x128xf32, #tpu.memory_space<vmem>>, vector<16x128xf32>
      tpu.vector_store %arg7[%c0_16, %c0_17], %20 {strides = array<i32>} : memref<16x128xf32, #tpu.memory_space<vmem>>, vector<16x128xf32>,
    } else {
    }
    return
  }
  func.func @transform_0(%arg0: i32, %arg1: i32, %arg2: i32) -> (i32, i32) {
    %c0_i32 = arith.constant 0 : i32
    return %arg0, %arg2 : i32, i32
  }
  func.func @transform_1(%arg0: i32, %arg1: i32, %arg2: i32) -> (i32, i32) {
    %c0_i32 = arith.constant 0 : i32
    return %arg2, %arg1 : i32, i32
  }
  func.func @transform_2(%arg0: i32, %arg1: i32, %arg2: i32) -> (i32, i32) {
    %c0_i32 = arith.constant 0 : i32
    %c0_i32_0 = arith.constant 0 : i32
    return %c0_i32, %arg1 : i32, i32
  }
  func.func @transform_3(%arg0: i32, %arg1: i32, %arg2: i32) -> (i32, i32) {
    %c0_i32 = arith.constant 0 : i32
    %c0_i32_0 = arith.constant 0 : i32
    return %c0_i32, %arg1 : i32, i32
  }
  func.func @transform_4(%arg0: i32, %arg1: i32, %arg2: i32) -> (i32, i32) {
    %c0_i32 = arith.constant 0 : i32
    return %arg0, %arg1 : i32, i32
  }
}

module attributes {stable_mosaic.version = 11 : i64} {
  func.func @_bn_kernel(%arg0: i32, %arg1: memref<8x512xf32, #tpu.memory_space<vmem>>, %arg2: memref<1x512xf32, #tpu.memory_space<vmem>>, %arg3: memref<1x512xf32, #tpu.memory_space<vmem>>, %arg4: memref<8x512xf32, #tpu.memory_space<vmem>>) attributes {dimension_semantics = [#tpu.dimension_semantics<parallel>], iteration_bounds = array<i64: 1>, scalar_prefetch = 0 : i64, scratch_operands = 0 : i64, tpu.core_type = #tpu.core_type<tc>, window_params = [{transform_indices = @transform_0, window_bounds = array<i64: 8, 512>}, {pipeline_mode = #tpu.pipeline_mode<synchronous>, transform_indices = @transform_1, window_bounds = array<i64: 1, 512>}, {pipeline_mode = #tpu.pipeline_mode<synchronous>, transform_indices = @transform_2, window_bounds = array<i64: 1, 512>}, {transform_indices = @transform_3, window_bounds = array<i64: 8, 512>}]} {
    %c0 = arith.constant 0 : index
    %c0_0 = arith.constant 0 : index
    %0 = vector.load %arg1[%c0, %c0_0] : memref<8x512xf32, #tpu.memory_space<vmem>>, vector<8x512xf32>
    %c0_1 = arith.constant 0 : index
    %c0_2 = arith.constant 0 : index
    %1 = vector.load %arg2[%c0_1, %c0_2] : memref<1x512xf32, #tpu.memory_space<vmem>>, vector<1x512xf32>
    %2 = vector.broadcast %1 : vector<1x512xf32> to vector<8x512xf32>
    %3 = arith.mulf %0, %2 : vector<8x512xf32>
    %c0_3 = arith.constant 0 : index
    %c0_4 = arith.constant 0 : index
    %4 = vector.load %arg3[%c0_3, %c0_4] : memref<1x512xf32, #tpu.memory_space<vmem>>, vector<1x512xf32>
    %5 = vector.broadcast %4 : vector<1x512xf32> to vector<8x512xf32>
    %6 = arith.addf %3, %5 : vector<8x512xf32>
    %cst = arith.constant 0.000000e+00 : f32
    %7 = vector.broadcast %cst : f32 to vector<8x512xf32>
    %8 = arith.maximumf %6, %7 : vector<8x512xf32>
    %c0_5 = arith.constant 0 : index
    %c0_6 = arith.constant 0 : index
    %9 = vector.load %arg4[%c0_5, %c0_6] : memref<8x512xf32, #tpu.memory_space<vmem>>, vector<8x512xf32>
    tpu.vector_store %arg4[%c0_5, %c0_6], %8 {strides = array<i32>} : memref<8x512xf32, #tpu.memory_space<vmem>>, vector<8x512xf32>,
    return
  }
  func.func @transform_0(%arg0: i32) -> (i32, i32) {
    %c0_i32 = arith.constant 0 : i32
    %c0_i32_0 = arith.constant 0 : i32
    return %arg0, %c0_i32 : i32, i32
  }
  func.func @transform_1(%arg0: i32) -> (i32, i32) {
    %c0_i32 = arith.constant 0 : i32
    %c0_i32_0 = arith.constant 0 : i32
    %c0_i32_1 = arith.constant 0 : i32
    return %c0_i32, %c0_i32_0 : i32, i32
  }
  func.func @transform_2(%arg0: i32) -> (i32, i32) {
    %c0_i32 = arith.constant 0 : i32
    %c0_i32_0 = arith.constant 0 : i32
    %c0_i32_1 = arith.constant 0 : i32
    return %c0_i32, %c0_i32_0 : i32, i32
  }
  func.func @transform_3(%arg0: i32) -> (i32, i32) {
    %c0_i32 = arith.constant 0 : i32
    %c0_i32_0 = arith.constant 0 : i32
    return %arg0, %c0_i32 : i32, i32
  }
}

module attributes {stable_mosaic.version = 11 : i64} {
  func.func @_bn_kernel(%arg0: i32, %arg1: memref<8x640xf32, #tpu.memory_space<vmem>>, %arg2: memref<1x640xf32, #tpu.memory_space<vmem>>, %arg3: memref<1x640xf32, #tpu.memory_space<vmem>>, %arg4: memref<8x640xf32, #tpu.memory_space<vmem>>) attributes {dimension_semantics = [#tpu.dimension_semantics<parallel>], iteration_bounds = array<i64: 1>, scalar_prefetch = 0 : i64, scratch_operands = 0 : i64, tpu.core_type = #tpu.core_type<tc>, window_params = [{transform_indices = @transform_0, window_bounds = array<i64: 8, 640>}, {pipeline_mode = #tpu.pipeline_mode<synchronous>, transform_indices = @transform_1, window_bounds = array<i64: 1, 640>}, {pipeline_mode = #tpu.pipeline_mode<synchronous>, transform_indices = @transform_2, window_bounds = array<i64: 1, 640>}, {transform_indices = @transform_3, window_bounds = array<i64: 8, 640>}]} {
    %c0 = arith.constant 0 : index
    %c0_0 = arith.constant 0 : index
    %0 = vector.load %arg1[%c0, %c0_0] : memref<8x640xf32, #tpu.memory_space<vmem>>, vector<8x640xf32>
    %c0_1 = arith.constant 0 : index
    %c0_2 = arith.constant 0 : index
    %1 = vector.load %arg2[%c0_1, %c0_2] : memref<1x640xf32, #tpu.memory_space<vmem>>, vector<1x640xf32>
    %2 = vector.broadcast %1 : vector<1x640xf32> to vector<8x640xf32>
    %3 = arith.mulf %0, %2 : vector<8x640xf32>
    %c0_3 = arith.constant 0 : index
    %c0_4 = arith.constant 0 : index
    %4 = vector.load %arg3[%c0_3, %c0_4] : memref<1x640xf32, #tpu.memory_space<vmem>>, vector<1x640xf32>
    %5 = vector.broadcast %4 : vector<1x640xf32> to vector<8x640xf32>
    %6 = arith.addf %3, %5 : vector<8x640xf32>
    %cst = arith.constant 0.000000e+00 : f32
    %7 = vector.broadcast %cst : f32 to vector<8x640xf32>
    %8 = arith.maximumf %6, %7 : vector<8x640xf32>
    %c0_5 = arith.constant 0 : index
    %c0_6 = arith.constant 0 : index
    %9 = vector.load %arg4[%c0_5, %c0_6] : memref<8x640xf32, #tpu.memory_space<vmem>>, vector<8x640xf32>
    tpu.vector_store %arg4[%c0_5, %c0_6], %8 {strides = array<i32>} : memref<8x640xf32, #tpu.memory_space<vmem>>, vector<8x640xf32>,
    return
  }
  func.func @transform_0(%arg0: i32) -> (i32, i32) {
    %c0_i32 = arith.constant 0 : i32
    %c0_i32_0 = arith.constant 0 : i32
    return %arg0, %c0_i32 : i32, i32
  }
  func.func @transform_1(%arg0: i32) -> (i32, i32) {
    %c0_i32 = arith.constant 0 : i32
    %c0_i32_0 = arith.constant 0 : i32
    %c0_i32_1 = arith.constant 0 : i32
    return %c0_i32, %c0_i32_0 : i32, i32
  }
  func.func @transform_2(%arg0: i32) -> (i32, i32) {
    %c0_i32 = arith.constant 0 : i32
    %c0_i32_0 = arith.constant 0 : i32
    %c0_i32_1 = arith.constant 0 : i32
    return %c0_i32, %c0_i32_0 : i32, i32
  }
  func.func @transform_3(%arg0: i32) -> (i32, i32) {
    %c0_i32 = arith.constant 0 : i32
    %c0_i32_0 = arith.constant 0 : i32
    return %arg0, %c0_i32 : i32, i32
  }
}

module attributes {stable_mosaic.version = 11 : i64} {
  func.func @_matmul_kernel(%arg0: i32, %arg1: i32, %arg2: i32, %arg3: memref<16x256xbf16, #tpu.memory_space<vmem>>, %arg4: memref<256x128xbf16, #tpu.memory_space<vmem>>, %arg5: memref<1x128xf32, #tpu.memory_space<vmem>>, %arg6: memref<1x128xf32, #tpu.memory_space<vmem>>, %arg7: memref<16x128xf32, #tpu.memory_space<vmem>>) attributes {dimension_semantics = [#tpu.dimension_semantics<parallel>, #tpu.dimension_semantics<parallel>, #tpu.dimension_semantics<arbitrary>], iteration_bounds = array<i64: 1, 1, 3>, scalar_prefetch = 0 : i64, scratch_operands = 0 : i64, tpu.core_type = #tpu.core_type<tc>, window_params = [{transform_indices = @transform_0, window_bounds = array<i64: 16, 256>}, {transform_indices = @transform_1, window_bounds = array<i64: 256, 128>}, {transform_indices = @transform_2, window_bounds = array<i64: 1, 128>}, {transform_indices = @transform_3, window_bounds = array<i64: 1, 128>}, {transform_indices = @transform_4, window_bounds = array<i64: 16, 128>}]} {
    %c0_i32 = arith.constant 0 : i32
    %0 = arith.cmpi eq, %arg2, %c0_i32 : i32
    %1 = arith.extui %0 : i1 to i32
    %c0_i32_0 = arith.constant 0 : i32
    %2 = arith.cmpi ne, %1, %c0_i32_0 : i32
    scf.if %2 {
      %cst_9 = arith.constant 0.000000e+00 : f32
      %12 = vector.broadcast %cst_9 : f32 to vector<16x128xf32>
      %c0_10 = arith.constant 0 : index
      %c0_11 = arith.constant 0 : index
      %13 = vector.load %arg7[%c0_10, %c0_11] : memref<16x128xf32, #tpu.memory_space<vmem>>, vector<16x128xf32>
      tpu.vector_store %arg7[%c0_10, %c0_11], %12 {strides = array<i32>} : memref<16x128xf32, #tpu.memory_space<vmem>>, vector<16x128xf32>,
    } else {
    }
    %c0 = arith.constant 0 : index
    %c0_1 = arith.constant 0 : index
    %3 = vector.load %arg7[%c0, %c0_1] : memref<16x128xf32, #tpu.memory_space<vmem>>, vector<16x128xf32>
    %c0_2 = arith.constant 0 : index
    %c0_3 = arith.constant 0 : index
    %4 = vector.load %arg3[%c0_2, %c0_3] : memref<16x256xbf16, #tpu.memory_space<vmem>>, vector<16x256xbf16>
    %c0_4 = arith.constant 0 : index
    %c0_5 = arith.constant 0 : index
    %5 = vector.load %arg4[%c0_4, %c0_5] : memref<256x128xbf16, #tpu.memory_space<vmem>>, vector<256x128xbf16>
    %cst = arith.constant dense<0.000000e+00> : vector<16x128xf32>
    %6 = tpu.matmul %4, %5, %cst {dimension_numbers = #tpu.dot_dimension_numbers<[1], [0], [0], [1], [0, 0, 1, 1], [], []>} : vector<16x256xbf16>, vector<256x128xbf16>, vector<16x128xf32> -> vector<16x128xf32>
    %7 = arith.addf %3, %6 : vector<16x128xf32>
    %c0_6 = arith.constant 0 : index
    %c0_7 = arith.constant 0 : index
    %8 = vector.load %arg7[%c0_6, %c0_7] : memref<16x128xf32, #tpu.memory_space<vmem>>, vector<16x128xf32>
    tpu.vector_store %arg7[%c0_6, %c0_7], %7 {strides = array<i32>} : memref<16x128xf32, #tpu.memory_space<vmem>>, vector<16x128xf32>,
    %c2_i32 = arith.constant 2 : i32
    %9 = arith.cmpi eq, %arg2, %c2_i32 : i32
    %10 = arith.extui %9 : i1 to i32
    %c0_i32_8 = arith.constant 0 : i32
    %11 = arith.cmpi ne, %10, %c0_i32_8 : i32
    scf.if %11 {
      %c0_9 = arith.constant 0 : index
      %c0_10 = arith.constant 0 : index
      %12 = vector.load %arg7[%c0_9, %c0_10] : memref<16x128xf32, #tpu.memory_space<vmem>>, vector<16x128xf32>
      %c0_11 = arith.constant 0 : index
      %c0_12 = arith.constant 0 : index
      %13 = vector.load %arg5[%c0_11, %c0_12] : memref<1x128xf32, #tpu.memory_space<vmem>>, vector<1x128xf32>
      %14 = vector.broadcast %13 : vector<1x128xf32> to vector<16x128xf32>
      %15 = arith.mulf %12, %14 : vector<16x128xf32>
      %c0_13 = arith.constant 0 : index
      %c0_14 = arith.constant 0 : index
      %16 = vector.load %arg6[%c0_13, %c0_14] : memref<1x128xf32, #tpu.memory_space<vmem>>, vector<1x128xf32>
      %17 = vector.broadcast %16 : vector<1x128xf32> to vector<16x128xf32>
      %18 = arith.addf %15, %17 : vector<16x128xf32>
      %cst_15 = arith.constant 0.000000e+00 : f32
      %19 = vector.broadcast %cst_15 : f32 to vector<16x128xf32>
      %20 = arith.maximumf %18, %19 : vector<16x128xf32>
      %c0_16 = arith.constant 0 : index
      %c0_17 = arith.constant 0 : index
      %21 = vector.load %arg7[%c0_16, %c0_17] : memref<16x128xf32, #tpu.memory_space<vmem>>, vector<16x128xf32>
      tpu.vector_store %arg7[%c0_16, %c0_17], %20 {strides = array<i32>} : memref<16x128xf32, #tpu.memory_space<vmem>>, vector<16x128xf32>,
    } else {
    }
    return
  }
  func.func @transform_0(%arg0: i32, %arg1: i32, %arg2: i32) -> (i32, i32) {
    %c0_i32 = arith.constant 0 : i32
    return %arg0, %arg2 : i32, i32
  }
  func.func @transform_1(%arg0: i32, %arg1: i32, %arg2: i32) -> (i32, i32) {
    %c0_i32 = arith.constant 0 : i32
    return %arg2, %arg1 : i32, i32
  }
  func.func @transform_2(%arg0: i32, %arg1: i32, %arg2: i32) -> (i32, i32) {
    %c0_i32 = arith.constant 0 : i32
    %c0_i32_0 = arith.constant 0 : i32
    return %c0_i32, %arg1 : i32, i32
  }
  func.func @transform_3(%arg0: i32, %arg1: i32, %arg2: i32) -> (i32, i32) {
    %c0_i32 = arith.constant 0 : i32
    %c0_i32_0 = arith.constant 0 : i32
    return %c0_i32, %arg1 : i32, i32
  }
  func.func @transform_4(%arg0: i32, %arg1: i32, %arg2: i32) -> (i32, i32) {
    %c0_i32 = arith.constant 0 : i32
    return %arg0, %arg1 : i32, i32
  }
}

module attributes {stable_mosaic.version = 11 : i64} {
  func.func @_bn_kernel(%arg0: i32, %arg1: memref<8x768xf32, #tpu.memory_space<vmem>>, %arg2: memref<1x768xf32, #tpu.memory_space<vmem>>, %arg3: memref<1x768xf32, #tpu.memory_space<vmem>>, %arg4: memref<8x768xf32, #tpu.memory_space<vmem>>) attributes {dimension_semantics = [#tpu.dimension_semantics<parallel>], iteration_bounds = array<i64: 1>, scalar_prefetch = 0 : i64, scratch_operands = 0 : i64, tpu.core_type = #tpu.core_type<tc>, window_params = [{transform_indices = @transform_0, window_bounds = array<i64: 8, 768>}, {pipeline_mode = #tpu.pipeline_mode<synchronous>, transform_indices = @transform_1, window_bounds = array<i64: 1, 768>}, {pipeline_mode = #tpu.pipeline_mode<synchronous>, transform_indices = @transform_2, window_bounds = array<i64: 1, 768>}, {transform_indices = @transform_3, window_bounds = array<i64: 8, 768>}]} {
    %c0 = arith.constant 0 : index
    %c0_0 = arith.constant 0 : index
    %0 = vector.load %arg1[%c0, %c0_0] : memref<8x768xf32, #tpu.memory_space<vmem>>, vector<8x768xf32>
    %c0_1 = arith.constant 0 : index
    %c0_2 = arith.constant 0 : index
    %1 = vector.load %arg2[%c0_1, %c0_2] : memref<1x768xf32, #tpu.memory_space<vmem>>, vector<1x768xf32>
    %2 = vector.broadcast %1 : vector<1x768xf32> to vector<8x768xf32>
    %3 = arith.mulf %0, %2 : vector<8x768xf32>
    %c0_3 = arith.constant 0 : index
    %c0_4 = arith.constant 0 : index
    %4 = vector.load %arg3[%c0_3, %c0_4] : memref<1x768xf32, #tpu.memory_space<vmem>>, vector<1x768xf32>
    %5 = vector.broadcast %4 : vector<1x768xf32> to vector<8x768xf32>
    %6 = arith.addf %3, %5 : vector<8x768xf32>
    %cst = arith.constant 0.000000e+00 : f32
    %7 = vector.broadcast %cst : f32 to vector<8x768xf32>
    %8 = arith.maximumf %6, %7 : vector<8x768xf32>
    %c0_5 = arith.constant 0 : index
    %c0_6 = arith.constant 0 : index
    %9 = vector.load %arg4[%c0_5, %c0_6] : memref<8x768xf32, #tpu.memory_space<vmem>>, vector<8x768xf32>
    tpu.vector_store %arg4[%c0_5, %c0_6], %8 {strides = array<i32>} : memref<8x768xf32, #tpu.memory_space<vmem>>, vector<8x768xf32>,
    return
  }
  func.func @transform_0(%arg0: i32) -> (i32, i32) {
    %c0_i32 = arith.constant 0 : i32
    %c0_i32_0 = arith.constant 0 : i32
    return %arg0, %c0_i32 : i32, i32
  }
  func.func @transform_1(%arg0: i32) -> (i32, i32) {
    %c0_i32 = arith.constant 0 : i32
    %c0_i32_0 = arith.constant 0 : i32
    %c0_i32_1 = arith.constant 0 : i32
    return %c0_i32, %c0_i32_0 : i32, i32
  }
  func.func @transform_2(%arg0: i32) -> (i32, i32) {
    %c0_i32 = arith.constant 0 : i32
    %c0_i32_0 = arith.constant 0 : i32
    %c0_i32_1 = arith.constant 0 : i32
    return %c0_i32, %c0_i32_0 : i32, i32
  }
  func.func @transform_3(%arg0: i32) -> (i32, i32) {
    %c0_i32 = arith.constant 0 : i32
    %c0_i32_0 = arith.constant 0 : i32
    return %arg0, %c0_i32 : i32, i32
  }
}

module attributes {stable_mosaic.version = 11 : i64} {
  func.func @_bn_kernel(%arg0: i32, %arg1: memref<8x896xf32, #tpu.memory_space<vmem>>, %arg2: memref<1x896xf32, #tpu.memory_space<vmem>>, %arg3: memref<1x896xf32, #tpu.memory_space<vmem>>, %arg4: memref<8x896xf32, #tpu.memory_space<vmem>>) attributes {dimension_semantics = [#tpu.dimension_semantics<parallel>], iteration_bounds = array<i64: 1>, scalar_prefetch = 0 : i64, scratch_operands = 0 : i64, tpu.core_type = #tpu.core_type<tc>, window_params = [{transform_indices = @transform_0, window_bounds = array<i64: 8, 896>}, {pipeline_mode = #tpu.pipeline_mode<synchronous>, transform_indices = @transform_1, window_bounds = array<i64: 1, 896>}, {pipeline_mode = #tpu.pipeline_mode<synchronous>, transform_indices = @transform_2, window_bounds = array<i64: 1, 896>}, {transform_indices = @transform_3, window_bounds = array<i64: 8, 896>}]} {
    %c0 = arith.constant 0 : index
    %c0_0 = arith.constant 0 : index
    %0 = vector.load %arg1[%c0, %c0_0] : memref<8x896xf32, #tpu.memory_space<vmem>>, vector<8x896xf32>
    %c0_1 = arith.constant 0 : index
    %c0_2 = arith.constant 0 : index
    %1 = vector.load %arg2[%c0_1, %c0_2] : memref<1x896xf32, #tpu.memory_space<vmem>>, vector<1x896xf32>
    %2 = vector.broadcast %1 : vector<1x896xf32> to vector<8x896xf32>
    %3 = arith.mulf %0, %2 : vector<8x896xf32>
    %c0_3 = arith.constant 0 : index
    %c0_4 = arith.constant 0 : index
    %4 = vector.load %arg3[%c0_3, %c0_4] : memref<1x896xf32, #tpu.memory_space<vmem>>, vector<1x896xf32>
    %5 = vector.broadcast %4 : vector<1x896xf32> to vector<8x896xf32>
    %6 = arith.addf %3, %5 : vector<8x896xf32>
    %cst = arith.constant 0.000000e+00 : f32
    %7 = vector.broadcast %cst : f32 to vector<8x896xf32>
    %8 = arith.maximumf %6, %7 : vector<8x896xf32>
    %c0_5 = arith.constant 0 : index
    %c0_6 = arith.constant 0 : index
    %9 = vector.load %arg4[%c0_5, %c0_6] : memref<8x896xf32, #tpu.memory_space<vmem>>, vector<8x896xf32>
    tpu.vector_store %arg4[%c0_5, %c0_6], %8 {strides = array<i32>} : memref<8x896xf32, #tpu.memory_space<vmem>>, vector<8x896xf32>,
    return
  }
  func.func @transform_0(%arg0: i32) -> (i32, i32) {
    %c0_i32 = arith.constant 0 : i32
    %c0_i32_0 = arith.constant 0 : i32
    return %arg0, %c0_i32 : i32, i32
  }
  func.func @transform_1(%arg0: i32) -> (i32, i32) {
    %c0_i32 = arith.constant 0 : i32
    %c0_i32_0 = arith.constant 0 : i32
    %c0_i32_1 = arith.constant 0 : i32
    return %c0_i32, %c0_i32_0 : i32, i32
  }
  func.func @transform_2(%arg0: i32) -> (i32, i32) {
    %c0_i32 = arith.constant 0 : i32
    %c0_i32_0 = arith.constant 0 : i32
    %c0_i32_1 = arith.constant 0 : i32
    return %c0_i32, %c0_i32_0 : i32, i32
  }
  func.func @transform_3(%arg0: i32) -> (i32, i32) {
    %c0_i32 = arith.constant 0 : i32
    %c0_i32_0 = arith.constant 0 : i32
    return %arg0, %c0_i32 : i32, i32
  }
}

module attributes {stable_mosaic.version = 11 : i64} {
  func.func @_matmul_kernel(%arg0: i32, %arg1: i32, %arg2: i32, %arg3: memref<16x256xbf16, #tpu.memory_space<vmem>>, %arg4: memref<256x128xbf16, #tpu.memory_space<vmem>>, %arg5: memref<1x128xf32, #tpu.memory_space<vmem>>, %arg6: memref<1x128xf32, #tpu.memory_space<vmem>>, %arg7: memref<16x128xf32, #tpu.memory_space<vmem>>) attributes {dimension_semantics = [#tpu.dimension_semantics<parallel>, #tpu.dimension_semantics<parallel>, #tpu.dimension_semantics<arbitrary>], iteration_bounds = array<i64: 1, 1, 4>, scalar_prefetch = 0 : i64, scratch_operands = 0 : i64, tpu.core_type = #tpu.core_type<tc>, window_params = [{transform_indices = @transform_0, window_bounds = array<i64: 16, 256>}, {transform_indices = @transform_1, window_bounds = array<i64: 256, 128>}, {transform_indices = @transform_2, window_bounds = array<i64: 1, 128>}, {transform_indices = @transform_3, window_bounds = array<i64: 1, 128>}, {transform_indices = @transform_4, window_bounds = array<i64: 16, 128>}]} {
    %c0_i32 = arith.constant 0 : i32
    %0 = arith.cmpi eq, %arg2, %c0_i32 : i32
    %1 = arith.extui %0 : i1 to i32
    %c0_i32_0 = arith.constant 0 : i32
    %2 = arith.cmpi ne, %1, %c0_i32_0 : i32
    scf.if %2 {
      %cst_9 = arith.constant 0.000000e+00 : f32
      %12 = vector.broadcast %cst_9 : f32 to vector<16x128xf32>
      %c0_10 = arith.constant 0 : index
      %c0_11 = arith.constant 0 : index
      %13 = vector.load %arg7[%c0_10, %c0_11] : memref<16x128xf32, #tpu.memory_space<vmem>>, vector<16x128xf32>
      tpu.vector_store %arg7[%c0_10, %c0_11], %12 {strides = array<i32>} : memref<16x128xf32, #tpu.memory_space<vmem>>, vector<16x128xf32>,
    } else {
    }
    %c0 = arith.constant 0 : index
    %c0_1 = arith.constant 0 : index
    %3 = vector.load %arg7[%c0, %c0_1] : memref<16x128xf32, #tpu.memory_space<vmem>>, vector<16x128xf32>
    %c0_2 = arith.constant 0 : index
    %c0_3 = arith.constant 0 : index
    %4 = vector.load %arg3[%c0_2, %c0_3] : memref<16x256xbf16, #tpu.memory_space<vmem>>, vector<16x256xbf16>
    %c0_4 = arith.constant 0 : index
    %c0_5 = arith.constant 0 : index
    %5 = vector.load %arg4[%c0_4, %c0_5] : memref<256x128xbf16, #tpu.memory_space<vmem>>, vector<256x128xbf16>
    %cst = arith.constant dense<0.000000e+00> : vector<16x128xf32>
    %6 = tpu.matmul %4, %5, %cst {dimension_numbers = #tpu.dot_dimension_numbers<[1], [0], [0], [1], [0, 0, 1, 1], [], []>} : vector<16x256xbf16>, vector<256x128xbf16>, vector<16x128xf32> -> vector<16x128xf32>
    %7 = arith.addf %3, %6 : vector<16x128xf32>
    %c0_6 = arith.constant 0 : index
    %c0_7 = arith.constant 0 : index
    %8 = vector.load %arg7[%c0_6, %c0_7] : memref<16x128xf32, #tpu.memory_space<vmem>>, vector<16x128xf32>
    tpu.vector_store %arg7[%c0_6, %c0_7], %7 {strides = array<i32>} : memref<16x128xf32, #tpu.memory_space<vmem>>, vector<16x128xf32>,
    %c3_i32 = arith.constant 3 : i32
    %9 = arith.cmpi eq, %arg2, %c3_i32 : i32
    %10 = arith.extui %9 : i1 to i32
    %c0_i32_8 = arith.constant 0 : i32
    %11 = arith.cmpi ne, %10, %c0_i32_8 : i32
    scf.if %11 {
      %c0_9 = arith.constant 0 : index
      %c0_10 = arith.constant 0 : index
      %12 = vector.load %arg7[%c0_9, %c0_10] : memref<16x128xf32, #tpu.memory_space<vmem>>, vector<16x128xf32>
      %c0_11 = arith.constant 0 : index
      %c0_12 = arith.constant 0 : index
      %13 = vector.load %arg5[%c0_11, %c0_12] : memref<1x128xf32, #tpu.memory_space<vmem>>, vector<1x128xf32>
      %14 = vector.broadcast %13 : vector<1x128xf32> to vector<16x128xf32>
      %15 = arith.mulf %12, %14 : vector<16x128xf32>
      %c0_13 = arith.constant 0 : index
      %c0_14 = arith.constant 0 : index
      %16 = vector.load %arg6[%c0_13, %c0_14] : memref<1x128xf32, #tpu.memory_space<vmem>>, vector<1x128xf32>
      %17 = vector.broadcast %16 : vector<1x128xf32> to vector<16x128xf32>
      %18 = arith.addf %15, %17 : vector<16x128xf32>
      %cst_15 = arith.constant 0.000000e+00 : f32
      %19 = vector.broadcast %cst_15 : f32 to vector<16x128xf32>
      %20 = arith.maximumf %18, %19 : vector<16x128xf32>
      %c0_16 = arith.constant 0 : index
      %c0_17 = arith.constant 0 : index
      %21 = vector.load %arg7[%c0_16, %c0_17] : memref<16x128xf32, #tpu.memory_space<vmem>>, vector<16x128xf32>
      tpu.vector_store %arg7[%c0_16, %c0_17], %20 {strides = array<i32>} : memref<16x128xf32, #tpu.memory_space<vmem>>, vector<16x128xf32>,
    } else {
    }
    return
  }
  func.func @transform_0(%arg0: i32, %arg1: i32, %arg2: i32) -> (i32, i32) {
    %c0_i32 = arith.constant 0 : i32
    return %arg0, %arg2 : i32, i32
  }
  func.func @transform_1(%arg0: i32, %arg1: i32, %arg2: i32) -> (i32, i32) {
    %c0_i32 = arith.constant 0 : i32
    return %arg2, %arg1 : i32, i32
  }
  func.func @transform_2(%arg0: i32, %arg1: i32, %arg2: i32) -> (i32, i32) {
    %c0_i32 = arith.constant 0 : i32
    %c0_i32_0 = arith.constant 0 : i32
    return %c0_i32, %arg1 : i32, i32
  }
  func.func @transform_3(%arg0: i32, %arg1: i32, %arg2: i32) -> (i32, i32) {
    %c0_i32 = arith.constant 0 : i32
    %c0_i32_0 = arith.constant 0 : i32
    return %c0_i32, %arg1 : i32, i32
  }
  func.func @transform_4(%arg0: i32, %arg1: i32, %arg2: i32) -> (i32, i32) {
    %c0_i32 = arith.constant 0 : i32
    return %arg0, %arg1 : i32, i32
  }
}

module attributes {stable_mosaic.version = 11 : i64} {
  func.func @_bn_kernel(%arg0: i32, %arg1: memref<8x1024xf32, #tpu.memory_space<vmem>>, %arg2: memref<1x1024xf32, #tpu.memory_space<vmem>>, %arg3: memref<1x1024xf32, #tpu.memory_space<vmem>>, %arg4: memref<8x1024xf32, #tpu.memory_space<vmem>>) attributes {dimension_semantics = [#tpu.dimension_semantics<parallel>], iteration_bounds = array<i64: 1>, scalar_prefetch = 0 : i64, scratch_operands = 0 : i64, tpu.core_type = #tpu.core_type<tc>, window_params = [{transform_indices = @transform_0, window_bounds = array<i64: 8, 1024>}, {pipeline_mode = #tpu.pipeline_mode<synchronous>, transform_indices = @transform_1, window_bounds = array<i64: 1, 1024>}, {pipeline_mode = #tpu.pipeline_mode<synchronous>, transform_indices = @transform_2, window_bounds = array<i64: 1, 1024>}, {transform_indices = @transform_3, window_bounds = array<i64: 8, 1024>}]} {
    %c0 = arith.constant 0 : index
    %c0_0 = arith.constant 0 : index
    %0 = vector.load %arg1[%c0, %c0_0] : memref<8x1024xf32, #tpu.memory_space<vmem>>, vector<8x1024xf32>
    %c0_1 = arith.constant 0 : index
    %c0_2 = arith.constant 0 : index
    %1 = vector.load %arg2[%c0_1, %c0_2] : memref<1x1024xf32, #tpu.memory_space<vmem>>, vector<1x1024xf32>
    %2 = vector.broadcast %1 : vector<1x1024xf32> to vector<8x1024xf32>
    %3 = arith.mulf %0, %2 : vector<8x1024xf32>
    %c0_3 = arith.constant 0 : index
    %c0_4 = arith.constant 0 : index
    %4 = vector.load %arg3[%c0_3, %c0_4] : memref<1x1024xf32, #tpu.memory_space<vmem>>, vector<1x1024xf32>
    %5 = vector.broadcast %4 : vector<1x1024xf32> to vector<8x1024xf32>
    %6 = arith.addf %3, %5 : vector<8x1024xf32>
    %cst = arith.constant 0.000000e+00 : f32
    %7 = vector.broadcast %cst : f32 to vector<8x1024xf32>
    %8 = arith.maximumf %6, %7 : vector<8x1024xf32>
    %c0_5 = arith.constant 0 : index
    %c0_6 = arith.constant 0 : index
    %9 = vector.load %arg4[%c0_5, %c0_6] : memref<8x1024xf32, #tpu.memory_space<vmem>>, vector<8x1024xf32>
    tpu.vector_store %arg4[%c0_5, %c0_6], %8 {strides = array<i32>} : memref<8x1024xf32, #tpu.memory_space<vmem>>, vector<8x1024xf32>,
    return
  }
  func.func @transform_0(%arg0: i32) -> (i32, i32) {
    %c0_i32 = arith.constant 0 : i32
    %c0_i32_0 = arith.constant 0 : i32
    return %arg0, %c0_i32 : i32, i32
  }
  func.func @transform_1(%arg0: i32) -> (i32, i32) {
    %c0_i32 = arith.constant 0 : i32
    %c0_i32_0 = arith.constant 0 : i32
    %c0_i32_1 = arith.constant 0 : i32
    return %c0_i32, %c0_i32_0 : i32, i32
  }
  func.func @transform_2(%arg0: i32) -> (i32, i32) {
    %c0_i32 = arith.constant 0 : i32
    %c0_i32_0 = arith.constant 0 : i32
    %c0_i32_1 = arith.constant 0 : i32
    return %c0_i32, %c0_i32_0 : i32, i32
  }
  func.func @transform_3(%arg0: i32) -> (i32, i32) {
    %c0_i32 = arith.constant 0 : i32
    %c0_i32_0 = arith.constant 0 : i32
    return %arg0, %c0_i32 : i32, i32
  }
}

module attributes {stable_mosaic.version = 11 : i64} {
  func.func @_matmul_kernel(%arg0: i32, %arg1: i32, %arg2: i32, %arg3: memref<16x256xbf16, #tpu.memory_space<vmem>>, %arg4: memref<256x256xbf16, #tpu.memory_space<vmem>>, %arg5: memref<1x256xf32, #tpu.memory_space<vmem>>, %arg6: memref<1x256xf32, #tpu.memory_space<vmem>>, %arg7: memref<16x256xf32, #tpu.memory_space<vmem>>) attributes {dimension_semantics = [#tpu.dimension_semantics<parallel>, #tpu.dimension_semantics<parallel>, #tpu.dimension_semantics<arbitrary>], iteration_bounds = array<i64: 1, 2, 4>, scalar_prefetch = 0 : i64, scratch_operands = 0 : i64, tpu.core_type = #tpu.core_type<tc>, window_params = [{transform_indices = @transform_0, window_bounds = array<i64: 16, 256>}, {transform_indices = @transform_1, window_bounds = array<i64: 256, 256>}, {transform_indices = @transform_2, window_bounds = array<i64: 1, 256>}, {transform_indices = @transform_3, window_bounds = array<i64: 1, 256>}, {transform_indices = @transform_4, window_bounds = array<i64: 16, 256>}]} {
    %c0_i32 = arith.constant 0 : i32
    %0 = arith.cmpi eq, %arg2, %c0_i32 : i32
    %1 = arith.extui %0 : i1 to i32
    %c0_i32_0 = arith.constant 0 : i32
    %2 = arith.cmpi ne, %1, %c0_i32_0 : i32
    scf.if %2 {
      %cst_9 = arith.constant 0.000000e+00 : f32
      %12 = vector.broadcast %cst_9 : f32 to vector<16x256xf32>
      %c0_10 = arith.constant 0 : index
      %c0_11 = arith.constant 0 : index
      %13 = vector.load %arg7[%c0_10, %c0_11] : memref<16x256xf32, #tpu.memory_space<vmem>>, vector<16x256xf32>
      tpu.vector_store %arg7[%c0_10, %c0_11], %12 {strides = array<i32>} : memref<16x256xf32, #tpu.memory_space<vmem>>, vector<16x256xf32>,
    } else {
    }
    %c0 = arith.constant 0 : index
    %c0_1 = arith.constant 0 : index
    %3 = vector.load %arg7[%c0, %c0_1] : memref<16x256xf32, #tpu.memory_space<vmem>>, vector<16x256xf32>
    %c0_2 = arith.constant 0 : index
    %c0_3 = arith.constant 0 : index
    %4 = vector.load %arg3[%c0_2, %c0_3] : memref<16x256xbf16, #tpu.memory_space<vmem>>, vector<16x256xbf16>
    %c0_4 = arith.constant 0 : index
    %c0_5 = arith.constant 0 : index
    %5 = vector.load %arg4[%c0_4, %c0_5] : memref<256x256xbf16, #tpu.memory_space<vmem>>, vector<256x256xbf16>
    %cst = arith.constant dense<0.000000e+00> : vector<16x256xf32>
    %6 = tpu.matmul %4, %5, %cst {dimension_numbers = #tpu.dot_dimension_numbers<[1], [0], [0], [1], [0, 0, 1, 1], [], []>} : vector<16x256xbf16>, vector<256x256xbf16>, vector<16x256xf32> -> vector<16x256xf32>
    %7 = arith.addf %3, %6 : vector<16x256xf32>
    %c0_6 = arith.constant 0 : index
    %c0_7 = arith.constant 0 : index
    %8 = vector.load %arg7[%c0_6, %c0_7] : memref<16x256xf32, #tpu.memory_space<vmem>>, vector<16x256xf32>
    tpu.vector_store %arg7[%c0_6, %c0_7], %7 {strides = array<i32>} : memref<16x256xf32, #tpu.memory_space<vmem>>, vector<16x256xf32>,
    %c3_i32 = arith.constant 3 : i32
    %9 = arith.cmpi eq, %arg2, %c3_i32 : i32
    %10 = arith.extui %9 : i1 to i32
    %c0_i32_8 = arith.constant 0 : i32
    %11 = arith.cmpi ne, %10, %c0_i32_8 : i32
    scf.if %11 {
      %c0_9 = arith.constant 0 : index
      %c0_10 = arith.constant 0 : index
      %12 = vector.load %arg7[%c0_9, %c0_10] : memref<16x256xf32, #tpu.memory_space<vmem>>, vector<16x256xf32>
      %c0_11 = arith.constant 0 : index
      %c0_12 = arith.constant 0 : index
      %13 = vector.load %arg5[%c0_11, %c0_12] : memref<1x256xf32, #tpu.memory_space<vmem>>, vector<1x256xf32>
      %14 = vector.broadcast %13 : vector<1x256xf32> to vector<16x256xf32>
      %15 = arith.mulf %12, %14 : vector<16x256xf32>
      %c0_13 = arith.constant 0 : index
      %c0_14 = arith.constant 0 : index
      %16 = vector.load %arg6[%c0_13, %c0_14] : memref<1x256xf32, #tpu.memory_space<vmem>>, vector<1x256xf32>
      %17 = vector.broadcast %16 : vector<1x256xf32> to vector<16x256xf32>
      %18 = arith.addf %15, %17 : vector<16x256xf32>
      %c0_15 = arith.constant 0 : index
      %c0_16 = arith.constant 0 : index
      %19 = vector.load %arg7[%c0_15, %c0_16] : memref<16x256xf32, #tpu.memory_space<vmem>>, vector<16x256xf32>
      tpu.vector_store %arg7[%c0_15, %c0_16], %18 {strides = array<i32>} : memref<16x256xf32, #tpu.memory_space<vmem>>, vector<16x256xf32>,
    } else {
    }
    return
  }
  func.func @transform_0(%arg0: i32, %arg1: i32, %arg2: i32) -> (i32, i32) {
    %c0_i32 = arith.constant 0 : i32
    return %arg0, %arg2 : i32, i32
  }
  func.func @transform_1(%arg0: i32, %arg1: i32, %arg2: i32) -> (i32, i32) {
    %c0_i32 = arith.constant 0 : i32
    return %arg2, %arg1 : i32, i32
  }
  func.func @transform_2(%arg0: i32, %arg1: i32, %arg2: i32) -> (i32, i32) {
    %c0_i32 = arith.constant 0 : i32
    %c0_i32_0 = arith.constant 0 : i32
    return %c0_i32, %arg1 : i32, i32
  }
  func.func @transform_3(%arg0: i32, %arg1: i32, %arg2: i32) -> (i32, i32) {
    %c0_i32 = arith.constant 0 : i32
    %c0_i32_0 = arith.constant 0 : i32
    return %c0_i32, %arg1 : i32, i32
  }
  func.func @transform_4(%arg0: i32, %arg1: i32, %arg2: i32) -> (i32, i32) {
    %c0_i32 = arith.constant 0 : i32
    return %arg0, %arg1 : i32, i32
  }
}

module attributes {stable_mosaic.version = 11 : i64} {
  func.func @_reduce_kernel(%arg0: i32, %arg1: memref<4x8x512xf32, #tpu.memory_space<vmem>>, %arg2: memref<8x512xf32, #tpu.memory_space<vmem>>) attributes {dimension_semantics = [#tpu.dimension_semantics<parallel>], iteration_bounds = array<i64: 1>, scalar_prefetch = 0 : i64, scratch_operands = 0 : i64, tpu.core_type = #tpu.core_type<tc>, window_params = [{transform_indices = @transform_0, window_bounds = array<i64: 4, 8, 512>}, {transform_indices = @transform_1, window_bounds = array<i64: 8, 512>}]} {
    %c0 = arith.constant 0 : index
    %c0_0 = arith.constant 0 : index
    %c0_1 = arith.constant 0 : index
    %0 = vector.load %arg1[%c0, %c0_0, %c0_1] : memref<4x8x512xf32, #tpu.memory_space<vmem>>, vector<4x8x512xf32>
    %cst = arith.constant dense<0.000000e+00> : vector<8x512xf32>
    %1 = vector.multi_reduction <add>, %0, %cst [0] : vector<4x8x512xf32> to vector<8x512xf32>
    %cst_2 = arith.constant 4.000000e+00 : f32
    %2 = vector.broadcast %cst_2 : f32 to vector<8x512xf32>
    %3 = arith.divf %1, %2 : vector<8x512xf32>
    %c0_3 = arith.constant 0 : index
    %c0_4 = arith.constant 0 : index
    %4 = vector.load %arg2[%c0_3, %c0_4] : memref<8x512xf32, #tpu.memory_space<vmem>>, vector<8x512xf32>
    tpu.vector_store %arg2[%c0_3, %c0_4], %3 {strides = array<i32>} : memref<8x512xf32, #tpu.memory_space<vmem>>, vector<8x512xf32>,
    return
  }
  func.func @transform_0(%arg0: i32) -> (i32, i32, i32) {
    %c0_i32 = arith.constant 0 : i32
    %c0_i32_0 = arith.constant 0 : i32
    %c0_i32_1 = arith.constant 0 : i32
    return %c0_i32, %arg0, %c0_i32_0 : i32, i32, i32
  }
  func.func @transform_1(%arg0: i32) -> (i32, i32) {
    %c0_i32 = arith.constant 0 : i32
    %c0_i32_0 = arith.constant 0 : i32
    return %arg0, %c0_i32 : i32, i32
  }
}

module attributes {stable_mosaic.version = 11 : i64} {
  func.func @_bn_kernel(%arg0: i32, %arg1: memref<8x1024xf32, #tpu.memory_space<vmem>>, %arg2: memref<1x1024xf32, #tpu.memory_space<vmem>>, %arg3: memref<1x1024xf32, #tpu.memory_space<vmem>>, %arg4: memref<8x1024xf32, #tpu.memory_space<vmem>>) attributes {dimension_semantics = [#tpu.dimension_semantics<parallel>], iteration_bounds = array<i64: 1>, scalar_prefetch = 0 : i64, scratch_operands = 0 : i64, tpu.core_type = #tpu.core_type<tc>, window_params = [{transform_indices = @transform_0, window_bounds = array<i64: 8, 1024>}, {pipeline_mode = #tpu.pipeline_mode<synchronous>, transform_indices = @transform_1, window_bounds = array<i64: 1, 1024>}, {pipeline_mode = #tpu.pipeline_mode<synchronous>, transform_indices = @transform_2, window_bounds = array<i64: 1, 1024>}, {transform_indices = @transform_3, window_bounds = array<i64: 8, 1024>}]} {
    %c0 = arith.constant 0 : index
    %c0_0 = arith.constant 0 : index
    %0 = vector.load %arg1[%c0, %c0_0] : memref<8x1024xf32, #tpu.memory_space<vmem>>, vector<8x1024xf32>
    %c0_1 = arith.constant 0 : index
    %c0_2 = arith.constant 0 : index
    %1 = vector.load %arg2[%c0_1, %c0_2] : memref<1x1024xf32, #tpu.memory_space<vmem>>, vector<1x1024xf32>
    %2 = vector.broadcast %1 : vector<1x1024xf32> to vector<8x1024xf32>
    %3 = arith.mulf %0, %2 : vector<8x1024xf32>
    %c0_3 = arith.constant 0 : index
    %c0_4 = arith.constant 0 : index
    %4 = vector.load %arg3[%c0_3, %c0_4] : memref<1x1024xf32, #tpu.memory_space<vmem>>, vector<1x1024xf32>
    %5 = vector.broadcast %4 : vector<1x1024xf32> to vector<8x1024xf32>
    %6 = arith.addf %3, %5 : vector<8x1024xf32>
    %c0_5 = arith.constant 0 : index
    %c0_6 = arith.constant 0 : index
    %7 = vector.load %arg4[%c0_5, %c0_6] : memref<8x1024xf32, #tpu.memory_space<vmem>>, vector<8x1024xf32>
    tpu.vector_store %arg4[%c0_5, %c0_6], %6 {strides = array<i32>} : memref<8x1024xf32, #tpu.memory_space<vmem>>, vector<8x1024xf32>,
    return
  }
  func.func @transform_0(%arg0: i32) -> (i32, i32) {
    %c0_i32 = arith.constant 0 : i32
    %c0_i32_0 = arith.constant 0 : i32
    return %arg0, %c0_i32 : i32, i32
  }
  func.func @transform_1(%arg0: i32) -> (i32, i32) {
    %c0_i32 = arith.constant 0 : i32
    %c0_i32_0 = arith.constant 0 : i32
    %c0_i32_1 = arith.constant 0 : i32
    return %c0_i32, %c0_i32_0 : i32, i32
  }
  func.func @transform_2(%arg0: i32) -> (i32, i32) {
    %c0_i32 = arith.constant 0 : i32
    %c0_i32_0 = arith.constant 0 : i32
    %c0_i32_1 = arith.constant 0 : i32
    return %c0_i32, %c0_i32_0 : i32, i32
  }
  func.func @transform_3(%arg0: i32) -> (i32, i32) {
    %c0_i32 = arith.constant 0 : i32
    %c0_i32_0 = arith.constant 0 : i32
    return %arg0, %c0_i32 : i32, i32
  }
}

module attributes {stable_mosaic.version = 11 : i64} {
  func.func @_reduce_kernel(%arg0: i32, %arg1: memref<1x8x1024xf32, #tpu.memory_space<vmem>>, %arg2: memref<8x1024xf32, #tpu.memory_space<vmem>>) attributes {dimension_semantics = [#tpu.dimension_semantics<parallel>], iteration_bounds = array<i64: 1>, scalar_prefetch = 0 : i64, scratch_operands = 0 : i64, tpu.core_type = #tpu.core_type<tc>, window_params = [{transform_indices = @transform_0, window_bounds = array<i64: 1, 8, 1024>}, {transform_indices = @transform_1, window_bounds = array<i64: 8, 1024>}]} {
    %c0 = arith.constant 0 : index
    %c0_0 = arith.constant 0 : index
    %c0_1 = arith.constant 0 : index
    %0 = vector.load %arg1[%c0, %c0_0, %c0_1] : memref<1x8x1024xf32, #tpu.memory_space<vmem>>, vector<1x8x1024xf32>
    %cst = arith.constant dense<0.000000e+00> : vector<8x1024xf32>
    %1 = vector.multi_reduction <add>, %0, %cst [0] : vector<1x8x1024xf32> to vector<8x1024xf32>
    %cst_2 = arith.constant 1.000000e+00 : f32
    %2 = vector.broadcast %cst_2 : f32 to vector<8x1024xf32>
    %3 = arith.divf %1, %2 : vector<8x1024xf32>
    %c0_3 = arith.constant 0 : index
    %c0_4 = arith.constant 0 : index
    %4 = vector.load %arg2[%c0_3, %c0_4] : memref<8x1024xf32, #tpu.memory_space<vmem>>, vector<8x1024xf32>
    tpu.vector_store %arg2[%c0_3, %c0_4], %3 {strides = array<i32>} : memref<8x1024xf32, #tpu.memory_space<vmem>>, vector<8x1024xf32>,
    return
  }
  func.func @transform_0(%arg0: i32) -> (i32, i32, i32) {
    %c0_i32 = arith.constant 0 : i32
    %c0_i32_0 = arith.constant 0 : i32
    %c0_i32_1 = arith.constant 0 : i32
    return %c0_i32, %arg0, %c0_i32_0 : i32, i32, i32
  }
  func.func @transform_1(%arg0: i32) -> (i32, i32) {
    %c0_i32 = arith.constant 0 : i32
    %c0_i32_0 = arith.constant 0 : i32
    return %arg0, %c0_i32 : i32, i32
  }
}

module attributes {stable_mosaic.version = 11 : i64} {
  func.func @_matmul_kernel(%arg0: i32, %arg1: i32, %arg2: i32, %arg3: memref<16x256xbf16, #tpu.memory_space<vmem>>, %arg4: memref<256x128xbf16, #tpu.memory_space<vmem>>, %arg5: memref<1x128xf32, #tpu.memory_space<vmem>>, %arg6: memref<1x128xf32, #tpu.memory_space<vmem>>, %arg7: memref<16x128xf32, #tpu.memory_space<vmem>>) attributes {dimension_semantics = [#tpu.dimension_semantics<parallel>, #tpu.dimension_semantics<parallel>, #tpu.dimension_semantics<arbitrary>], iteration_bounds = array<i64: 1, 1, 4>, scalar_prefetch = 0 : i64, scratch_operands = 0 : i64, tpu.core_type = #tpu.core_type<tc>, window_params = [{transform_indices = @transform_0, window_bounds = array<i64: 16, 256>}, {transform_indices = @transform_1, window_bounds = array<i64: 256, 128>}, {transform_indices = @transform_2, window_bounds = array<i64: 1, 128>}, {transform_indices = @transform_3, window_bounds = array<i64: 1, 128>}, {transform_indices = @transform_4, window_bounds = array<i64: 16, 128>}]} {
    %c0_i32 = arith.constant 0 : i32
    %0 = arith.cmpi eq, %arg2, %c0_i32 : i32
    %1 = arith.extui %0 : i1 to i32
    %c0_i32_0 = arith.constant 0 : i32
    %2 = arith.cmpi ne, %1, %c0_i32_0 : i32
    scf.if %2 {
      %cst_9 = arith.constant 0.000000e+00 : f32
      %12 = vector.broadcast %cst_9 : f32 to vector<16x128xf32>
      %c0_10 = arith.constant 0 : index
      %c0_11 = arith.constant 0 : index
      %13 = vector.load %arg7[%c0_10, %c0_11] : memref<16x128xf32, #tpu.memory_space<vmem>>, vector<16x128xf32>
      tpu.vector_store %arg7[%c0_10, %c0_11], %12 {strides = array<i32>} : memref<16x128xf32, #tpu.memory_space<vmem>>, vector<16x128xf32>,
    } else {
    }
    %c0 = arith.constant 0 : index
    %c0_1 = arith.constant 0 : index
    %3 = vector.load %arg7[%c0, %c0_1] : memref<16x128xf32, #tpu.memory_space<vmem>>, vector<16x128xf32>
    %c0_2 = arith.constant 0 : index
    %c0_3 = arith.constant 0 : index
    %4 = vector.load %arg3[%c0_2, %c0_3] : memref<16x256xbf16, #tpu.memory_space<vmem>>, vector<16x256xbf16>
    %c0_4 = arith.constant 0 : index
    %c0_5 = arith.constant 0 : index
    %5 = vector.load %arg4[%c0_4, %c0_5] : memref<256x128xbf16, #tpu.memory_space<vmem>>, vector<256x128xbf16>
    %cst = arith.constant dense<0.000000e+00> : vector<16x128xf32>
    %6 = tpu.matmul %4, %5, %cst {dimension_numbers = #tpu.dot_dimension_numbers<[1], [0], [0], [1], [0, 0, 1, 1], [], []>} : vector<16x256xbf16>, vector<256x128xbf16>, vector<16x128xf32> -> vector<16x128xf32>
    %7 = arith.addf %3, %6 : vector<16x128xf32>
    %c0_6 = arith.constant 0 : index
    %c0_7 = arith.constant 0 : index
    %8 = vector.load %arg7[%c0_6, %c0_7] : memref<16x128xf32, #tpu.memory_space<vmem>>, vector<16x128xf32>
    tpu.vector_store %arg7[%c0_6, %c0_7], %7 {strides = array<i32>} : memref<16x128xf32, #tpu.memory_space<vmem>>, vector<16x128xf32>,
    %c3_i32 = arith.constant 3 : i32
    %9 = arith.cmpi eq, %arg2, %c3_i32 : i32
    %10 = arith.extui %9 : i1 to i32
    %c0_i32_8 = arith.constant 0 : i32
    %11 = arith.cmpi ne, %10, %c0_i32_8 : i32
    scf.if %11 {
      %c0_9 = arith.constant 0 : index
      %c0_10 = arith.constant 0 : index
      %12 = vector.load %arg7[%c0_9, %c0_10] : memref<16x128xf32, #tpu.memory_space<vmem>>, vector<16x128xf32>
      %c0_11 = arith.constant 0 : index
      %c0_12 = arith.constant 0 : index
      %13 = vector.load %arg5[%c0_11, %c0_12] : memref<1x128xf32, #tpu.memory_space<vmem>>, vector<1x128xf32>
      %14 = vector.broadcast %13 : vector<1x128xf32> to vector<16x128xf32>
      %15 = arith.mulf %12, %14 : vector<16x128xf32>
      %c0_13 = arith.constant 0 : index
      %c0_14 = arith.constant 0 : index
      %16 = vector.load %arg6[%c0_13, %c0_14] : memref<1x128xf32, #tpu.memory_space<vmem>>, vector<1x128xf32>
      %17 = vector.broadcast %16 : vector<1x128xf32> to vector<16x128xf32>
      %18 = arith.addf %15, %17 : vector<16x128xf32>
      %c0_15 = arith.constant 0 : index
      %c0_16 = arith.constant 0 : index
      %19 = vector.load %arg7[%c0_15, %c0_16] : memref<16x128xf32, #tpu.memory_space<vmem>>, vector<16x128xf32>
      tpu.vector_store %arg7[%c0_15, %c0_16], %18 {strides = array<i32>} : memref<16x128xf32, #tpu.memory_space<vmem>>, vector<16x128xf32>,
    } else {
    }
    return
  }
  func.func @transform_0(%arg0: i32, %arg1: i32, %arg2: i32) -> (i32, i32) {
    %c0_i32 = arith.constant 0 : i32
    return %arg0, %arg2 : i32, i32
  }
  func.func @transform_1(%arg0: i32, %arg1: i32, %arg2: i32) -> (i32, i32) {
    %c0_i32 = arith.constant 0 : i32
    return %arg2, %arg1 : i32, i32
  }
  func.func @transform_2(%arg0: i32, %arg1: i32, %arg2: i32) -> (i32, i32) {
    %c0_i32 = arith.constant 0 : i32
    %c0_i32_0 = arith.constant 0 : i32
    return %c0_i32, %arg1 : i32, i32
  }
  func.func @transform_3(%arg0: i32, %arg1: i32, %arg2: i32) -> (i32, i32) {
    %c0_i32 = arith.constant 0 : i32
    %c0_i32_0 = arith.constant 0 : i32
    return %c0_i32, %arg1 : i32, i32
  }
  func.func @transform_4(%arg0: i32, %arg1: i32, %arg2: i32) -> (i32, i32) {
    %c0_i32 = arith.constant 0 : i32
    return %arg0, %arg1 : i32, i32
  }
}

</mosaic_0001>

<bundles_post_ra>
// kernel: densenet121_forward.189
= control target key start
LH: loop header
LB: loop body
LE: loop exit
PB: predicated region body
PF: predicated region fallthrough
CT: control target
= control target key end

     0   :  { %s790_s0 = inlined_call_operand.vmem [shape: f32[9,128,128], index: 0, kind: input, shape index: {}]   ;;  %s791_s1 = inlined_call_operand.vmem [shape: f32[128,128], index: 1, kind: output, shape index: {}]  }
   0x1   :  { %v8_v0 = vld [vmem:[%s790_s0] sm:$0xff]  ;;  %v9_v6 = vld [vmem:[%s790_s0 + $0x8] sm:$0xff]  ;;  %v10_v15 = vld [vmem:[%s790_s0 + $0x10] sm:$0xff] }
   0x2   :  { %v24_v1 = vld [vmem:[%s790_s0 + $0x80] sm:$0xff]  ;;  %v25_v7 = vld [vmem:[%s790_s0 + $0x88] sm:$0xff]  ;;  %v26_v16 = vld [vmem:[%s790_s0 + $0x90] sm:$0xff] }
   0x3   :  { %v40_v2 = vld [vmem:[%s790_s0 + $0x100] sm:$0xff]  ;;  %v152_v3 = vmax.f32 %v8_v0, %v24_v1  ;;  %v41_v8 = vld [vmem:[%s790_s0 + $0x108] sm:$0xff]  ;;  %v160_v10 = vmax.f32 %v9_v6, %v25_v7  ;;  %v42_v17 = vld [vmem:[%s790_s0 + $0x110] sm:$0xff]  ;;  %v168_v20 = vmax.f32 %v10_v15, %v26_v16 }
   0x4   :  { %v56_v4 = vld [vmem:[%s790_s0 + $0x180] sm:$0xff]  ;;  %v57_v13 = vld [vmem:[%s790_s0 + $0x188] sm:$0xff]  ;;  %v58_v24 = vld [vmem:[%s790_s0 + $0x190] sm:$0xff] }
   0x5   :  { %v153_v5 = vmax.f32 %v152_v3, %v40_v2  ;;  %v72_v9 = vld [vmem:[%s790_s0 + $0x200] sm:$0xff]  ;;  %v161_v14 = vmax.f32 %v160_v10, %v41_v8  ;;  %v73_v19 = vld [vmem:[%s790_s0 + $0x208] sm:$0xff]  ;;  %v169_v26 = vmax.f32 %v168_v20, %v42_v17  ;;  %v11_v27 = vld [vmem:[%s790_s0 + $0x18] sm:$0xff] }
   0x6   :  { %v88_v11 = vld [vmem:[%s790_s0 + $0x280] sm:$0xff]  ;;  %v89_v22 = vld [vmem:[%s790_s0 + $0x288] sm:$0xff]  ;;  %v27_v28 = vld [vmem:[%s790_s0 + $0x98] sm:$0xff] }
   0x7   :  { %v154_v12 = vmax.f32 %v153_v5, %v56_v4  ;;  %v104_v21 = vld [vmem:[%s790_s0 + $0x300] sm:$0xff]  ;;  %v162_v23 = vmax.f32 %v161_v14, %v57_v13  ;;  %v43_v29 = vld [vmem:[%s790_s0 + $0x118] sm:$0xff]  ;;  %v74_v33 = vld [vmem:[%s790_s0 + $0x210] sm:$0xff]  ;;  %v176_v34 = vmax.f32 %v11_v27, %v27_v28  ;;  %v170_v38 = vmax.f32 %v169_v26, %v58_v24 }
   0x8   :  { %v120_v30 = vld [vmem:[%s790_s0 + $0x380] sm:$0xff]  ;;  %v105_v36 = vld [vmem:[%s790_s0 + $0x308] sm:$0xff]  ;;  %v90_v37 = vld [vmem:[%s790_s0 + $0x290] sm:$0xff] }
   0x9   :  { %v155_v18 = vmax.f32 %v154_v12, %v72_v9  ;;  %v136_v31 = vld [vmem:[%s790_s0 + $0x400] sm:$0xff]  ;;  %v163_v32 = vmax.f32 %v162_v23, %v73_v19  ;;  %v59_v39 = vld [vmem:[%s790_s0 + $0x198] sm:$0xff]  ;;  %v177_v41 = vmax.f32 %v176_v34, %v43_v29  ;;  %v121_v46 = vld [vmem:[%s790_s0 + $0x388] sm:$0xff]  ;;  %v171_v48 = vmax.f32 %v170_v38, %v74_v33 }
   0xa   :  { %v12_v42 = vld [vmem:[%s790_s0 + $0x20] sm:$0xff]  ;;  %v137_v47 = vld [vmem:[%s790_s0 + $0x408] sm:$0xff]  ;;  %v75_v49 = vld [vmem:[%s790_s0 + $0x218] sm:$0xff] }
   0xb   :  { %v156_v25 = vmax.f32 %v155_v18, %v88_v11  ;;  %v164_v40 = vmax.f32 %v163_v32, %v89_v22  ;;  %v28_v43 = vld [vmem:[%s790_s0 + $0xa0] sm:$0xff]  ;;  %v106_v52 = vld [vmem:[%s790_s0 + $0x310] sm:$0xff]  ;;  %v91_v53 = vld [vmem:[%s790_s0 + $0x298] sm:$0xff]  ;;  %v178_v54 = vmax.f32 %v177_v41, %v59_v39  ;;  %v172_v57 = vmax.f32 %v171_v48, %v90_v37 }
   0xc   :  { %v44_v44 = vld [vmem:[%s790_s0 + $0x120] sm:$0xff]  ;;  %v184_v50 = vmax.f32 %v12_v42, %v28_v43  ;;  %v13_v59 = vld [vmem:[%s790_s0 + $0x28] sm:$0xff]  ;;  %v122_v63 = vld [vmem:[%s790_s0 + $0x390] sm:$0xff] }
   0xd   :  { %v157_v35 = vmax.f32 %v156_v25, %v104_v21  ;;  %v165_v51 = vmax.f32 %v164_v40, %v105_v36  ;;  %v60_v55 = vld [vmem:[%s790_s0 + $0x1a0] sm:$0xff]  ;;  %v29_v60 = vld [vmem:[%s790_s0 + $0xa8] sm:$0xff]  ;;  %v138_v0 = vld [vmem:[%s790_s0 + $0x410] sm:$0xff]  ;;  %v179_v1 = vmax.f32 %v178_v54, %v75_v49  ;;  %v173_v4 = vmax.f32 %v172_v57, %v106_v52 }
   0xe   :  { %v185_v58 = vmax.f32 %v184_v50, %v44_v44  ;;  %v45_v61 = vld [vmem:[%s790_s0 + $0x128] sm:$0xff]  ;;  %v76_v2 = vld [vmem:[%s790_s0 + $0x220] sm:$0xff]  ;;  %v192_v3 = vmax.f32 %v13_v59, %v29_v60  ;;  %v107_v5 = vld [vmem:[%s790_s0 + $0x318] sm:$0xff] }
   0xf   :  { %v158_v45 = vmax.f32 %v157_v35, %v120_v30  ;;  %v166_v62 = vmax.f32 %v165_v51, %v121_v46  ;;  %v92_v6 = vld [vmem:[%s790_s0 + $0x2a0] sm:$0xff]  ;;  %v61_v8 = vld [vmem:[%s790_s0 + $0x1a8] sm:$0xff]  ;;  %v180_v10 = vmax.f32 %v179_v1, %v91_v53  ;;  %v14_v12 = vld [vmem:[%s790_s0 + $0x30] sm:$0xff]  ;;  %v174_v15 = vmax.f32 %v173_v4, %v122_v63 }
  0x10   :  { %v186_v7 = vmax.f32 %v185_v58, %v60_v55  ;;  %v193_v11 = vmax.f32 %v192_v3, %v45_v61  ;;  %v30_v13 = vld [vmem:[%s790_s0 + $0xb0] sm:$0xff]  ;;  %v123_v16 = vld [vmem:[%s790_s0 + $0x398] sm:$0xff]  ;;  %v77_v19 = vld [vmem:[%s790_s0 + $0x228] sm:$0xff] }
  0x11   :  { %v159_v56 = vmax.f32 %v158_v45, %v136_v31  ;;  %v167_v9 = vmax.f32 %v166_v62, %v137_v47  ;;  %v46_v14 = vld [vmem:[%s790_s0 + $0x130] sm:$0xff]  ;;  %v139_v17 = vld [vmem:[%s790_s0 + $0x418] sm:$0xff]  ;;  %v200_v20 = vmax.f32 %v14_v12, %v30_v13  ;;  %v181_v21 = vmax.f32 %v180_v10, %v107_v5  ;;  %v108_v22 = vld [vmem:[%s790_s0 + $0x320] sm:$0xff] }
  0x12   :  { %v187_v18 = vmax.f32 %v186_v7, %v76_v2  ;;  %v93_v23 = vld [vmem:[%s790_s0 + $0x2a8] sm:$0xff]  ;;  %v194_v24 = vmax.f32 %v193_v11, %v61_v8  ;;  %v62_v25 = vld [vmem:[%s790_s0 + $0x1b0] sm:$0xff]  ;;  %v175_v26 = vmax.f32 %v174_v15, %v138_v0  ;;  %v15_v29 = vld [vmem:[%s790_s0 + $0x38] sm:$0xff] }
  0x13   :  { %280 = vst [vmem:[%s791_s1] sm:$0xff] %v159_v56  ;;  %281 = vst [vmem:[%s791_s1 + $0x8] sm:$0xff] %v167_v9  ;;  %v201_v28 = vmax.f32 %v200_v20, %v46_v14  ;;  %v31_v30 = vld [vmem:[%s790_s0 + $0xb8] sm:$0xff]  ;;  %v182_v32 = vmax.f32 %v181_v21, %v123_v16  ;;  %v124_v33 = vld [vmem:[%s790_s0 + $0x3a0] sm:$0xff] }
  0x14   :  { %v188_v27 = vmax.f32 %v187_v18, %v92_v6  ;;  %v47_v31 = vld [vmem:[%s790_s0 + $0x138] sm:$0xff]  ;;  %v140_v34 = vld [vmem:[%s790_s0 + $0x420] sm:$0xff]  ;;  %v195_v35 = vmax.f32 %v194_v24, %v77_v19  ;;  %v78_v36 = vld [vmem:[%s790_s0 + $0x230] sm:$0xff]  ;;  %v208_v37 = vmax.f32 %v15_v29, %v31_v30  ;;  %282 = vst [vmem:[%s791_s1 + $0x10] sm:$0xff] %v175_v26 }
  0x15   :  { %v109_v39 = vld [vmem:[%s790_s0 + $0x328] sm:$0xff]  ;;  %v94_v40 = vld [vmem:[%s790_s0 + $0x2b0] sm:$0xff]  ;;  %v202_v41 = vmax.f32 %v201_v28, %v62_v25  ;;  %v63_v42 = vld [vmem:[%s790_s0 + $0x1b8] sm:$0xff]  ;;  %v183_v43 = vmax.f32 %v182_v32, %v139_v17 }
  0x16   :  { %v189_v38 = vmax.f32 %v188_v27, %v108_v22  ;;  %v196_v44 = vmax.f32 %v195_v35, %v93_v23  ;;  %v209_v45 = vmax.f32 %v208_v37, %v47_v31  ;;  %v16_v46 = vld [vmem:[%s790_s0 + $0x40] sm:$0xff]  ;;  %v125_v50 = vld [vmem:[%s790_s0 + $0x3a8] sm:$0xff]  ;;  %v79_v53 = vld [vmem:[%s790_s0 + $0x238] sm:$0xff] }
  0x17   :  { %v32_v47 = vld [vmem:[%s790_s0 + $0xc0] sm:$0xff]  ;;  %v141_v51 = vld [vmem:[%s790_s0 + $0x428] sm:$0xff]  ;;  %v203_v52 = vmax.f32 %v202_v41, %v78_v36  ;;  %283 = vst [vmem:[%s791_s1 + $0x18] sm:$0xff] %v183_v43  ;;  %v110_v56 = vld [vmem:[%s790_s0 + $0x330] sm:$0xff] }
  0x18   :  { %v48_v48 = vld [vmem:[%s790_s0 + $0x140] sm:$0xff]  ;;  %v190_v49 = vmax.f32 %v189_v38, %v124_v33  ;;  %v216_v54 = vmax.f32 %v16_v46, %v32_v47  ;;  %v197_v55 = vmax.f32 %v196_v44, %v109_v39  ;;  %v95_v57 = vld [vmem:[%s790_s0 + $0x2b8] sm:$0xff]  ;;  %v210_v58 = vmax.f32 %v209_v45, %v63_v42  ;;  %v17_v63 = vld [vmem:[%s790_s0 + $0x48] sm:$0xff] }
  0x19   :  { %v64_v59 = vld [vmem:[%s790_s0 + $0x1c0] sm:$0xff]  ;;  %v204_v61 = vmax.f32 %v203_v52, %v94_v40  ;;  %v33_v0 = vld [vmem:[%s790_s0 + $0xc8] sm:$0xff]  ;;  %v126_v3 = vld [vmem:[%s790_s0 + $0x3b0] sm:$0xff] }
  0x1a   :  { %v191_v60 = vmax.f32 %v190_v49, %v140_v34  ;;  %v217_v62 = vmax.f32 %v216_v54, %v48_v48  ;;  %v49_v1 = vld [vmem:[%s790_s0 + $0x148] sm:$0xff]  ;;  %v198_v2 = vmax.f32 %v197_v55, %v125_v50  ;;  %v142_v4 = vld [vmem:[%s790_s0 + $0x430] sm:$0xff]  ;;  %v211_v5 = vmax.f32 %v210_v58, %v79_v53  ;;  %v80_v6 = vld [vmem:[%s790_s0 + $0x240] sm:$0xff] }
  0x1b   :  { %v224_v7 = vmax.f32 %v17_v63, %v33_v0  ;;  %v205_v8 = vmax.f32 %v204_v61, %v110_v56  ;;  %v111_v9 = vld [vmem:[%s790_s0 + $0x338] sm:$0xff]  ;;  %v96_v10 = vld [vmem:[%s790_s0 + $0x2c0] sm:$0xff]  ;;  %v65_v12 = vld [vmem:[%s790_s0 + $0x1c8] sm:$0xff] }
  0x1c   :  { %284 = vst [vmem:[%s791_s1 + $0x20] sm:$0xff] %v191_v60  ;;  %v218_v11 = vmax.f32 %v217_v62, %v64_v59  ;;  %v199_v13 = vmax.f32 %v198_v2, %v141_v51  ;;  %v212_v14 = vmax.f32 %v211_v5, %v95_v57  ;;  %v18_v16 = vld [vmem:[%s790_s0 + $0x50] sm:$0xff]  ;;  %v127_v20 = vld [vmem:[%s790_s0 + $0x3b8] sm:$0xff]  ;;  %v81_v23 = vld [vmem:[%s790_s0 + $0x248] sm:$0xff] }
  0x1d   :  { %v225_v15 = vmax.f32 %v224_v7, %v49_v1  ;;  %v34_v17 = vld [vmem:[%s790_s0 + $0xd0] sm:$0xff]  ;;  %v206_v19 = vmax.f32 %v205_v8, %v126_v3  ;;  %v143_v21 = vld [vmem:[%s790_s0 + $0x438] sm:$0xff]  ;;  %v112_v26 = vld [vmem:[%s790_s0 + $0x340] sm:$0xff] }
  0x1e   :  { %v50_v18 = vld [vmem:[%s790_s0 + $0x150] sm:$0xff]  ;;  %v219_v22 = vmax.f32 %v218_v11, %v80_v6  ;;  %v232_v24 = vmax.f32 %v18_v16, %v34_v17  ;;  %285 = vst [vmem:[%s791_s1 + $0x28] sm:$0xff] %v199_v13  ;;  %v213_v25 = vmax.f32 %v212_v14, %v111_v9  ;;  %v97_v27 = vld [vmem:[%s790_s0 + $0x2c8] sm:$0xff]  ;;  %v19_v33 = vld [vmem:[%s790_s0 + $0x58] sm:$0xff] }
  0x1f   :  { %v226_v28 = vmax.f32 %v225_v15, %v65_v12  ;;  %v66_v29 = vld [vmem:[%s790_s0 + $0x1d0] sm:$0xff]  ;;  %v207_v30 = vmax.f32 %v206_v19, %v142_v4  ;;  %v35_v34 = vld [vmem:[%s790_s0 + $0xd8] sm:$0xff]  ;;  %v128_v37 = vld [vmem:[%s790_s0 + $0x3c0] sm:$0xff] }
  0x20   :  { %v220_v31 = vmax.f32 %v219_v22, %v96_v10  ;;  %v233_v32 = vmax.f32 %v232_v24, %v50_v18  ;;  %v51_v35 = vld [vmem:[%s790_s0 + $0x158] sm:$0xff]  ;;  %v214_v36 = vmax.f32 %v213_v25, %v127_v20  ;;  %v144_v38 = vld [vmem:[%s790_s0 + $0x440] sm:$0xff]  ;;  %v82_v40 = vld [vmem:[%s790_s0 + $0x250] sm:$0xff]  ;;  %v240_v41 = vmax.f32 %v19_v33, %v35_v34 }
  0x21   :  { %v227_v39 = vmax.f32 %v226_v28, %v81_v23  ;;  %286 = vst [vmem:[%s791_s1 + $0x30] sm:$0xff] %v207_v30  ;;  %v113_v43 = vld [vmem:[%s790_s0 + $0x348] sm:$0xff]  ;;  %v98_v44 = vld [vmem:[%s790_s0 + $0x2d0] sm:$0xff]  ;;  %v67_v46 = vld [vmem:[%s790_s0 + $0x1d8] sm:$0xff] }
  0x22   :  { %v221_v42 = vmax.f32 %v220_v31, %v112_v26  ;;  %v234_v45 = vmax.f32 %v233_v32, %v66_v29  ;;  %v215_v47 = vmax.f32 %v214_v36, %v143_v21  ;;  %v241_v49 = vmax.f32 %v240_v41, %v51_v35  ;;  %v20_v50 = vld [vmem:[%s790_s0 + $0x60] sm:$0xff]  ;;  %v129_v54 = vld [vmem:[%s790_s0 + $0x3c8] sm:$0xff]  ;;  %v83_v57 = vld [vmem:[%s790_s0 + $0x258] sm:$0xff] }
  0x23   :  { %v228_v48 = vmax.f32 %v227_v39, %v97_v27  ;;  %v36_v51 = vld [vmem:[%s790_s0 + $0xe0] sm:$0xff]  ;;  %v145_v55 = vld [vmem:[%s790_s0 + $0x448] sm:$0xff]  ;;  %v114_v60 = vld [vmem:[%s790_s0 + $0x350] sm:$0xff] }
  0x24   :  { %v52_v52 = vld [vmem:[%s790_s0 + $0x160] sm:$0xff]  ;;  %v222_v53 = vmax.f32 %v221_v42, %v128_v37  ;;  %v235_v56 = vmax.f32 %v234_v45, %v82_v40  ;;  %v248_v58 = vmax.f32 %v20_v50, %v36_v51  ;;  %287 = vst [vmem:[%s791_s1 + $0x38] sm:$0xff] %v215_v47  ;;  %v99_v61 = vld [vmem:[%s790_s0 + $0x2d8] sm:$0xff]  ;;  %v242_v62 = vmax.f32 %v241_v49, %v67_v46  ;;  %v21_v3 = vld [vmem:[%s790_s0 + $0x68] sm:$0xff] }
  0x25   :  { %v229_v59 = vmax.f32 %v228_v48, %v113_v43  ;;  %v68_v63 = vld [vmem:[%s790_s0 + $0x1e0] sm:$0xff]  ;;  %v37_v4 = vld [vmem:[%s790_s0 + $0xe8] sm:$0xff]  ;;  %v130_v7 = vld [vmem:[%s790_s0 + $0x3d0] sm:$0xff] }
  0x26   :  { %v223_v0 = vmax.f32 %v222_v53, %v144_v38  ;;  %v236_v1 = vmax.f32 %v235_v56, %v98_v44  ;;  %v249_v2 = vmax.f32 %v248_v58, %v52_v52  ;;  %v53_v5 = vld [vmem:[%s790_s0 + $0x168] sm:$0xff]  ;;  %v146_v8 = vld [vmem:[%s790_s0 + $0x450] sm:$0xff]  ;;  %v243_v9 = vmax.f32 %v242_v62, %v83_v57  ;;  %v84_v10 = vld [vmem:[%s790_s0 + $0x260] sm:$0xff] }
  0x27   :  { %v230_v6 = vmax.f32 %v229_v59, %v129_v54  ;;  %v256_v11 = vmax.f32 %v21_v3, %v37_v4  ;;  %v115_v13 = vld [vmem:[%s790_s0 + $0x358] sm:$0xff]  ;;  %v100_v14 = vld [vmem:[%s790_s0 + $0x2e0] sm:$0xff]  ;;  %v69_v16 = vld [vmem:[%s790_s0 + $0x1e8] sm:$0xff] }
  0x28   :  { %288 = vst [vmem:[%s791_s1 + $0x40] sm:$0xff] %v223_v0  ;;  %v237_v12 = vmax.f32 %v236_v1, %v114_v60  ;;  %v250_v15 = vmax.f32 %v249_v2, %v68_v63  ;;  %v244_v18 = vmax.f32 %v243_v9, %v99_v61  ;;  %v22_v20 = vld [vmem:[%s790_s0 + $0x70] sm:$0xff]  ;;  %v131_v24 = vld [vmem:[%s790_s0 + $0x3d8] sm:$0xff]  ;;  %v85_v27 = vld [vmem:[%s790_s0 + $0x268] sm:$0xff] }
  0x29   :  { %v231_v17 = vmax.f32 %v230_v6, %v145_v55  ;;  %v257_v19 = vmax.f32 %v256_v11, %v53_v5  ;;  %v38_v21 = vld [vmem:[%s790_s0 + $0xf0] sm:$0xff]  ;;  %v147_v25 = vld [vmem:[%s790_s0 + $0x458] sm:$0xff]  ;;  %v116_v30 = vld [vmem:[%s790_s0 + $0x360] sm:$0xff] }
  0x2a   :  { %v54_v22 = vld [vmem:[%s790_s0 + $0x170] sm:$0xff]  ;;  %v238_v23 = vmax.f32 %v237_v12, %v130_v7  ;;  %v251_v26 = vmax.f32 %v250_v15, %v84_v10  ;;  %v264_v28 = vmax.f32 %v22_v20, %v38_v21  ;;  %v245_v29 = vmax.f32 %v244_v18, %v115_v13  ;;  %v101_v31 = vld [vmem:[%s790_s0 + $0x2e8] sm:$0xff]  ;;  %v23_v37 = vld [vmem:[%s790_s0 + $0x78] sm:$0xff] }
  0x2b   :  { %289 = vst [vmem:[%s791_s1 + $0x48] sm:$0xff] %v231_v17  ;;  %v258_v32 = vmax.f32 %v257_v19, %v69_v16  ;;  %v70_v33 = vld [vmem:[%s790_s0 + $0x1f0] sm:$0xff]  ;;  %v39_v38 = vld [vmem:[%s790_s0 + $0xf8] sm:$0xff]  ;;  %v132_v41 = vld [vmem:[%s790_s0 + $0x3e0] sm:$0xff] }
  0x2c   :  { %v239_v34 = vmax.f32 %v238_v23, %v146_v8  ;;  %v252_v35 = vmax.f32 %v251_v26, %v100_v14  ;;  %v265_v36 = vmax.f32 %v264_v28, %v54_v22  ;;  %v55_v39 = vld [vmem:[%s790_s0 + $0x178] sm:$0xff]  ;;  %v246_v40 = vmax.f32 %v245_v29, %v131_v24  ;;  %v86_v43 = vld [vmem:[%s790_s0 + $0x270] sm:$0xff]  ;;  %v117_v46 = vld [vmem:[%s790_s0 + $0x368] sm:$0xff] }
  0x2d   :  { %v259_v42 = vmax.f32 %v258_v32, %v85_v27  ;;  %v272_v44 = vmax.f32 %v23_v37, %v39_v38  ;;  %v71_v48 = vld [vmem:[%s790_s0 + $0x1f8] sm:$0xff]  ;;  %v148_v50 = vld [vmem:[%s790_s0 + $0x460] sm:$0xff]  ;;  %v102_v52 = vld [vmem:[%s790_s0 + $0x2f0] sm:$0xff] }
  0x2e   :  { %290 = vst [vmem:[%s791_s1 + $0x50] sm:$0xff] %v239_v34  ;;  %v253_v45 = vmax.f32 %v252_v35, %v116_v30  ;;  %v266_v47 = vmax.f32 %v265_v36, %v70_v33  ;;  %v247_v49 = vmax.f32 %v246_v40, %v147_v25  ;;  %v133_v55 = vld [vmem:[%s790_s0 + $0x3e8] sm:$0xff]  ;;  %v87_v57 = vld [vmem:[%s790_s0 + $0x278] sm:$0xff]  ;;  %v118_v59 = vld [vmem:[%s790_s0 + $0x370] sm:$0xff] }
  0x2f   :  { %v260_v51 = vmax.f32 %v259_v42, %v101_v31  ;;  %v273_v53 = vmax.f32 %v272_v44, %v55_v39  ;;  %v149_v62 = vld [vmem:[%s790_s0 + $0x468] sm:$0xff]  ;;  %v103_v0 = vld [vmem:[%s790_s0 + $0x2f8] sm:$0xff]  ;;  %v134_v2 = vld [vmem:[%s790_s0 + $0x3f0] sm:$0xff] }
  0x30   :  { %v254_v54 = vmax.f32 %v253_v45, %v132_v41  ;;  %v267_v56 = vmax.f32 %v266_v47, %v86_v43  ;;  %291 = vst [vmem:[%s791_s1 + $0x58] sm:$0xff] %v247_v49  ;;  %v119_v5 = vld [vmem:[%s790_s0 + $0x378] sm:$0xff]  ;;  %v150_v7 = vld [vmem:[%s790_s0 + $0x470] sm:$0xff] }
  0x31   :  { %v261_v58 = vmax.f32 %v260_v51, %v117_v46  ;;  %v274_v60 = vmax.f32 %v273_v53, %v71_v48  ;;  %v135_v10 = vld [vmem:[%s790_s0 + $0x3f8] sm:$0xff] }
  0x32   :  { %v255_v61 = vmax.f32 %v254_v54, %v148_v50  ;;  %v268_v63 = vmax.f32 %v267_v56, %v102_v52  ;;  %v151_v13 = vld [vmem:[%s790_s0 + $0x478] sm:$0xff] }
  0x33   :  { %v262_v1 = vmax.f32 %v261_v58, %v133_v55  ;;  %v275_v3 = vmax.f32 %v274_v60, %v87_v57 }
  0x34   :  { %292 = vst [vmem:[%s791_s1 + $0x60] sm:$0xff] %v255_v61  ;;  %v269_v4 = vmax.f32 %v268_v63, %v118_v59 }
  0x35   :  { %v263_v6 = vmax.f32 %v262_v1, %v149_v62  ;;  %v276_v8 = vmax.f32 %v275_v3, %v103_v0 }
  0x36   :  { %v270_v9 = vmax.f32 %v269_v4, %v134_v2 }
  0x37   :  { %293 = vst [vmem:[%s791_s1 + $0x68] sm:$0xff] %v263_v6  ;;  %v277_v11 = vmax.f32 %v276_v8, %v119_v5 }
  0x38   :  { %v271_v12 = vmax.f32 %v270_v9, %v150_v7 }
  0x39   :  { %v278_v14 = vmax.f32 %v277_v11, %v135_v10 }
  0x3a   :  { %294 = vst [vmem:[%s791_s1 + $0x70] sm:$0xff] %v271_v12 }
  0x3b   :  { %v279_v15 = vmax.f32 %v278_v14, %v151_v13 }
  0x3d   :  { %295 = vst [vmem:[%s791_s1 + $0x78] sm:$0xff] %v279_v15 }

// kernel: densenet121_forward.188
= control target key start
LH: loop header
LB: loop body
LE: loop exit
PB: predicated region body
PF: predicated region fallthrough
CT: control target
= control target key end

     0   :  { %s1557_s15 = smov 0   ;;  %s1559_s16 = smov 0   ;;  %s1787_s0 = inlined_call_operand.vmem [shape: bf16[512,256], index: 0, kind: input, shape index: {}]   ;;  %s1788_s1 = inlined_call_operand.vmem [shape: bf16[256,128], index: 1, kind: input, shape index: {}]   ;;  %s1789_s2 = inlined_call_operand.vmem [shape: f32[1,128], index: 2, kind: input, shape index: {}]   ;;  %s1790_s3 = inlined_call_operand.vmem [shape: f32[1,128], index: 3, kind: input, shape index: {}]   ;;  %s1791_s4 = inlined_call_operand.vmem [shape: f32[512,128], index: 4, kind: output, shape index: {}]  }
   0x1   :  { %s1561_s17 = smov 0  }
   0x2 LB: > { %s33_s18 = sadd.s32 1, %s1526_s16  ;;  %p1232_p0 = scmp.ge.s32.totalorder %s1530_s17, 1  ;;  %s1530_s17 = sphi %s1561_s17, %s14_s17   ;;  %s1526_s16 = sphi %s1559_s16, %s1793_s16   ;;  %s1522_s15 = sphi %s1557_s15, %s1792_s15  }
   0x3   : > { %p35_p1 = scmp.ge.s32.totalorder %s33_s18, 2  ;;  %p224_p2 = scmp.lt.s32.totalorder %s1530_s17, 3 }
   0x5   : > { %s1795_s18 = smov (%p35_p1, %s33_s18), 0  ;;  %p225_p3 = pnand %p1232_p0, %p224_p2 }
   0x6   : > { %s1233_s21 = sshll.u32 (!%p225_p3), %s1522_s15, 5 }
   0x7   : > { %228 = sbr.rel (%p225_p3) target bundleno = 309 (0x135), region = 36  ;;  %p274_p4 = scmp.lt.s32.totalorder (!%p225_p3), %s1233_s21, 63 }
   0xc   : > { %v1444_v0 = vld [vmem:[%s1788_s1 + $0x78] sm:$0xff]   ;;  %v1446_v2 = vld [vmem:[%s1788_s1 + $0x70] sm:$0xff]   ;;  %v1448_v4 = vld [vmem:[%s1788_s1 + $0x68] sm:$0xff]   ;;  %s1797_s21 = smov (!%p274_p4, %s1233_s21), 63 }
   0xd   : > { %v1445_v1 = vld [vmem:[%s1788_s1 + $0x38] sm:$0xff]   ;;  %1291 = vmatprep.subr.bf16.mxu0 %v1444_v0  ;;  %1403 = vmatprep.subr.bf16.mxu1 %v1444_v0  ;;  %v1447_v3 = vld [vmem:[%s1788_s1 + $0x30] sm:$0xff]   ;;  %v1449_v5 = vld [vmem:[%s1788_s1 + $0x28] sm:$0xff]   ;;  %s1290_s10 = sshll.u32 %s1797_s21, 3 }
   0xe   : > { %1292 = vmatpush3.bf16.msra.mxu0 %v1445_v1  ;;  %1411 = vmatpush3.bf16.msra.mxu1 %v1445_v1  ;;  %v1450_v6 = vld [vmem:[%s1788_s1 + $0x60] sm:$0xff]   ;;  %v1452_v8 = vld [vmem:[%s1788_s1 + $0x58] sm:$0xff]   ;;  %s1610_s15 = scalar_lea.vmem %s1787_s0, %s1290_s10  ;;  %v1454_v10 = vld [vmem:[%s1788_s1 + $0x50] sm:$0xff]  }
   0xf   : > { %1293 = vmatprep.subr.bf16.mxu0 %v1446_v2  ;;  %1404 = vmatprep.subr.bf16.mxu1 %v1446_v2  ;;  %v1451_v7 = vld [vmem:[%s1788_s1 + $0x20] sm:$0xff]   ;;  %v1453_v9 = vld [vmem:[%s1788_s1 + $0x18] sm:$0xff]   ;;  %v1455_v13 = vld [vmem:[%s1788_s1 + $0x10] sm:$0xff]  }
  0x10   : > { %v1462_v11 = vld [vmem:[%s1610_s15 + $0x4] ss:$8 sps:$4 sm:$0xff]   ;;  %v1460_v18 = vld [vmem:[%s1610_s15] ss:$8 sps:$4 sm:$0xff]   ;;  %v1466_v20 = vld [vmem:[%s1610_s15 + $0x14] ss:$8 sps:$4 sm:$0xff]  }
  0x11   : > { %v1465_v12 = vld [vmem:[%s1610_s15 + $0x84] ss:$8 sps:$4 sm:$0xff]   ;;  %729 = vmatprep.mubr.bf16.mxu0 %v1462_v11  ;;  %v1463_v19 = vld [vmem:[%s1610_s15 + $0x80] ss:$8 sps:$4 sm:$0xff]   ;;  %v1468_v21 = vld [vmem:[%s1610_s15 + $0x94] ss:$8 sps:$4 sm:$0xff]  }
  0x12   : > { %1294 = vmatpush3.bf16.msra.mxu0 %v1447_v3  ;;  %1412 = vmatpush3.bf16.msra.mxu1 %v1447_v3  ;;  %v1456_v14 = vld [vmem:[%s1788_s1 + $0x48] sm:$0xff]   ;;  %v1458_v16 = vld [vmem:[%s1788_s1 + $0x40] sm:$0xff]   ;;  %v1470_v22 = vld [vmem:[%s1610_s15 + $0x10] ss:$8 sps:$4 sm:$0xff]  }
  0x13   : > { %1295 = vmatprep.subr.bf16.mxu0 %v1448_v4  ;;  %1405 = vmatprep.subr.bf16.mxu1 %v1448_v4  ;;  %v1457_v15 = vld [vmem:[%s1788_s1 + $0x8] sm:$0xff]   ;;  %v1459_v17 = vld [vmem:[%s1788_s1] sm:$0xff]   ;;  %v1471_v23 = vld [vmem:[%s1610_s15 + $0x90] ss:$8 sps:$4 sm:$0xff]  }
  0x14   : > { %793 = vmatprep.mubr.bf16.mxu1 %v1465_v12  ;;  %v1472_v24 = vld [vmem:[%s1610_s15 + $0x24] ss:$8 sps:$4 sm:$0xff]   ;;  %v1476_v26 = vld [vmem:[%s1610_s15 + $0x20] ss:$8 sps:$4 sm:$0xff]   ;;  %v1478_v28 = vld [vmem:[%s1610_s15 + $0x34] ss:$8 sps:$4 sm:$0xff]  }
  0x15   : > { %v1474_v25 = vld [vmem:[%s1610_s15 + $0xa4] ss:$8 sps:$4 sm:$0xff]   ;;  %v1477_v27 = vld [vmem:[%s1610_s15 + $0xa0] ss:$8 sps:$4 sm:$0xff]   ;;  %v1480_v29 = vld [vmem:[%s1610_s15 + $0xb4] ss:$8 sps:$4 sm:$0xff]  }
  0x16   : > { %1296 = vmatpush3.bf16.msra.mxu0 %v1449_v5  ;;  %1413 = vmatpush3.bf16.msra.mxu1 %v1449_v5  ;;  %v1482_v30 = vld [vmem:[%s1610_s15 + $0x30] ss:$8 sps:$4 sm:$0xff]   ;;  %v1484_v32 = vld [vmem:[%s1610_s15 + $0x44] ss:$8 sps:$4 sm:$0xff]   ;;  %v1488_v34 = vld [vmem:[%s1610_s15 + $0x40] ss:$8 sps:$4 sm:$0xff]  }
  0x17   : > { %1297 = vmatprep.subr.bf16.mxu0 %v1450_v6  ;;  %1406 = vmatprep.subr.bf16.mxu1 %v1450_v6  ;;  %v1483_v31 = vld [vmem:[%s1610_s15 + $0xb0] ss:$8 sps:$4 sm:$0xff]   ;;  %v1486_v33 = vld [vmem:[%s1610_s15 + $0xc4] ss:$8 sps:$4 sm:$0xff]   ;;  %v1489_v35 = vld [vmem:[%s1610_s15 + $0xc0] ss:$8 sps:$4 sm:$0xff]  }
  0x18   : > { %v1490_v36 = vld [vmem:[%s1610_s15 + $0x54] ss:$8 sps:$4 sm:$0xff]   ;;  %v1494_v38 = vld [vmem:[%s1610_s15 + $0x50] ss:$8 sps:$4 sm:$0xff]   ;;  %v1496_v40 = vld [vmem:[%s1610_s15 + $0x64] ss:$8 sps:$4 sm:$0xff]  }
  0x19   : > { %v1492_v37 = vld [vmem:[%s1610_s15 + $0xd4] ss:$8 sps:$4 sm:$0xff]   ;;  %v1495_v39 = vld [vmem:[%s1610_s15 + $0xd0] ss:$8 sps:$4 sm:$0xff]   ;;  %v1498_v41 = vld [vmem:[%s1610_s15 + $0xe4] ss:$8 sps:$4 sm:$0xff]  }
  0x1a   : > { %1298 = vmatpush3.bf16.msra.mxu0 %v1451_v7  ;;  %1414 = vmatpush3.bf16.msra.mxu1 %v1451_v7  ;;  %v1500_v42 = vld [vmem:[%s1610_s15 + $0x60] ss:$8 sps:$4 sm:$0xff]   ;;  %v1502_v44 = vld [vmem:[%s1610_s15 + $0x74] ss:$8 sps:$4 sm:$0xff]   ;;  %v1506_v46 = vld [vmem:[%s1610_s15 + $0x70] ss:$8 sps:$4 sm:$0xff]  }
  0x1b   : > { %1299 = vmatprep.subr.bf16.mxu0 %v1452_v8  ;;  %1407 = vmatprep.subr.bf16.mxu1 %v1452_v8  ;;  %v1501_v43 = vld [vmem:[%s1610_s15 + $0xe0] ss:$8 sps:$4 sm:$0xff]   ;;  %v1504_v45 = vld [vmem:[%s1610_s15 + $0xf4] ss:$8 sps:$4 sm:$0xff]   ;;  %v1507_v47 = vld [vmem:[%s1610_s15 + $0xf0] ss:$8 sps:$4 sm:$0xff]   ;;  %s1684_s15 = scalar_lea.vmem %s1791_s4, %s1290_s10 }
  0x1c   : > { %v1668_v54 = vld [vmem:[%s1789_s2] ss:$0 sm:$0xff] }
  0x1d   : > { %v1673_v57 = vld [vmem:[%s1790_s3] ss:$0 sm:$0xff] }
  0x1e   : > { %1300 = vmatpush3.bf16.msra.mxu0 %v1453_v9  ;;  %1415 = vmatpush3.bf16.msra.mxu1 %v1453_v9 }
  0x1f   : > { %1301 = vmatprep.subr.bf16.mxu0 %v1454_v10  ;;  %1408 = vmatprep.subr.bf16.mxu1 %v1454_v10 }
  0x22   : > { %1302 = vmatpush3.bf16.msra.mxu0 %v1455_v13  ;;  %1416 = vmatpush3.bf16.msra.mxu1 %v1455_v13 }
  0x23   : > { %1303 = vmatprep.subr.bf16.mxu0 %v1456_v14  ;;  %1409 = vmatprep.subr.bf16.mxu1 %v1456_v14 }
  0x26   : > { %1304 = vmatpush3.bf16.msra.mxu0 %v1457_v15  ;;  %1417 = vmatpush3.bf16.msra.mxu1 %v1457_v15 }
  0x27   : > { %1305 = vmatprep.subr.bf16.mxu0 %v1458_v16  ;;  %1410 = vmatprep.subr.bf16.mxu1 %v1458_v16 }
  0x2a   : > { %1306 = vmatpush3.bf16.msra.mxu0 %v1459_v17  ;;  %1418 = vmatpush3.bf16.msra.mxu1 %v1459_v17 }
  0x2d   : > { %730 = vmatmul.mubr.bf16.vlgmr.msra.gmra.mxu0 %v1460_v18  ;;  %794 = vmatmul.mubr.bf16.vlgmr.msra.gmra.mxu1 %v1463_v19 }
  0x2e   : > { %737 = vmatprep.mubr.bf16.mxu0 %v1466_v20  ;;  %801 = vmatprep.mubr.bf16.mxu1 %v1468_v21 }
  0x35   : > { %738 = vmatmul.mubr.bf16.gmra.mxu0 %v1470_v22  ;;  %802 = vmatmul.mubr.bf16.gmra.mxu1 %v1471_v23 }
  0x36   : > { %745 = vmatprep.mubr.bf16.mxu0 %v1472_v24  ;;  %809 = vmatprep.mubr.bf16.mxu1 %v1474_v25 }
  0x3d   : > { %746 = vmatmul.mubr.bf16.gmra.mxu0 %v1476_v26  ;;  %810 = vmatmul.mubr.bf16.gmra.mxu1 %v1477_v27 }
  0x3e   : > { %753 = vmatprep.mubr.bf16.mxu0 %v1478_v28  ;;  %817 = vmatprep.mubr.bf16.mxu1 %v1480_v29 }
  0x45   : > { %754 = vmatmul.mubr.bf16.gmra.mxu0 %v1482_v30  ;;  %818 = vmatmul.mubr.bf16.gmra.mxu1 %v1483_v31 }
  0x46   : > { %761 = vmatprep.mubr.bf16.mxu0 %v1484_v32  ;;  %825 = vmatprep.mubr.bf16.mxu1 %v1486_v33 }
  0x4d   : > { %762 = vmatmul.mubr.bf16.gmra.mxu0 %v1488_v34  ;;  %826 = vmatmul.mubr.bf16.gmra.mxu1 %v1489_v35 }
  0x4e   : > { %769 = vmatprep.mubr.bf16.mxu0 %v1490_v36  ;;  %833 = vmatprep.mubr.bf16.mxu1 %v1492_v37 }
  0x55   : > { %770 = vmatmul.mubr.bf16.gmra.mxu0 %v1494_v38  ;;  %834 = vmatmul.mubr.bf16.gmra.mxu1 %v1495_v39 }
  0x56   : > { %777 = vmatprep.mubr.bf16.mxu0 %v1496_v40  ;;  %841 = vmatprep.mubr.bf16.mxu1 %v1498_v41 }
  0x5d   : > { %778 = vmatmul.mubr.bf16.gmra.mxu0 %v1500_v42  ;;  %842 = vmatmul.mubr.bf16.gmra.mxu1 %v1501_v43 }
  0x5e   : > { %785 = vmatprep.mubr.bf16.mxu0 %v1502_v44  ;;  %849 = vmatprep.mubr.bf16.mxu1 %v1504_v45 }
  0x65   : > { %786 = vmatmul.mubr.bf16.gmra.mxu0 %v1506_v46  ;;  %850 = vmatmul.mubr.bf16.gmra.mxu1 %v1507_v47 }
  0xed   : > { %v1307_v48 = vpop.f32.mrf.mxu0  ;;  %v1355_v49 = vpop.f32.mrf.mxu1 }
  0xef   : > { %v1308_v50 = vpop.f32.mrf.mxu0  ;;  %v1356_v51 = vpop.f32.mrf.mxu1 }
  0xf0   : > { %v1309_v52 = vadd.f32 %v1308_v50, %v1307_v48  ;;  %v1357_v53 = vadd.f32 %v1356_v51, %v1355_v49 }
  0xf1   : > { %v1310_v55 = vpop.f32.mrf.mxu0  ;;  %v1358_v56 = vpop.f32.mrf.mxu1 }
  0xf2   : > { %v964_v60 = vmul.f32 %v1309_v52, %v1668_v54  ;;  %v980_v61 = vmul.f32 %v1357_v53, %v1668_v54 }
  0xf3   : > { %v1311_v58 = vpop.f32.mrf.mxu0  ;;  %v1359_v59 = vpop.f32.mrf.mxu1 }
  0xf4   : > { %v1312_v62 = vadd.f32 %v1311_v58, %v1310_v55  ;;  %v1360_v63 = vadd.f32 %v1359_v59, %v1358_v56  ;;  %v1003_v2 = vadd.f32 %v1673_v57, %v964_v60  ;;  %v1019_v3 = vadd.f32 %v1673_v57, %v980_v61 }
  0xf5   : > { %v1313_v0 = vpop.f32.mrf.mxu0  ;;  %v1361_v1 = vpop.f32.mrf.mxu1 }
  0xf6   : > { %v1035_v6 = vmax.f32 %v1003_v2, 0.0  ;;  %v1051_v7 = vmax.f32 %v1019_v3, 0.0  ;;  %v965_v8 = vmul.f32 %v1312_v62, %v1668_v54  ;;  %v981_v9 = vmul.f32 %v1360_v63, %v1668_v54 }
  0xf7   : > { %v1314_v4 = vpop.f32.mrf.mxu0  ;;  %v1362_v5 = vpop.f32.mrf.mxu1 }
  0xf8   : > { %v1315_v10 = vadd.f32 %v1314_v4, %v1313_v0  ;;  %v1363_v11 = vadd.f32 %v1362_v5, %v1361_v1  ;;  %1067 = vst [vmem:[%s1684_s15] sm:$0xff] %v1035_v6  ;;  %1083 = vst [vmem:[%s1684_s15 + $0x80] sm:$0xff] %v1051_v7  ;;  %v1004_v14 = vadd.f32 %v1673_v57, %v965_v8 }
  0xf9   : > { %v1316_v12 = vpop.f32.mrf.mxu0  ;;  %v1364_v13 = vpop.f32.mrf.mxu1  ;;  %v1020_v15 = vadd.f32 %v1673_v57, %v981_v9 }
  0xfa   : > { %v1036_v18 = vmax.f32 %v1004_v14, 0.0  ;;  %v966_v22 = vmul.f32 %v1315_v10, %v1668_v54  ;;  %v982_v23 = vmul.f32 %v1363_v11, %v1668_v54 }
  0xfb   : > { %v1317_v16 = vpop.f32.mrf.mxu0  ;;  %v1365_v17 = vpop.f32.mrf.mxu1  ;;  %v1052_v19 = vmax.f32 %v1020_v15, 0.0 }
  0xfc   : > { %v1318_v20 = vadd.f32 %v1317_v16, %v1316_v12  ;;  %v1366_v21 = vadd.f32 %v1365_v17, %v1364_v13  ;;  %1068 = vst [vmem:[%s1684_s15 + $0x8] sm:$0xff] %v1036_v18  ;;  %v1005_v26 = vadd.f32 %v1673_v57, %v966_v22  ;;  %v1021_v27 = vadd.f32 %v1673_v57, %v982_v23 }
  0xfd   : > { %v1319_v24 = vpop.f32.mrf.mxu0  ;;  %v1367_v25 = vpop.f32.mrf.mxu1  ;;  %1084 = vst [vmem:[%s1684_s15 + $0x88] sm:$0xff] %v1052_v19 }
  0xfe   : > { %v967_v30 = vmul.f32 %v1318_v20, %v1668_v54  ;;  %v983_v31 = vmul.f32 %v1366_v21, %v1668_v54  ;;  %v1037_v34 = vmax.f32 %v1005_v26, 0.0  ;;  %v1053_v35 = vmax.f32 %v1021_v27, 0.0 }
  0xff   : > { %v1320_v28 = vpop.f32.mrf.mxu0  ;;  %v1368_v29 = vpop.f32.mrf.mxu1 }
 0x100   : > { %v1321_v32 = vadd.f32 %v1320_v28, %v1319_v24  ;;  %v1369_v33 = vadd.f32 %v1368_v29, %v1367_v25  ;;  %v1006_v38 = vadd.f32 %v1673_v57, %v967_v30  ;;  %v1022_v39 = vadd.f32 %v1673_v57, %v983_v31  ;;  %1069 = vst [vmem:[%s1684_s15 + $0x10] sm:$0xff] %v1037_v34 }
 0x101   : > { %v1322_v36 = vpop.f32.mrf.mxu0  ;;  %v1370_v37 = vpop.f32.mrf.mxu1  ;;  %1085 = vst [vmem:[%s1684_s15 + $0x90] sm:$0xff] %v1053_v35 }
 0x102   : > { %v1038_v42 = vmax.f32 %v1006_v38, 0.0  ;;  %v1054_v43 = vmax.f32 %v1022_v39, 0.0  ;;  %v968_v44 = vmul.f32 %v1321_v32, %v1668_v54  ;;  %v984_v45 = vmul.f32 %v1369_v33, %v1668_v54 }
 0x103   : > { %v1323_v40 = vpop.f32.mrf.mxu0  ;;  %v1371_v41 = vpop.f32.mrf.mxu1 }
 0x104   : > { %v1324_v46 = vadd.f32 %v1323_v40, %v1322_v36  ;;  %v1372_v47 = vadd.f32 %v1371_v41, %v1370_v37  ;;  %1070 = vst [vmem:[%s1684_s15 + $0x18] sm:$0xff] %v1038_v42  ;;  %1086 = vst [vmem:[%s1684_s15 + $0x98] sm:$0xff] %v1054_v43  ;;  %v1007_v50 = vadd.f32 %v1673_v57, %v968_v44 }
 0x105   : > { %v1325_v48 = vpop.f32.mrf.mxu0  ;;  %v1373_v49 = vpop.f32.mrf.mxu1  ;;  %v1023_v51 = vadd.f32 %v1673_v57, %v984_v45 }
 0x106   : > { %v1039_v55 = vmax.f32 %v1007_v50, 0.0  ;;  %v969_v60 = vmul.f32 %v1324_v46, %v1668_v54  ;;  %v985_v61 = vmul.f32 %v1372_v47, %v1668_v54 }
 0x107   : > { %v1326_v52 = vpop.f32.mrf.mxu0  ;;  %v1374_v53 = vpop.f32.mrf.mxu1  ;;  %v1055_v56 = vmax.f32 %v1023_v51, 0.0 }
 0x108   : > { %v1327_v58 = vadd.f32 %v1326_v52, %v1325_v48  ;;  %v1375_v59 = vadd.f32 %v1374_v53, %v1373_v49  ;;  %1071 = vst [vmem:[%s1684_s15 + $0x20] sm:$0xff] %v1039_v55  ;;  %v1008_v0 = vadd.f32 %v1673_v57, %v969_v60  ;;  %v1024_v1 = vadd.f32 %v1673_v57, %v985_v61 }
 0x109   : > { %v1328_v62 = vpop.f32.mrf.mxu0  ;;  %v1376_v63 = vpop.f32.mrf.mxu1  ;;  %1087 = vst [vmem:[%s1684_s15 + $0xa0] sm:$0xff] %v1055_v56 }
 0x10a   : > { %v970_v4 = vmul.f32 %v1327_v58, %v1668_v54  ;;  %v986_v5 = vmul.f32 %v1375_v59, %v1668_v54  ;;  %v1040_v8 = vmax.f32 %v1008_v0, 0.0  ;;  %v1056_v9 = vmax.f32 %v1024_v1, 0.0 }
 0x10b   : > { %v1329_v2 = vpop.f32.mrf.mxu0  ;;  %v1377_v3 = vpop.f32.mrf.mxu1 }
 0x10c   : > { %v1330_v6 = vadd.f32 %v1329_v2, %v1328_v62  ;;  %v1378_v7 = vadd.f32 %v1377_v3, %v1376_v63  ;;  %v1009_v12 = vadd.f32 %v1673_v57, %v970_v4  ;;  %v1025_v13 = vadd.f32 %v1673_v57, %v986_v5  ;;  %1072 = vst [vmem:[%s1684_s15 + $0x28] sm:$0xff] %v1040_v8 }
 0x10d   : > { %v1331_v10 = vpop.f32.mrf.mxu0  ;;  %v1379_v11 = vpop.f32.mrf.mxu1  ;;  %1088 = vst [vmem:[%s1684_s15 + $0xa8] sm:$0xff] %v1056_v9 }
 0x10e   : > { %v1041_v16 = vmax.f32 %v1009_v12, 0.0  ;;  %v1057_v17 = vmax.f32 %v1025_v13, 0.0  ;;  %v971_v18 = vmul.f32 %v1330_v6, %v1668_v54  ;;  %v987_v19 = vmul.f32 %v1378_v7, %v1668_v54 }
 0x10f   : > { %v1332_v14 = vpop.f32.mrf.mxu0  ;;  %v1380_v15 = vpop.f32.mrf.mxu1 }
 0x110   : > { %v1333_v20 = vadd.f32 %v1332_v14, %v1331_v10  ;;  %v1381_v21 = vadd.f32 %v1380_v15, %v1379_v11  ;;  %1073 = vst [vmem:[%s1684_s15 + $0x30] sm:$0xff] %v1041_v16  ;;  %1089 = vst [vmem:[%s1684_s15 + $0xb0] sm:$0xff] %v1057_v17  ;;  %v1010_v24 = vadd.f32 %v1673_v57, %v971_v18 }
 0x111   : > { %v1334_v22 = vpop.f32.mrf.mxu0  ;;  %v1382_v23 = vpop.f32.mrf.mxu1  ;;  %v1026_v25 = vadd.f32 %v1673_v57, %v987_v19 }
 0x112   : > { %v1042_v28 = vmax.f32 %v1010_v24, 0.0  ;;  %v972_v32 = vmul.f32 %v1333_v20, %v1668_v54  ;;  %v988_v33 = vmul.f32 %v1381_v21, %v1668_v54 }
 0x113   : > { %v1335_v26 = vpop.f32.mrf.mxu0  ;;  %v1383_v27 = vpop.f32.mrf.mxu1  ;;  %v1058_v29 = vmax.f32 %v1026_v25, 0.0 }
 0x114   : > { %v1336_v30 = vadd.f32 %v1335_v26, %v1334_v22  ;;  %v1384_v31 = vadd.f32 %v1383_v27, %v1382_v23  ;;  %1074 = vst [vmem:[%s1684_s15 + $0x38] sm:$0xff] %v1042_v28  ;;  %v1011_v36 = vadd.f32 %v1673_v57, %v972_v32  ;;  %v1027_v37 = vadd.f32 %v1673_v57, %v988_v33 }
 0x115   : > { %v1337_v34 = vpop.f32.mrf.mxu0  ;;  %v1385_v35 = vpop.f32.mrf.mxu1  ;;  %1090 = vst [vmem:[%s1684_s15 + $0xb8] sm:$0xff] %v1058_v29 }
 0x116   : > { %v973_v40 = vmul.f32 %v1336_v30, %v1668_v54  ;;  %v989_v41 = vmul.f32 %v1384_v31, %v1668_v54  ;;  %v1043_v44 = vmax.f32 %v1011_v36, 0.0  ;;  %v1059_v45 = vmax.f32 %v1027_v37, 0.0 }
 0x117   : > { %v1338_v38 = vpop.f32.mrf.mxu0  ;;  %v1386_v39 = vpop.f32.mrf.mxu1 }
 0x118   : > { %v1339_v42 = vadd.f32 %v1338_v38, %v1337_v34  ;;  %v1387_v43 = vadd.f32 %v1386_v39, %v1385_v35  ;;  %v1012_v48 = vadd.f32 %v1673_v57, %v973_v40  ;;  %v1028_v49 = vadd.f32 %v1673_v57, %v989_v41  ;;  %1075 = vst [vmem:[%s1684_s15 + $0x40] sm:$0xff] %v1043_v44 }
 0x119   : > { %v1340_v46 = vpop.f32.mrf.mxu0  ;;  %v1388_v47 = vpop.f32.mrf.mxu1  ;;  %1091 = vst [vmem:[%s1684_s15 + $0xc0] sm:$0xff] %v1059_v45 }
 0x11a   : > { %v1044_v52 = vmax.f32 %v1012_v48, 0.0  ;;  %v1060_v53 = vmax.f32 %v1028_v49, 0.0  ;;  %v974_v55 = vmul.f32 %v1339_v42, %v1668_v54  ;;  %v990_v56 = vmul.f32 %v1387_v43, %v1668_v54 }
 0x11b   : > { %v1341_v50 = vpop.f32.mrf.mxu0  ;;  %v1389_v51 = vpop.f32.mrf.mxu1 }
 0x11c   : > { %v1342_v58 = vadd.f32 %v1341_v50, %v1340_v46  ;;  %v1390_v59 = vadd.f32 %v1389_v51, %v1388_v47  ;;  %1076 = vst [vmem:[%s1684_s15 + $0x48] sm:$0xff] %v1044_v52  ;;  %1092 = vst [vmem:[%s1684_s15 + $0xc8] sm:$0xff] %v1060_v53  ;;  %v1013_v62 = vadd.f32 %v1673_v57, %v974_v55 }
 0x11d   : > { %v1343_v60 = vpop.f32.mrf.mxu0  ;;  %v1391_v61 = vpop.f32.mrf.mxu1  ;;  %v1029_v63 = vadd.f32 %v1673_v57, %v990_v56 }
 0x11e   : > { %v1045_v2 = vmax.f32 %v1013_v62, 0.0  ;;  %v975_v6 = vmul.f32 %v1342_v58, %v1668_v54  ;;  %v991_v7 = vmul.f32 %v1390_v59, %v1668_v54 }
 0x11f   : > { %v1344_v0 = vpop.f32.mrf.mxu0  ;;  %v1392_v1 = vpop.f32.mrf.mxu1  ;;  %v1061_v3 = vmax.f32 %v1029_v63, 0.0 }
 0x120   : > { %v1345_v4 = vadd.f32 %v1344_v0, %v1343_v60  ;;  %v1393_v5 = vadd.f32 %v1392_v1, %v1391_v61  ;;  %1077 = vst [vmem:[%s1684_s15 + $0x50] sm:$0xff] %v1045_v2  ;;  %v1014_v10 = vadd.f32 %v1673_v57, %v975_v6  ;;  %v1030_v11 = vadd.f32 %v1673_v57, %v991_v7 }
 0x121   : > { %v1346_v8 = vpop.f32.mrf.mxu0  ;;  %v1394_v9 = vpop.f32.mrf.mxu1  ;;  %1093 = vst [vmem:[%s1684_s15 + $0xd0] sm:$0xff] %v1061_v3 }
 0x122   : > { %v976_v14 = vmul.f32 %v1345_v4, %v1668_v54  ;;  %v992_v15 = vmul.f32 %v1393_v5, %v1668_v54  ;;  %v1046_v18 = vmax.f32 %v1014_v10, 0.0  ;;  %v1062_v19 = vmax.f32 %v1030_v11, 0.0 }
 0x123   : > { %v1347_v12 = vpop.f32.mrf.mxu0  ;;  %v1395_v13 = vpop.f32.mrf.mxu1 }
 0x124   : > { %v1348_v16 = vadd.f32 %v1347_v12, %v1346_v8  ;;  %v1396_v17 = vadd.f32 %v1395_v13, %v1394_v9  ;;  %v1015_v22 = vadd.f32 %v1673_v57, %v976_v14  ;;  %v1031_v23 = vadd.f32 %v1673_v57, %v992_v15  ;;  %1078 = vst [vmem:[%s1684_s15 + $0x58] sm:$0xff] %v1046_v18 }
 0x125   : > { %v1349_v20 = vpop.f32.mrf.mxu0  ;;  %v1397_v21 = vpop.f32.mrf.mxu1  ;;  %1094 = vst [vmem:[%s1684_s15 + $0xd8] sm:$0xff] %v1062_v19 }
 0x126   : > { %v1047_v26 = vmax.f32 %v1015_v22, 0.0  ;;  %v1063_v27 = vmax.f32 %v1031_v23, 0.0  ;;  %v977_v28 = vmul.f32 %v1348_v16, %v1668_v54  ;;  %v993_v29 = vmul.f32 %v1396_v17, %v1668_v54 }
 0x127   : > { %v1350_v24 = vpop.f32.mrf.mxu0  ;;  %v1398_v25 = vpop.f32.mrf.mxu1 }
 0x128   : > { %v1351_v30 = vadd.f32 %v1350_v24, %v1349_v20  ;;  %v1399_v31 = vadd.f32 %v1398_v25, %v1397_v21  ;;  %1079 = vst [vmem:[%s1684_s15 + $0x60] sm:$0xff] %v1047_v26  ;;  %1095 = vst [vmem:[%s1684_s15 + $0xe0] sm:$0xff] %v1063_v27  ;;  %v1016_v34 = vadd.f32 %v1673_v57, %v977_v28 }
 0x129   : > { %v1352_v32 = vpop.f32.mrf.mxu0  ;;  %v1400_v33 = vpop.f32.mrf.mxu1  ;;  %v1032_v35 = vadd.f32 %v1673_v57, %v993_v29 }
 0x12a   : > { %v1048_v38 = vmax.f32 %v1016_v34, 0.0  ;;  %v978_v42 = vmul.f32 %v1351_v30, %v1668_v54  ;;  %v994_v43 = vmul.f32 %v1399_v31, %v1668_v54 }
 0x12b   : > { %v1353_v36 = vpop.f32.mrf.mxu0  ;;  %v1401_v37 = vpop.f32.mrf.mxu1  ;;  %v1064_v39 = vmax.f32 %v1032_v35, 0.0 }
 0x12c   : > { %v1354_v40 = vadd.f32 %v1353_v36, %v1352_v32  ;;  %v1402_v41 = vadd.f32 %v1401_v37, %v1400_v33  ;;  %1080 = vst [vmem:[%s1684_s15 + $0x68] sm:$0xff] %v1048_v38  ;;  %v1017_v44 = vadd.f32 %v1673_v57, %v978_v42  ;;  %v1033_v45 = vadd.f32 %v1673_v57, %v994_v43 }
 0x12d   : > { %1096 = vst [vmem:[%s1684_s15 + $0xe8] sm:$0xff] %v1064_v39 }
 0x12e   : > { %v979_v46 = vmul.f32 %v1354_v40, %v1668_v54  ;;  %v995_v47 = vmul.f32 %v1402_v41, %v1668_v54  ;;  %v1049_v48 = vmax.f32 %v1017_v44, 0.0  ;;  %v1065_v49 = vmax.f32 %v1033_v45, 0.0 }
 0x130   : > { %v1018_v50 = vadd.f32 %v1673_v57, %v979_v46  ;;  %v1034_v51 = vadd.f32 %v1673_v57, %v995_v47  ;;  %1081 = vst [vmem:[%s1684_s15 + $0x70] sm:$0xff] %v1049_v48  ;;  %1097 = vst [vmem:[%s1684_s15 + $0xf0] sm:$0xff] %v1065_v49 }
 0x132   : > { %v1050_v52 = vmax.f32 %v1018_v50, 0.0  ;;  %v1066_v53 = vmax.f32 %v1034_v51, 0.0 }
 0x134   : > { %1082 = vst [vmem:[%s1684_s15 + $0x78] sm:$0xff] %v1050_v52  ;;  %1098 = vst [vmem:[%s1684_s15 + $0xf8] sm:$0xff] %v1066_v53 }
 0x135 PF: > { %s14_s17 = sadd.s32 1, %s1530_s17   ;;  %s1792_s15 = smov %s1526_s16 }
 0x136   : > { %p11_p5 = scmp.ge.s32.totalorder %s14_s17, 4   ;;  %s1793_s16 = smov %s1795_s18 }
 0x138   :  { %13 = sbr.rel (!%p11_p5) target bundleno = 2 (0x2), region = 83 }

// kernel: densenet121_forward.190
= control target key start
LH: loop header
LB: loop body
LE: loop exit
PB: predicated region body
PF: predicated region fallthrough
CT: control target
= control target key end

     0   :  { %s254_s0 = inlined_call_operand.vmem [shape: f32[128,128], index: 0, kind: input, shape index: {}]   ;;  %s255_s1 = inlined_call_operand.vmem [shape: f32[1,128], index: 1, kind: input, shape index: {}]   ;;  %s256_s2 = inlined_call_operand.vmem [shape: f32[1,128], index: 2, kind: input, shape index: {}]   ;;  %s257_s3 = inlined_call_operand.vmem [shape: f32[128,128], index: 3, kind: output, shape index: {}]  }
   0x1   :  { %v14_v0 = vld [vmem:[%s254_s0] sm:$0xff]  ;;  %v15_v4 = vld [vmem:[%s254_s0 + $0x8] sm:$0xff]  ;;  %v16_v5 = vld [vmem:[%s254_s0 + $0x10] sm:$0xff] }
   0x2   :  { %v112_v1 = vld [vmem:[%s255_s1] ss:$0 sm:$0xff]  ;;  %v17_v6 = vld [vmem:[%s254_s0 + $0x18] sm:$0xff]  ;;  %v19_v11 = vld [vmem:[%s254_s0 + $0x28] sm:$0xff] }
   0x3   :  { %v143_v2 = vld [vmem:[%s256_s2] ss:$0 sm:$0xff]  ;;  %v37_v3 = vmul.f32 %v112_v1, %v14_v0  ;;  %v38_v7 = vmul.f32 %v112_v1, %v15_v4  ;;  %v39_v8 = vmul.f32 %v112_v1, %v16_v5  ;;  %v40_v9 = vmul.f32 %v112_v1, %v17_v6  ;;  %v20_v12 = vld [vmem:[%s254_s0 + $0x30] sm:$0xff]  ;;  %v21_v17 = vld [vmem:[%s254_s0 + $0x38] sm:$0xff] }
   0x4   :  { %v18_v10 = vld [vmem:[%s254_s0 + $0x20] sm:$0xff]  ;;  %v42_v15 = vmul.f32 %v112_v1, %v19_v11  ;;  %v43_v16 = vmul.f32 %v112_v1, %v20_v12  ;;  %v44_v21 = vmul.f32 %v112_v1, %v21_v17  ;;  %v23_v27 = vld [vmem:[%s254_s0 + $0x48] sm:$0xff]  ;;  %v24_v28 = vld [vmem:[%s254_s0 + $0x50] sm:$0xff] }
   0x5   :  { %v60_v13 = vadd.f32 %v143_v2, %v37_v3  ;;  %v41_v14 = vmul.f32 %v112_v1, %v18_v10  ;;  %v61_v18 = vadd.f32 %v143_v2, %v38_v7  ;;  %v62_v19 = vadd.f32 %v143_v2, %v39_v8  ;;  %v22_v22 = vld [vmem:[%s254_s0 + $0x40] sm:$0xff]  ;;  %v25_v29 = vld [vmem:[%s254_s0 + $0x58] sm:$0xff]  ;;  %v27_v35 = vld [vmem:[%s254_s0 + $0x68] sm:$0xff] }
   0x6   :  { %v63_v20 = vadd.f32 %v143_v2, %v40_v9  ;;  %v65_v25 = vadd.f32 %v143_v2, %v42_v15  ;;  %v66_v26 = vadd.f32 %v143_v2, %v43_v16  ;;  %v67_v33 = vadd.f32 %v143_v2, %v44_v21  ;;  %v26_v34 = vld [vmem:[%s254_s0 + $0x60] sm:$0xff]  ;;  %v28_v36 = vld [vmem:[%s254_s0 + $0x70] sm:$0xff]  ;;  %v29_v41 = vld [vmem:[%s254_s0 + $0x78] sm:$0xff] }
   0x7   :  { %v76_v23 = vmax.f32 %v60_v13, 0.0  ;;  %v64_v24 = vadd.f32 %v143_v2, %v41_v14  ;;  %v77_v30 = vmax.f32 %v61_v18, 0.0  ;;  %v78_v31 = vmax.f32 %v62_v19, 0.0 }
   0x8   :  { %v79_v32 = vmax.f32 %v63_v20, 0.0  ;;  %v81_v38 = vmax.f32 %v65_v25, 0.0  ;;  %v82_v39 = vmax.f32 %v66_v26, 0.0  ;;  %v45_v40 = vmul.f32 %v112_v1, %v22_v22 }
   0x9   :  { %92 = vst [vmem:[%s257_s3] sm:$0xff] %v76_v23  ;;  %v80_v37 = vmax.f32 %v64_v24, 0.0  ;;  %93 = vst [vmem:[%s257_s3 + $0x8] sm:$0xff] %v77_v30  ;;  %v83_v42 = vmax.f32 %v67_v33, 0.0  ;;  %v46_v43 = vmul.f32 %v112_v1, %v23_v27  ;;  %v47_v44 = vmul.f32 %v112_v1, %v24_v28 }
   0xa   :  { %94 = vst [vmem:[%s257_s3 + $0x10] sm:$0xff] %v78_v31  ;;  %95 = vst [vmem:[%s257_s3 + $0x18] sm:$0xff] %v79_v32  ;;  %v48_v45 = vmul.f32 %v112_v1, %v25_v29  ;;  %v68_v46 = vadd.f32 %v143_v2, %v45_v40  ;;  %v49_v47 = vmul.f32 %v112_v1, %v26_v34 }
   0xb   :  { %96 = vst [vmem:[%s257_s3 + $0x20] sm:$0xff] %v80_v37  ;;  %97 = vst [vmem:[%s257_s3 + $0x28] sm:$0xff] %v81_v38  ;;  %v50_v48 = vmul.f32 %v112_v1, %v27_v35  ;;  %v51_v49 = vmul.f32 %v112_v1, %v28_v36  ;;  %v69_v50 = vadd.f32 %v143_v2, %v46_v43 }
   0xc   :  { %98 = vst [vmem:[%s257_s3 + $0x30] sm:$0xff] %v82_v39  ;;  %99 = vst [vmem:[%s257_s3 + $0x38] sm:$0xff] %v83_v42  ;;  %v70_v51 = vadd.f32 %v143_v2, %v47_v44  ;;  %v71_v52 = vadd.f32 %v143_v2, %v48_v45  ;;  %v52_v53 = vmul.f32 %v112_v1, %v29_v41  ;;  %v84_v54 = vmax.f32 %v68_v46, 0.0 }
   0xd   :  { %v72_v55 = vadd.f32 %v143_v2, %v49_v47  ;;  %v73_v56 = vadd.f32 %v143_v2, %v50_v48  ;;  %v74_v57 = vadd.f32 %v143_v2, %v51_v49  ;;  %v85_v58 = vmax.f32 %v69_v50, 0.0 }
   0xe   :  { %v86_v59 = vmax.f32 %v70_v51, 0.0  ;;  %v87_v60 = vmax.f32 %v71_v52, 0.0  ;;  %v75_v61 = vadd.f32 %v143_v2, %v52_v53  ;;  %100 = vst [vmem:[%s257_s3 + $0x40] sm:$0xff] %v84_v54 }
   0xf   :  { %v88_v62 = vmax.f32 %v72_v55, 0.0  ;;  %v89_v63 = vmax.f32 %v73_v56, 0.0  ;;  %v90_v0 = vmax.f32 %v74_v57, 0.0  ;;  %101 = vst [vmem:[%s257_s3 + $0x48] sm:$0xff] %v85_v58 }
  0x10   :  { %102 = vst [vmem:[%s257_s3 + $0x50] sm:$0xff] %v86_v59  ;;  %103 = vst [vmem:[%s257_s3 + $0x58] sm:$0xff] %v87_v60  ;;  %v91_v1 = vmax.f32 %v75_v61, 0.0 }
  0x11   :  { %104 = vst [vmem:[%s257_s3 + $0x60] sm:$0xff] %v88_v62  ;;  %105 = vst [vmem:[%s257_s3 + $0x68] sm:$0xff] %v89_v63 }
  0x12   :  { %106 = vst [vmem:[%s257_s3 + $0x70] sm:$0xff] %v90_v0  ;;  %107 = vst [vmem:[%s257_s3 + $0x78] sm:$0xff] %v91_v1 }

// kernel: densenet121_forward.191
= control target key start
LH: loop header
LB: loop body
LE: loop exit
PB: predicated region body
PF: predicated region fallthrough
CT: control target
= control target key end

     0   :  { %s674_s1 = inlined_call_operand.vmem [shape: bf16[128,128], index: 1, kind: input, shape index: {}]   ;;  %s675_s0 = inlined_call_operand.vmem [shape: bf16[128,128], index: 0, kind: input, shape index: {}]   ;;  %s676_s2 = inlined_call_operand.vmem [shape: f32[1,128], index: 2, kind: input, shape index: {}]   ;;  %s677_s3 = inlined_call_operand.vmem [shape: f32[1,128], index: 3, kind: input, shape index: {}]   ;;  %s678_s4 = inlined_call_operand.vmem [shape: f32[128,128], index: 4, kind: output, shape index: {}]  }
   0x1   :  { %v495_v0 = vld [vmem:[%s674_s1 + $0x38] sm:$0xff]   ;;  %v496_v1 = vld [vmem:[%s674_s1 + $0x30] sm:$0xff]   ;;  %v497_v2 = vld [vmem:[%s674_s1 + $0x28] sm:$0xff]  }
   0x2   :  { %446 = vmatprep.subr.bf16.mxu0 %v495_v0  ;;  %478 = vmatprep.subr.bf16.mxu1 %v495_v0  ;;  %v498_v3 = vld [vmem:[%s674_s1 + $0x20] sm:$0xff]   ;;  %v499_v6 = vld [vmem:[%s674_s1 + $0x18] sm:$0xff]   ;;  %v500_v7 = vld [vmem:[%s674_s1 + $0x10] sm:$0xff]  }
   0x3   :  { %447 = vmatpush3.bf16.msra.mxu0 %v495_v0  ;;  %486 = vmatpush3.bf16.msra.mxu1 %v495_v0  ;;  %v503_v4 = vld [vmem:[%s675_s0] sm:$0xff]   ;;  %v501_v8 = vld [vmem:[%s674_s1 + $0x8] sm:$0xff]   ;;  %v507_v12 = vld [vmem:[%s675_s0 + $0x10] sm:$0xff]  }
   0x4   :  { %448 = vmatprep.subr.bf16.mxu0 %v496_v1  ;;  %479 = vmatprep.subr.bf16.mxu1 %v496_v1  ;;  %v504_v5 = vld [vmem:[%s675_s0 + $0x20] sm:$0xff]   ;;  %v505_v10 = vld [vmem:[%s675_s0 + $0x8] sm:$0xff]   ;;  %v508_v13 = vld [vmem:[%s675_s0 + $0x30] sm:$0xff]  }
   0x5   :  { %462 = vmatprep.mubr.bf16.mxu0 %v503_v4  ;;  %470 = vmatprep.mubr.bf16.mxu1 %v504_v5  ;;  %v502_v9 = vld [vmem:[%s674_s1] sm:$0xff]   ;;  %v506_v11 = vld [vmem:[%s675_s0 + $0x28] sm:$0xff]   ;;  %v509_v14 = vld [vmem:[%s675_s0 + $0x18] sm:$0xff]  }
   0x6   :  { %v510_v15 = vld [vmem:[%s675_s0 + $0x38] sm:$0xff]   ;;  %v587_v17 = vld [vmem:[%s676_s2] ss:$0 sm:$0xff] }
   0x7   :  { %449 = vmatpush3.bf16.msra.mxu0 %v496_v1  ;;  %487 = vmatpush3.bf16.msra.mxu1 %v496_v1  ;;  %v592_v19 = vld [vmem:[%s677_s3] ss:$0 sm:$0xff] }
   0x8   :  { %450 = vmatprep.subr.bf16.mxu0 %v497_v2  ;;  %480 = vmatprep.subr.bf16.mxu1 %v497_v2 }
   0xb   :  { %451 = vmatpush3.bf16.msra.mxu0 %v497_v2  ;;  %488 = vmatpush3.bf16.msra.mxu1 %v497_v2 }
   0xc   :  { %452 = vmatprep.subr.bf16.mxu0 %v498_v3  ;;  %481 = vmatprep.subr.bf16.mxu1 %v498_v3 }
   0xf   :  { %453 = vmatpush3.bf16.msra.mxu0 %v498_v3  ;;  %489 = vmatpush3.bf16.msra.mxu1 %v498_v3 }
  0x10   :  { %454 = vmatprep.subr.bf16.mxu0 %v499_v6  ;;  %482 = vmatprep.subr.bf16.mxu1 %v499_v6 }
  0x13   :  { %455 = vmatpush3.bf16.msra.mxu0 %v499_v6  ;;  %490 = vmatpush3.bf16.msra.mxu1 %v499_v6 }
  0x14   :  { %456 = vmatprep.subr.bf16.mxu0 %v500_v7  ;;  %483 = vmatprep.subr.bf16.mxu1 %v500_v7 }
  0x17   :  { %457 = vmatpush3.bf16.msra.mxu0 %v500_v7  ;;  %491 = vmatpush3.bf16.msra.mxu1 %v500_v7 }
  0x18   :  { %458 = vmatprep.subr.bf16.mxu0 %v501_v8  ;;  %484 = vmatprep.subr.bf16.mxu1 %v501_v8 }
  0x1b   :  { %459 = vmatpush3.bf16.msra.mxu0 %v501_v8  ;;  %492 = vmatpush3.bf16.msra.mxu1 %v501_v8 }
  0x1c   :  { %460 = vmatprep.subr.bf16.mxu0 %v502_v9  ;;  %485 = vmatprep.subr.bf16.mxu1 %v502_v9 }
  0x1f   :  { %461 = vmatpush3.bf16.msra.mxu0 %v502_v9  ;;  %493 = vmatpush3.bf16.msra.mxu1 %v502_v9 }
  0x22   :  { %463 = vmatmul.mubr.bf16.vlgmr.msra.gmra.mxu0 %v505_v10  ;;  %471 = vmatmul.mubr.bf16.vlgmr.msra.gmra.mxu1 %v506_v11 }
  0x23   :  { %466 = vmatprep.mubr.bf16.mxu0 %v507_v12  ;;  %474 = vmatprep.mubr.bf16.mxu1 %v508_v13 }
  0x2a   :  { %467 = vmatmul.mubr.bf16.gmra.mxu0 %v509_v14  ;;  %475 = vmatmul.mubr.bf16.gmra.mxu1 %v510_v15 }
  0xe2   :  { %v464_v16 = vpop.f32.mrf.mxu0  ;;  %v472_v18 = vpop.f32.mrf.mxu1 }
  0xe3   :  { %v339_v22 = vmul.f32 %v464_v16, %v587_v17  ;;  %v347_v23 = vmul.f32 %v472_v18, %v587_v17 }
  0xe4   :  { %v216_v20 = vpop.f32.mrf.mxu0  ;;  %v248_v21 = vpop.f32.mrf.mxu1 }
  0xe5   :  { %v362_v26 = vadd.f32 %v592_v19, %v339_v22  ;;  %v370_v27 = vadd.f32 %v592_v19, %v347_v23  ;;  %v337_v28 = vmul.f32 %v587_v17, %v216_v20  ;;  %v345_v29 = vmul.f32 %v587_v17, %v248_v21 }
  0xe6   :  { %v465_v24 = vpop.f32.mrf.mxu0  ;;  %v473_v25 = vpop.f32.mrf.mxu1 }
  0xe7   :  { %v378_v32 = vmax.f32 %v362_v26, 0.0  ;;  %v386_v33 = vmax.f32 %v370_v27, 0.0  ;;  %v360_v34 = vadd.f32 %v592_v19, %v337_v28  ;;  %v368_v35 = vadd.f32 %v592_v19, %v345_v29 }
  0xe8   :  { %v219_v30 = vpop.f32.mrf.mxu0  ;;  %v251_v31 = vpop.f32.mrf.mxu1  ;;  %v340_v36 = vmul.f32 %v465_v24, %v587_v17  ;;  %v348_v37 = vmul.f32 %v473_v25, %v587_v17 }
  0xe9   :  { %394 = vst [vmem:[%s678_s4 + $0x10] sm:$0xff] %v378_v32  ;;  %402 = vst [vmem:[%s678_s4 + $0x50] sm:$0xff] %v386_v33  ;;  %v376_v40 = vmax.f32 %v360_v34, 0.0  ;;  %v384_v41 = vmax.f32 %v368_v35, 0.0  ;;  %v338_v44 = vmul.f32 %v587_v17, %v219_v30  ;;  %v346_v45 = vmul.f32 %v587_v17, %v251_v31 }
  0xea   :  { %v468_v38 = vpop.f32.mrf.mxu0  ;;  %v476_v39 = vpop.f32.mrf.mxu1  ;;  %v363_v42 = vadd.f32 %v592_v19, %v340_v36  ;;  %v371_v43 = vadd.f32 %v592_v19, %v348_v37 }
  0xeb   :  { %392 = vst [vmem:[%s678_s4] sm:$0xff] %v376_v40  ;;  %400 = vst [vmem:[%s678_s4 + $0x40] sm:$0xff] %v384_v41  ;;  %v343_v48 = vmul.f32 %v468_v38, %v587_v17  ;;  %v351_v49 = vmul.f32 %v476_v39, %v587_v17  ;;  %v361_v52 = vadd.f32 %v592_v19, %v338_v44 }
  0xec   :  { %v232_v46 = vpop.f32.mrf.mxu0  ;;  %v264_v47 = vpop.f32.mrf.mxu1  ;;  %v379_v50 = vmax.f32 %v363_v42, 0.0  ;;  %v387_v51 = vmax.f32 %v371_v43, 0.0  ;;  %v369_v53 = vadd.f32 %v592_v19, %v346_v45 }
  0xed   :  { %v366_v56 = vadd.f32 %v592_v19, %v343_v48  ;;  %v374_v57 = vadd.f32 %v592_v19, %v351_v49  ;;  %v341_v58 = vmul.f32 %v587_v17, %v232_v46  ;;  %v349_v59 = vmul.f32 %v587_v17, %v264_v47 }
  0xee   :  { %v469_v54 = vpop.f32.mrf.mxu0  ;;  %v477_v55 = vpop.f32.mrf.mxu1  ;;  %395 = vst [vmem:[%s678_s4 + $0x18] sm:$0xff] %v379_v50  ;;  %403 = vst [vmem:[%s678_s4 + $0x58] sm:$0xff] %v387_v51  ;;  %v377_v60 = vmax.f32 %v361_v52, 0.0  ;;  %v385_v61 = vmax.f32 %v369_v53, 0.0 }
  0xef   :  { %v382_v0 = vmax.f32 %v366_v56, 0.0  ;;  %v390_v1 = vmax.f32 %v374_v57, 0.0  ;;  %v364_v2 = vadd.f32 %v592_v19, %v341_v58  ;;  %v372_v3 = vadd.f32 %v592_v19, %v349_v59 }
  0xf0   :  { %v235_v62 = vpop.f32.mrf.mxu0  ;;  %v267_v63 = vpop.f32.mrf.mxu1  ;;  %393 = vst [vmem:[%s678_s4 + $0x8] sm:$0xff] %v377_v60  ;;  %401 = vst [vmem:[%s678_s4 + $0x48] sm:$0xff] %v385_v61  ;;  %v344_v4 = vmul.f32 %v469_v54, %v587_v17  ;;  %v352_v5 = vmul.f32 %v477_v55, %v587_v17 }
  0xf1   :  { %398 = vst [vmem:[%s678_s4 + $0x30] sm:$0xff] %v382_v0  ;;  %406 = vst [vmem:[%s678_s4 + $0x70] sm:$0xff] %v390_v1  ;;  %v380_v6 = vmax.f32 %v364_v2, 0.0  ;;  %v388_v7 = vmax.f32 %v372_v3, 0.0  ;;  %v342_v10 = vmul.f32 %v587_v17, %v235_v62  ;;  %v350_v11 = vmul.f32 %v587_v17, %v267_v63 }
  0xf2   :  { %v367_v8 = vadd.f32 %v592_v19, %v344_v4  ;;  %v375_v9 = vadd.f32 %v592_v19, %v352_v5 }
  0xf3   :  { %396 = vst [vmem:[%s678_s4 + $0x20] sm:$0xff] %v380_v6  ;;  %404 = vst [vmem:[%s678_s4 + $0x60] sm:$0xff] %v388_v7  ;;  %v365_v14 = vadd.f32 %v592_v19, %v342_v10  ;;  %v373_v15 = vadd.f32 %v592_v19, %v350_v11 }
  0xf4   :  { %v383_v12 = vmax.f32 %v367_v8, 0.0  ;;  %v391_v13 = vmax.f32 %v375_v9, 0.0 }
  0xf5   :  { %v381_v16 = vmax.f32 %v365_v14, 0.0  ;;  %v389_v17 = vmax.f32 %v373_v15, 0.0 }
  0xf6   :  { %399 = vst [vmem:[%s678_s4 + $0x38] sm:$0xff] %v383_v12  ;;  %407 = vst [vmem:[%s678_s4 + $0x78] sm:$0xff] %v391_v13 }
  0xf7   :  { %397 = vst [vmem:[%s678_s4 + $0x28] sm:$0xff] %v381_v16  ;;  %405 = vst [vmem:[%s678_s4 + $0x68] sm:$0xff] %v389_v17 }

// kernel: densenet121_forward.192
= control target key start
LH: loop header
LB: loop body
LE: loop exit
PB: predicated region body
PF: predicated region fallthrough
CT: control target
= control target key end

     0   :  { %s1265_s15 = smov 0   ;;  %s1267_s16 = smov 0   ;;  %s1632_s0 = inlined_call_operand.vmem [shape: bf16[128,1280], index: 0, kind: input, shape index: {}]   ;;  %s1633_s1 = inlined_call_operand.vmem [shape: bf16[1280,128], index: 1, kind: input, shape index: {}]   ;;  %s1634_s2 = inlined_call_operand.vmem [shape: f32[1,128], index: 2, kind: input, shape index: {}]   ;;  %s1635_s3 = inlined_call_operand.vmem [shape: f32[1,128], index: 3, kind: input, shape index: {}]   ;;  %s1636_s4 = inlined_call_operand.vmem [shape: f32[128,128], index: 4, kind: output, shape index: {}]  }
   0x1   :  { %s1269_s17 = smov 0   ;;  %s1271_s18 = smov 0  }
   0x2   :  { %s1273_s19 = smov 0  }
   0x3 LB: > { %s26_s20 = sadd.s32 1, %s1233_s18  ;;  %p49_p1 = scmp.ne.s32.totalorder %s1225_s16, %s1221_s15  ;;  %s1237_s19 = sphi %s1273_s19, %s14_s19   ;;  %s1233_s18 = sphi %s1271_s18, %s1640_s18   ;;  %s1229_s17 = sphi %s1269_s17, %s1639_s17   ;;  %s1225_s16 = sphi %s1267_s16, %s1638_s16   ;;  %s1221_s15 = sphi %s1265_s15, %s1637_s15  }
   0x4   : > { %p27_p0 = scmp.ge.s32.totalorder %s26_s20, 5  ;;  %p50_p2 = scmp.eq.s32.totalorder %s1237_s19, 0 }
   0x5   : > { %s42_s22 = sadd.s32 1, %s1225_s16  ;;  %p989_p5 = scmp.ge.s32.totalorder %s1237_s19, 5 }
   0x6   : > { %s1642_s20 = smov (%p27_p0, %s26_s20), 0  ;;  %p51_p3 = por %p50_p2, %p49_p1 }
   0x7   : > { %s38_s21 = ssub.s32 %s1233_s18, %s1642_s20  ;;  %195 = sbr.rel (%p989_p5) target bundleno = 24 (0x18), region = 24 }
   0x8   : > { %p40_p4 = scmp.eq.s32.totalorder %s38_s21, 0 }
   0xa   : > { %s1300_s23 = scalar_select %p40_p4, %s1225_s16, %s42_s22  }
   0xc   : > { %198 = sbr.rel (!%p51_p3) target bundleno = 24 (0x18), region = 28  ;;  %s200_s24 = sand.u32 (%p51_p3), 1, %s1225_s16  }
   0xd   : > { %s1037_s25 = sshll.u32 (%p51_p3), %s1233_s18, 3  ;;  %s990_s26 = sshll.u32 (%p51_p3), %s200_s24, 7 }
   0xe   : > { %s1308_s29 = scalar_lea.vmem (%p51_p3), %s1632_s0, %s1037_s25  ;;  %s202_s30 = scalar_lea.vmem (%p51_p3), [#allocation2], %s990_s26 }
   0xf   : > { %v267_v0 = vld [vmem:[%s1308_s29] sm:$0xff] (%p51_p3)  ;;  %v269_v1 = vld [vmem:[%s1308_s29 + $0x28] sm:$0xff] (%p51_p3)  ;;  %v271_v2 = vld [vmem:[%s1308_s29 + $0x50] sm:$0xff] (%p51_p3) }
  0x10   : > { %268 = vst [vmem:[%s202_s30] sm:$0xff] (%p51_p3), %v267_v0  ;;  %270 = vst [vmem:[%s202_s30 + $0x8] sm:$0xff] (%p51_p3), %v269_v1  ;;  %v273_v3 = vld [vmem:[%s1308_s29 + $0x78] sm:$0xff] (%p51_p3)  ;;  %v275_v4 = vld [vmem:[%s1308_s29 + $0xa0] sm:$0xff] (%p51_p3) }
  0x11   : > { %272 = vst [vmem:[%s202_s30 + $0x10] sm:$0xff] %v271_v2  ;;  %v277_v5 = vld [vmem:[%s1308_s29 + $0xc8] sm:$0xff]  ;;  %274 = vst [vmem:[%s202_s30 + $0x18] sm:$0xff] %v273_v3  ;;  %v279_v6 = vld [vmem:[%s1308_s29 + $0xf0] sm:$0xff] }
  0x12   : > { %276 = vst [vmem:[%s202_s30 + $0x20] sm:$0xff] %v275_v4  ;;  %278 = vst [vmem:[%s202_s30 + $0x28] sm:$0xff] %v277_v5  ;;  %v281_v7 = vld [vmem:[%s1308_s29 + $0x118] sm:$0xff]  ;;  %v283_v8 = vld [vmem:[%s1308_s29 + $0x140] sm:$0xff] }
  0x13   : > { %280 = vst [vmem:[%s202_s30 + $0x30] sm:$0xff] %v279_v6  ;;  %282 = vst [vmem:[%s202_s30 + $0x38] sm:$0xff] %v281_v7  ;;  %v285_v9 = vld [vmem:[%s1308_s29 + $0x168] sm:$0xff]  ;;  %v287_v10 = vld [vmem:[%s1308_s29 + $0x190] sm:$0xff] }
  0x14   : > { %284 = vst [vmem:[%s202_s30 + $0x40] sm:$0xff] %v283_v8  ;;  %v289_v11 = vld [vmem:[%s1308_s29 + $0x1b8] sm:$0xff]  ;;  %286 = vst [vmem:[%s202_s30 + $0x48] sm:$0xff] %v285_v9  ;;  %v291_v12 = vld [vmem:[%s1308_s29 + $0x1e0] sm:$0xff] }
  0x15   : > { %288 = vst [vmem:[%s202_s30 + $0x50] sm:$0xff] %v287_v10  ;;  %290 = vst [vmem:[%s202_s30 + $0x58] sm:$0xff] %v289_v11  ;;  %v293_v13 = vld [vmem:[%s1308_s29 + $0x208] sm:$0xff]  ;;  %v295_v14 = vld [vmem:[%s1308_s29 + $0x230] sm:$0xff] }
  0x16   : > { %292 = vst [vmem:[%s202_s30 + $0x60] sm:$0xff] %v291_v12  ;;  %294 = vst [vmem:[%s202_s30 + $0x68] sm:$0xff] %v293_v13  ;;  %v297_v15 = vld [vmem:[%s1308_s29 + $0x258] sm:$0xff] }
  0x17   : > { %296 = vst [vmem:[%s202_s30 + $0x70] sm:$0xff] %v295_v14  ;;  %298 = vst [vmem:[%s202_s30 + $0x78] sm:$0xff] %v297_v15 }
  0x18 PF: > { %p993_p6 = scmp.ge.s32.totalorder %s1237_s19, 1  ;;  %p315_p7 = scmp.lt.s32.totalorder %s1237_s19, 6 }
  0x1a   : > { %p316_p8 = pnand %p993_p6, %p315_p7 }
  0x1b   : > { %s322_s5 = sand.u32 (!%p316_p8), 1, %s1221_s15   ;;  %s995_s6 = sshll.u32 (!%p316_p8), %s1229_s17, 5 }
  0x1c   : > { %319 = sbr.rel (%p316_p8) target bundleno = 323 (0x143), region = 70  ;;  %s994_s7 = sshll.u32 (!%p316_p8), %s322_s5, 7 }
  0x1d   : > { %p367_p9 = scmp.lt.s32.totalorder (!%p316_p8), %s995_s6, 159  ;;  %s1335_s12 = scalar_lea.vmem (!%p316_p8), [#allocation2], %s994_s7 }
  0x1e   : > { %p997_p10 = scmp.ne.s32.totalorder (!%p316_p8), %s1229_s17, 0 }
  0x21   : > { %s1644_s6 = smov (!%p367_p9, %s995_s6), 159  ;;  %394 = sbr.rel (%p997_p10) target bundleno = 47 (0x2f), region = 78 }
  0x22   : > { %s996_s8 = sshll.u32 %s1644_s6, 2 }
  0x23   : > { %s1333_s11 = scalar_lea.vmem %s1633_s1, %s996_s8 }
  0x26   : > { %v1239_v16 = vmov 0.0  }
  0x27   : > { %395 = vst [vmem:[%s1636_s4] sm:$0xff] %v1239_v16  ;;  %396 = vst [vmem:[%s1636_s4 + $0x8] sm:$0xff] %v1239_v16 }
  0x28   : > { %397 = vst [vmem:[%s1636_s4 + $0x10] sm:$0xff] %v1239_v16  ;;  %398 = vst [vmem:[%s1636_s4 + $0x18] sm:$0xff] %v1239_v16 }
  0x29   : > { %399 = vst [vmem:[%s1636_s4 + $0x20] sm:$0xff] %v1239_v16  ;;  %400 = vst [vmem:[%s1636_s4 + $0x28] sm:$0xff] %v1239_v16 }
  0x2a   : > { %401 = vst [vmem:[%s1636_s4 + $0x30] sm:$0xff] %v1239_v16  ;;  %402 = vst [vmem:[%s1636_s4 + $0x38] sm:$0xff] %v1239_v16 }
  0x2b   : > { %403 = vst [vmem:[%s1636_s4 + $0x40] sm:$0xff] %v1239_v16  ;;  %404 = vst [vmem:[%s1636_s4 + $0x48] sm:$0xff] %v1239_v16 }
  0x2c   : > { %405 = vst [vmem:[%s1636_s4 + $0x50] sm:$0xff] %v1239_v16  ;;  %406 = vst [vmem:[%s1636_s4 + $0x58] sm:$0xff] %v1239_v16 }
  0x2d   : > { %407 = vst [vmem:[%s1636_s4 + $0x60] sm:$0xff] %v1239_v16  ;;  %408 = vst [vmem:[%s1636_s4 + $0x68] sm:$0xff] %v1239_v16 }
  0x2e   : > { %409 = vst [vmem:[%s1636_s4 + $0x70] sm:$0xff] %v1239_v16  ;;  %410 = vst [vmem:[%s1636_s4 + $0x78] sm:$0xff] %v1239_v16 }
  0x2f PF: > { %v1159_v17 = vld [vmem:[%s1333_s11 + $0x78] sm:$0xff]   ;;  %v1161_v19 = vld [vmem:[%s1333_s11 + $0x70] sm:$0xff]   ;;  %v1163_v21 = vld [vmem:[%s1333_s11 + $0x68] sm:$0xff]   ;;  %p1030_p11 = scmp.ne.s32.totalorder %s1229_s17, 4 }
  0x30   : > { %v1160_v18 = vld [vmem:[%s1333_s11 + $0x38] sm:$0xff]   ;;  %1038 = vmatprep.subr.bf16.mxu0 %v1159_v17  ;;  %1102 = vmatprep.subr.bf16.mxu1 %v1159_v17  ;;  %v1162_v20 = vld [vmem:[%s1333_s11 + $0x30] sm:$0xff]   ;;  %v1164_v22 = vld [vmem:[%s1333_s11 + $0x28] sm:$0xff]  }
  0x31   : > { %1039 = vmatpush3.bf16.msra.mxu0 %v1160_v18  ;;  %1110 = vmatpush3.bf16.msra.mxu1 %v1160_v18  ;;  %v1165_v23 = vld [vmem:[%s1333_s11 + $0x60] sm:$0xff]   ;;  %v1167_v25 = vld [vmem:[%s1333_s11 + $0x58] sm:$0xff]   ;;  %v1169_v27 = vld [vmem:[%s1333_s11 + $0x50] sm:$0xff]  }
  0x32   : > { %1040 = vmatprep.subr.bf16.mxu0 %v1161_v19  ;;  %1103 = vmatprep.subr.bf16.mxu1 %v1161_v19  ;;  %v1166_v24 = vld [vmem:[%s1333_s11 + $0x20] sm:$0xff]   ;;  %v1168_v26 = vld [vmem:[%s1333_s11 + $0x18] sm:$0xff]   ;;  %v1170_v30 = vld [vmem:[%s1333_s11 + $0x10] sm:$0xff]  }
  0x33   : > { %v1177_v28 = vld [vmem:[%s1335_s12 + $0x4] ss:$8 sps:$4 sm:$0xff]   ;;  %v1175_v35 = vld [vmem:[%s1335_s12] ss:$8 sps:$4 sm:$0xff]   ;;  %v1181_v37 = vld [vmem:[%s1335_s12 + $0x14] ss:$8 sps:$4 sm:$0xff]  }
  0x34   : > { %v1180_v29 = vld [vmem:[%s1335_s12 + $0x44] ss:$8 sps:$4 sm:$0xff]   ;;  %683 = vmatprep.mubr.bf16.mxu0 %v1177_v28  ;;  %v1178_v36 = vld [vmem:[%s1335_s12 + $0x40] ss:$8 sps:$4 sm:$0xff]   ;;  %v1183_v38 = vld [vmem:[%s1335_s12 + $0x54] ss:$8 sps:$4 sm:$0xff]  }
  0x35   : > { %1041 = vmatpush3.bf16.msra.mxu0 %v1162_v20  ;;  %1111 = vmatpush3.bf16.msra.mxu1 %v1162_v20  ;;  %v1171_v31 = vld [vmem:[%s1333_s11 + $0x48] sm:$0xff]   ;;  %v1173_v33 = vld [vmem:[%s1333_s11 + $0x40] sm:$0xff]   ;;  %v1185_v39 = vld [vmem:[%s1335_s12 + $0x10] ss:$8 sps:$4 sm:$0xff]  }
  0x36   : > { %1042 = vmatprep.subr.bf16.mxu0 %v1163_v21  ;;  %1104 = vmatprep.subr.bf16.mxu1 %v1163_v21  ;;  %v1172_v32 = vld [vmem:[%s1333_s11 + $0x8] sm:$0xff]   ;;  %v1174_v34 = vld [vmem:[%s1333_s11] sm:$0xff]   ;;  %v1186_v40 = vld [vmem:[%s1335_s12 + $0x50] ss:$8 sps:$4 sm:$0xff]  }
  0x37   : > { %715 = vmatprep.mubr.bf16.mxu1 %v1180_v29  ;;  %v1187_v41 = vld [vmem:[%s1335_s12 + $0x24] ss:$8 sps:$4 sm:$0xff]   ;;  %v1191_v43 = vld [vmem:[%s1335_s12 + $0x20] ss:$8 sps:$4 sm:$0xff]   ;;  %v1193_v45 = vld [vmem:[%s1335_s12 + $0x34] ss:$8 sps:$4 sm:$0xff]  }
  0x38   : > { %v1189_v42 = vld [vmem:[%s1335_s12 + $0x64] ss:$8 sps:$4 sm:$0xff]   ;;  %v1192_v44 = vld [vmem:[%s1335_s12 + $0x60] ss:$8 sps:$4 sm:$0xff]   ;;  %v1195_v46 = vld [vmem:[%s1335_s12 + $0x74] ss:$8 sps:$4 sm:$0xff]  }
  0x39   : > { %1043 = vmatpush3.bf16.msra.mxu0 %v1164_v22  ;;  %1112 = vmatpush3.bf16.msra.mxu1 %v1164_v22  ;;  %v1197_v47 = vld [vmem:[%s1335_s12 + $0x30] ss:$8 sps:$4 sm:$0xff]   ;;  %v411_v51 = vld [vmem:[%s1636_s4] sm:$0xff]  ;;  %v412_v61 = vld [vmem:[%s1636_s4 + $0x8] sm:$0xff] }
  0x3a   : > { %1044 = vmatprep.subr.bf16.mxu0 %v1165_v23  ;;  %1105 = vmatprep.subr.bf16.mxu1 %v1165_v23  ;;  %v1198_v48 = vld [vmem:[%s1335_s12 + $0x70] ss:$8 sps:$4 sm:$0xff]   ;;  %v419_v53 = vld [vmem:[%s1636_s4 + $0x40] sm:$0xff]  ;;  %v420_v63 = vld [vmem:[%s1636_s4 + $0x48] sm:$0xff] }
  0x3b   : > { %v413_v7 = vld [vmem:[%s1636_s4 + $0x10] sm:$0xff]  ;;  %v414_v17 = vld [vmem:[%s1636_s4 + $0x18] sm:$0xff]  ;;  %v423_v29 = vld [vmem:[%s1636_s4 + $0x60] sm:$0xff] }
  0x3c   : > { %v421_v9 = vld [vmem:[%s1636_s4 + $0x50] sm:$0xff]  ;;  %v422_v19 = vld [vmem:[%s1636_s4 + $0x58] sm:$0xff] }
  0x3d   : > { %1045 = vmatpush3.bf16.msra.mxu0 %v1166_v24  ;;  %1113 = vmatpush3.bf16.msra.mxu1 %v1166_v24 }
  0x3e   : > { %1046 = vmatprep.subr.bf16.mxu0 %v1167_v25  ;;  %1106 = vmatprep.subr.bf16.mxu1 %v1167_v25 }
  0x41   : > { %1047 = vmatpush3.bf16.msra.mxu0 %v1168_v26  ;;  %1114 = vmatpush3.bf16.msra.mxu1 %v1168_v26 }
  0x42   : > { %1048 = vmatprep.subr.bf16.mxu0 %v1169_v27  ;;  %1107 = vmatprep.subr.bf16.mxu1 %v1169_v27  ;;  %v415_v27 = vld [vmem:[%s1636_s4 + $0x20] sm:$0xff] }
  0x45   : > { %1049 = vmatpush3.bf16.msra.mxu0 %v1170_v30  ;;  %1115 = vmatpush3.bf16.msra.mxu1 %v1170_v30 }
  0x46   : > { %1050 = vmatprep.subr.bf16.mxu0 %v1171_v31  ;;  %1108 = vmatprep.subr.bf16.mxu1 %v1171_v31 }
  0x49   : > { %1051 = vmatpush3.bf16.msra.mxu0 %v1172_v32  ;;  %1116 = vmatpush3.bf16.msra.mxu1 %v1172_v32 }
  0x4a   : > { %1052 = vmatprep.subr.bf16.mxu0 %v1173_v33  ;;  %1109 = vmatprep.subr.bf16.mxu1 %v1173_v33 }
  0x4d   : > { %1053 = vmatpush3.bf16.msra.mxu0 %v1174_v34  ;;  %1117 = vmatpush3.bf16.msra.mxu1 %v1174_v34 }
  0x50   : > { %684 = vmatmul.mubr.bf16.vlgmr.msra.gmra.mxu0 %v1175_v35  ;;  %716 = vmatmul.mubr.bf16.vlgmr.msra.gmra.mxu1 %v1178_v36 }
  0x51   : > { %691 = vmatprep.mubr.bf16.mxu0 %v1181_v37  ;;  %723 = vmatprep.mubr.bf16.mxu1 %v1183_v38  ;;  %v416_v37 = vld [vmem:[%s1636_s4 + $0x28] sm:$0xff] }
  0x58   : > { %692 = vmatmul.mubr.bf16.gmra.mxu0 %v1185_v39  ;;  %724 = vmatmul.mubr.bf16.gmra.mxu1 %v1186_v40  ;;  %v424_v39 = vld [vmem:[%s1636_s4 + $0x68] sm:$0xff] }
  0x59   : > { %699 = vmatprep.mubr.bf16.mxu0 %v1187_v41  ;;  %731 = vmatprep.mubr.bf16.mxu1 %v1189_v42 }
  0x60   : > { %700 = vmatmul.mubr.bf16.gmra.mxu0 %v1191_v43  ;;  %732 = vmatmul.mubr.bf16.gmra.mxu1 %v1192_v44 }
  0x61   : > { %707 = vmatprep.mubr.bf16.mxu0 %v1193_v45  ;;  %739 = vmatprep.mubr.bf16.mxu1 %v1195_v46 }
  0x68   : > { %708 = vmatmul.mubr.bf16.gmra.mxu0 %v1197_v47  ;;  %740 = vmatmul.mubr.bf16.gmra.mxu1 %v1198_v48  ;;  %v417_v47 = vld [vmem:[%s1636_s4 + $0x30] sm:$0xff] }
 0x110   : > { %v1054_v49 = vpop.f32.mrf.mxu0  ;;  %v1078_v50 = vpop.f32.mrf.mxu1 }
 0x112   : > { %v1055_v52 = vpop.f32.mrf.mxu0  ;;  %v1079_v54 = vpop.f32.mrf.mxu1 }
 0x113   : > { %v1056_v55 = vadd.f32 %v1055_v52, %v1054_v49  ;;  %v1080_v56 = vadd.f32 %v1079_v54, %v1078_v50  ;;  %v425_v49 = vld [vmem:[%s1636_s4 + $0x70] sm:$0xff] }
 0x114   : > { %v1057_v57 = vpop.f32.mrf.mxu0  ;;  %v1081_v58 = vpop.f32.mrf.mxu1 }
 0x115   : > { %v748_v59 = vadd.f32 %v1056_v55, %v411_v51  ;;  %v756_v60 = vadd.f32 %v1080_v56, %v419_v53 }
 0x116   : > { %v1058_v62 = vpop.f32.mrf.mxu0  ;;  %v1082_v0 = vpop.f32.mrf.mxu1 }
 0x117   : > { %764 = vst [vmem:[%s1636_s4] sm:$0xff] %v748_v59  ;;  %772 = vst [vmem:[%s1636_s4 + $0x40] sm:$0xff] %v756_v60  ;;  %v1059_v1 = vadd.f32 %v1058_v62, %v1057_v57  ;;  %v1083_v2 = vadd.f32 %v1082_v0, %v1081_v58  ;;  %v418_v57 = vld [vmem:[%s1636_s4 + $0x38] sm:$0xff] }
 0x118   : > { %v1060_v3 = vpop.f32.mrf.mxu0  ;;  %v1084_v4 = vpop.f32.mrf.mxu1  ;;  %v426_v59 = vld [vmem:[%s1636_s4 + $0x78] sm:$0xff] }
 0x119   : > { %v749_v5 = vadd.f32 %v1059_v1, %v412_v61  ;;  %v757_v6 = vadd.f32 %v1083_v2, %v420_v63 }
 0x11a   : > { %v1061_v8 = vpop.f32.mrf.mxu0  ;;  %v1085_v10 = vpop.f32.mrf.mxu1 }
 0x11b   : > { %765 = vst [vmem:[%s1636_s4 + $0x8] sm:$0xff] %v749_v5  ;;  %773 = vst [vmem:[%s1636_s4 + $0x48] sm:$0xff] %v757_v6  ;;  %v1062_v11 = vadd.f32 %v1061_v8, %v1060_v3  ;;  %v1086_v12 = vadd.f32 %v1085_v10, %v1084_v4 }
 0x11c   : > { %v1063_v13 = vpop.f32.mrf.mxu0  ;;  %v1087_v14 = vpop.f32.mrf.mxu1 }
 0x11d   : > { %v750_v15 = vadd.f32 %v1062_v11, %v413_v7  ;;  %v758_v16 = vadd.f32 %v1086_v12, %v421_v9 }
 0x11e   : > { %v1064_v18 = vpop.f32.mrf.mxu0  ;;  %v1088_v20 = vpop.f32.mrf.mxu1 }
 0x11f   : > { %766 = vst [vmem:[%s1636_s4 + $0x10] sm:$0xff] %v750_v15  ;;  %774 = vst [vmem:[%s1636_s4 + $0x50] sm:$0xff] %v758_v16  ;;  %v1065_v21 = vadd.f32 %v1064_v18, %v1063_v13  ;;  %v1089_v22 = vadd.f32 %v1088_v20, %v1087_v14 }
 0x120   : > { %v1066_v23 = vpop.f32.mrf.mxu0  ;;  %v1090_v24 = vpop.f32.mrf.mxu1 }
 0x121   : > { %v751_v25 = vadd.f32 %v1065_v21, %v414_v17  ;;  %v759_v26 = vadd.f32 %v1089_v22, %v422_v19 }
 0x122   : > { %v1067_v28 = vpop.f32.mrf.mxu0  ;;  %v1091_v30 = vpop.f32.mrf.mxu1 }
 0x123   : > { %767 = vst [vmem:[%s1636_s4 + $0x18] sm:$0xff] %v751_v25  ;;  %775 = vst [vmem:[%s1636_s4 + $0x58] sm:$0xff] %v759_v26  ;;  %v1068_v31 = vadd.f32 %v1067_v28, %v1066_v23  ;;  %v1092_v32 = vadd.f32 %v1091_v30, %v1090_v24 }
 0x124   : > { %v1069_v33 = vpop.f32.mrf.mxu0  ;;  %v1093_v34 = vpop.f32.mrf.mxu1 }
 0x125   : > { %v752_v35 = vadd.f32 %v1068_v31, %v415_v27  ;;  %v760_v36 = vadd.f32 %v1092_v32, %v423_v29 }
 0x126   : > { %v1070_v38 = vpop.f32.mrf.mxu0  ;;  %v1094_v40 = vpop.f32.mrf.mxu1 }
 0x127   : > { %768 = vst [vmem:[%s1636_s4 + $0x20] sm:$0xff] %v752_v35  ;;  %776 = vst [vmem:[%s1636_s4 + $0x60] sm:$0xff] %v760_v36  ;;  %v1071_v41 = vadd.f32 %v1070_v38, %v1069_v33  ;;  %v1095_v42 = vadd.f32 %v1094_v40, %v1093_v34 }
 0x128   : > { %v1072_v43 = vpop.f32.mrf.mxu0  ;;  %v1096_v44 = vpop.f32.mrf.mxu1 }
 0x129   : > { %v753_v45 = vadd.f32 %v1071_v41, %v416_v37  ;;  %v761_v46 = vadd.f32 %v1095_v42, %v424_v39 }
 0x12a   : > { %v1073_v48 = vpop.f32.mrf.mxu0  ;;  %v1097_v50 = vpop.f32.mrf.mxu1 }
 0x12b   : > { %769 = vst [vmem:[%s1636_s4 + $0x28] sm:$0xff] %v753_v45  ;;  %777 = vst [vmem:[%s1636_s4 + $0x68] sm:$0xff] %v761_v46  ;;  %v1074_v51 = vadd.f32 %v1073_v48, %v1072_v43  ;;  %v1098_v52 = vadd.f32 %v1097_v50, %v1096_v44 }
 0x12c   : > { %v1075_v53 = vpop.f32.mrf.mxu0  ;;  %v1099_v54 = vpop.f32.mrf.mxu1 }
 0x12d   : > { %v754_v55 = vadd.f32 %v1074_v51, %v417_v47  ;;  %v762_v56 = vadd.f32 %v1098_v52, %v425_v49 }
 0x12e   : > { %v1076_v58 = vpop.f32.mrf.mxu0  ;;  %v1100_v60 = vpop.f32.mrf.mxu1 }
 0x12f   : > { %770 = vst [vmem:[%s1636_s4 + $0x30] sm:$0xff] %v754_v55  ;;  %778 = vst [vmem:[%s1636_s4 + $0x70] sm:$0xff] %v762_v56  ;;  %v1077_v61 = vadd.f32 %v1076_v58, %v1075_v53  ;;  %v1101_v62 = vadd.f32 %v1100_v60, %v1099_v54  ;;  %783 = sbr.rel (%p1030_p11) target bundleno = 323 (0x143), region = 82 }
 0x131   : > { %v755_v63 = vadd.f32 %v1077_v61, %v418_v57  ;;  %v763_v0 = vadd.f32 %v1101_v62, %v426_v59 }
 0x133   : > { %771 = vst [vmem:[%s1636_s4 + $0x38] sm:$0xff] %v755_v63  ;;  %779 = vst [vmem:[%s1636_s4 + $0x78] sm:$0xff] %v763_v0 }
 0x134   : > { %v784_v1 = vld [vmem:[%s1636_s4] sm:$0xff]  ;;  %v785_v5 = vld [vmem:[%s1636_s4 + $0x8] sm:$0xff]  ;;  %v786_v6 = vld [vmem:[%s1636_s4 + $0x10] sm:$0xff] }
 0x135   : > { %v1031_v2 = vld [vmem:[%s1634_s2] ss:$0 sm:$0xff]  ;;  %v787_v7 = vld [vmem:[%s1636_s4 + $0x18] sm:$0xff]  ;;  %v789_v12 = vld [vmem:[%s1636_s4 + $0x28] sm:$0xff] }
 0x136   : > { %v1032_v3 = vld [vmem:[%s1635_s3] ss:$0 sm:$0xff]  ;;  %v807_v4 = vmul.f32 %v1031_v2, %v784_v1  ;;  %v808_v8 = vmul.f32 %v1031_v2, %v785_v5  ;;  %v809_v9 = vmul.f32 %v1031_v2, %v786_v6  ;;  %v810_v10 = vmul.f32 %v1031_v2, %v787_v7  ;;  %v790_v13 = vld [vmem:[%s1636_s4 + $0x30] sm:$0xff]  ;;  %v793_v20 = vld [vmem:[%s1636_s4 + $0x48] sm:$0xff] }
 0x137   : > { %v788_v11 = vld [vmem:[%s1636_s4 + $0x20] sm:$0xff]  ;;  %v812_v16 = vmul.f32 %v1031_v2, %v789_v12  ;;  %v813_v17 = vmul.f32 %v1031_v2, %v790_v13  ;;  %v794_v25 = vld [vmem:[%s1636_s4 + $0x50] sm:$0xff]  ;;  %v795_v26 = vld [vmem:[%s1636_s4 + $0x58] sm:$0xff]  ;;  %v816_v36 = vmul.f32 %v1031_v2, %v793_v20 }
 0x138   : > { %v830_v14 = vadd.f32 %v1032_v3, %v807_v4  ;;  %v811_v15 = vmul.f32 %v1031_v2, %v788_v11  ;;  %v792_v19 = vld [vmem:[%s1636_s4 + $0x40] sm:$0xff]  ;;  %v831_v21 = vadd.f32 %v1032_v3, %v808_v8  ;;  %v832_v22 = vadd.f32 %v1032_v3, %v809_v9  ;;  %v797_v32 = vld [vmem:[%s1636_s4 + $0x68] sm:$0xff]  ;;  %v798_v33 = vld [vmem:[%s1636_s4 + $0x70] sm:$0xff] }
 0x139   : > { %v833_v23 = vadd.f32 %v1032_v3, %v810_v10  ;;  %v796_v27 = vld [vmem:[%s1636_s4 + $0x60] sm:$0xff]  ;;  %v835_v29 = vadd.f32 %v1032_v3, %v812_v16  ;;  %v836_v30 = vadd.f32 %v1032_v3, %v813_v17  ;;  %v815_v31 = vmul.f32 %v1031_v2, %v792_v19 }
 0x13a   : > { %v791_v18 = vld [vmem:[%s1636_s4 + $0x38] sm:$0xff]  ;;  %846 = vst [vmem:[%s1636_s4] sm:$0xff] %v830_v14  ;;  %v834_v28 = vadd.f32 %v1032_v3, %v811_v15  ;;  %847 = vst [vmem:[%s1636_s4 + $0x8] sm:$0xff] %v831_v21  ;;  %v817_v37 = vmul.f32 %v1031_v2, %v794_v25  ;;  %v818_v38 = vmul.f32 %v1031_v2, %v795_v26 }
 0x13b   : > { %v814_v24 = vmul.f32 %v1031_v2, %v791_v18  ;;  %v799_v34 = vld [vmem:[%s1636_s4 + $0x78] sm:$0xff]  ;;  %848 = vst [vmem:[%s1636_s4 + $0x10] sm:$0xff] %v832_v22  ;;  %849 = vst [vmem:[%s1636_s4 + $0x18] sm:$0xff] %v833_v23  ;;  %v838_v39 = vadd.f32 %v1032_v3, %v815_v31  ;;  %v819_v40 = vmul.f32 %v1031_v2, %v796_v27 }
 0x13c   : > { %850 = vst [vmem:[%s1636_s4 + $0x20] sm:$0xff] %v834_v28  ;;  %851 = vst [vmem:[%s1636_s4 + $0x28] sm:$0xff] %v835_v29  ;;  %v820_v41 = vmul.f32 %v1031_v2, %v797_v32  ;;  %v821_v42 = vmul.f32 %v1031_v2, %v798_v33  ;;  %v839_v43 = vadd.f32 %v1032_v3, %v816_v36 }
 0x13d   : > { %v837_v35 = vadd.f32 %v1032_v3, %v814_v24  ;;  %852 = vst [vmem:[%s1636_s4 + $0x30] sm:$0xff] %v836_v30  ;;  %v840_v44 = vadd.f32 %v1032_v3, %v817_v37  ;;  %v841_v45 = vadd.f32 %v1032_v3, %v818_v38  ;;  %v822_v46 = vmul.f32 %v1031_v2, %v799_v34 }
 0x13e   : > { %854 = vst [vmem:[%s1636_s4 + $0x40] sm:$0xff] %v838_v39  ;;  %v842_v47 = vadd.f32 %v1032_v3, %v819_v40  ;;  %v843_v48 = vadd.f32 %v1032_v3, %v820_v41  ;;  %v844_v49 = vadd.f32 %v1032_v3, %v821_v42  ;;  %855 = vst [vmem:[%s1636_s4 + $0x48] sm:$0xff] %v839_v43 }
 0x13f   : > { %853 = vst [vmem:[%s1636_s4 + $0x38] sm:$0xff] %v837_v35  ;;  %856 = vst [vmem:[%s1636_s4 + $0x50] sm:$0xff] %v840_v44  ;;  %v845_v50 = vadd.f32 %v1032_v3, %v822_v46 }
 0x140   : > { %857 = vst [vmem:[%s1636_s4 + $0x58] sm:$0xff] %v841_v45  ;;  %858 = vst [vmem:[%s1636_s4 + $0x60] sm:$0xff] %v842_v47 }
 0x141   : > { %859 = vst [vmem:[%s1636_s4 + $0x68] sm:$0xff] %v843_v48  ;;  %860 = vst [vmem:[%s1636_s4 + $0x70] sm:$0xff] %v844_v49 }
 0x142   : > { %861 = vst [vmem:[%s1636_s4 + $0x78] sm:$0xff] %v845_v50 }
 0x143 PF: > { %s14_s19 = sadd.s32 1, %s1237_s19   ;;  %s1637_s15 = smov %s1225_s16 }
 0x144   : > { %p11_p12 = scmp.ge.s32.totalorder %s14_s19, 7   ;;  %s1638_s16 = smov %s1300_s23 }
 0x145   : > { %s1639_s17 = smov %s1233_s18  ;;  %s1640_s18 = smov %s1642_s20 }
 0x146   :  { %13 = sbr.rel (!%p11_p12) target bundleno = 3 (0x3), region = 126 }

// kernel: densenet121_forward.199
= control target key start
LH: loop header
LB: loop body
LE: loop exit
PB: predicated region body
PF: predicated region fallthrough
CT: control target
= control target key end

     0   :  { %v48_v0 = vlaneseq  ;;  %s492_s1 = inlined_call_operand.vmem [shape: f32[1,256], index: 1, kind: input, shape index: {}]   ;;  %s493_s2 = inlined_call_operand.vmem [shape: f32[1,256], index: 2, kind: input, shape index: {}]   ;;  %s494_s0 = inlined_call_operand.vmem [shape: f32[128,256], index: 0, kind: input, shape index: {}]   ;;  %s495_s3 = inlined_call_operand.vmem [shape: f32[128,256], index: 3, kind: output, shape index: {}]  }
   0x1   :  { %v46_v2 = vld [vmem:[%s492_s1] sm:$0x3]  ;;  %v15_v6 = vld [vmem:[%s494_s0 + $0x8] sm:$0xff]  ;;  %v16_v8 = vld [vmem:[%s494_s0 + $0x10] sm:$0xff] }
   0x2   :  { %v49_v1 = vshrl.u32 %v48_v0, 7  ;;  %v90_v3 = vld [vmem:[%s493_s2] sm:$0x3]  ;;  %v17_v9 = vld [vmem:[%s494_s0 + $0x18] sm:$0xff]  ;;  %v19_v15 = vld [vmem:[%s494_s0 + $0x28] sm:$0xff] }
   0x3   :  { %v14_v4 = vld [vmem:[%s494_s0] sm:$0xff]  ;;  %v20_v16 = vld [vmem:[%s494_s0 + $0x30] sm:$0xff]  ;;  %v21_v17 = vld [vmem:[%s494_s0 + $0x38] sm:$0xff] }
   0x4   :  { %v50_v5 = vsub.s32 0, %v49_v1  ;;  %v54_v7 = vsub.s32 1, %v49_v1  ;;  %v18_v10 = vld [vmem:[%s494_s0 + $0x20] sm:$0xff]  ;;  %v23_v31 = vld [vmem:[%s494_s0 + $0x48] sm:$0xff]  ;;  %v24_v32 = vld [vmem:[%s494_s0 + $0x50] sm:$0xff] }
   0x5   :  { %v22_v30 = vld [vmem:[%s494_s0 + $0x40] sm:$0xff]  ;;  %v25_v37 = vld [vmem:[%s494_s0 + $0x58] sm:$0xff]  ;;  %v27_v39 = vld [vmem:[%s494_s0 + $0x68] sm:$0xff] }
   0x6   :  { %v243_v11 = vrot.slane %v46_v2, %v50_v5  ;;  %v245_v12 = vrot.slane %v90_v3, %v50_v5  ;;  %v247_v13 = vrot.slane %v46_v2, %v54_v7  ;;  %v249_v14 = vrot.slane %v90_v3, %v54_v7  ;;  %v26_v38 = vld [vmem:[%s494_s0 + $0x60] sm:$0xff]  ;;  %v28_v44 = vld [vmem:[%s494_s0 + $0x70] sm:$0xff]  ;;  %v29_v45 = vld [vmem:[%s494_s0 + $0x78] sm:$0xff] }
   0x7   :  { %v30_v62 = vld [vmem:[%s494_s0 + $0x80] sm:$0xff]  ;;  %v31_v63 = vld [vmem:[%s494_s0 + $0x88] sm:$0xff]  ;;  %v32_v0 = vld [vmem:[%s494_s0 + $0x90] sm:$0xff] }
   0x8   :  { %v58_v18 = vmul.f32 %v243_v11, %v14_v4  ;;  %v59_v19 = vmul.f32 %v247_v13, %v15_v6  ;;  %v60_v20 = vmul.f32 %v243_v11, %v16_v8  ;;  %v61_v21 = vmul.f32 %v247_v13, %v17_v9  ;;  %v33_v5 = vld [vmem:[%s494_s0 + $0x98] sm:$0xff]  ;;  %v34_v6 = vld [vmem:[%s494_s0 + $0xa0] sm:$0xff]  ;;  %v35_v7 = vld [vmem:[%s494_s0 + $0xa8] sm:$0xff] }
   0x9   :  { %v62_v22 = vmul.f32 %v243_v11, %v18_v10  ;;  %v63_v23 = vmul.f32 %v247_v13, %v19_v15  ;;  %v64_v24 = vmul.f32 %v243_v11, %v20_v16  ;;  %v65_v25 = vmul.f32 %v247_v13, %v21_v17  ;;  %v36_v16 = vld [vmem:[%s494_s0 + $0xb0] sm:$0xff]  ;;  %v37_v17 = vld [vmem:[%s494_s0 + $0xb8] sm:$0xff] }
   0xa   :  { %v102_v26 = vadd.f32 %v245_v12, %v58_v18  ;;  %v103_v27 = vadd.f32 %v249_v14, %v59_v19  ;;  %v104_v28 = vadd.f32 %v245_v12, %v60_v20  ;;  %v105_v29 = vadd.f32 %v249_v14, %v61_v21 }
   0xb   :  { %v106_v33 = vadd.f32 %v245_v12, %v62_v22  ;;  %v107_v34 = vadd.f32 %v249_v14, %v63_v23  ;;  %v108_v35 = vadd.f32 %v245_v12, %v64_v24  ;;  %v109_v36 = vadd.f32 %v249_v14, %v65_v25 }
   0xc   :  { %v134_v40 = vmax.f32 %v102_v26, 0.0  ;;  %v135_v41 = vmax.f32 %v103_v27, 0.0  ;;  %v136_v42 = vmax.f32 %v104_v28, 0.0  ;;  %v137_v43 = vmax.f32 %v105_v29, 0.0 }
   0xd   :  { %v138_v46 = vmax.f32 %v106_v33, 0.0  ;;  %v139_v47 = vmax.f32 %v107_v34, 0.0  ;;  %v140_v48 = vmax.f32 %v108_v35, 0.0  ;;  %v141_v49 = vmax.f32 %v109_v36, 0.0  ;;  %v38_v34 = vld [vmem:[%s494_s0 + $0xc0] sm:$0xff]  ;;  %v39_v35 = vld [vmem:[%s494_s0 + $0xc8] sm:$0xff] }
   0xe   :  { %166 = vst [vmem:[%s495_s3] sm:$0xff] %v134_v40  ;;  %167 = vst [vmem:[%s495_s3 + $0x8] sm:$0xff] %v135_v41  ;;  %v66_v50 = vmul.f32 %v243_v11, %v22_v30  ;;  %v67_v51 = vmul.f32 %v247_v13, %v23_v31  ;;  %v68_v52 = vmul.f32 %v243_v11, %v24_v32  ;;  %v40_v36 = vld [vmem:[%s494_s0 + $0xd0] sm:$0xff]  ;;  %v41_v41 = vld [vmem:[%s494_s0 + $0xd8] sm:$0xff] }
   0xf   :  { %168 = vst [vmem:[%s495_s3 + $0x10] sm:$0xff] %v136_v42  ;;  %169 = vst [vmem:[%s495_s3 + $0x18] sm:$0xff] %v137_v43  ;;  %v69_v53 = vmul.f32 %v247_v13, %v25_v37  ;;  %v70_v54 = vmul.f32 %v243_v11, %v26_v38  ;;  %v71_v55 = vmul.f32 %v247_v13, %v27_v39  ;;  %v42_v42 = vld [vmem:[%s494_s0 + $0xe0] sm:$0xff]  ;;  %v43_v43 = vld [vmem:[%s494_s0 + $0xe8] sm:$0xff] }
  0x10   :  { %170 = vst [vmem:[%s495_s3 + $0x20] sm:$0xff] %v138_v46  ;;  %171 = vst [vmem:[%s495_s3 + $0x28] sm:$0xff] %v139_v47  ;;  %v72_v56 = vmul.f32 %v243_v11, %v28_v44  ;;  %v73_v57 = vmul.f32 %v247_v13, %v29_v45  ;;  %v110_v58 = vadd.f32 %v245_v12, %v66_v50 }
  0x11   :  { %172 = vst [vmem:[%s495_s3 + $0x30] sm:$0xff] %v140_v48  ;;  %173 = vst [vmem:[%s495_s3 + $0x38] sm:$0xff] %v141_v49  ;;  %v111_v59 = vadd.f32 %v249_v14, %v67_v51  ;;  %v112_v60 = vadd.f32 %v245_v12, %v68_v52  ;;  %v113_v61 = vadd.f32 %v249_v14, %v69_v53  ;;  %v44_v48 = vld [vmem:[%s494_s0 + $0xf0] sm:$0xff]  ;;  %v45_v49 = vld [vmem:[%s494_s0 + $0xf8] sm:$0xff] }
  0x12   :  { %v114_v1 = vadd.f32 %v245_v12, %v70_v54  ;;  %v115_v2 = vadd.f32 %v249_v14, %v71_v55  ;;  %v116_v3 = vadd.f32 %v245_v12, %v72_v56  ;;  %v117_v4 = vadd.f32 %v249_v14, %v73_v57 }
  0x13   :  { %v142_v8 = vmax.f32 %v110_v58, 0.0  ;;  %v143_v9 = vmax.f32 %v111_v59, 0.0  ;;  %v144_v10 = vmax.f32 %v112_v60, 0.0  ;;  %v145_v15 = vmax.f32 %v113_v61, 0.0 }
  0x14   :  { %v146_v18 = vmax.f32 %v114_v1, 0.0  ;;  %v147_v19 = vmax.f32 %v115_v2, 0.0  ;;  %v148_v20 = vmax.f32 %v116_v3, 0.0  ;;  %v149_v21 = vmax.f32 %v117_v4, 0.0 }
  0x15   :  { %174 = vst [vmem:[%s495_s3 + $0x40] sm:$0xff] %v142_v8  ;;  %175 = vst [vmem:[%s495_s3 + $0x48] sm:$0xff] %v143_v9  ;;  %v74_v22 = vmul.f32 %v243_v11, %v30_v62  ;;  %v75_v23 = vmul.f32 %v247_v13, %v31_v63  ;;  %v76_v24 = vmul.f32 %v243_v11, %v32_v0 }
  0x16   :  { %176 = vst [vmem:[%s495_s3 + $0x50] sm:$0xff] %v144_v10  ;;  %177 = vst [vmem:[%s495_s3 + $0x58] sm:$0xff] %v145_v15  ;;  %v77_v25 = vmul.f32 %v247_v13, %v33_v5  ;;  %v78_v26 = vmul.f32 %v243_v11, %v34_v6  ;;  %v79_v27 = vmul.f32 %v247_v13, %v35_v7 }
  0x17   :  { %178 = vst [vmem:[%s495_s3 + $0x60] sm:$0xff] %v146_v18  ;;  %179 = vst [vmem:[%s495_s3 + $0x68] sm:$0xff] %v147_v19  ;;  %v80_v28 = vmul.f32 %v243_v11, %v36_v16  ;;  %v81_v29 = vmul.f32 %v247_v13, %v37_v17  ;;  %v118_v30 = vadd.f32 %v245_v12, %v74_v22 }
  0x18   :  { %180 = vst [vmem:[%s495_s3 + $0x70] sm:$0xff] %v148_v20  ;;  %181 = vst [vmem:[%s495_s3 + $0x78] sm:$0xff] %v149_v21  ;;  %v119_v31 = vadd.f32 %v249_v14, %v75_v23  ;;  %v120_v32 = vadd.f32 %v245_v12, %v76_v24  ;;  %v121_v33 = vadd.f32 %v249_v14, %v77_v25 }
  0x19   :  { %v122_v37 = vadd.f32 %v245_v12, %v78_v26  ;;  %v123_v38 = vadd.f32 %v249_v14, %v79_v27  ;;  %v124_v39 = vadd.f32 %v245_v12, %v80_v28  ;;  %v125_v40 = vadd.f32 %v249_v14, %v81_v29 }
  0x1a   :  { %v150_v44 = vmax.f32 %v118_v30, 0.0  ;;  %v151_v45 = vmax.f32 %v119_v31, 0.0  ;;  %v152_v46 = vmax.f32 %v120_v32, 0.0  ;;  %v153_v47 = vmax.f32 %v121_v33, 0.0 }
  0x1b   :  { %v154_v50 = vmax.f32 %v122_v37, 0.0  ;;  %v155_v51 = vmax.f32 %v123_v38, 0.0  ;;  %v156_v52 = vmax.f32 %v124_v39, 0.0  ;;  %v157_v53 = vmax.f32 %v125_v40, 0.0 }
  0x1c   :  { %182 = vst [vmem:[%s495_s3 + $0x80] sm:$0xff] %v150_v44  ;;  %183 = vst [vmem:[%s495_s3 + $0x88] sm:$0xff] %v151_v45  ;;  %v82_v54 = vmul.f32 %v243_v11, %v38_v34  ;;  %v83_v55 = vmul.f32 %v247_v13, %v39_v35  ;;  %v84_v56 = vmul.f32 %v243_v11, %v40_v36 }
  0x1d   :  { %184 = vst [vmem:[%s495_s3 + $0x90] sm:$0xff] %v152_v46  ;;  %185 = vst [vmem:[%s495_s3 + $0x98] sm:$0xff] %v153_v47  ;;  %v85_v57 = vmul.f32 %v247_v13, %v41_v41  ;;  %v86_v58 = vmul.f32 %v243_v11, %v42_v42  ;;  %v87_v59 = vmul.f32 %v247_v13, %v43_v43 }
  0x1e   :  { %186 = vst [vmem:[%s495_s3 + $0xa0] sm:$0xff] %v154_v50  ;;  %187 = vst [vmem:[%s495_s3 + $0xa8] sm:$0xff] %v155_v51  ;;  %v88_v60 = vmul.f32 %v243_v11, %v44_v48  ;;  %v89_v61 = vmul.f32 %v247_v13, %v45_v49  ;;  %v126_v62 = vadd.f32 %v245_v12, %v82_v54 }
  0x1f   :  { %188 = vst [vmem:[%s495_s3 + $0xb0] sm:$0xff] %v156_v52  ;;  %189 = vst [vmem:[%s495_s3 + $0xb8] sm:$0xff] %v157_v53  ;;  %v127_v63 = vadd.f32 %v249_v14, %v83_v55  ;;  %v128_v0 = vadd.f32 %v245_v12, %v84_v56  ;;  %v129_v1 = vadd.f32 %v249_v14, %v85_v57 }
  0x20   :  { %v130_v2 = vadd.f32 %v245_v12, %v86_v58  ;;  %v131_v3 = vadd.f32 %v249_v14, %v87_v59  ;;  %v132_v4 = vadd.f32 %v245_v12, %v88_v60  ;;  %v133_v5 = vadd.f32 %v249_v14, %v89_v61 }
  0x21   :  { %v158_v6 = vmax.f32 %v126_v62, 0.0  ;;  %v159_v11 = vmax.f32 %v127_v63, 0.0  ;;  %v160_v7 = vmax.f32 %v128_v0, 0.0  ;;  %v161_v13 = vmax.f32 %v129_v1, 0.0 }
  0x22   :  { %v162_v8 = vmax.f32 %v130_v2, 0.0  ;;  %v163_v9 = vmax.f32 %v131_v3, 0.0  ;;  %v164_v10 = vmax.f32 %v132_v4, 0.0  ;;  %v165_v15 = vmax.f32 %v133_v5, 0.0 }
  0x23   :  { %190 = vst [vmem:[%s495_s3 + $0xc0] sm:$0xff] %v158_v6  ;;  %191 = vst [vmem:[%s495_s3 + $0xc8] sm:$0xff] %v159_v11 }
  0x24   :  { %192 = vst [vmem:[%s495_s3 + $0xd0] sm:$0xff] %v160_v7  ;;  %193 = vst [vmem:[%s495_s3 + $0xd8] sm:$0xff] %v161_v13 }
  0x25   :  { %194 = vst [vmem:[%s495_s3 + $0xe0] sm:$0xff] %v162_v8  ;;  %195 = vst [vmem:[%s495_s3 + $0xe8] sm:$0xff] %v163_v9 }
  0x26   :  { %196 = vst [vmem:[%s495_s3 + $0xf0] sm:$0xff] %v164_v10  ;;  %197 = vst [vmem:[%s495_s3 + $0xf8] sm:$0xff] %v165_v15 }

// kernel: densenet121_forward.200
= control target key start
LH: loop header
LB: loop body
LE: loop exit
PB: predicated region body
PF: predicated region fallthrough
CT: control target
= control target key end

     0   :  { %s874_s1 = inlined_call_operand.vmem [shape: bf16[256,128], index: 1, kind: input, shape index: {}]   ;;  %s875_s0 = inlined_call_operand.vmem [shape: bf16[128,256], index: 0, kind: input, shape index: {}]   ;;  %s876_s2 = inlined_call_operand.vmem [shape: f32[1,128], index: 2, kind: input, shape index: {}]   ;;  %s877_s3 = inlined_call_operand.vmem [shape: f32[1,128], index: 3, kind: input, shape index: {}]   ;;  %s878_s4 = inlined_call_operand.vmem [shape: f32[128,128], index: 4, kind: output, shape index: {}]  }
   0x1   :  { %v623_v0 = vld [vmem:[%s874_s1 + $0x78] sm:$0xff]   ;;  %v625_v2 = vld [vmem:[%s874_s1 + $0x70] sm:$0xff]   ;;  %v627_v4 = vld [vmem:[%s874_s1 + $0x68] sm:$0xff]  }
   0x2   :  { %v624_v1 = vld [vmem:[%s874_s1 + $0x38] sm:$0xff]   ;;  %542 = vmatprep.subr.bf16.mxu0 %v623_v0  ;;  %606 = vmatprep.subr.bf16.mxu1 %v623_v0  ;;  %v626_v3 = vld [vmem:[%s874_s1 + $0x30] sm:$0xff]   ;;  %v628_v5 = vld [vmem:[%s874_s1 + $0x28] sm:$0xff]  }
   0x3   :  { %543 = vmatpush3.bf16.msra.mxu0 %v624_v1  ;;  %614 = vmatpush3.bf16.msra.mxu1 %v624_v1  ;;  %v629_v6 = vld [vmem:[%s874_s1 + $0x60] sm:$0xff]   ;;  %v631_v8 = vld [vmem:[%s874_s1 + $0x58] sm:$0xff]   ;;  %v633_v10 = vld [vmem:[%s874_s1 + $0x50] sm:$0xff]  }
   0x4   :  { %544 = vmatprep.subr.bf16.mxu0 %v625_v2  ;;  %607 = vmatprep.subr.bf16.mxu1 %v625_v2  ;;  %v630_v7 = vld [vmem:[%s874_s1 + $0x20] sm:$0xff]   ;;  %v632_v9 = vld [vmem:[%s874_s1 + $0x18] sm:$0xff]   ;;  %v634_v13 = vld [vmem:[%s874_s1 + $0x10] sm:$0xff]  }
   0x5   :  { %v641_v11 = vld [vmem:[%s875_s0 + $0x4] ss:$8 sps:$4 sm:$0xff]   ;;  %v639_v18 = vld [vmem:[%s875_s0] ss:$8 sps:$4 sm:$0xff]   ;;  %v645_v20 = vld [vmem:[%s875_s0 + $0x14] ss:$8 sps:$4 sm:$0xff]  }
   0x6   :  { %v644_v12 = vld [vmem:[%s875_s0 + $0x44] ss:$8 sps:$4 sm:$0xff]   ;;  %310 = vmatprep.mubr.bf16.mxu0 %v641_v11  ;;  %v642_v19 = vld [vmem:[%s875_s0 + $0x40] ss:$8 sps:$4 sm:$0xff]   ;;  %v647_v21 = vld [vmem:[%s875_s0 + $0x54] ss:$8 sps:$4 sm:$0xff]  }
   0x7   :  { %545 = vmatpush3.bf16.msra.mxu0 %v626_v3  ;;  %615 = vmatpush3.bf16.msra.mxu1 %v626_v3  ;;  %v635_v14 = vld [vmem:[%s874_s1 + $0x48] sm:$0xff]   ;;  %v637_v16 = vld [vmem:[%s874_s1 + $0x40] sm:$0xff]   ;;  %v649_v22 = vld [vmem:[%s875_s0 + $0x10] ss:$8 sps:$4 sm:$0xff]  }
   0x8   :  { %546 = vmatprep.subr.bf16.mxu0 %v627_v4  ;;  %608 = vmatprep.subr.bf16.mxu1 %v627_v4  ;;  %v636_v15 = vld [vmem:[%s874_s1 + $0x8] sm:$0xff]   ;;  %v638_v17 = vld [vmem:[%s874_s1] sm:$0xff]   ;;  %v650_v23 = vld [vmem:[%s875_s0 + $0x50] ss:$8 sps:$4 sm:$0xff]  }
   0x9   :  { %342 = vmatprep.mubr.bf16.mxu1 %v644_v12  ;;  %v651_v24 = vld [vmem:[%s875_s0 + $0x24] ss:$8 sps:$4 sm:$0xff]   ;;  %v655_v26 = vld [vmem:[%s875_s0 + $0x20] ss:$8 sps:$4 sm:$0xff]   ;;  %v657_v28 = vld [vmem:[%s875_s0 + $0x34] ss:$8 sps:$4 sm:$0xff]  }
   0xa   :  { %v653_v25 = vld [vmem:[%s875_s0 + $0x64] ss:$8 sps:$4 sm:$0xff]   ;;  %v656_v27 = vld [vmem:[%s875_s0 + $0x60] ss:$8 sps:$4 sm:$0xff]   ;;  %v659_v29 = vld [vmem:[%s875_s0 + $0x74] ss:$8 sps:$4 sm:$0xff]  }
   0xb   :  { %547 = vmatpush3.bf16.msra.mxu0 %v628_v5  ;;  %616 = vmatpush3.bf16.msra.mxu1 %v628_v5  ;;  %v661_v30 = vld [vmem:[%s875_s0 + $0x30] ss:$8 sps:$4 sm:$0xff]   ;;  %v787_v38 = vld [vmem:[%s876_s2] ss:$0 sm:$0xff] }
   0xc   :  { %548 = vmatprep.subr.bf16.mxu0 %v629_v6  ;;  %609 = vmatprep.subr.bf16.mxu1 %v629_v6  ;;  %v662_v31 = vld [vmem:[%s875_s0 + $0x70] ss:$8 sps:$4 sm:$0xff]   ;;  %v792_v41 = vld [vmem:[%s877_s3] ss:$0 sm:$0xff] }
   0xf   :  { %549 = vmatpush3.bf16.msra.mxu0 %v630_v7  ;;  %617 = vmatpush3.bf16.msra.mxu1 %v630_v7 }
  0x10   :  { %550 = vmatprep.subr.bf16.mxu0 %v631_v8  ;;  %610 = vmatprep.subr.bf16.mxu1 %v631_v8 }
  0x13   :  { %551 = vmatpush3.bf16.msra.mxu0 %v632_v9  ;;  %618 = vmatpush3.bf16.msra.mxu1 %v632_v9 }
  0x14   :  { %552 = vmatprep.subr.bf16.mxu0 %v633_v10  ;;  %611 = vmatprep.subr.bf16.mxu1 %v633_v10 }
  0x17   :  { %553 = vmatpush3.bf16.msra.mxu0 %v634_v13  ;;  %619 = vmatpush3.bf16.msra.mxu1 %v634_v13 }
  0x18   :  { %554 = vmatprep.subr.bf16.mxu0 %v635_v14  ;;  %612 = vmatprep.subr.bf16.mxu1 %v635_v14 }
  0x1b   :  { %555 = vmatpush3.bf16.msra.mxu0 %v636_v15  ;;  %620 = vmatpush3.bf16.msra.mxu1 %v636_v15 }
  0x1c   :  { %556 = vmatprep.subr.bf16.mxu0 %v637_v16  ;;  %613 = vmatprep.subr.bf16.mxu1 %v637_v16 }
  0x1f   :  { %557 = vmatpush3.bf16.msra.mxu0 %v638_v17  ;;  %621 = vmatpush3.bf16.msra.mxu1 %v638_v17 }
  0x22   :  { %311 = vmatmul.mubr.bf16.vlgmr.msra.gmra.mxu0 %v639_v18  ;;  %343 = vmatmul.mubr.bf16.vlgmr.msra.gmra.mxu1 %v642_v19 }
  0x23   :  { %318 = vmatprep.mubr.bf16.mxu0 %v645_v20  ;;  %350 = vmatprep.mubr.bf16.mxu1 %v647_v21 }
  0x2a   :  { %319 = vmatmul.mubr.bf16.gmra.mxu0 %v649_v22  ;;  %351 = vmatmul.mubr.bf16.gmra.mxu1 %v650_v23 }
  0x2b   :  { %326 = vmatprep.mubr.bf16.mxu0 %v651_v24  ;;  %358 = vmatprep.mubr.bf16.mxu1 %v653_v25 }
  0x32   :  { %327 = vmatmul.mubr.bf16.gmra.mxu0 %v655_v26  ;;  %359 = vmatmul.mubr.bf16.gmra.mxu1 %v656_v27 }
  0x33   :  { %334 = vmatprep.mubr.bf16.mxu0 %v657_v28  ;;  %366 = vmatprep.mubr.bf16.mxu1 %v659_v29 }
  0x3a   :  { %335 = vmatmul.mubr.bf16.gmra.mxu0 %v661_v30  ;;  %367 = vmatmul.mubr.bf16.gmra.mxu1 %v662_v31 }
  0xe2   :  { %v558_v32 = vpop.f32.mrf.mxu0  ;;  %v582_v33 = vpop.f32.mrf.mxu1 }
  0xe4   :  { %v559_v34 = vpop.f32.mrf.mxu0  ;;  %v583_v35 = vpop.f32.mrf.mxu1 }
  0xe5   :  { %v560_v36 = vadd.f32 %v559_v34, %v558_v32  ;;  %v584_v37 = vadd.f32 %v583_v35, %v582_v33 }
  0xe6   :  { %v561_v39 = vpop.f32.mrf.mxu0  ;;  %v585_v40 = vpop.f32.mrf.mxu1 }
  0xe7   :  { %v433_v44 = vmul.f32 %v560_v36, %v787_v38  ;;  %v441_v45 = vmul.f32 %v584_v37, %v787_v38 }
  0xe8   :  { %v562_v42 = vpop.f32.mrf.mxu0  ;;  %v586_v43 = vpop.f32.mrf.mxu1 }
  0xe9   :  { %v563_v46 = vadd.f32 %v562_v42, %v561_v39  ;;  %v587_v47 = vadd.f32 %v586_v43, %v585_v40  ;;  %v456_v50 = vadd.f32 %v792_v41, %v433_v44  ;;  %v464_v51 = vadd.f32 %v792_v41, %v441_v45 }
  0xea   :  { %v564_v48 = vpop.f32.mrf.mxu0  ;;  %v588_v49 = vpop.f32.mrf.mxu1 }
  0xeb   :  { %v472_v54 = vmax.f32 %v456_v50, 0.0  ;;  %v480_v55 = vmax.f32 %v464_v51, 0.0  ;;  %v434_v56 = vmul.f32 %v563_v46, %v787_v38  ;;  %v442_v57 = vmul.f32 %v587_v47, %v787_v38 }
  0xec   :  { %v565_v52 = vpop.f32.mrf.mxu0  ;;  %v589_v53 = vpop.f32.mrf.mxu1 }
  0xed   :  { %v566_v58 = vadd.f32 %v565_v52, %v564_v48  ;;  %v590_v59 = vadd.f32 %v589_v53, %v588_v49  ;;  %488 = vst [vmem:[%s878_s4] sm:$0xff] %v472_v54  ;;  %496 = vst [vmem:[%s878_s4 + $0x40] sm:$0xff] %v480_v55  ;;  %v457_v62 = vadd.f32 %v792_v41, %v434_v56 }
  0xee   :  { %v567_v60 = vpop.f32.mrf.mxu0  ;;  %v591_v61 = vpop.f32.mrf.mxu1  ;;  %v465_v63 = vadd.f32 %v792_v41, %v442_v57 }
  0xef   :  { %v473_v2 = vmax.f32 %v457_v62, 0.0  ;;  %v435_v6 = vmul.f32 %v566_v58, %v787_v38  ;;  %v443_v7 = vmul.f32 %v590_v59, %v787_v38 }
  0xf0   :  { %v568_v0 = vpop.f32.mrf.mxu0  ;;  %v592_v1 = vpop.f32.mrf.mxu1  ;;  %v481_v3 = vmax.f32 %v465_v63, 0.0 }
  0xf1   :  { %v569_v4 = vadd.f32 %v568_v0, %v567_v60  ;;  %v593_v5 = vadd.f32 %v592_v1, %v591_v61  ;;  %489 = vst [vmem:[%s878_s4 + $0x8] sm:$0xff] %v473_v2  ;;  %v458_v10 = vadd.f32 %v792_v41, %v435_v6  ;;  %v466_v11 = vadd.f32 %v792_v41, %v443_v7 }
  0xf2   :  { %v570_v8 = vpop.f32.mrf.mxu0  ;;  %v594_v9 = vpop.f32.mrf.mxu1  ;;  %497 = vst [vmem:[%s878_s4 + $0x48] sm:$0xff] %v481_v3 }
  0xf3   :  { %v436_v14 = vmul.f32 %v569_v4, %v787_v38  ;;  %v444_v15 = vmul.f32 %v593_v5, %v787_v38  ;;  %v474_v18 = vmax.f32 %v458_v10, 0.0  ;;  %v482_v19 = vmax.f32 %v466_v11, 0.0 }
  0xf4   :  { %v571_v12 = vpop.f32.mrf.mxu0  ;;  %v595_v13 = vpop.f32.mrf.mxu1 }
  0xf5   :  { %v572_v16 = vadd.f32 %v571_v12, %v570_v8  ;;  %v596_v17 = vadd.f32 %v595_v13, %v594_v9  ;;  %v459_v22 = vadd.f32 %v792_v41, %v436_v14  ;;  %v467_v23 = vadd.f32 %v792_v41, %v444_v15  ;;  %490 = vst [vmem:[%s878_s4 + $0x10] sm:$0xff] %v474_v18 }
  0xf6   :  { %v573_v20 = vpop.f32.mrf.mxu0  ;;  %v597_v21 = vpop.f32.mrf.mxu1  ;;  %498 = vst [vmem:[%s878_s4 + $0x50] sm:$0xff] %v482_v19 }
  0xf7   :  { %v475_v26 = vmax.f32 %v459_v22, 0.0  ;;  %v483_v27 = vmax.f32 %v467_v23, 0.0  ;;  %v437_v28 = vmul.f32 %v572_v16, %v787_v38  ;;  %v445_v29 = vmul.f32 %v596_v17, %v787_v38 }
  0xf8   :  { %v574_v24 = vpop.f32.mrf.mxu0  ;;  %v598_v25 = vpop.f32.mrf.mxu1 }
  0xf9   :  { %v575_v30 = vadd.f32 %v574_v24, %v573_v20  ;;  %v599_v31 = vadd.f32 %v598_v25, %v597_v21  ;;  %491 = vst [vmem:[%s878_s4 + $0x18] sm:$0xff] %v475_v26  ;;  %499 = vst [vmem:[%s878_s4 + $0x58] sm:$0xff] %v483_v27  ;;  %v460_v34 = vadd.f32 %v792_v41, %v437_v28 }
  0xfa   :  { %v576_v32 = vpop.f32.mrf.mxu0  ;;  %v600_v33 = vpop.f32.mrf.mxu1  ;;  %v468_v35 = vadd.f32 %v792_v41, %v445_v29 }
  0xfb   :  { %v476_v39 = vmax.f32 %v460_v34, 0.0  ;;  %v438_v44 = vmul.f32 %v575_v30, %v787_v38  ;;  %v446_v45 = vmul.f32 %v599_v31, %v787_v38 }
  0xfc   :  { %v577_v36 = vpop.f32.mrf.mxu0  ;;  %v601_v37 = vpop.f32.mrf.mxu1  ;;  %v484_v40 = vmax.f32 %v468_v35, 0.0 }
  0xfd   :  { %v578_v42 = vadd.f32 %v577_v36, %v576_v32  ;;  %v602_v43 = vadd.f32 %v601_v37, %v600_v33  ;;  %492 = vst [vmem:[%s878_s4 + $0x20] sm:$0xff] %v476_v39  ;;  %v461_v48 = vadd.f32 %v792_v41, %v438_v44  ;;  %v469_v49 = vadd.f32 %v792_v41, %v446_v45 }
  0xfe   :  { %v579_v46 = vpop.f32.mrf.mxu0  ;;  %v603_v47 = vpop.f32.mrf.mxu1  ;;  %500 = vst [vmem:[%s878_s4 + $0x60] sm:$0xff] %v484_v40 }
  0xff   :  { %v439_v52 = vmul.f32 %v578_v42, %v787_v38  ;;  %v447_v53 = vmul.f32 %v602_v43, %v787_v38  ;;  %v477_v56 = vmax.f32 %v461_v48, 0.0  ;;  %v485_v57 = vmax.f32 %v469_v49, 0.0 }
 0x100   :  { %v580_v50 = vpop.f32.mrf.mxu0  ;;  %v604_v51 = vpop.f32.mrf.mxu1 }
 0x101   :  { %v581_v54 = vadd.f32 %v580_v50, %v579_v46  ;;  %v605_v55 = vadd.f32 %v604_v51, %v603_v47  ;;  %v462_v58 = vadd.f32 %v792_v41, %v439_v52  ;;  %v470_v59 = vadd.f32 %v792_v41, %v447_v53  ;;  %493 = vst [vmem:[%s878_s4 + $0x28] sm:$0xff] %v477_v56 }
 0x102   :  { %501 = vst [vmem:[%s878_s4 + $0x68] sm:$0xff] %v485_v57 }
 0x103   :  { %v478_v60 = vmax.f32 %v462_v58, 0.0  ;;  %v486_v61 = vmax.f32 %v470_v59, 0.0  ;;  %v440_v62 = vmul.f32 %v581_v54, %v787_v38  ;;  %v448_v63 = vmul.f32 %v605_v55, %v787_v38 }
 0x105   :  { %494 = vst [vmem:[%s878_s4 + $0x30] sm:$0xff] %v478_v60  ;;  %502 = vst [vmem:[%s878_s4 + $0x70] sm:$0xff] %v486_v61  ;;  %v463_v0 = vadd.f32 %v792_v41, %v440_v62  ;;  %v471_v1 = vadd.f32 %v792_v41, %v448_v63 }
 0x107   :  { %v479_v2 = vmax.f32 %v463_v0, 0.0  ;;  %v487_v3 = vmax.f32 %v471_v1, 0.0 }
 0x109   :  { %495 = vst [vmem:[%s878_s4 + $0x38] sm:$0xff] %v479_v2  ;;  %503 = vst [vmem:[%s878_s4 + $0x78] sm:$0xff] %v487_v3 }

// kernel: densenet121_forward.210
= control target key start
LH: loop header
LB: loop body
LE: loop exit
PB: predicated region body
PF: predicated region fallthrough
CT: control target
= control target key end

     0   :  { %s119_s0 = inlined_call_operand.vmem [shape: f32[4,32,128], index: 0, kind: input, shape index: {}]   ;;  %s120_s1 = inlined_call_operand.vmem [shape: f32[32,128], index: 1, kind: output, shape index: {}]  }
   0x1   :  { %v8_v0 = vld [vmem:[%s119_s0] sm:$0xff]  ;;  %v9_v4 = vld [vmem:[%s119_s0 + $0x8] sm:$0xff]  ;;  %v10_v9 = vld [vmem:[%s119_s0 + $0x10] sm:$0xff] }
   0x2   :  { %v12_v1 = vld [vmem:[%s119_s0 + $0x20] sm:$0xff]  ;;  %v13_v5 = vld [vmem:[%s119_s0 + $0x28] sm:$0xff]  ;;  %v14_v12 = vld [vmem:[%s119_s0 + $0x30] sm:$0xff] }
   0x3   :  { %v16_v2 = vld [vmem:[%s119_s0 + $0x40] sm:$0xff]  ;;  %v24_v3 = vadd.f32 %v12_v1, %v8_v0  ;;  %v17_v7 = vld [vmem:[%s119_s0 + $0x48] sm:$0xff]  ;;  %v27_v8 = vadd.f32 %v13_v5, %v9_v4  ;;  %v18_v13 = vld [vmem:[%s119_s0 + $0x50] sm:$0xff]  ;;  %v30_v15 = vadd.f32 %v14_v12, %v10_v9 }
   0x4   :  { %v20_v6 = vld [vmem:[%s119_s0 + $0x60] sm:$0xff]  ;;  %v21_v11 = vld [vmem:[%s119_s0 + $0x68] sm:$0xff]  ;;  %v11_v16 = vld [vmem:[%s119_s0 + $0x18] sm:$0xff] }
   0x5   :  { %v25_v10 = vadd.f32 %v24_v3, %v16_v2  ;;  %v28_v14 = vadd.f32 %v27_v8, %v17_v7  ;;  %v15_v17 = vld [vmem:[%s119_s0 + $0x38] sm:$0xff]  ;;  %v22_v20 = vld [vmem:[%s119_s0 + $0x70] sm:$0xff]  ;;  %v31_v23 = vadd.f32 %v30_v15, %v18_v13 }
   0x6   :  { %v19_v18 = vld [vmem:[%s119_s0 + $0x58] sm:$0xff]  ;;  %v33_v21 = vadd.f32 %v15_v17, %v11_v16 }
   0x7   :  { %v26_v19 = vadd.f32 %v25_v10, %v20_v6  ;;  %v29_v22 = vadd.f32 %v28_v14, %v21_v11  ;;  %v23_v24 = vld [vmem:[%s119_s0 + $0x78] sm:$0xff]  ;;  %v32_v28 = vadd.f32 %v31_v23, %v22_v20 }
   0x8   :  { %v34_v26 = vadd.f32 %v33_v21, %v19_v18 }
   0x9   :  { %v37_v25 = vmul.f32 0.25, %v26_v19  ;;  %v38_v27 = vmul.f32 0.25, %v29_v22  ;;  %v39_v30 = vmul.f32 0.25, %v32_v28 }
   0xa   :  { %v35_v29 = vadd.f32 %v34_v26, %v23_v24 }
   0xb   :  { %41 = vst [vmem:[%s120_s1] sm:$0xff] %v37_v25  ;;  %42 = vst [vmem:[%s120_s1 + $0x8] sm:$0xff] %v38_v27 }
   0xc   :  { %v40_v31 = vmul.f32 0.25, %v35_v29  ;;  %43 = vst [vmem:[%s120_s1 + $0x10] sm:$0xff] %v39_v30 }
   0xe   :  { %44 = vst [vmem:[%s120_s1 + $0x18] sm:$0xff] %v40_v31 }

// kernel: densenet121_forward.209
= control target key start
LH: loop header
LB: loop body
LE: loop exit
PB: predicated region body
PF: predicated region fallthrough
CT: control target
= control target key end

     0   :  { %s858_s1 = inlined_call_operand.vmem [shape: bf16[256,128], index: 1, kind: input, shape index: {}]   ;;  %s859_s0 = inlined_call_operand.vmem [shape: bf16[128,256], index: 0, kind: input, shape index: {}]   ;;  %s860_s2 = inlined_call_operand.vmem [shape: f32[1,128], index: 2, kind: input, shape index: {}]   ;;  %s861_s3 = inlined_call_operand.vmem [shape: f32[1,128], index: 3, kind: input, shape index: {}]   ;;  %s862_s4 = inlined_call_operand.vmem [shape: f32[128,128], index: 4, kind: output, shape index: {}]  }
   0x1   :  { %v607_v0 = vld [vmem:[%s858_s1 + $0x78] sm:$0xff]   ;;  %v609_v2 = vld [vmem:[%s858_s1 + $0x70] sm:$0xff]   ;;  %v611_v4 = vld [vmem:[%s858_s1 + $0x68] sm:$0xff]  }
   0x2   :  { %v608_v1 = vld [vmem:[%s858_s1 + $0x38] sm:$0xff]   ;;  %526 = vmatprep.subr.bf16.mxu0 %v607_v0  ;;  %590 = vmatprep.subr.bf16.mxu1 %v607_v0  ;;  %v610_v3 = vld [vmem:[%s858_s1 + $0x30] sm:$0xff]   ;;  %v612_v5 = vld [vmem:[%s858_s1 + $0x28] sm:$0xff]  }
   0x3   :  { %527 = vmatpush3.bf16.msra.mxu0 %v608_v1  ;;  %598 = vmatpush3.bf16.msra.mxu1 %v608_v1  ;;  %v613_v6 = vld [vmem:[%s858_s1 + $0x60] sm:$0xff]   ;;  %v615_v8 = vld [vmem:[%s858_s1 + $0x58] sm:$0xff]   ;;  %v617_v10 = vld [vmem:[%s858_s1 + $0x50] sm:$0xff]  }
   0x4   :  { %528 = vmatprep.subr.bf16.mxu0 %v609_v2  ;;  %591 = vmatprep.subr.bf16.mxu1 %v609_v2  ;;  %v614_v7 = vld [vmem:[%s858_s1 + $0x20] sm:$0xff]   ;;  %v616_v9 = vld [vmem:[%s858_s1 + $0x18] sm:$0xff]   ;;  %v618_v13 = vld [vmem:[%s858_s1 + $0x10] sm:$0xff]  }
   0x5   :  { %v625_v11 = vld [vmem:[%s859_s0 + $0x4] ss:$8 sps:$4 sm:$0xff]   ;;  %v623_v18 = vld [vmem:[%s859_s0] ss:$8 sps:$4 sm:$0xff]   ;;  %v629_v20 = vld [vmem:[%s859_s0 + $0x14] ss:$8 sps:$4 sm:$0xff]  }
   0x6   :  { %v628_v12 = vld [vmem:[%s859_s0 + $0x44] ss:$8 sps:$4 sm:$0xff]   ;;  %310 = vmatprep.mubr.bf16.mxu0 %v625_v11  ;;  %v626_v19 = vld [vmem:[%s859_s0 + $0x40] ss:$8 sps:$4 sm:$0xff]   ;;  %v631_v21 = vld [vmem:[%s859_s0 + $0x54] ss:$8 sps:$4 sm:$0xff]  }
   0x7   :  { %529 = vmatpush3.bf16.msra.mxu0 %v610_v3  ;;  %599 = vmatpush3.bf16.msra.mxu1 %v610_v3  ;;  %v619_v14 = vld [vmem:[%s858_s1 + $0x48] sm:$0xff]   ;;  %v621_v16 = vld [vmem:[%s858_s1 + $0x40] sm:$0xff]   ;;  %v633_v22 = vld [vmem:[%s859_s0 + $0x10] ss:$8 sps:$4 sm:$0xff]  }
   0x8   :  { %530 = vmatprep.subr.bf16.mxu0 %v611_v4  ;;  %592 = vmatprep.subr.bf16.mxu1 %v611_v4  ;;  %v620_v15 = vld [vmem:[%s858_s1 + $0x8] sm:$0xff]   ;;  %v622_v17 = vld [vmem:[%s858_s1] sm:$0xff]   ;;  %v634_v23 = vld [vmem:[%s859_s0 + $0x50] ss:$8 sps:$4 sm:$0xff]  }
   0x9   :  { %342 = vmatprep.mubr.bf16.mxu1 %v628_v12  ;;  %v635_v24 = vld [vmem:[%s859_s0 + $0x24] ss:$8 sps:$4 sm:$0xff]   ;;  %v639_v26 = vld [vmem:[%s859_s0 + $0x20] ss:$8 sps:$4 sm:$0xff]   ;;  %v641_v28 = vld [vmem:[%s859_s0 + $0x34] ss:$8 sps:$4 sm:$0xff]  }
   0xa   :  { %v637_v25 = vld [vmem:[%s859_s0 + $0x64] ss:$8 sps:$4 sm:$0xff]   ;;  %v640_v27 = vld [vmem:[%s859_s0 + $0x60] ss:$8 sps:$4 sm:$0xff]   ;;  %v643_v29 = vld [vmem:[%s859_s0 + $0x74] ss:$8 sps:$4 sm:$0xff]  }
   0xb   :  { %531 = vmatpush3.bf16.msra.mxu0 %v612_v5  ;;  %600 = vmatpush3.bf16.msra.mxu1 %v612_v5  ;;  %v645_v30 = vld [vmem:[%s859_s0 + $0x30] ss:$8 sps:$4 sm:$0xff]   ;;  %v771_v38 = vld [vmem:[%s860_s2] ss:$0 sm:$0xff] }
   0xc   :  { %532 = vmatprep.subr.bf16.mxu0 %v613_v6  ;;  %593 = vmatprep.subr.bf16.mxu1 %v613_v6  ;;  %v646_v31 = vld [vmem:[%s859_s0 + $0x70] ss:$8 sps:$4 sm:$0xff]   ;;  %v776_v41 = vld [vmem:[%s861_s3] ss:$0 sm:$0xff] }
   0xf   :  { %533 = vmatpush3.bf16.msra.mxu0 %v614_v7  ;;  %601 = vmatpush3.bf16.msra.mxu1 %v614_v7 }
  0x10   :  { %534 = vmatprep.subr.bf16.mxu0 %v615_v8  ;;  %594 = vmatprep.subr.bf16.mxu1 %v615_v8 }
  0x13   :  { %535 = vmatpush3.bf16.msra.mxu0 %v616_v9  ;;  %602 = vmatpush3.bf16.msra.mxu1 %v616_v9 }
  0x14   :  { %536 = vmatprep.subr.bf16.mxu0 %v617_v10  ;;  %595 = vmatprep.subr.bf16.mxu1 %v617_v10 }
  0x17   :  { %537 = vmatpush3.bf16.msra.mxu0 %v618_v13  ;;  %603 = vmatpush3.bf16.msra.mxu1 %v618_v13 }
  0x18   :  { %538 = vmatprep.subr.bf16.mxu0 %v619_v14  ;;  %596 = vmatprep.subr.bf16.mxu1 %v619_v14 }
  0x1b   :  { %539 = vmatpush3.bf16.msra.mxu0 %v620_v15  ;;  %604 = vmatpush3.bf16.msra.mxu1 %v620_v15 }
  0x1c   :  { %540 = vmatprep.subr.bf16.mxu0 %v621_v16  ;;  %597 = vmatprep.subr.bf16.mxu1 %v621_v16 }
  0x1f   :  { %541 = vmatpush3.bf16.msra.mxu0 %v622_v17  ;;  %605 = vmatpush3.bf16.msra.mxu1 %v622_v17 }
  0x22   :  { %311 = vmatmul.mubr.bf16.vlgmr.msra.gmra.mxu0 %v623_v18  ;;  %343 = vmatmul.mubr.bf16.vlgmr.msra.gmra.mxu1 %v626_v19 }
  0x23   :  { %318 = vmatprep.mubr.bf16.mxu0 %v629_v20  ;;  %350 = vmatprep.mubr.bf16.mxu1 %v631_v21 }
  0x2a   :  { %319 = vmatmul.mubr.bf16.gmra.mxu0 %v633_v22  ;;  %351 = vmatmul.mubr.bf16.gmra.mxu1 %v634_v23 }
  0x2b   :  { %326 = vmatprep.mubr.bf16.mxu0 %v635_v24  ;;  %358 = vmatprep.mubr.bf16.mxu1 %v637_v25 }
  0x32   :  { %327 = vmatmul.mubr.bf16.gmra.mxu0 %v639_v26  ;;  %359 = vmatmul.mubr.bf16.gmra.mxu1 %v640_v27 }
  0x33   :  { %334 = vmatprep.mubr.bf16.mxu0 %v641_v28  ;;  %366 = vmatprep.mubr.bf16.mxu1 %v643_v29 }
  0x3a   :  { %335 = vmatmul.mubr.bf16.gmra.mxu0 %v645_v30  ;;  %367 = vmatmul.mubr.bf16.gmra.mxu1 %v646_v31 }
  0xe2   :  { %v542_v32 = vpop.f32.mrf.mxu0  ;;  %v566_v33 = vpop.f32.mrf.mxu1 }
  0xe4   :  { %v543_v34 = vpop.f32.mrf.mxu0  ;;  %v567_v35 = vpop.f32.mrf.mxu1 }
  0xe5   :  { %v544_v36 = vadd.f32 %v543_v34, %v542_v32  ;;  %v568_v37 = vadd.f32 %v567_v35, %v566_v33 }
  0xe6   :  { %v545_v39 = vpop.f32.mrf.mxu0  ;;  %v569_v40 = vpop.f32.mrf.mxu1 }
  0xe7   :  { %v433_v44 = vmul.f32 %v544_v36, %v771_v38  ;;  %v441_v45 = vmul.f32 %v568_v37, %v771_v38 }
  0xe8   :  { %v546_v42 = vpop.f32.mrf.mxu0  ;;  %v570_v43 = vpop.f32.mrf.mxu1 }
  0xe9   :  { %v547_v46 = vadd.f32 %v546_v42, %v545_v39  ;;  %v571_v47 = vadd.f32 %v570_v43, %v569_v40  ;;  %v456_v50 = vadd.f32 %v776_v41, %v433_v44  ;;  %v464_v51 = vadd.f32 %v776_v41, %v441_v45 }
  0xea   :  { %v548_v48 = vpop.f32.mrf.mxu0  ;;  %v572_v49 = vpop.f32.mrf.mxu1 }
  0xeb   :  { %472 = vst [vmem:[%s862_s4] sm:$0xff] %v456_v50  ;;  %480 = vst [vmem:[%s862_s4 + $0x40] sm:$0xff] %v464_v51  ;;  %v434_v54 = vmul.f32 %v547_v46, %v771_v38  ;;  %v442_v55 = vmul.f32 %v571_v47, %v771_v38 }
  0xec   :  { %v549_v52 = vpop.f32.mrf.mxu0  ;;  %v573_v53 = vpop.f32.mrf.mxu1 }
  0xed   :  { %v550_v56 = vadd.f32 %v549_v52, %v548_v48  ;;  %v574_v57 = vadd.f32 %v573_v53, %v572_v49  ;;  %v457_v60 = vadd.f32 %v776_v41, %v434_v54  ;;  %v465_v61 = vadd.f32 %v776_v41, %v442_v55 }
  0xee   :  { %v551_v58 = vpop.f32.mrf.mxu0  ;;  %v575_v59 = vpop.f32.mrf.mxu1 }
  0xef   :  { %473 = vst [vmem:[%s862_s4 + $0x8] sm:$0xff] %v457_v60  ;;  %481 = vst [vmem:[%s862_s4 + $0x48] sm:$0xff] %v465_v61  ;;  %v435_v0 = vmul.f32 %v550_v56, %v771_v38  ;;  %v443_v1 = vmul.f32 %v574_v57, %v771_v38 }
  0xf0   :  { %v552_v62 = vpop.f32.mrf.mxu0  ;;  %v576_v63 = vpop.f32.mrf.mxu1 }
  0xf1   :  { %v553_v2 = vadd.f32 %v552_v62, %v551_v58  ;;  %v577_v3 = vadd.f32 %v576_v63, %v575_v59  ;;  %v458_v6 = vadd.f32 %v776_v41, %v435_v0  ;;  %v466_v7 = vadd.f32 %v776_v41, %v443_v1 }
  0xf2   :  { %v554_v4 = vpop.f32.mrf.mxu0  ;;  %v578_v5 = vpop.f32.mrf.mxu1 }
  0xf3   :  { %474 = vst [vmem:[%s862_s4 + $0x10] sm:$0xff] %v458_v6  ;;  %482 = vst [vmem:[%s862_s4 + $0x50] sm:$0xff] %v466_v7  ;;  %v436_v10 = vmul.f32 %v553_v2, %v771_v38  ;;  %v444_v11 = vmul.f32 %v577_v3, %v771_v38 }
  0xf4   :  { %v555_v8 = vpop.f32.mrf.mxu0  ;;  %v579_v9 = vpop.f32.mrf.mxu1 }
  0xf5   :  { %v556_v12 = vadd.f32 %v555_v8, %v554_v4  ;;  %v580_v13 = vadd.f32 %v579_v9, %v578_v5  ;;  %v459_v16 = vadd.f32 %v776_v41, %v436_v10  ;;  %v467_v17 = vadd.f32 %v776_v41, %v444_v11 }
  0xf6   :  { %v557_v14 = vpop.f32.mrf.mxu0  ;;  %v581_v15 = vpop.f32.mrf.mxu1 }
  0xf7   :  { %475 = vst [vmem:[%s862_s4 + $0x18] sm:$0xff] %v459_v16  ;;  %483 = vst [vmem:[%s862_s4 + $0x58] sm:$0xff] %v467_v17  ;;  %v437_v20 = vmul.f32 %v556_v12, %v771_v38  ;;  %v445_v21 = vmul.f32 %v580_v13, %v771_v38 }
  0xf8   :  { %v558_v18 = vpop.f32.mrf.mxu0  ;;  %v582_v19 = vpop.f32.mrf.mxu1 }
  0xf9   :  { %v559_v22 = vadd.f32 %v558_v18, %v557_v14  ;;  %v583_v23 = vadd.f32 %v582_v19, %v581_v15  ;;  %v460_v26 = vadd.f32 %v776_v41, %v437_v20  ;;  %v468_v27 = vadd.f32 %v776_v41, %v445_v21 }
  0xfa   :  { %v560_v24 = vpop.f32.mrf.mxu0  ;;  %v584_v25 = vpop.f32.mrf.mxu1 }
  0xfb   :  { %476 = vst [vmem:[%s862_s4 + $0x20] sm:$0xff] %v460_v26  ;;  %484 = vst [vmem:[%s862_s4 + $0x60] sm:$0xff] %v468_v27  ;;  %v438_v30 = vmul.f32 %v559_v22, %v771_v38  ;;  %v446_v31 = vmul.f32 %v583_v23, %v771_v38 }
  0xfc   :  { %v561_v28 = vpop.f32.mrf.mxu0  ;;  %v585_v29 = vpop.f32.mrf.mxu1 }
  0xfd   :  { %v562_v32 = vadd.f32 %v561_v28, %v560_v24  ;;  %v586_v33 = vadd.f32 %v585_v29, %v584_v25  ;;  %v461_v36 = vadd.f32 %v776_v41, %v438_v30  ;;  %v469_v37 = vadd.f32 %v776_v41, %v446_v31 }
  0xfe   :  { %v563_v34 = vpop.f32.mrf.mxu0  ;;  %v587_v35 = vpop.f32.mrf.mxu1 }
  0xff   :  { %477 = vst [vmem:[%s862_s4 + $0x28] sm:$0xff] %v461_v36  ;;  %485 = vst [vmem:[%s862_s4 + $0x68] sm:$0xff] %v469_v37  ;;  %v439_v42 = vmul.f32 %v562_v32, %v771_v38  ;;  %v447_v43 = vmul.f32 %v586_v33, %v771_v38 }
 0x100   :  { %v564_v39 = vpop.f32.mrf.mxu0  ;;  %v588_v40 = vpop.f32.mrf.mxu1 }
 0x101   :  { %v565_v44 = vadd.f32 %v564_v39, %v563_v34  ;;  %v589_v45 = vadd.f32 %v588_v40, %v587_v35  ;;  %v462_v46 = vadd.f32 %v776_v41, %v439_v42  ;;  %v470_v47 = vadd.f32 %v776_v41, %v447_v43 }
 0x103   :  { %478 = vst [vmem:[%s862_s4 + $0x30] sm:$0xff] %v462_v46  ;;  %486 = vst [vmem:[%s862_s4 + $0x70] sm:$0xff] %v470_v47  ;;  %v440_v48 = vmul.f32 %v565_v44, %v771_v38  ;;  %v448_v49 = vmul.f32 %v589_v45, %v771_v38 }
 0x105   :  { %v463_v50 = vadd.f32 %v776_v41, %v440_v48  ;;  %v471_v51 = vadd.f32 %v776_v41, %v448_v49 }
 0x107   :  { %479 = vst [vmem:[%s862_s4 + $0x38] sm:$0xff] %v463_v50  ;;  %487 = vst [vmem:[%s862_s4 + $0x78] sm:$0xff] %v471_v51 }

// kernel: densenet121_forward.211
= control target key start
LH: loop header
LB: loop body
LE: loop exit
PB: predicated region body
PF: predicated region fallthrough
CT: control target
= control target key end

     0   :  { %s104_s0 = inlined_call_operand.vmem [shape: f32[32,128], index: 0, kind: input, shape index: {}]   ;;  %s105_s1 = inlined_call_operand.vmem [shape: f32[1,128], index: 1, kind: input, shape index: {}]   ;;  %s106_s2 = inlined_call_operand.vmem [shape: f32[1,128], index: 2, kind: input, shape index: {}]   ;;  %s107_s3 = inlined_call_operand.vmem [shape: f32[32,128], index: 3, kind: output, shape index: {}]  }
   0x1   :  { %v14_v0 = vld [vmem:[%s104_s0] sm:$0xff]  ;;  %v15_v4 = vld [vmem:[%s104_s0 + $0x8] sm:$0xff]  ;;  %v16_v5 = vld [vmem:[%s104_s0 + $0x10] sm:$0xff] }
   0x2   :  { %v52_v1 = vld [vmem:[%s105_s1] ss:$0 sm:$0xff]  ;;  %v17_v6 = vld [vmem:[%s104_s0 + $0x18] sm:$0xff] }
   0x3   :  { %v53_v2 = vld [vmem:[%s106_s2] ss:$0 sm:$0xff]  ;;  %v25_v3 = vmul.f32 %v52_v1, %v14_v0  ;;  %v26_v7 = vmul.f32 %v52_v1, %v15_v4  ;;  %v27_v8 = vmul.f32 %v52_v1, %v16_v5  ;;  %v28_v9 = vmul.f32 %v52_v1, %v17_v6 }
   0x5   :  { %v36_v10 = vadd.f32 %v53_v2, %v25_v3  ;;  %v37_v11 = vadd.f32 %v53_v2, %v26_v7  ;;  %v38_v12 = vadd.f32 %v53_v2, %v27_v8  ;;  %v39_v13 = vadd.f32 %v53_v2, %v28_v9 }
   0x7   :  { %v40_v14 = vmax.f32 %v36_v10, 0.0  ;;  %v41_v15 = vmax.f32 %v37_v11, 0.0  ;;  %v42_v16 = vmax.f32 %v38_v12, 0.0  ;;  %v43_v17 = vmax.f32 %v39_v13, 0.0 }
   0x9   :  { %44 = vst [vmem:[%s107_s3] sm:$0xff] %v40_v14  ;;  %45 = vst [vmem:[%s107_s3 + $0x8] sm:$0xff] %v41_v15 }
   0xa   :  { %46 = vst [vmem:[%s107_s3 + $0x10] sm:$0xff] %v42_v16  ;;  %47 = vst [vmem:[%s107_s3 + $0x18] sm:$0xff] %v43_v17 }

// kernel: densenet121_forward.212
= control target key start
LH: loop header
LB: loop body
LE: loop exit
PB: predicated region body
PF: predicated region fallthrough
CT: control target
= control target key end

     0   :  { %s334_s1 = inlined_call_operand.vmem [shape: bf16[128,128], index: 1, kind: input, shape index: {}]   ;;  %s335_s0 = inlined_call_operand.vmem [shape: bf16[32,128], index: 0, kind: input, shape index: {}]   ;;  %s336_s2 = inlined_call_operand.vmem [shape: f32[1,128], index: 2, kind: input, shape index: {}]   ;;  %s337_s3 = inlined_call_operand.vmem [shape: f32[1,128], index: 3, kind: input, shape index: {}]   ;;  %s338_s4 = inlined_call_operand.vmem [shape: f32[32,128], index: 4, kind: output, shape index: {}]  }
   0x1   :  { %v251_v0 = vld [vmem:[%s334_s1 + $0x38] sm:$0xff]   ;;  %v252_v1 = vld [vmem:[%s334_s1 + $0x30] sm:$0xff]   ;;  %v253_v2 = vld [vmem:[%s334_s1 + $0x28] sm:$0xff]  }
   0x2   :  { %230 = vmatprep.subr.bf16.mxu0 %v251_v0  ;;  %v254_v3 = vld [vmem:[%s334_s1 + $0x20] sm:$0xff]   ;;  %v255_v5 = vld [vmem:[%s334_s1 + $0x18] sm:$0xff]   ;;  %v256_v6 = vld [vmem:[%s334_s1 + $0x10] sm:$0xff]  }
   0x3   :  { %231 = vmatpush3.bf16.msra.mxu0 %v251_v0  ;;  %v259_v4 = vld [vmem:[%s335_s0] sm:$0xff]   ;;  %v257_v7 = vld [vmem:[%s334_s1 + $0x8] sm:$0xff]  }
   0x4   :  { %232 = vmatprep.subr.bf16.mxu0 %v252_v1  ;;  %246 = vmatprep.mubr.bf16.mxu0 %v259_v4  ;;  %v258_v8 = vld [vmem:[%s334_s1] sm:$0xff]   ;;  %v260_v9 = vld [vmem:[%s335_s0 + $0x8] sm:$0xff]  }
   0x5   :  { %v218_v11 = vld [vmem:[%s336_s2] ss:$0 sm:$0xff] }
   0x6   :  { %v219_v12 = vld [vmem:[%s337_s3] ss:$0 sm:$0xff] }
   0x7   :  { %233 = vmatpush3.bf16.msra.mxu0 %v252_v1 }
   0x8   :  { %234 = vmatprep.subr.bf16.mxu0 %v253_v2 }
   0xb   :  { %235 = vmatpush3.bf16.msra.mxu0 %v253_v2 }
   0xc   :  { %236 = vmatprep.subr.bf16.mxu0 %v254_v3 }
   0xf   :  { %237 = vmatpush3.bf16.msra.mxu0 %v254_v3 }
  0x10   :  { %238 = vmatprep.subr.bf16.mxu0 %v255_v5 }
  0x13   :  { %239 = vmatpush3.bf16.msra.mxu0 %v255_v5 }
  0x14   :  { %240 = vmatprep.subr.bf16.mxu0 %v256_v6 }
  0x17   :  { %241 = vmatpush3.bf16.msra.mxu0 %v256_v6 }
  0x18   :  { %242 = vmatprep.subr.bf16.mxu0 %v257_v7 }
  0x1b   :  { %243 = vmatpush3.bf16.msra.mxu0 %v257_v7 }
  0x1c   :  { %244 = vmatprep.subr.bf16.mxu0 %v258_v8 }
  0x1f   :  { %245 = vmatpush3.bf16.msra.mxu0 %v258_v8 }
  0x22   :  { %247 = vmatmul.mubr.bf16.vlgmr.msra.gmra.mxu0 %v260_v9 }
  0xe2   :  { %v248_v10 = vpop.f32.mrf.mxu0 }
  0xe3   :  { %v183_v14 = vmul.f32 %v248_v10, %v218_v11 }
  0xe4   :  { %v144_v13 = vpop.f32.mrf.mxu0 }
  0xe5   :  { %v194_v16 = vadd.f32 %v219_v12, %v183_v14  ;;  %v181_v17 = vmul.f32 %v218_v11, %v144_v13 }
  0xe6   :  { %v249_v15 = vpop.f32.mrf.mxu0 }
  0xe7   :  { %v198_v19 = vmax.f32 %v194_v16, 0.0  ;;  %v192_v20 = vadd.f32 %v219_v12, %v181_v17  ;;  %v184_v21 = vmul.f32 %v249_v15, %v218_v11 }
  0xe8   :  { %v147_v18 = vpop.f32.mrf.mxu0 }
  0xe9   :  { %202 = vst [vmem:[%s338_s4 + $0x10] sm:$0xff] %v198_v19  ;;  %v196_v22 = vmax.f32 %v192_v20, 0.0  ;;  %v195_v23 = vadd.f32 %v219_v12, %v184_v21  ;;  %v182_v24 = vmul.f32 %v218_v11, %v147_v18 }
  0xeb   :  { %200 = vst [vmem:[%s338_s4] sm:$0xff] %v196_v22  ;;  %v199_v25 = vmax.f32 %v195_v23, 0.0  ;;  %v193_v26 = vadd.f32 %v219_v12, %v182_v24 }
  0xed   :  { %203 = vst [vmem:[%s338_s4 + $0x18] sm:$0xff] %v199_v25  ;;  %v197_v27 = vmax.f32 %v193_v26, 0.0 }
  0xef   :  { %201 = vst [vmem:[%s338_s4 + $0x8] sm:$0xff] %v197_v27 }

// kernel: densenet121_forward.213
= control target key start
LH: loop header
LB: loop body
LE: loop exit
PB: predicated region body
PF: predicated region fallthrough
CT: control target
= control target key end

     0   :  { %s935_s15 = smov 0   ;;  %s937_s16 = smov 0   ;;  %s1092_s0 = inlined_call_operand.vmem [shape: bf16[32,1280], index: 0, kind: input, shape index: {}]   ;;  %s1093_s1 = inlined_call_operand.vmem [shape: bf16[1280,128], index: 1, kind: input, shape index: {}]   ;;  %s1094_s2 = inlined_call_operand.vmem [shape: f32[1,128], index: 2, kind: input, shape index: {}]   ;;  %s1095_s3 = inlined_call_operand.vmem [shape: f32[1,128], index: 3, kind: input, shape index: {}]   ;;  %s1096_s4 = inlined_call_operand.vmem [shape: f32[32,128], index: 4, kind: output, shape index: {}]  }
   0x1   :  { %s939_s17 = smov 0   ;;  %s941_s18 = smov 0  }
   0x2   :  { %s943_s19 = smov 0  }
   0x3 LB: > { %s26_s20 = sadd.s32 1, %s903_s18  ;;  %p49_p1 = scmp.ne.s32.totalorder %s895_s16, %s891_s15  ;;  %s907_s19 = sphi %s943_s19, %s14_s19   ;;  %s903_s18 = sphi %s941_s18, %s1100_s18   ;;  %s899_s17 = sphi %s939_s17, %s1099_s17   ;;  %s895_s16 = sphi %s937_s16, %s1098_s16   ;;  %s891_s15 = sphi %s935_s15, %s1097_s15  }
   0x4   : > { %p27_p0 = scmp.ge.s32.totalorder %s26_s20, 5  ;;  %p50_p2 = scmp.eq.s32.totalorder %s907_s19, 0 }
   0x5   : > { %s42_s22 = sadd.s32 1, %s895_s16  ;;  %p725_p5 = scmp.ge.s32.totalorder %s907_s19, 5 }
   0x6   : > { %s1102_s20 = smov (%p27_p0, %s26_s20), 0  ;;  %p51_p3 = por %p50_p2, %p49_p1 }
   0x7   : > { %s38_s21 = ssub.s32 %s903_s18, %s1102_s20  ;;  %195 = sbr.rel (%p725_p5) target bundleno = 18 (0x12), region = 24 }
   0x8   : > { %p40_p4 = scmp.eq.s32.totalorder %s38_s21, 0 }
   0xa   : > { %s970_s23 = scalar_select %p40_p4, %s895_s16, %s42_s22  }
   0xc   : > { %198 = sbr.rel (!%p51_p3) target bundleno = 18 (0x12), region = 28  ;;  %s200_s24 = sand.u32 (%p51_p3), 1, %s895_s16  }
   0xd   : > { %s761_s25 = sshll.u32 (%p51_p3), %s903_s18, 3  ;;  %s726_s26 = sshll.u32 (%p51_p3), %s200_s24, 5 }
   0xe   : > { %s208_s29 = scalar_lea.vmem (%p51_p3), %s1092_s0, %s761_s25  ;;  %s202_s30 = scalar_lea.vmem (%p51_p3), [#allocation2], %s726_s26 }
   0xf   : > { %v243_v0 = vld [vmem:[%s208_s29] sm:$0xff] (%p51_p3)  ;;  %v245_v1 = vld [vmem:[%s208_s29 + $0x28] sm:$0xff] (%p51_p3)  ;;  %v247_v2 = vld [vmem:[%s208_s29 + $0x50] sm:$0xff] (%p51_p3) }
  0x10   : > { %244 = vst [vmem:[%s202_s30] sm:$0xff] (%p51_p3), %v243_v0  ;;  %246 = vst [vmem:[%s202_s30 + $0x8] sm:$0xff] (%p51_p3), %v245_v1  ;;  %v249_v3 = vld [vmem:[%s208_s29 + $0x78] sm:$0xff] (%p51_p3) }
  0x11   : > { %248 = vst [vmem:[%s202_s30 + $0x10] sm:$0xff] %v247_v2  ;;  %250 = vst [vmem:[%s202_s30 + $0x18] sm:$0xff] %v249_v3 }
  0x12 PF: > { %p729_p6 = scmp.ge.s32.totalorder %s907_s19, 1  ;;  %p267_p7 = scmp.lt.s32.totalorder %s907_s19, 6 }
  0x14   : > { %p268_p8 = pnand %p729_p6, %p267_p7 }
  0x15   : > { %s274_s5 = sand.u32 (!%p268_p8), 1, %s891_s15   ;;  %s731_s6 = sshll.u32 (!%p268_p8), %s899_s17, 5 }
  0x16   : > { %271 = sbr.rel (%p268_p8) target bundleno = 284 (0x11c), region = 70  ;;  %s730_s7 = sshll.u32 (!%p268_p8), %s274_s5, 5 }
  0x17   : > { %p319_p9 = scmp.lt.s32.totalorder (!%p268_p8), %s731_s6, 159  ;;  %s987_s12 = scalar_lea.vmem (!%p268_p8), [#allocation2], %s730_s7 }
  0x18   : > { %p733_p10 = scmp.ne.s32.totalorder (!%p268_p8), %s899_s17, 0 }
  0x1b   : > { %s1104_s6 = smov (!%p319_p9, %s731_s6), 159  ;;  %346 = sbr.rel (%p733_p10) target bundleno = 35 (0x23), region = 78 }
  0x1c   : > { %s732_s8 = sshll.u32 %s1104_s6, 2 }
  0x1d   : > { %s985_s11 = scalar_lea.vmem %s1093_s1, %s732_s8 }
  0x20   : > { %v909_v4 = vmov 0.0  }
  0x21   : > { %347 = vst [vmem:[%s1096_s4] sm:$0xff] %v909_v4  ;;  %348 = vst [vmem:[%s1096_s4 + $0x8] sm:$0xff] %v909_v4 }
  0x22   : > { %349 = vst [vmem:[%s1096_s4 + $0x10] sm:$0xff] %v909_v4  ;;  %350 = vst [vmem:[%s1096_s4 + $0x18] sm:$0xff] %v909_v4 }
  0x23 PF: > { %v847_v5 = vld [vmem:[%s985_s11 + $0x78] sm:$0xff]   ;;  %v849_v7 = vld [vmem:[%s985_s11 + $0x70] sm:$0xff]   ;;  %v851_v9 = vld [vmem:[%s985_s11 + $0x68] sm:$0xff]   ;;  %p754_p11 = scmp.ne.s32.totalorder %s899_s17, 4 }
  0x24   : > { %v848_v6 = vld [vmem:[%s985_s11 + $0x38] sm:$0xff]   ;;  %762 = vmatprep.subr.bf16.mxu0 %v847_v5  ;;  %790 = vmatprep.subr.bf16.mxu1 %v847_v5  ;;  %v850_v8 = vld [vmem:[%s985_s11 + $0x30] sm:$0xff]   ;;  %v852_v10 = vld [vmem:[%s985_s11 + $0x28] sm:$0xff]  }
  0x25   : > { %763 = vmatpush3.bf16.msra.mxu0 %v848_v6  ;;  %798 = vmatpush3.bf16.msra.mxu1 %v848_v6  ;;  %v853_v11 = vld [vmem:[%s985_s11 + $0x60] sm:$0xff]   ;;  %v855_v13 = vld [vmem:[%s985_s11 + $0x58] sm:$0xff]   ;;  %v857_v15 = vld [vmem:[%s985_s11 + $0x50] sm:$0xff]  }
  0x26   : > { %764 = vmatprep.subr.bf16.mxu0 %v849_v7  ;;  %791 = vmatprep.subr.bf16.mxu1 %v849_v7  ;;  %v854_v12 = vld [vmem:[%s985_s11 + $0x20] sm:$0xff]   ;;  %v856_v14 = vld [vmem:[%s985_s11 + $0x18] sm:$0xff]   ;;  %v858_v18 = vld [vmem:[%s985_s11 + $0x10] sm:$0xff]  }
  0x27   : > { %v865_v16 = vld [vmem:[%s987_s12 + $0x4] ss:$8 sps:$4 sm:$0xff]   ;;  %v868_v17 = vld [vmem:[%s987_s12 + $0x14] ss:$8 sps:$4 sm:$0xff]   ;;  %v863_v23 = vld [vmem:[%s987_s12] ss:$8 sps:$4 sm:$0xff]  }
  0x28   : > { %v859_v19 = vld [vmem:[%s985_s11 + $0x48] sm:$0xff]   ;;  %539 = vmatprep.mubr.bf16.mxu0 %v865_v16  ;;  %547 = vmatprep.mubr.bf16.mxu1 %v868_v17  ;;  %v861_v21 = vld [vmem:[%s985_s11 + $0x40] sm:$0xff]   ;;  %v866_v24 = vld [vmem:[%s987_s12 + $0x10] ss:$8 sps:$4 sm:$0xff]  }
  0x29   : > { %765 = vmatpush3.bf16.msra.mxu0 %v850_v8  ;;  %799 = vmatpush3.bf16.msra.mxu1 %v850_v8  ;;  %v860_v20 = vld [vmem:[%s985_s11 + $0x8] sm:$0xff]   ;;  %v862_v22 = vld [vmem:[%s985_s11] sm:$0xff]   ;;  %v353_v29 = vld [vmem:[%s1096_s4 + $0x10] sm:$0xff] }
  0x2a   : > { %766 = vmatprep.subr.bf16.mxu0 %v851_v9  ;;  %792 = vmatprep.subr.bf16.mxu1 %v851_v9  ;;  %v351_v27 = vld [vmem:[%s1096_s4] sm:$0xff]  ;;  %v352_v37 = vld [vmem:[%s1096_s4 + $0x8] sm:$0xff]  ;;  %v354_v39 = vld [vmem:[%s1096_s4 + $0x18] sm:$0xff] }
  0x2d   : > { %767 = vmatpush3.bf16.msra.mxu0 %v852_v10  ;;  %800 = vmatpush3.bf16.msra.mxu1 %v852_v10 }
  0x2e   : > { %768 = vmatprep.subr.bf16.mxu0 %v853_v11  ;;  %793 = vmatprep.subr.bf16.mxu1 %v853_v11 }
  0x31   : > { %769 = vmatpush3.bf16.msra.mxu0 %v854_v12  ;;  %801 = vmatpush3.bf16.msra.mxu1 %v854_v12 }
  0x32   : > { %770 = vmatprep.subr.bf16.mxu0 %v855_v13  ;;  %794 = vmatprep.subr.bf16.mxu1 %v855_v13 }
  0x35   : > { %771 = vmatpush3.bf16.msra.mxu0 %v856_v14  ;;  %802 = vmatpush3.bf16.msra.mxu1 %v856_v14 }
  0x36   : > { %772 = vmatprep.subr.bf16.mxu0 %v857_v15  ;;  %795 = vmatprep.subr.bf16.mxu1 %v857_v15 }
  0x39   : > { %773 = vmatpush3.bf16.msra.mxu0 %v858_v18  ;;  %803 = vmatpush3.bf16.msra.mxu1 %v858_v18 }
  0x3a   : > { %774 = vmatprep.subr.bf16.mxu0 %v859_v19  ;;  %796 = vmatprep.subr.bf16.mxu1 %v859_v19 }
  0x3d   : > { %775 = vmatpush3.bf16.msra.mxu0 %v860_v20  ;;  %804 = vmatpush3.bf16.msra.mxu1 %v860_v20 }
  0x3e   : > { %776 = vmatprep.subr.bf16.mxu0 %v861_v21  ;;  %797 = vmatprep.subr.bf16.mxu1 %v861_v21 }
  0x41   : > { %777 = vmatpush3.bf16.msra.mxu0 %v862_v22  ;;  %805 = vmatpush3.bf16.msra.mxu1 %v862_v22 }
  0x44   : > { %540 = vmatmul.mubr.bf16.vlgmr.msra.gmra.mxu0 %v863_v23  ;;  %548 = vmatmul.mubr.bf16.vlgmr.msra.gmra.mxu1 %v866_v24 }
 0x104   : > { %v778_v25 = vpop.f32.mrf.mxu0  ;;  %v784_v26 = vpop.f32.mrf.mxu1 }
 0x106   : > { %v779_v28 = vpop.f32.mrf.mxu0  ;;  %v785_v30 = vpop.f32.mrf.mxu1 }
 0x107   : > { %v780_v31 = vadd.f32 %v779_v28, %v778_v25  ;;  %v786_v32 = vadd.f32 %v785_v30, %v784_v26 }
 0x108   : > { %v781_v33 = vpop.f32.mrf.mxu0  ;;  %v787_v34 = vpop.f32.mrf.mxu1 }
 0x109   : > { %v556_v35 = vadd.f32 %v780_v31, %v351_v27  ;;  %v558_v36 = vadd.f32 %v786_v32, %v353_v29 }
 0x10a   : > { %v782_v38 = vpop.f32.mrf.mxu0  ;;  %v788_v40 = vpop.f32.mrf.mxu1 }
 0x10b   : > { %560 = vst [vmem:[%s1096_s4] sm:$0xff] %v556_v35  ;;  %562 = vst [vmem:[%s1096_s4 + $0x10] sm:$0xff] %v558_v36  ;;  %v783_v41 = vadd.f32 %v782_v38, %v781_v33  ;;  %v789_v42 = vadd.f32 %v788_v40, %v787_v34  ;;  %567 = sbr.rel (%p754_p11) target bundleno = 284 (0x11c), region = 82 }
 0x10d   : > { %v557_v43 = vadd.f32 %v783_v41, %v352_v37  ;;  %v559_v44 = vadd.f32 %v789_v42, %v354_v39 }
 0x10f   : > { %561 = vst [vmem:[%s1096_s4 + $0x8] sm:$0xff] %v557_v43  ;;  %563 = vst [vmem:[%s1096_s4 + $0x18] sm:$0xff] %v559_v44 }
 0x110   : > { %v755_v46 = vld [vmem:[%s1094_s2] ss:$0 sm:$0xff] }
 0x111   : > { %v756_v47 = vld [vmem:[%s1095_s3] ss:$0 sm:$0xff] }
 0x112   : > { %v568_v45 = vld [vmem:[%s1096_s4] sm:$0xff]  ;;  %v570_v50 = vld [vmem:[%s1096_s4 + $0x10] sm:$0xff] }
 0x113   : > { %v579_v48 = vmul.f32 %v755_v46, %v568_v45  ;;  %v581_v53 = vmul.f32 %v755_v46, %v570_v50 }
 0x115   : > { %v590_v55 = vadd.f32 %v756_v47, %v579_v48  ;;  %v592_v57 = vadd.f32 %v756_v47, %v581_v53 }
 0x116   : > { %v569_v49 = vld [vmem:[%s1096_s4 + $0x8] sm:$0xff]  ;;  %v571_v51 = vld [vmem:[%s1096_s4 + $0x18] sm:$0xff] }
 0x117   : > { %v580_v52 = vmul.f32 %v755_v46, %v569_v49  ;;  %v582_v54 = vmul.f32 %v755_v46, %v571_v51  ;;  %594 = vst [vmem:[%s1096_s4] sm:$0xff] %v590_v55  ;;  %596 = vst [vmem:[%s1096_s4 + $0x10] sm:$0xff] %v592_v57 }
 0x119   : > { %v591_v56 = vadd.f32 %v756_v47, %v580_v52  ;;  %v593_v58 = vadd.f32 %v756_v47, %v582_v54 }
 0x11b   : > { %595 = vst [vmem:[%s1096_s4 + $0x8] sm:$0xff] %v591_v56  ;;  %597 = vst [vmem:[%s1096_s4 + $0x18] sm:$0xff] %v593_v58 }
 0x11c PF: > { %s14_s19 = sadd.s32 1, %s907_s19   ;;  %s1097_s15 = smov %s895_s16 }
 0x11d   : > { %p11_p12 = scmp.ge.s32.totalorder %s14_s19, 7   ;;  %s1098_s16 = smov %s970_s23 }
 0x11e   : > { %s1099_s17 = smov %s903_s18  ;;  %s1100_s18 = smov %s1102_s20 }
 0x11f   :  { %13 = sbr.rel (!%p11_p12) target bundleno = 3 (0x3), region = 126 }

// kernel: densenet121_forward.214
= control target key start
LH: loop header
LB: loop body
LE: loop exit
PB: predicated region body
PF: predicated region fallthrough
CT: control target
= control target key end

     0   :  { %v24_v0 = vlaneseq  ;;  %s156_s1 = inlined_call_operand.vmem [shape: f32[1,256], index: 1, kind: input, shape index: {}]   ;;  %s157_s2 = inlined_call_operand.vmem [shape: f32[1,256], index: 2, kind: input, shape index: {}]   ;;  %s158_s0 = inlined_call_operand.vmem [shape: f32[32,256], index: 0, kind: input, shape index: {}]   ;;  %s159_s3 = inlined_call_operand.vmem [shape: f32[32,256], index: 3, kind: output, shape index: {}]  }
   0x1   :  { %v22_v2 = vld [vmem:[%s156_s1] sm:$0x3]  ;;  %v15_v6 = vld [vmem:[%s158_s0 + $0x8] sm:$0xff]  ;;  %v16_v8 = vld [vmem:[%s158_s0 + $0x10] sm:$0xff] }
   0x2   :  { %v25_v1 = vshrl.u32 %v24_v0, 7  ;;  %v42_v3 = vld [vmem:[%s157_s2] sm:$0x3]  ;;  %v17_v9 = vld [vmem:[%s158_s0 + $0x18] sm:$0xff]  ;;  %v19_v15 = vld [vmem:[%s158_s0 + $0x28] sm:$0xff] }
   0x3   :  { %v14_v4 = vld [vmem:[%s158_s0] sm:$0xff]  ;;  %v20_v16 = vld [vmem:[%s158_s0 + $0x30] sm:$0xff]  ;;  %v21_v17 = vld [vmem:[%s158_s0 + $0x38] sm:$0xff] }
   0x4   :  { %v26_v5 = vsub.s32 0, %v25_v1  ;;  %v30_v7 = vsub.s32 1, %v25_v1  ;;  %v18_v10 = vld [vmem:[%s158_s0 + $0x20] sm:$0xff] }
   0x6   :  { %v27_v11 = vrot.slane %v22_v2, %v26_v5  ;;  %v47_v12 = vrot.slane %v42_v3, %v26_v5  ;;  %v31_v13 = vrot.slane %v22_v2, %v30_v7  ;;  %v51_v14 = vrot.slane %v42_v3, %v30_v7 }
   0x8   :  { %v34_v18 = vmul.f32 %v27_v11, %v14_v4  ;;  %v35_v19 = vmul.f32 %v31_v13, %v15_v6  ;;  %v36_v20 = vmul.f32 %v27_v11, %v16_v8  ;;  %v37_v21 = vmul.f32 %v31_v13, %v17_v9 }
   0x9   :  { %v38_v22 = vmul.f32 %v27_v11, %v18_v10  ;;  %v39_v23 = vmul.f32 %v31_v13, %v19_v15  ;;  %v40_v24 = vmul.f32 %v27_v11, %v20_v16  ;;  %v41_v25 = vmul.f32 %v31_v13, %v21_v17 }
   0xa   :  { %v54_v26 = vadd.f32 %v47_v12, %v34_v18  ;;  %v55_v27 = vadd.f32 %v51_v14, %v35_v19  ;;  %v56_v28 = vadd.f32 %v47_v12, %v36_v20  ;;  %v57_v29 = vadd.f32 %v51_v14, %v37_v21 }
   0xb   :  { %v58_v30 = vadd.f32 %v47_v12, %v38_v22  ;;  %v59_v31 = vadd.f32 %v51_v14, %v39_v23  ;;  %v60_v32 = vadd.f32 %v47_v12, %v40_v24  ;;  %v61_v33 = vadd.f32 %v51_v14, %v41_v25 }
   0xc   :  { %v62_v34 = vmax.f32 %v54_v26, 0.0  ;;  %v63_v35 = vmax.f32 %v55_v27, 0.0  ;;  %v64_v36 = vmax.f32 %v56_v28, 0.0  ;;  %v65_v37 = vmax.f32 %v57_v29, 0.0 }
   0xd   :  { %v66_v38 = vmax.f32 %v58_v30, 0.0  ;;  %v67_v39 = vmax.f32 %v59_v31, 0.0  ;;  %v68_v40 = vmax.f32 %v60_v32, 0.0  ;;  %v69_v41 = vmax.f32 %v61_v33, 0.0 }
   0xe   :  { %70 = vst [vmem:[%s159_s3] sm:$0xff] %v62_v34  ;;  %71 = vst [vmem:[%s159_s3 + $0x8] sm:$0xff] %v63_v35 }
   0xf   :  { %72 = vst [vmem:[%s159_s3 + $0x10] sm:$0xff] %v64_v36  ;;  %73 = vst [vmem:[%s159_s3 + $0x18] sm:$0xff] %v65_v37 }
  0x10   :  { %74 = vst [vmem:[%s159_s3 + $0x20] sm:$0xff] %v66_v38  ;;  %75 = vst [vmem:[%s159_s3 + $0x28] sm:$0xff] %v67_v39 }
  0x11   :  { %76 = vst [vmem:[%s159_s3 + $0x30] sm:$0xff] %v68_v40  ;;  %77 = vst [vmem:[%s159_s3 + $0x38] sm:$0xff] %v69_v41 }

// kernel: densenet121_forward.215
= control target key start
LH: loop header
LB: loop body
LE: loop exit
PB: predicated region body
PF: predicated region fallthrough
CT: control target
= control target key end

     0   :  { %s472_s1 = inlined_call_operand.vmem [shape: bf16[256,128], index: 1, kind: input, shape index: {}]   ;;  %s473_s0 = inlined_call_operand.vmem [shape: bf16[32,256], index: 0, kind: input, shape index: {}]   ;;  %s474_s2 = inlined_call_operand.vmem [shape: f32[1,128], index: 2, kind: input, shape index: {}]   ;;  %s475_s3 = inlined_call_operand.vmem [shape: f32[1,128], index: 3, kind: input, shape index: {}]   ;;  %s476_s4 = inlined_call_operand.vmem [shape: f32[32,128], index: 4, kind: output, shape index: {}]  }
   0x1   :  { %v347_v0 = vld [vmem:[%s472_s1 + $0x78] sm:$0xff]   ;;  %v349_v2 = vld [vmem:[%s472_s1 + $0x70] sm:$0xff]   ;;  %v351_v4 = vld [vmem:[%s472_s1 + $0x68] sm:$0xff]  }
   0x2   :  { %v348_v1 = vld [vmem:[%s472_s1 + $0x38] sm:$0xff]   ;;  %302 = vmatprep.subr.bf16.mxu0 %v347_v0  ;;  %330 = vmatprep.subr.bf16.mxu1 %v347_v0  ;;  %v350_v3 = vld [vmem:[%s472_s1 + $0x30] sm:$0xff]   ;;  %v352_v5 = vld [vmem:[%s472_s1 + $0x28] sm:$0xff]  }
   0x3   :  { %303 = vmatpush3.bf16.msra.mxu0 %v348_v1  ;;  %338 = vmatpush3.bf16.msra.mxu1 %v348_v1  ;;  %v353_v6 = vld [vmem:[%s472_s1 + $0x60] sm:$0xff]   ;;  %v355_v8 = vld [vmem:[%s472_s1 + $0x58] sm:$0xff]   ;;  %v357_v10 = vld [vmem:[%s472_s1 + $0x50] sm:$0xff]  }
   0x4   :  { %304 = vmatprep.subr.bf16.mxu0 %v349_v2  ;;  %331 = vmatprep.subr.bf16.mxu1 %v349_v2  ;;  %v354_v7 = vld [vmem:[%s472_s1 + $0x20] sm:$0xff]   ;;  %v356_v9 = vld [vmem:[%s472_s1 + $0x18] sm:$0xff]   ;;  %v358_v13 = vld [vmem:[%s472_s1 + $0x10] sm:$0xff]  }
   0x5   :  { %v365_v11 = vld [vmem:[%s473_s0 + $0x4] ss:$8 sps:$4 sm:$0xff]   ;;  %v368_v12 = vld [vmem:[%s473_s0 + $0x14] ss:$8 sps:$4 sm:$0xff]   ;;  %v363_v18 = vld [vmem:[%s473_s0] ss:$8 sps:$4 sm:$0xff]  }
   0x6   :  { %v359_v14 = vld [vmem:[%s472_s1 + $0x48] sm:$0xff]   ;;  %214 = vmatprep.mubr.bf16.mxu0 %v365_v11  ;;  %222 = vmatprep.mubr.bf16.mxu1 %v368_v12  ;;  %v361_v16 = vld [vmem:[%s472_s1 + $0x40] sm:$0xff]   ;;  %v366_v19 = vld [vmem:[%s473_s0 + $0x10] ss:$8 sps:$4 sm:$0xff]  }
   0x7   :  { %305 = vmatpush3.bf16.msra.mxu0 %v350_v3  ;;  %339 = vmatpush3.bf16.msra.mxu1 %v350_v3  ;;  %v360_v15 = vld [vmem:[%s472_s1 + $0x8] sm:$0xff]   ;;  %v362_v17 = vld [vmem:[%s472_s1] sm:$0xff]  }
   0x8   :  { %306 = vmatprep.subr.bf16.mxu0 %v351_v4  ;;  %332 = vmatprep.subr.bf16.mxu1 %v351_v4  ;;  %v300_v26 = vld [vmem:[%s474_s2] ss:$0 sm:$0xff] }
   0x9   :  { %v301_v29 = vld [vmem:[%s475_s3] ss:$0 sm:$0xff] }
   0xb   :  { %307 = vmatpush3.bf16.msra.mxu0 %v352_v5  ;;  %340 = vmatpush3.bf16.msra.mxu1 %v352_v5 }
   0xc   :  { %308 = vmatprep.subr.bf16.mxu0 %v353_v6  ;;  %333 = vmatprep.subr.bf16.mxu1 %v353_v6 }
   0xf   :  { %309 = vmatpush3.bf16.msra.mxu0 %v354_v7  ;;  %341 = vmatpush3.bf16.msra.mxu1 %v354_v7 }
  0x10   :  { %310 = vmatprep.subr.bf16.mxu0 %v355_v8  ;;  %334 = vmatprep.subr.bf16.mxu1 %v355_v8 }
  0x13   :  { %311 = vmatpush3.bf16.msra.mxu0 %v356_v9  ;;  %342 = vmatpush3.bf16.msra.mxu1 %v356_v9 }
  0x14   :  { %312 = vmatprep.subr.bf16.mxu0 %v357_v10  ;;  %335 = vmatprep.subr.bf16.mxu1 %v357_v10 }
  0x17   :  { %313 = vmatpush3.bf16.msra.mxu0 %v358_v13  ;;  %343 = vmatpush3.bf16.msra.mxu1 %v358_v13 }
  0x18   :  { %314 = vmatprep.subr.bf16.mxu0 %v359_v14  ;;  %336 = vmatprep.subr.bf16.mxu1 %v359_v14 }
  0x1b   :  { %315 = vmatpush3.bf16.msra.mxu0 %v360_v15  ;;  %344 = vmatpush3.bf16.msra.mxu1 %v360_v15 }
  0x1c   :  { %316 = vmatprep.subr.bf16.mxu0 %v361_v16  ;;  %337 = vmatprep.subr.bf16.mxu1 %v361_v16 }
  0x1f   :  { %317 = vmatpush3.bf16.msra.mxu0 %v362_v17  ;;  %345 = vmatpush3.bf16.msra.mxu1 %v362_v17 }
  0x22   :  { %215 = vmatmul.mubr.bf16.vlgmr.msra.gmra.mxu0 %v363_v18  ;;  %223 = vmatmul.mubr.bf16.vlgmr.msra.gmra.mxu1 %v366_v19 }
  0xe2   :  { %v318_v20 = vpop.f32.mrf.mxu0  ;;  %v324_v21 = vpop.f32.mrf.mxu1 }
  0xe4   :  { %v319_v22 = vpop.f32.mrf.mxu0  ;;  %v325_v23 = vpop.f32.mrf.mxu1 }
  0xe5   :  { %v320_v24 = vadd.f32 %v319_v22, %v318_v20  ;;  %v326_v25 = vadd.f32 %v325_v23, %v324_v21 }
  0xe6   :  { %v321_v27 = vpop.f32.mrf.mxu0  ;;  %v327_v28 = vpop.f32.mrf.mxu1 }
  0xe7   :  { %v253_v32 = vmul.f32 %v320_v24, %v300_v26  ;;  %v255_v33 = vmul.f32 %v326_v25, %v300_v26 }
  0xe8   :  { %v322_v30 = vpop.f32.mrf.mxu0  ;;  %v328_v31 = vpop.f32.mrf.mxu1 }
  0xe9   :  { %v323_v34 = vadd.f32 %v322_v30, %v321_v27  ;;  %v329_v35 = vadd.f32 %v328_v31, %v327_v28  ;;  %v264_v36 = vadd.f32 %v301_v29, %v253_v32  ;;  %v266_v37 = vadd.f32 %v301_v29, %v255_v33 }
  0xeb   :  { %v268_v38 = vmax.f32 %v264_v36, 0.0  ;;  %v270_v39 = vmax.f32 %v266_v37, 0.0  ;;  %v254_v40 = vmul.f32 %v323_v34, %v300_v26  ;;  %v256_v41 = vmul.f32 %v329_v35, %v300_v26 }
  0xed   :  { %272 = vst [vmem:[%s476_s4] sm:$0xff] %v268_v38  ;;  %274 = vst [vmem:[%s476_s4 + $0x10] sm:$0xff] %v270_v39  ;;  %v265_v42 = vadd.f32 %v301_v29, %v254_v40  ;;  %v267_v43 = vadd.f32 %v301_v29, %v256_v41 }
  0xef   :  { %v269_v44 = vmax.f32 %v265_v42, 0.0  ;;  %v271_v45 = vmax.f32 %v267_v43, 0.0 }
  0xf1   :  { %273 = vst [vmem:[%s476_s4 + $0x8] sm:$0xff] %v269_v44  ;;  %275 = vst [vmem:[%s476_s4 + $0x18] sm:$0xff] %v271_v45 }

// kernel: densenet121_forward.226
= control target key start
LH: loop header
LB: loop body
LE: loop exit
PB: predicated region body
PF: predicated region fallthrough
CT: control target
= control target key end

     0   :  { %v28_v0 = vlaneseq  ;;  %s210_s1 = inlined_call_operand.vmem [shape: f32[1,384], index: 1, kind: input, shape index: {}]   ;;  %s211_s2 = inlined_call_operand.vmem [shape: f32[1,384], index: 2, kind: input, shape index: {}]   ;;  %s212_s0 = inlined_call_operand.vmem [shape: f32[32,384], index: 0, kind: input, shape index: {}]   ;;  %s213_s3 = inlined_call_operand.vmem [shape: f32[32,384], index: 3, kind: output, shape index: {}]  }
   0x1   :  { %v26_v2 = vld [vmem:[%s210_s1] sm:$0x7]  ;;  %v15_v6 = vld [vmem:[%s212_s0 + $0x8] sm:$0xff]  ;;  %v16_v9 = vld [vmem:[%s212_s0 + $0x10] sm:$0xff] }
   0x2   :  { %v29_v1 = vshrl.u32 %v28_v0, 7  ;;  %v55_v3 = vld [vmem:[%s211_s2] sm:$0x7]  ;;  %v17_v10 = vld [vmem:[%s212_s0 + $0x18] sm:$0xff]  ;;  %v19_v16 = vld [vmem:[%s212_s0 + $0x28] sm:$0xff] }
   0x3   :  { %v14_v4 = vld [vmem:[%s212_s0] sm:$0xff]  ;;  %v20_v17 = vld [vmem:[%s212_s0 + $0x30] sm:$0xff]  ;;  %v21_v18 = vld [vmem:[%s212_s0 + $0x38] sm:$0xff] }
   0x4   :  { %v30_v5 = vsub.s32 0, %v29_v1  ;;  %v34_v7 = vsub.s32 1, %v29_v1  ;;  %v38_v8 = vsub.s32 2, %v29_v1  ;;  %v18_v11 = vld [vmem:[%s212_s0 + $0x20] sm:$0xff]  ;;  %v23_v38 = vld [vmem:[%s212_s0 + $0x48] sm:$0xff]  ;;  %v24_v39 = vld [vmem:[%s212_s0 + $0x50] sm:$0xff] }
   0x5   :  { %v22_v33 = vld [vmem:[%s212_s0 + $0x40] sm:$0xff]  ;;  %v25_v40 = vld [vmem:[%s212_s0 + $0x58] sm:$0xff] }
   0x6   :  { %v31_v12 = vrot.slane %v26_v2, %v30_v5  ;;  %v60_v13 = vrot.slane %v55_v3, %v30_v5  ;;  %v35_v14 = vrot.slane %v26_v2, %v34_v7  ;;  %v64_v15 = vrot.slane %v55_v3, %v34_v7 }
   0x7   :  { %v39_v19 = vrot.slane %v26_v2, %v38_v8  ;;  %v68_v20 = vrot.slane %v55_v3, %v38_v8 }
   0x8   :  { %v43_v21 = vmul.f32 %v31_v12, %v14_v4  ;;  %v44_v22 = vmul.f32 %v35_v14, %v15_v6  ;;  %v46_v23 = vmul.f32 %v31_v12, %v17_v10  ;;  %v47_v24 = vmul.f32 %v35_v14, %v18_v11 }
   0x9   :  { %v45_v25 = vmul.f32 %v39_v19, %v16_v9  ;;  %v48_v26 = vmul.f32 %v39_v19, %v19_v16  ;;  %v49_v27 = vmul.f32 %v31_v12, %v20_v17  ;;  %v50_v28 = vmul.f32 %v35_v14, %v21_v18 }
   0xa   :  { %v72_v29 = vadd.f32 %v60_v13, %v43_v21  ;;  %v73_v30 = vadd.f32 %v64_v15, %v44_v22  ;;  %v75_v31 = vadd.f32 %v60_v13, %v46_v23  ;;  %v76_v32 = vadd.f32 %v64_v15, %v47_v24 }
   0xb   :  { %v74_v34 = vadd.f32 %v68_v20, %v45_v25  ;;  %v77_v35 = vadd.f32 %v68_v20, %v48_v26  ;;  %v78_v36 = vadd.f32 %v60_v13, %v49_v27  ;;  %v79_v37 = vadd.f32 %v64_v15, %v50_v28 }
   0xc   :  { %v84_v41 = vmax.f32 %v72_v29, 0.0  ;;  %v85_v42 = vmax.f32 %v73_v30, 0.0  ;;  %v87_v43 = vmax.f32 %v75_v31, 0.0  ;;  %v88_v44 = vmax.f32 %v76_v32, 0.0 }
   0xd   :  { %v86_v45 = vmax.f32 %v74_v34, 0.0  ;;  %v89_v46 = vmax.f32 %v77_v35, 0.0  ;;  %v90_v47 = vmax.f32 %v78_v36, 0.0  ;;  %v91_v48 = vmax.f32 %v79_v37, 0.0 }
   0xe   :  { %96 = vst [vmem:[%s213_s3] sm:$0xff] %v84_v41  ;;  %97 = vst [vmem:[%s213_s3 + $0x8] sm:$0xff] %v85_v42  ;;  %v51_v49 = vmul.f32 %v39_v19, %v22_v33  ;;  %v52_v50 = vmul.f32 %v31_v12, %v23_v38  ;;  %v53_v51 = vmul.f32 %v35_v14, %v24_v39 }
   0xf   :  { %99 = vst [vmem:[%s213_s3 + $0x18] sm:$0xff] %v87_v43  ;;  %100 = vst [vmem:[%s213_s3 + $0x20] sm:$0xff] %v88_v44  ;;  %v54_v52 = vmul.f32 %v39_v19, %v25_v40 }
  0x10   :  { %98 = vst [vmem:[%s213_s3 + $0x10] sm:$0xff] %v86_v45  ;;  %101 = vst [vmem:[%s213_s3 + $0x28] sm:$0xff] %v89_v46  ;;  %v80_v53 = vadd.f32 %v68_v20, %v51_v49  ;;  %v81_v54 = vadd.f32 %v60_v13, %v52_v50  ;;  %v82_v55 = vadd.f32 %v64_v15, %v53_v51 }
  0x11   :  { %102 = vst [vmem:[%s213_s3 + $0x30] sm:$0xff] %v90_v47  ;;  %103 = vst [vmem:[%s213_s3 + $0x38] sm:$0xff] %v91_v48  ;;  %v83_v56 = vadd.f32 %v68_v20, %v54_v52 }
  0x12   :  { %v92_v57 = vmax.f32 %v80_v53, 0.0  ;;  %v93_v58 = vmax.f32 %v81_v54, 0.0  ;;  %v94_v59 = vmax.f32 %v82_v55, 0.0 }
  0x13   :  { %v95_v60 = vmax.f32 %v83_v56, 0.0 }
  0x14   :  { %104 = vst [vmem:[%s213_s3 + $0x40] sm:$0xff] %v92_v57  ;;  %105 = vst [vmem:[%s213_s3 + $0x48] sm:$0xff] %v93_v58 }
  0x15   :  { %106 = vst [vmem:[%s213_s3 + $0x50] sm:$0xff] %v94_v59  ;;  %107 = vst [vmem:[%s213_s3 + $0x58] sm:$0xff] %v95_v60 }

// kernel: densenet121_forward.227
= control target key start
LH: loop header
LB: loop body
LE: loop exit
PB: predicated region body
PF: predicated region fallthrough
CT: control target
= control target key end

     0   :  { %s939_s15 = smov 0   ;;  %s941_s16 = smov 0   ;;  %s1096_s0 = inlined_call_operand.vmem [shape: bf16[32,512], index: 0, kind: input, shape index: {}]   ;;  %s1097_s1 = inlined_call_operand.vmem [shape: bf16[512,128], index: 1, kind: input, shape index: {}]   ;;  %s1098_s2 = inlined_call_operand.vmem [shape: f32[1,128], index: 2, kind: input, shape index: {}]   ;;  %s1099_s3 = inlined_call_operand.vmem [shape: f32[1,128], index: 3, kind: input, shape index: {}]   ;;  %s1100_s4 = inlined_call_operand.vmem [shape: f32[32,128], index: 4, kind: output, shape index: {}]  }
   0x1   :  { %s943_s17 = smov 0   ;;  %s945_s18 = smov 0  }
   0x2   :  { %s947_s19 = smov 0  }
   0x3 LB: > { %s26_s20 = sadd.s32 1, %s907_s18  ;;  %p49_p1 = scmp.ne.s32.totalorder %s899_s16, %s895_s15  ;;  %s911_s19 = sphi %s947_s19, %s14_s19   ;;  %s907_s18 = sphi %s945_s18, %s1104_s18   ;;  %s903_s17 = sphi %s943_s17, %s1103_s17   ;;  %s899_s16 = sphi %s941_s16, %s1102_s16   ;;  %s895_s15 = sphi %s939_s15, %s1101_s15  }
   0x4   : > { %p27_p0 = scmp.ge.s32.totalorder %s26_s20, 2  ;;  %p50_p2 = scmp.eq.s32.totalorder %s911_s19, 0 }
   0x5   : > { %s42_s22 = sadd.s32 1, %s899_s16  ;;  %p729_p5 = scmp.ge.s32.totalorder %s911_s19, 2 }
   0x6   : > { %s1106_s20 = smov (%p27_p0, %s26_s20), 0  ;;  %p51_p3 = por %p50_p2, %p49_p1 }
   0x7   : > { %s38_s21 = ssub.s32 %s907_s18, %s1106_s20  ;;  %195 = sbr.rel (%p729_p5) target bundleno = 18 (0x12), region = 24 }
   0x8   : > { %p40_p4 = scmp.eq.s32.totalorder %s38_s21, 0 }
   0xa   : > { %s974_s23 = scalar_select %p40_p4, %s899_s16, %s42_s22  }
   0xc   : > { %198 = sbr.rel (!%p51_p3) target bundleno = 18 (0x12), region = 28  ;;  %s200_s24 = sand.u32 (%p51_p3), 1, %s899_s16  }
   0xd   : > { %s765_s25 = sshll.u32 (%p51_p3), %s907_s18, 3  ;;  %s730_s26 = sshll.u32 (%p51_p3), %s200_s24, 5 }
   0xe   : > { %s208_s29 = scalar_lea.vmem (%p51_p3), %s1096_s0, %s765_s25  ;;  %s202_s30 = scalar_lea.vmem (%p51_p3), [#allocation2], %s730_s26 }
   0xf   : > { %v243_v0 = vld [vmem:[%s208_s29] sm:$0xff] (%p51_p3)  ;;  %v245_v1 = vld [vmem:[%s208_s29 + $0x10] sm:$0xff] (%p51_p3) }
  0x10   : > { %v247_v2 = vld [vmem:[%s208_s29 + $0x20] sm:$0xff] (%p51_p3)  ;;  %244 = vst [vmem:[%s202_s30] sm:$0xff] (%p51_p3), %v243_v0  ;;  %246 = vst [vmem:[%s202_s30 + $0x8] sm:$0xff] (%p51_p3), %v245_v1  ;;  %v249_v3 = vld [vmem:[%s208_s29 + $0x30] sm:$0xff] (%p51_p3) }
  0x11   : > { %248 = vst [vmem:[%s202_s30 + $0x10] sm:$0xff] %v247_v2  ;;  %250 = vst [vmem:[%s202_s30 + $0x18] sm:$0xff] %v249_v3 }
  0x12 PF: > { %p733_p6 = scmp.ge.s32.totalorder %s911_s19, 1  ;;  %p267_p7 = scmp.lt.s32.totalorder %s911_s19, 3 }
  0x14   : > { %p268_p8 = pnand %p733_p6, %p267_p7 }
  0x15   : > { %s274_s5 = sand.u32 (!%p268_p8), 1, %s895_s15   ;;  %s735_s6 = sshll.u32 (!%p268_p8), %s903_s17, 5 }
  0x16   : > { %271 = sbr.rel (%p268_p8) target bundleno = 286 (0x11e), region = 70  ;;  %s734_s7 = sshll.u32 (!%p268_p8), %s274_s5, 5 }
  0x17   : > { %p319_p9 = scmp.lt.s32.totalorder (!%p268_p8), %s735_s6, 63  ;;  %s991_s12 = scalar_lea.vmem (!%p268_p8), [#allocation2], %s734_s7 }
  0x18   : > { %p737_p10 = scmp.ne.s32.totalorder (!%p268_p8), %s903_s17, 0 }
  0x1b   : > { %s1108_s6 = smov (!%p319_p9, %s735_s6), 63  ;;  %346 = sbr.rel (%p737_p10) target bundleno = 35 (0x23), region = 78 }
  0x1c   : > { %s736_s8 = sshll.u32 %s1108_s6, 2 }
  0x1d   : > { %s989_s11 = scalar_lea.vmem %s1097_s1, %s736_s8 }
  0x20   : > { %v913_v4 = vmov 0.0  }
  0x21   : > { %347 = vst [vmem:[%s1100_s4] sm:$0xff] %v913_v4  ;;  %348 = vst [vmem:[%s1100_s4 + $0x8] sm:$0xff] %v913_v4 }
  0x22   : > { %349 = vst [vmem:[%s1100_s4 + $0x10] sm:$0xff] %v913_v4  ;;  %350 = vst [vmem:[%s1100_s4 + $0x18] sm:$0xff] %v913_v4 }
  0x23 PF: > { %v851_v5 = vld [vmem:[%s989_s11 + $0x78] sm:$0xff]   ;;  %v853_v7 = vld [vmem:[%s989_s11 + $0x70] sm:$0xff]   ;;  %v855_v9 = vld [vmem:[%s989_s11 + $0x68] sm:$0xff]   ;;  %p758_p11 = scmp.ne.s32.totalorder %s903_s17, 1 }
  0x24   : > { %v852_v6 = vld [vmem:[%s989_s11 + $0x38] sm:$0xff]   ;;  %766 = vmatprep.subr.bf16.mxu0 %v851_v5  ;;  %794 = vmatprep.subr.bf16.mxu1 %v851_v5  ;;  %v854_v8 = vld [vmem:[%s989_s11 + $0x30] sm:$0xff]   ;;  %v856_v10 = vld [vmem:[%s989_s11 + $0x28] sm:$0xff]  }
  0x25   : > { %767 = vmatpush3.bf16.msra.mxu0 %v852_v6  ;;  %802 = vmatpush3.bf16.msra.mxu1 %v852_v6  ;;  %v857_v11 = vld [vmem:[%s989_s11 + $0x60] sm:$0xff]   ;;  %v859_v13 = vld [vmem:[%s989_s11 + $0x58] sm:$0xff]   ;;  %v861_v15 = vld [vmem:[%s989_s11 + $0x50] sm:$0xff]  }
  0x26   : > { %768 = vmatprep.subr.bf16.mxu0 %v853_v7  ;;  %795 = vmatprep.subr.bf16.mxu1 %v853_v7  ;;  %v858_v12 = vld [vmem:[%s989_s11 + $0x20] sm:$0xff]   ;;  %v860_v14 = vld [vmem:[%s989_s11 + $0x18] sm:$0xff]   ;;  %v862_v18 = vld [vmem:[%s989_s11 + $0x10] sm:$0xff]  }
  0x27   : > { %v869_v16 = vld [vmem:[%s991_s12 + $0x4] ss:$8 sps:$4 sm:$0xff]   ;;  %v872_v17 = vld [vmem:[%s991_s12 + $0x14] ss:$8 sps:$4 sm:$0xff]   ;;  %v867_v23 = vld [vmem:[%s991_s12] ss:$8 sps:$4 sm:$0xff]  }
  0x28   : > { %v863_v19 = vld [vmem:[%s989_s11 + $0x48] sm:$0xff]   ;;  %539 = vmatprep.mubr.bf16.mxu0 %v869_v16  ;;  %547 = vmatprep.mubr.bf16.mxu1 %v872_v17  ;;  %v865_v21 = vld [vmem:[%s989_s11 + $0x40] sm:$0xff]   ;;  %v870_v24 = vld [vmem:[%s991_s12 + $0x10] ss:$8 sps:$4 sm:$0xff]  }
  0x29   : > { %769 = vmatpush3.bf16.msra.mxu0 %v854_v8  ;;  %803 = vmatpush3.bf16.msra.mxu1 %v854_v8  ;;  %v864_v20 = vld [vmem:[%s989_s11 + $0x8] sm:$0xff]   ;;  %v866_v22 = vld [vmem:[%s989_s11] sm:$0xff]   ;;  %v353_v29 = vld [vmem:[%s1100_s4 + $0x10] sm:$0xff] }
  0x2a   : > { %770 = vmatprep.subr.bf16.mxu0 %v855_v9  ;;  %796 = vmatprep.subr.bf16.mxu1 %v855_v9  ;;  %v351_v27 = vld [vmem:[%s1100_s4] sm:$0xff]  ;;  %v352_v37 = vld [vmem:[%s1100_s4 + $0x8] sm:$0xff]  ;;  %v354_v39 = vld [vmem:[%s1100_s4 + $0x18] sm:$0xff] }
  0x2d   : > { %771 = vmatpush3.bf16.msra.mxu0 %v856_v10  ;;  %804 = vmatpush3.bf16.msra.mxu1 %v856_v10 }
  0x2e   : > { %772 = vmatprep.subr.bf16.mxu0 %v857_v11  ;;  %797 = vmatprep.subr.bf16.mxu1 %v857_v11 }
  0x31   : > { %773 = vmatpush3.bf16.msra.mxu0 %v858_v12  ;;  %805 = vmatpush3.bf16.msra.mxu1 %v858_v12 }
  0x32   : > { %774 = vmatprep.subr.bf16.mxu0 %v859_v13  ;;  %798 = vmatprep.subr.bf16.mxu1 %v859_v13 }
  0x35   : > { %775 = vmatpush3.bf16.msra.mxu0 %v860_v14  ;;  %806 = vmatpush3.bf16.msra.mxu1 %v860_v14 }
  0x36   : > { %776 = vmatprep.subr.bf16.mxu0 %v861_v15  ;;  %799 = vmatprep.subr.bf16.mxu1 %v861_v15 }
  0x39   : > { %777 = vmatpush3.bf16.msra.mxu0 %v862_v18  ;;  %807 = vmatpush3.bf16.msra.mxu1 %v862_v18 }
  0x3a   : > { %778 = vmatprep.subr.bf16.mxu0 %v863_v19  ;;  %800 = vmatprep.subr.bf16.mxu1 %v863_v19 }
  0x3d   : > { %779 = vmatpush3.bf16.msra.mxu0 %v864_v20  ;;  %808 = vmatpush3.bf16.msra.mxu1 %v864_v20 }
  0x3e   : > { %780 = vmatprep.subr.bf16.mxu0 %v865_v21  ;;  %801 = vmatprep.subr.bf16.mxu1 %v865_v21 }
  0x41   : > { %781 = vmatpush3.bf16.msra.mxu0 %v866_v22  ;;  %809 = vmatpush3.bf16.msra.mxu1 %v866_v22 }
  0x44   : > { %540 = vmatmul.mubr.bf16.vlgmr.msra.gmra.mxu0 %v867_v23  ;;  %548 = vmatmul.mubr.bf16.vlgmr.msra.gmra.mxu1 %v870_v24 }
 0x104   : > { %v782_v25 = vpop.f32.mrf.mxu0  ;;  %v788_v26 = vpop.f32.mrf.mxu1 }
 0x106   : > { %v783_v28 = vpop.f32.mrf.mxu0  ;;  %v789_v30 = vpop.f32.mrf.mxu1 }
 0x107   : > { %v784_v31 = vadd.f32 %v783_v28, %v782_v25  ;;  %v790_v32 = vadd.f32 %v789_v30, %v788_v26 }
 0x108   : > { %v785_v33 = vpop.f32.mrf.mxu0  ;;  %v791_v34 = vpop.f32.mrf.mxu1 }
 0x109   : > { %v556_v35 = vadd.f32 %v784_v31, %v351_v27  ;;  %v558_v36 = vadd.f32 %v790_v32, %v353_v29 }
 0x10a   : > { %v786_v38 = vpop.f32.mrf.mxu0  ;;  %v792_v40 = vpop.f32.mrf.mxu1 }
 0x10b   : > { %560 = vst [vmem:[%s1100_s4] sm:$0xff] %v556_v35  ;;  %562 = vst [vmem:[%s1100_s4 + $0x10] sm:$0xff] %v558_v36  ;;  %v787_v41 = vadd.f32 %v786_v38, %v785_v33  ;;  %v793_v42 = vadd.f32 %v792_v40, %v791_v34  ;;  %567 = sbr.rel (%p758_p11) target bundleno = 286 (0x11e), region = 82 }
 0x10d   : > { %v557_v43 = vadd.f32 %v787_v41, %v352_v37  ;;  %v559_v44 = vadd.f32 %v793_v42, %v354_v39 }
 0x10f   : > { %561 = vst [vmem:[%s1100_s4 + $0x8] sm:$0xff] %v557_v43  ;;  %563 = vst [vmem:[%s1100_s4 + $0x18] sm:$0xff] %v559_v44 }
 0x110   : > { %v759_v46 = vld [vmem:[%s1098_s2] ss:$0 sm:$0xff] }
 0x111   : > { %v760_v47 = vld [vmem:[%s1099_s3] ss:$0 sm:$0xff] }
 0x112   : > { %v568_v45 = vld [vmem:[%s1100_s4] sm:$0xff]  ;;  %v570_v50 = vld [vmem:[%s1100_s4 + $0x10] sm:$0xff] }
 0x113   : > { %v579_v48 = vmul.f32 %v759_v46, %v568_v45  ;;  %v581_v53 = vmul.f32 %v759_v46, %v570_v50 }
 0x115   : > { %v590_v55 = vadd.f32 %v760_v47, %v579_v48  ;;  %v592_v57 = vadd.f32 %v760_v47, %v581_v53 }
 0x116   : > { %v569_v49 = vld [vmem:[%s1100_s4 + $0x8] sm:$0xff]  ;;  %v571_v51 = vld [vmem:[%s1100_s4 + $0x18] sm:$0xff] }
 0x117   : > { %v580_v52 = vmul.f32 %v759_v46, %v569_v49  ;;  %v582_v54 = vmul.f32 %v759_v46, %v571_v51  ;;  %v594_v59 = vmax.f32 %v590_v55, 0.0  ;;  %v596_v61 = vmax.f32 %v592_v57, 0.0 }
 0x119   : > { %v591_v56 = vadd.f32 %v760_v47, %v580_v52  ;;  %v593_v58 = vadd.f32 %v760_v47, %v582_v54  ;;  %598 = vst [vmem:[%s1100_s4] sm:$0xff] %v594_v59  ;;  %600 = vst [vmem:[%s1100_s4 + $0x10] sm:$0xff] %v596_v61 }
 0x11b   : > { %v595_v60 = vmax.f32 %v591_v56, 0.0  ;;  %v597_v62 = vmax.f32 %v593_v58, 0.0 }
 0x11d   : > { %599 = vst [vmem:[%s1100_s4 + $0x8] sm:$0xff] %v595_v60  ;;  %601 = vst [vmem:[%s1100_s4 + $0x18] sm:$0xff] %v597_v62 }
 0x11e PF: > { %s14_s19 = sadd.s32 1, %s911_s19   ;;  %s1101_s15 = smov %s899_s16 }
 0x11f   : > { %p11_p12 = scmp.ge.s32.totalorder %s14_s19, 4   ;;  %s1102_s16 = smov %s974_s23 }
 0x120   : > { %s1103_s17 = smov %s907_s18  ;;  %s1104_s18 = smov %s1106_s20 }
 0x121   :  { %13 = sbr.rel (!%p11_p12) target bundleno = 3 (0x3), region = 126 }

// kernel: densenet121_forward.238
= control target key start
LH: loop header
LB: loop body
LE: loop exit
PB: predicated region body
PF: predicated region fallthrough
CT: control target
= control target key end

     0   :  { %v32_v0 = vlaneseq  ;;  %s270_s1 = inlined_call_operand.vmem [shape: f32[1,512], index: 1, kind: input, shape index: {}]   ;;  %s271_s2 = inlined_call_operand.vmem [shape: f32[1,512], index: 2, kind: input, shape index: {}]   ;;  %s272_s0 = inlined_call_operand.vmem [shape: f32[32,512], index: 0, kind: input, shape index: {}]   ;;  %s273_s3 = inlined_call_operand.vmem [shape: f32[32,512], index: 3, kind: output, shape index: {}]  }
   0x1   :  { %v30_v2 = vld [vmem:[%s270_s1] sm:$0xf]  ;;  %v15_v6 = vld [vmem:[%s272_s0 + $0x8] sm:$0xff]  ;;  %v16_v10 = vld [vmem:[%s272_s0 + $0x10] sm:$0xff] }
   0x2   :  { %v33_v1 = vshrl.u32 %v32_v0, 7  ;;  %v68_v3 = vld [vmem:[%s271_s2] sm:$0xf]  ;;  %v19_v12 = vld [vmem:[%s272_s0 + $0x28] sm:$0xff]  ;;  %v17_v17 = vld [vmem:[%s272_s0 + $0x18] sm:$0xff] }
   0x3   :  { %v14_v4 = vld [vmem:[%s272_s0] sm:$0xff]  ;;  %v20_v18 = vld [vmem:[%s272_s0 + $0x30] sm:$0xff]  ;;  %v21_v19 = vld [vmem:[%s272_s0 + $0x38] sm:$0xff] }
   0x4   :  { %v34_v5 = vsub.s32 0, %v33_v1  ;;  %v38_v7 = vsub.s32 1, %v33_v1  ;;  %v42_v8 = vsub.s32 2, %v33_v1  ;;  %v46_v9 = vsub.s32 3, %v33_v1  ;;  %v18_v11 = vld [vmem:[%s272_s0 + $0x20] sm:$0xff]  ;;  %v23_v37 = vld [vmem:[%s272_s0 + $0x48] sm:$0xff] }
   0x5   :  { %v22_v36 = vld [vmem:[%s272_s0 + $0x40] sm:$0xff]  ;;  %v24_v38 = vld [vmem:[%s272_s0 + $0x50] sm:$0xff]  ;;  %v25_v43 = vld [vmem:[%s272_s0 + $0x58] sm:$0xff] }
   0x6   :  { %v35_v13 = vrot.slane %v30_v2, %v34_v5  ;;  %v183_v14 = vrot.slane %v68_v3, %v34_v5  ;;  %v39_v15 = vrot.slane %v30_v2, %v38_v7  ;;  %v77_v16 = vrot.slane %v68_v3, %v38_v7  ;;  %v26_v44 = vld [vmem:[%s272_s0 + $0x60] sm:$0xff]  ;;  %v27_v45 = vld [vmem:[%s272_s0 + $0x68] sm:$0xff]  ;;  %v28_v50 = vld [vmem:[%s272_s0 + $0x70] sm:$0xff] }
   0x7   :  { %v43_v20 = vrot.slane %v30_v2, %v42_v8  ;;  %v81_v21 = vrot.slane %v68_v3, %v42_v8  ;;  %v47_v22 = vrot.slane %v30_v2, %v46_v9  ;;  %v85_v23 = vrot.slane %v68_v3, %v46_v9  ;;  %v29_v51 = vld [vmem:[%s272_s0 + $0x78] sm:$0xff] }
   0x8   :  { %v52_v24 = vmul.f32 %v35_v13, %v14_v4  ;;  %v53_v25 = vmul.f32 %v39_v15, %v15_v6  ;;  %v56_v26 = vmul.f32 %v35_v13, %v18_v11  ;;  %v57_v27 = vmul.f32 %v39_v15, %v19_v12 }
   0x9   :  { %v54_v28 = vmul.f32 %v43_v20, %v16_v10  ;;  %v55_v29 = vmul.f32 %v47_v22, %v17_v17  ;;  %v58_v30 = vmul.f32 %v43_v20, %v20_v18  ;;  %v59_v31 = vmul.f32 %v47_v22, %v21_v19 }
   0xa   :  { %v90_v32 = vadd.f32 %v183_v14, %v52_v24  ;;  %v91_v33 = vadd.f32 %v77_v16, %v53_v25  ;;  %v94_v34 = vadd.f32 %v183_v14, %v56_v26  ;;  %v95_v35 = vadd.f32 %v77_v16, %v57_v27 }
   0xb   :  { %v92_v39 = vadd.f32 %v81_v21, %v54_v28  ;;  %v93_v40 = vadd.f32 %v85_v23, %v55_v29  ;;  %v96_v41 = vadd.f32 %v81_v21, %v58_v30  ;;  %v97_v42 = vadd.f32 %v85_v23, %v59_v31 }
   0xc   :  { %v106_v46 = vmax.f32 %v90_v32, 0.0  ;;  %v107_v47 = vmax.f32 %v91_v33, 0.0  ;;  %v110_v48 = vmax.f32 %v94_v34, 0.0  ;;  %v111_v49 = vmax.f32 %v95_v35, 0.0 }
   0xd   :  { %v108_v52 = vmax.f32 %v92_v39, 0.0  ;;  %v109_v53 = vmax.f32 %v93_v40, 0.0  ;;  %v112_v54 = vmax.f32 %v96_v41, 0.0  ;;  %v113_v55 = vmax.f32 %v97_v42, 0.0 }
   0xe   :  { %122 = vst [vmem:[%s273_s3] sm:$0xff] %v106_v46  ;;  %123 = vst [vmem:[%s273_s3 + $0x8] sm:$0xff] %v107_v47  ;;  %v60_v56 = vmul.f32 %v35_v13, %v22_v36  ;;  %v61_v57 = vmul.f32 %v39_v15, %v23_v37  ;;  %v62_v58 = vmul.f32 %v43_v20, %v24_v38 }
   0xf   :  { %126 = vst [vmem:[%s273_s3 + $0x20] sm:$0xff] %v110_v48  ;;  %127 = vst [vmem:[%s273_s3 + $0x28] sm:$0xff] %v111_v49  ;;  %v63_v59 = vmul.f32 %v47_v22, %v25_v43  ;;  %v64_v60 = vmul.f32 %v35_v13, %v26_v44  ;;  %v65_v61 = vmul.f32 %v39_v15, %v27_v45 }
  0x10   :  { %124 = vst [vmem:[%s273_s3 + $0x10] sm:$0xff] %v108_v52  ;;  %125 = vst [vmem:[%s273_s3 + $0x18] sm:$0xff] %v109_v53  ;;  %v66_v62 = vmul.f32 %v43_v20, %v28_v50  ;;  %v67_v63 = vmul.f32 %v47_v22, %v29_v51  ;;  %v98_v0 = vadd.f32 %v183_v14, %v60_v56 }
  0x11   :  { %128 = vst [vmem:[%s273_s3 + $0x30] sm:$0xff] %v112_v54  ;;  %129 = vst [vmem:[%s273_s3 + $0x38] sm:$0xff] %v113_v55  ;;  %v99_v1 = vadd.f32 %v77_v16, %v61_v57  ;;  %v100_v2 = vadd.f32 %v81_v21, %v62_v58  ;;  %v101_v3 = vadd.f32 %v85_v23, %v63_v59 }
  0x12   :  { %v102_v4 = vadd.f32 %v183_v14, %v64_v60  ;;  %v103_v5 = vadd.f32 %v77_v16, %v65_v61  ;;  %v104_v6 = vadd.f32 %v81_v21, %v66_v62  ;;  %v105_v7 = vadd.f32 %v85_v23, %v67_v63 }
  0x13   :  { %v114_v8 = vmax.f32 %v98_v0, 0.0  ;;  %v115_v9 = vmax.f32 %v99_v1, 0.0  ;;  %v116_v10 = vmax.f32 %v100_v2, 0.0  ;;  %v117_v11 = vmax.f32 %v101_v3, 0.0 }
  0x14   :  { %v118_v12 = vmax.f32 %v102_v4, 0.0  ;;  %v119_v17 = vmax.f32 %v103_v5, 0.0  ;;  %v120_v13 = vmax.f32 %v104_v6, 0.0  ;;  %v121_v15 = vmax.f32 %v105_v7, 0.0 }
  0x15   :  { %130 = vst [vmem:[%s273_s3 + $0x40] sm:$0xff] %v114_v8  ;;  %131 = vst [vmem:[%s273_s3 + $0x48] sm:$0xff] %v115_v9 }
  0x16   :  { %132 = vst [vmem:[%s273_s3 + $0x50] sm:$0xff] %v116_v10  ;;  %133 = vst [vmem:[%s273_s3 + $0x58] sm:$0xff] %v117_v11 }
  0x17   :  { %134 = vst [vmem:[%s273_s3 + $0x60] sm:$0xff] %v118_v12  ;;  %135 = vst [vmem:[%s273_s3 + $0x68] sm:$0xff] %v119_v17 }
  0x18   :  { %136 = vst [vmem:[%s273_s3 + $0x70] sm:$0xff] %v120_v13  ;;  %137 = vst [vmem:[%s273_s3 + $0x78] sm:$0xff] %v121_v15 }

// kernel: densenet121_forward.248
= control target key start
LH: loop header
LB: loop body
LE: loop exit
PB: predicated region body
PF: predicated region fallthrough
CT: control target
= control target key end

     0   :  { %s1115_s15 = smov 0   ;;  %s1117_s16 = smov 0   ;;  %s1348_s0 = inlined_call_operand.vmem [shape: bf16[32,512], index: 0, kind: input, shape index: {}]   ;;  %s1349_s1 = inlined_call_operand.vmem [shape: bf16[512,256], index: 1, kind: input, shape index: {}]   ;;  %s1350_s2 = inlined_call_operand.vmem [shape: f32[1,256], index: 2, kind: input, shape index: {}]   ;;  %s1351_s3 = inlined_call_operand.vmem [shape: f32[1,256], index: 3, kind: input, shape index: {}]   ;;  %s1352_s4 = inlined_call_operand.vmem [shape: f32[32,256], index: 4, kind: output, shape index: {}]  }
   0x1   :  { %s1119_s17 = smov 0   ;;  %s1121_s18 = smov 0  }
   0x2   :  { %s1123_s19 = smov 0  }
   0x3 LB: > { %s26_s20 = sadd.s32 1, %s1083_s18  ;;  %p49_p1 = scmp.ne.s32.totalorder %s1075_s16, %s1071_s15  ;;  %s1087_s19 = sphi %s1123_s19, %s14_s19   ;;  %s1083_s18 = sphi %s1121_s18, %s1356_s18   ;;  %s1079_s17 = sphi %s1119_s17, %s1355_s17   ;;  %s1075_s16 = sphi %s1117_s16, %s1354_s16   ;;  %s1071_s15 = sphi %s1115_s15, %s1353_s15  }
   0x4   : > { %p27_p0 = scmp.ge.s32.totalorder %s26_s20, 2  ;;  %p50_p2 = scmp.eq.s32.totalorder %s1087_s19, 0 }
   0x5   : > { %s42_s22 = sadd.s32 1, %s1075_s16  ;;  %p869_p5 = scmp.ge.s32.totalorder %s1087_s19, 2 }
   0x6   : > { %s1358_s20 = smov (%p27_p0, %s26_s20), 0  ;;  %p51_p3 = por %p50_p2, %p49_p1 }
   0x7   : > { %s38_s21 = ssub.s32 %s1083_s18, %s1358_s20  ;;  %199 = sbr.rel (%p869_p5) target bundleno = 18 (0x12), region = 24 }
   0x8   : > { %p40_p4 = scmp.eq.s32.totalorder %s38_s21, 0 }
   0xa   : > { %s1150_s23 = scalar_select %p40_p4, %s1075_s16, %s42_s22  }
   0xc   : > { %202 = sbr.rel (!%p51_p3) target bundleno = 18 (0x12), region = 28  ;;  %s204_s24 = sand.u32 (%p51_p3), 1, %s1075_s16  }
   0xd   : > { %s920_s25 = sshll.u32 (%p51_p3), %s1083_s18, 3  ;;  %s870_s26 = sshll.u32 (%p51_p3), %s204_s24, 5 }
   0xe   : > { %s212_s29 = scalar_lea.vmem (%p51_p3), %s1348_s0, %s920_s25  ;;  %s206_s30 = scalar_lea.vmem (%p51_p3), [#allocation2], %s870_s26 }
   0xf   : > { %v247_v0 = vld [vmem:[%s212_s29] sm:$0xff] (%p51_p3)  ;;  %v249_v1 = vld [vmem:[%s212_s29 + $0x10] sm:$0xff] (%p51_p3) }
  0x10   : > { %v251_v2 = vld [vmem:[%s212_s29 + $0x20] sm:$0xff] (%p51_p3)  ;;  %248 = vst [vmem:[%s206_s30] sm:$0xff] (%p51_p3), %v247_v0  ;;  %250 = vst [vmem:[%s206_s30 + $0x8] sm:$0xff] (%p51_p3), %v249_v1  ;;  %v253_v3 = vld [vmem:[%s212_s29 + $0x30] sm:$0xff] (%p51_p3) }
  0x11   : > { %252 = vst [vmem:[%s206_s30 + $0x10] sm:$0xff] %v251_v2  ;;  %254 = vst [vmem:[%s206_s30 + $0x18] sm:$0xff] %v253_v3 }
  0x12 PF: > { %p873_p6 = scmp.ge.s32.totalorder %s1087_s19, 1  ;;  %p274_p7 = scmp.lt.s32.totalorder %s1087_s19, 3 }
  0x14   : > { %p275_p8 = pnand %p873_p6, %p274_p7 }
  0x15   : > { %s281_s5 = sand.u32 (!%p275_p8), 1, %s1071_s15   ;;  %s875_s6 = sshll.u32 (!%p275_p8), %s1079_s17, 5 }
  0x16   : > { %278 = sbr.rel (%p275_p8) target bundleno = 320 (0x140), region = 70  ;;  %s874_s7 = sshll.u32 (!%p275_p8), %s281_s5, 5 }
  0x17   : > { %p333_p9 = scmp.lt.s32.totalorder (!%p275_p8), %s875_s6, 63  ;;  %s1167_s12 = scalar_lea.vmem (!%p275_p8), [#allocation2], %s874_s7 }
  0x18   : > { %p878_p10 = scmp.ne.s32.totalorder (!%p275_p8), %s1079_s17, 0 }
  0x1b   : > { %s1360_s6 = smov (!%p333_p9, %s875_s6), 63  ;;  %368 = sbr.rel (%p878_p10) target bundleno = 37 (0x25), region = 78 }
  0x1c   : > { %s921_s8 = sshll.u32 %s1360_s6, 3 }
  0x1d   : > { %s1165_s11 = scalar_lea.vmem %s1349_s1, %s921_s8 }
  0x20   : > { %v1089_v4 = vmov 0.0  }
  0x21   : > { %369 = vst [vmem:[%s1352_s4] sm:$0xff] %v1089_v4  ;;  %370 = vst [vmem:[%s1352_s4 + $0x8] sm:$0xff] %v1089_v4 }
  0x22   : > { %371 = vst [vmem:[%s1352_s4 + $0x10] sm:$0xff] %v1089_v4  ;;  %372 = vst [vmem:[%s1352_s4 + $0x18] sm:$0xff] %v1089_v4 }
  0x23   : > { %373 = vst [vmem:[%s1352_s4 + $0x20] sm:$0xff] %v1089_v4  ;;  %374 = vst [vmem:[%s1352_s4 + $0x28] sm:$0xff] %v1089_v4 }
  0x24   : > { %375 = vst [vmem:[%s1352_s4 + $0x30] sm:$0xff] %v1089_v4  ;;  %376 = vst [vmem:[%s1352_s4 + $0x38] sm:$0xff] %v1089_v4 }
  0x25 PF: > { %v995_v5 = vld [vmem:[%s1165_s11 + $0x74] ss:$8 sps:$4 sm:$0xff]   ;;  %v997_v6 = vld [vmem:[%s1165_s11 + $0x70] ss:$8 sps:$4 sm:$0xff]   ;;  %v998_v7 = vld [vmem:[%s1165_s11 + $0x64] ss:$8 sps:$4 sm:$0xff]  }
  0x26   : > { %601 = vmatprep.subr.bf16.mxu0 %v995_v5  ;;  %922 = vmatprep.subr.bf16.mxu1 %v995_v5  ;;  %v1000_v8 = vld [vmem:[%s1165_s11 + $0x60] ss:$8 sps:$4 sm:$0xff]   ;;  %v1001_v9 = vld [vmem:[%s1165_s11 + $0x54] ss:$8 sps:$4 sm:$0xff]   ;;  %v1003_v10 = vld [vmem:[%s1165_s11 + $0x50] ss:$8 sps:$4 sm:$0xff]  }
  0x27   : > { %602 = vmatpush1.bf16.msra.mxu0 %v997_v6  ;;  %938 = vmatpush1.bf16.msra.mxu1 %v997_v6  ;;  %v1004_v11 = vld [vmem:[%s1165_s11 + $0x44] ss:$8 sps:$4 sm:$0xff]   ;;  %v1006_v12 = vld [vmem:[%s1165_s11 + $0x40] ss:$8 sps:$4 sm:$0xff]   ;;  %v1007_v13 = vld [vmem:[%s1165_s11 + $0x34] ss:$8 sps:$4 sm:$0xff]  }
  0x28   : > { %603 = vmatprep.subr.bf16.mxu0 %v998_v7  ;;  %923 = vmatprep.subr.bf16.mxu1 %v998_v7  ;;  %v1009_v14 = vld [vmem:[%s1165_s11 + $0x30] ss:$8 sps:$4 sm:$0xff]   ;;  %v1010_v15 = vld [vmem:[%s1165_s11 + $0x24] ss:$8 sps:$4 sm:$0xff]   ;;  %v1012_v16 = vld [vmem:[%s1165_s11 + $0x20] ss:$8 sps:$4 sm:$0xff]  }
  0x29   : > { %v1013_v17 = vld [vmem:[%s1165_s11 + $0x14] ss:$8 sps:$4 sm:$0xff]   ;;  %v1045_v18 = vld [vmem:[%s1167_s12 + $0x4] ss:$8 sps:$4 sm:$0xff]   ;;  %v1015_v19 = vld [vmem:[%s1165_s11 + $0x10] ss:$8 sps:$4 sm:$0xff]  }
  0x2a   : > { %v1048_v20 = vld [vmem:[%s1167_s12 + $0x14] ss:$8 sps:$4 sm:$0xff]   ;;  %v1016_v21 = vld [vmem:[%s1165_s11 + $0x4] ss:$8 sps:$4 sm:$0xff]   ;;  %633 = vmatprep.mubr.bf16.mxu0 %v1045_v18  ;;  %v1018_v22 = vld [vmem:[%s1165_s11] ss:$8 sps:$4 sm:$0xff]  }
  0x2b   : > { %604 = vmatpush1.bf16.msra.mxu0 %v1000_v8  ;;  %939 = vmatpush1.bf16.msra.mxu1 %v1000_v8  ;;  %v1019_v23 = vld [vmem:[%s1165_s11 + $0xf4] ss:$8 sps:$4 sm:$0xff]   ;;  %v1021_v24 = vld [vmem:[%s1165_s11 + $0xf0] ss:$8 sps:$4 sm:$0xff]   ;;  %v1022_v25 = vld [vmem:[%s1165_s11 + $0xe4] ss:$8 sps:$4 sm:$0xff]  }
  0x2c   : > { %605 = vmatprep.subr.bf16.mxu0 %v1001_v9  ;;  %924 = vmatprep.subr.bf16.mxu1 %v1001_v9  ;;  %v1024_v26 = vld [vmem:[%s1165_s11 + $0xe0] ss:$8 sps:$4 sm:$0xff]   ;;  %v1025_v27 = vld [vmem:[%s1165_s11 + $0xd4] ss:$8 sps:$4 sm:$0xff]   ;;  %v1027_v28 = vld [vmem:[%s1165_s11 + $0xd0] ss:$8 sps:$4 sm:$0xff]  }
  0x2d   : > { %643 = vmatprep.mubr.bf16.mxu1 %v1048_v20  ;;  %v1028_v29 = vld [vmem:[%s1165_s11 + $0xc4] ss:$8 sps:$4 sm:$0xff]   ;;  %v1030_v30 = vld [vmem:[%s1165_s11 + $0xc0] ss:$8 sps:$4 sm:$0xff]   ;;  %v1031_v31 = vld [vmem:[%s1165_s11 + $0xb4] ss:$8 sps:$4 sm:$0xff]  }
  0x2e   : > { %v1033_v32 = vld [vmem:[%s1165_s11 + $0xb0] ss:$8 sps:$4 sm:$0xff]   ;;  %v1034_v33 = vld [vmem:[%s1165_s11 + $0xa4] ss:$8 sps:$4 sm:$0xff]   ;;  %v1036_v34 = vld [vmem:[%s1165_s11 + $0xa0] ss:$8 sps:$4 sm:$0xff]  }
  0x2f   : > { %606 = vmatpush1.bf16.msra.mxu0 %v1003_v10  ;;  %940 = vmatpush1.bf16.msra.mxu1 %v1003_v10  ;;  %v1037_v35 = vld [vmem:[%s1165_s11 + $0x94] ss:$8 sps:$4 sm:$0xff]   ;;  %v1039_v36 = vld [vmem:[%s1165_s11 + $0x90] ss:$8 sps:$4 sm:$0xff]   ;;  %v1040_v37 = vld [vmem:[%s1165_s11 + $0x84] ss:$8 sps:$4 sm:$0xff]  }
  0x30   : > { %607 = vmatprep.subr.bf16.mxu0 %v1004_v11  ;;  %925 = vmatprep.subr.bf16.mxu1 %v1004_v11  ;;  %v1042_v38 = vld [vmem:[%s1165_s11 + $0x80] ss:$8 sps:$4 sm:$0xff]   ;;  %v1046_v40 = vld [vmem:[%s1167_s12 + $0x10] ss:$8 sps:$4 sm:$0xff]   ;;  %p915_p11 = scmp.ne.s32.totalorder %s1079_s17, 1 }
  0x31   : > { %v1043_v39 = vld [vmem:[%s1167_s12] ss:$8 sps:$4 sm:$0xff]   ;;  %v379_v51 = vld [vmem:[%s1352_s4 + $0x10] sm:$0xff]  ;;  %v380_v57 = vld [vmem:[%s1352_s4 + $0x18] sm:$0xff] }
  0x32   : > { %v377_v41 = vld [vmem:[%s1352_s4] sm:$0xff]  ;;  %v378_v45 = vld [vmem:[%s1352_s4 + $0x8] sm:$0xff]  ;;  %v383_v52 = vld [vmem:[%s1352_s4 + $0x30] sm:$0xff] }
  0x33   : > { %608 = vmatpush1.bf16.msra.mxu0 %v1006_v12  ;;  %941 = vmatpush1.bf16.msra.mxu1 %v1006_v12  ;;  %v381_v42 = vld [vmem:[%s1352_s4 + $0x20] sm:$0xff]  ;;  %v382_v46 = vld [vmem:[%s1352_s4 + $0x28] sm:$0xff]  ;;  %v384_v58 = vld [vmem:[%s1352_s4 + $0x38] sm:$0xff] }
  0x34   : > { %609 = vmatprep.subr.bf16.mxu0 %v1007_v13  ;;  %926 = vmatprep.subr.bf16.mxu1 %v1007_v13 }
  0x37   : > { %610 = vmatpush1.bf16.msra.mxu0 %v1009_v14  ;;  %942 = vmatpush1.bf16.msra.mxu1 %v1009_v14 }
  0x38   : > { %611 = vmatprep.subr.bf16.mxu0 %v1010_v15  ;;  %927 = vmatprep.subr.bf16.mxu1 %v1010_v15 }
  0x3b   : > { %612 = vmatpush1.bf16.msra.mxu0 %v1012_v16  ;;  %943 = vmatpush1.bf16.msra.mxu1 %v1012_v16 }
  0x3c   : > { %613 = vmatprep.subr.bf16.mxu0 %v1013_v17  ;;  %928 = vmatprep.subr.bf16.mxu1 %v1013_v17 }
  0x3f   : > { %614 = vmatpush1.bf16.msra.mxu0 %v1015_v19  ;;  %944 = vmatpush1.bf16.msra.mxu1 %v1015_v19 }
  0x40   : > { %615 = vmatprep.subr.bf16.mxu0 %v1016_v21  ;;  %929 = vmatprep.subr.bf16.mxu1 %v1016_v21 }
  0x43   : > { %616 = vmatpush1.bf16.msra.mxu0 %v1018_v22  ;;  %945 = vmatpush1.bf16.msra.mxu1 %v1018_v22 }
  0x44   : > { %617 = vmatprep.subr.bf16.mxu0 %v1019_v23  ;;  %930 = vmatprep.subr.bf16.mxu1 %v1019_v23 }
  0x47   : > { %618 = vmatpush2.bf16.msra.mxu0 %v1021_v24  ;;  %946 = vmatpush2.bf16.msra.mxu1 %v1021_v24 }
  0x48   : > { %619 = vmatprep.subr.bf16.mxu0 %v1022_v25  ;;  %931 = vmatprep.subr.bf16.mxu1 %v1022_v25 }
  0x4b   : > { %620 = vmatpush2.bf16.msra.mxu0 %v1024_v26  ;;  %947 = vmatpush2.bf16.msra.mxu1 %v1024_v26 }
  0x4c   : > { %621 = vmatprep.subr.bf16.mxu0 %v1025_v27  ;;  %932 = vmatprep.subr.bf16.mxu1 %v1025_v27 }
  0x4f   : > { %622 = vmatpush2.bf16.msra.mxu0 %v1027_v28  ;;  %948 = vmatpush2.bf16.msra.mxu1 %v1027_v28 }
  0x50   : > { %623 = vmatprep.subr.bf16.mxu0 %v1028_v29  ;;  %933 = vmatprep.subr.bf16.mxu1 %v1028_v29 }
  0x53   : > { %624 = vmatpush2.bf16.msra.mxu0 %v1030_v30  ;;  %949 = vmatpush2.bf16.msra.mxu1 %v1030_v30 }
  0x54   : > { %625 = vmatprep.subr.bf16.mxu0 %v1031_v31  ;;  %934 = vmatprep.subr.bf16.mxu1 %v1031_v31 }
  0x57   : > { %626 = vmatpush2.bf16.msra.mxu0 %v1033_v32  ;;  %950 = vmatpush2.bf16.msra.mxu1 %v1033_v32 }
  0x58   : > { %627 = vmatprep.subr.bf16.mxu0 %v1034_v33  ;;  %935 = vmatprep.subr.bf16.mxu1 %v1034_v33 }
  0x5b   : > { %628 = vmatpush2.bf16.msra.mxu0 %v1036_v34  ;;  %951 = vmatpush2.bf16.msra.mxu1 %v1036_v34 }
  0x5c   : > { %629 = vmatprep.subr.bf16.mxu0 %v1037_v35  ;;  %936 = vmatprep.subr.bf16.mxu1 %v1037_v35 }
  0x5f   : > { %630 = vmatpush2.bf16.msra.mxu0 %v1039_v36  ;;  %952 = vmatpush2.bf16.msra.mxu1 %v1039_v36 }
  0x60   : > { %631 = vmatprep.subr.bf16.mxu0 %v1040_v37  ;;  %937 = vmatprep.subr.bf16.mxu1 %v1040_v37 }
  0x63   : > { %632 = vmatpush2.bf16.msra.mxu0 %v1042_v38  ;;  %953 = vmatpush2.bf16.msra.mxu1 %v1042_v38 }
  0x66   : > { %634 = vmatmul.mubr.bf16.vlgmr.msra.gmra.mxu0 %v1043_v39  ;;  %644 = vmatmul.mubr.bf16.vlgmr.msra.gmra.mxu1 %v1046_v40 }
 0x126   : > { %v635_v43 = vpop.f32.mrf.mxu0  ;;  %v645_v44 = vpop.f32.mrf.mxu1 }
 0x127   : > { %v654_v47 = vadd.f32 %v635_v43, %v377_v41  ;;  %v658_v48 = vadd.f32 %v645_v44, %v381_v42 }
 0x128   : > { %v637_v49 = vpop.f32.mrf.mxu0  ;;  %v647_v50 = vpop.f32.mrf.mxu1 }
 0x129   : > { %662 = vst [vmem:[%s1352_s4] sm:$0xff] %v654_v47  ;;  %666 = vst [vmem:[%s1352_s4 + $0x20] sm:$0xff] %v658_v48  ;;  %v655_v53 = vadd.f32 %v637_v49, %v378_v45  ;;  %v659_v54 = vadd.f32 %v647_v50, %v382_v46 }
 0x12a   : > { %v639_v55 = vpop.f32.mrf.mxu0  ;;  %v649_v56 = vpop.f32.mrf.mxu1 }
 0x12b   : > { %663 = vst [vmem:[%s1352_s4 + $0x8] sm:$0xff] %v655_v53  ;;  %667 = vst [vmem:[%s1352_s4 + $0x28] sm:$0xff] %v659_v54  ;;  %v656_v59 = vadd.f32 %v639_v55, %v379_v51  ;;  %v660_v60 = vadd.f32 %v649_v56, %v383_v52  ;;  %673 = sbr.rel (%p915_p11) target bundleno = 320 (0x140), region = 82 }
 0x12c   : > { %v641_v61 = vpop.f32.mrf.mxu0  ;;  %v651_v62 = vpop.f32.mrf.mxu1 }
 0x12d   : > { %664 = vst [vmem:[%s1352_s4 + $0x10] sm:$0xff] %v656_v59  ;;  %668 = vst [vmem:[%s1352_s4 + $0x30] sm:$0xff] %v660_v60  ;;  %v657_v63 = vadd.f32 %v641_v61, %v380_v57  ;;  %v661_v0 = vadd.f32 %v651_v62, %v384_v58 }
 0x12f   : > { %665 = vst [vmem:[%s1352_s4 + $0x18] sm:$0xff] %v657_v63  ;;  %669 = vst [vmem:[%s1352_s4 + $0x38] sm:$0xff] %v661_v0 }
 0x130   : > { %v684_v1 = vlaneseq  ;;  %v682_v3 = vld [vmem:[%s1350_s2] sm:$0x3] }
 0x131   : > { %v702_v4 = vld [vmem:[%s1351_s3] sm:$0x3] }
 0x132   : > { %v685_v2 = vshrl.u32 %v684_v1, 7  ;;  %v674_v5 = vld [vmem:[%s1352_s4] sm:$0xff]  ;;  %v675_v7 = vld [vmem:[%s1352_s4 + $0x8] sm:$0xff] }
 0x133   : > { %v678_v11 = vld [vmem:[%s1352_s4 + $0x20] sm:$0xff]  ;;  %v679_v16 = vld [vmem:[%s1352_s4 + $0x28] sm:$0xff] }
 0x134   : > { %v686_v6 = vsub.s32 0, %v685_v2  ;;  %v690_v8 = vsub.s32 1, %v685_v2  ;;  %v676_v9 = vld [vmem:[%s1352_s4 + $0x10] sm:$0xff] }
 0x135   : > { %v680_v17 = vld [vmem:[%s1352_s4 + $0x30] sm:$0xff] }
 0x136   : > { %v677_v10 = vld [vmem:[%s1352_s4 + $0x18] sm:$0xff]  ;;  %v687_v12 = vrot.slane %v682_v3, %v686_v6  ;;  %v707_v13 = vrot.slane %v702_v4, %v686_v6  ;;  %v691_v14 = vrot.slane %v682_v3, %v690_v8  ;;  %v711_v15 = vrot.slane %v702_v4, %v690_v8 }
 0x137   : > { %v681_v18 = vld [vmem:[%s1352_s4 + $0x38] sm:$0xff] }
 0x138   : > { %v694_v19 = vmul.f32 %v687_v12, %v674_v5  ;;  %v695_v20 = vmul.f32 %v691_v14, %v675_v7  ;;  %v696_v21 = vmul.f32 %v687_v12, %v676_v9  ;;  %v697_v22 = vmul.f32 %v691_v14, %v677_v10 }
 0x139   : > { %v698_v23 = vmul.f32 %v687_v12, %v678_v11  ;;  %v699_v24 = vmul.f32 %v691_v14, %v679_v16  ;;  %v700_v25 = vmul.f32 %v687_v12, %v680_v17  ;;  %v701_v26 = vmul.f32 %v691_v14, %v681_v18 }
 0x13a   : > { %v714_v27 = vadd.f32 %v707_v13, %v694_v19  ;;  %v715_v28 = vadd.f32 %v711_v15, %v695_v20  ;;  %v716_v29 = vadd.f32 %v707_v13, %v696_v21  ;;  %v717_v30 = vadd.f32 %v711_v15, %v697_v22 }
 0x13b   : > { %v718_v31 = vadd.f32 %v707_v13, %v698_v23  ;;  %v719_v32 = vadd.f32 %v711_v15, %v699_v24  ;;  %v720_v33 = vadd.f32 %v707_v13, %v700_v25  ;;  %v721_v34 = vadd.f32 %v711_v15, %v701_v26 }
 0x13c   : > { %722 = vst [vmem:[%s1352_s4] sm:$0xff] %v714_v27  ;;  %723 = vst [vmem:[%s1352_s4 + $0x8] sm:$0xff] %v715_v28 }
 0x13d   : > { %724 = vst [vmem:[%s1352_s4 + $0x10] sm:$0xff] %v716_v29  ;;  %725 = vst [vmem:[%s1352_s4 + $0x18] sm:$0xff] %v717_v30 }
 0x13e   : > { %726 = vst [vmem:[%s1352_s4 + $0x20] sm:$0xff] %v718_v31  ;;  %727 = vst [vmem:[%s1352_s4 + $0x28] sm:$0xff] %v719_v32 }
 0x13f   : > { %728 = vst [vmem:[%s1352_s4 + $0x30] sm:$0xff] %v720_v33  ;;  %729 = vst [vmem:[%s1352_s4 + $0x38] sm:$0xff] %v721_v34 }
 0x140 PF: > { %s14_s19 = sadd.s32 1, %s1087_s19   ;;  %s1353_s15 = smov %s1075_s16 }
 0x141   : > { %p11_p12 = scmp.ge.s32.totalorder %s14_s19, 4   ;;  %s1354_s16 = smov %s1150_s23 }
 0x142   : > { %s1355_s17 = smov %s1083_s18  ;;  %s1356_s18 = smov %s1358_s20 }
 0x143   :  { %13 = sbr.rel (!%p11_p12) target bundleno = 3 (0x3), region = 126 }

// kernel: densenet121_forward.249
= control target key start
LH: loop header
LB: loop body
LE: loop exit
PB: predicated region body
PF: predicated region fallthrough
CT: control target
= control target key end

     0   :  { %s71_s0 = inlined_call_operand.vmem [shape: f32[4,8,256], index: 0, kind: input, shape index: {}]   ;;  %s72_s1 = inlined_call_operand.vmem [shape: f32[8,256], index: 1, kind: output, shape index: {}]  }
   0x1   :  { %v8_v0 = vld [vmem:[%s71_s0] sm:$0xff]  ;;  %v10_v1 = vld [vmem:[%s71_s0 + $0x10] sm:$0xff]  ;;  %v9_v4 = vld [vmem:[%s71_s0 + $0x8] sm:$0xff] }
   0x2   :  { %v12_v2 = vld [vmem:[%s71_s0 + $0x20] sm:$0xff]  ;;  %v16_v3 = vadd.f32 %v10_v1, %v8_v0  ;;  %v11_v5 = vld [vmem:[%s71_s0 + $0x18] sm:$0xff]  ;;  %v14_v6 = vld [vmem:[%s71_s0 + $0x30] sm:$0xff] }
   0x3   :  { %v13_v7 = vld [vmem:[%s71_s0 + $0x28] sm:$0xff]  ;;  %v19_v8 = vadd.f32 %v11_v5, %v9_v4  ;;  %v15_v10 = vld [vmem:[%s71_s0 + $0x38] sm:$0xff] }
   0x4   :  { %v17_v9 = vadd.f32 %v16_v3, %v12_v2 }
   0x5   :  { %v20_v11 = vadd.f32 %v19_v8, %v13_v7 }
   0x6   :  { %v18_v12 = vadd.f32 %v17_v9, %v14_v6 }
   0x7   :  { %v21_v13 = vadd.f32 %v20_v11, %v15_v10 }
   0x8   :  { %v23_v14 = vmul.f32 0.25, %v18_v12 }
   0x9   :  { %v24_v15 = vmul.f32 0.25, %v21_v13 }
   0xa   :  { %25 = vst [vmem:[%s72_s1] sm:$0xff] %v23_v14 }
   0xb   :  { %26 = vst [vmem:[%s72_s1 + $0x8] sm:$0xff] %v24_v15 }

// kernel: densenet121_forward.250
= control target key start
LH: loop header
LB: loop body
LE: loop exit
PB: predicated region body
PF: predicated region fallthrough
CT: control target
= control target key end

     0   :  { %v18_v0 = vlaneseq  ;;  %s90_s1 = inlined_call_operand.vmem [shape: f32[1,256], index: 1, kind: input, shape index: {}]   ;;  %s91_s2 = inlined_call_operand.vmem [shape: f32[1,256], index: 2, kind: input, shape index: {}]   ;;  %s92_s0 = inlined_call_operand.vmem [shape: f32[8,256], index: 0, kind: input, shape index: {}]   ;;  %s93_s3 = inlined_call_operand.vmem [shape: f32[8,256], index: 3, kind: output, shape index: {}]  }
   0x1   :  { %v16_v2 = vld [vmem:[%s90_s1] sm:$0x3]  ;;  %v15_v7 = vld [vmem:[%s92_s0 + $0x8] sm:$0xff] }
   0x2   :  { %v19_v1 = vshrl.u32 %v18_v0, 7  ;;  %v30_v3 = vld [vmem:[%s91_s2] sm:$0x3] }
   0x3   :  { %v14_v6 = vld [vmem:[%s92_s0] sm:$0xff] }
   0x4   :  { %v20_v4 = vsub.s32 0, %v19_v1  ;;  %v24_v5 = vsub.s32 1, %v19_v1 }
   0x6   :  { %v21_v8 = vrot.slane %v16_v2, %v20_v4  ;;  %v35_v9 = vrot.slane %v30_v3, %v20_v4  ;;  %v25_v10 = vrot.slane %v16_v2, %v24_v5  ;;  %v39_v11 = vrot.slane %v30_v3, %v24_v5 }
   0x8   :  { %v28_v12 = vmul.f32 %v21_v8, %v14_v6  ;;  %v29_v13 = vmul.f32 %v25_v10, %v15_v7 }
   0xa   :  { %v42_v14 = vadd.f32 %v35_v9, %v28_v12  ;;  %v43_v15 = vadd.f32 %v39_v11, %v29_v13 }
   0xc   :  { %v44_v16 = vmax.f32 %v42_v14, 0.0  ;;  %v45_v17 = vmax.f32 %v43_v15, 0.0 }
   0xe   :  { %46 = vst [vmem:[%s93_s3] sm:$0xff] %v44_v16  ;;  %47 = vst [vmem:[%s93_s3 + $0x8] sm:$0xff] %v45_v17 }

// kernel: densenet121_forward.251
= control target key start
LH: loop header
LB: loop body
LE: loop exit
PB: predicated region body
PF: predicated region fallthrough
CT: control target
= control target key end

     0   :  { %s395_s1 = inlined_call_operand.vmem [shape: bf16[256,128], index: 1, kind: input, shape index: {}]   ;;  %s396_s0 = inlined_call_operand.vmem [shape: bf16[16,256], index: 0, kind: input, shape index: {}]   ;;  %s397_s2 = inlined_call_operand.vmem [shape: f32[1,128], index: 2, kind: input, shape index: {}]   ;;  %s398_s3 = inlined_call_operand.vmem [shape: f32[1,128], index: 3, kind: input, shape index: {}]   ;;  %s399_s4 = inlined_call_operand.vmem [shape: f32[16,128], index: 4, kind: output, shape index: {}]  }
   0x1   :  { %v285_v0 = vld [vmem:[%s395_s1 + $0x78] sm:$0xff]   ;;  %v287_v2 = vld [vmem:[%s395_s1 + $0x70] sm:$0xff]   ;;  %v289_v4 = vld [vmem:[%s395_s1 + $0x68] sm:$0xff]  }
   0x2   :  { %v286_v1 = vld [vmem:[%s395_s1 + $0x38] sm:$0xff]   ;;  %262 = vmatprep.subr.bf16.mxu0 %v285_v0  ;;  %v288_v3 = vld [vmem:[%s395_s1 + $0x30] sm:$0xff]   ;;  %v290_v5 = vld [vmem:[%s395_s1 + $0x28] sm:$0xff]  }
   0x3   :  { %263 = vmatpush3.bf16.msra.mxu0 %v286_v1  ;;  %v291_v6 = vld [vmem:[%s395_s1 + $0x60] sm:$0xff]   ;;  %v293_v8 = vld [vmem:[%s395_s1 + $0x58] sm:$0xff]   ;;  %v295_v10 = vld [vmem:[%s395_s1 + $0x50] sm:$0xff]  }
   0x4   :  { %264 = vmatprep.subr.bf16.mxu0 %v287_v2  ;;  %v292_v7 = vld [vmem:[%s395_s1 + $0x20] sm:$0xff]   ;;  %v294_v9 = vld [vmem:[%s395_s1 + $0x18] sm:$0xff]   ;;  %v296_v12 = vld [vmem:[%s395_s1 + $0x10] sm:$0xff]  }
   0x5   :  { %v303_v11 = vld [vmem:[%s396_s0 + $0x4] ss:$8 sps:$4 sm:$0xff]   ;;  %v301_v17 = vld [vmem:[%s396_s0] ss:$8 sps:$4 sm:$0xff]  }
   0x6   :  { %198 = vmatprep.mubr.bf16.mxu0 %v303_v11  ;;  %v297_v13 = vld [vmem:[%s395_s1 + $0x48] sm:$0xff]   ;;  %v299_v15 = vld [vmem:[%s395_s1 + $0x40] sm:$0xff]  }
   0x7   :  { %265 = vmatpush3.bf16.msra.mxu0 %v288_v3  ;;  %v298_v14 = vld [vmem:[%s395_s1 + $0x8] sm:$0xff]   ;;  %v300_v16 = vld [vmem:[%s395_s1] sm:$0xff]  }
   0x8   :  { %266 = vmatprep.subr.bf16.mxu0 %v289_v4  ;;  %v260_v21 = vld [vmem:[%s397_s2] ss:$0 sm:$0xff] }
   0x9   :  { %v261_v23 = vld [vmem:[%s398_s3] ss:$0 sm:$0xff] }
   0xb   :  { %267 = vmatpush3.bf16.msra.mxu0 %v290_v5 }
   0xc   :  { %268 = vmatprep.subr.bf16.mxu0 %v291_v6 }
   0xf   :  { %269 = vmatpush3.bf16.msra.mxu0 %v292_v7 }
  0x10   :  { %270 = vmatprep.subr.bf16.mxu0 %v293_v8 }
  0x13   :  { %271 = vmatpush3.bf16.msra.mxu0 %v294_v9 }
  0x14   :  { %272 = vmatprep.subr.bf16.mxu0 %v295_v10 }
  0x17   :  { %273 = vmatpush3.bf16.msra.mxu0 %v296_v12 }
  0x18   :  { %274 = vmatprep.subr.bf16.mxu0 %v297_v13 }
  0x1b   :  { %275 = vmatpush3.bf16.msra.mxu0 %v298_v14 }
  0x1c   :  { %276 = vmatprep.subr.bf16.mxu0 %v299_v15 }
  0x1f   :  { %277 = vmatpush3.bf16.msra.mxu0 %v300_v16 }
  0x22   :  { %199 = vmatmul.mubr.bf16.vlgmr.msra.gmra.mxu0 %v301_v17 }
  0xe2   :  { %v278_v18 = vpop.f32.mrf.mxu0 }
  0xe4   :  { %v279_v19 = vpop.f32.mrf.mxu0 }
  0xe5   :  { %v280_v20 = vadd.f32 %v279_v19, %v278_v18 }
  0xe6   :  { %v281_v22 = vpop.f32.mrf.mxu0 }
  0xe7   :  { %v223_v25 = vmul.f32 %v280_v20, %v260_v21 }
  0xe8   :  { %v282_v24 = vpop.f32.mrf.mxu0 }
  0xe9   :  { %v283_v26 = vadd.f32 %v282_v24, %v281_v22  ;;  %v232_v27 = vadd.f32 %v261_v23, %v223_v25 }
  0xeb   :  { %v234_v28 = vmax.f32 %v232_v27, 0.0  ;;  %v224_v29 = vmul.f32 %v283_v26, %v260_v21 }
  0xed   :  { %236 = vst [vmem:[%s399_s4] sm:$0xff] %v234_v28  ;;  %v233_v30 = vadd.f32 %v261_v23, %v224_v29 }
  0xef   :  { %v235_v31 = vmax.f32 %v233_v30, 0.0 }
  0xf1   :  { %237 = vst [vmem:[%s399_s4 + $0x8] sm:$0xff] %v235_v31 }

// kernel: densenet121_forward.253
= control target key start
LH: loop header
LB: loop body
LE: loop exit
PB: predicated region body
PF: predicated region fallthrough
CT: control target
= control target key end

     0   :  { %v19_v0 = vlaneseq  ;;  %s111_s1 = inlined_call_operand.vmem [shape: f32[1,384], index: 1, kind: input, shape index: {}]   ;;  %s112_s2 = inlined_call_operand.vmem [shape: f32[1,384], index: 2, kind: input, shape index: {}]   ;;  %s113_s0 = inlined_call_operand.vmem [shape: f32[8,384], index: 0, kind: input, shape index: {}]   ;;  %s114_s3 = inlined_call_operand.vmem [shape: f32[8,384], index: 3, kind: output, shape index: {}]  }
   0x1   :  { %v17_v2 = vld [vmem:[%s111_s1] sm:$0x7]  ;;  %v15_v8 = vld [vmem:[%s113_s0 + $0x8] sm:$0xff]  ;;  %v16_v13 = vld [vmem:[%s113_s0 + $0x10] sm:$0xff] }
   0x2   :  { %v20_v1 = vshrl.u32 %v19_v0, 7  ;;  %v37_v3 = vld [vmem:[%s112_s2] sm:$0x7] }
   0x3   :  { %v14_v7 = vld [vmem:[%s113_s0] sm:$0xff] }
   0x4   :  { %v21_v4 = vsub.s32 0, %v20_v1  ;;  %v25_v5 = vsub.s32 1, %v20_v1  ;;  %v29_v6 = vsub.s32 2, %v20_v1 }
   0x6   :  { %v22_v9 = vrot.slane %v17_v2, %v21_v4  ;;  %v42_v10 = vrot.slane %v37_v3, %v21_v4  ;;  %v26_v11 = vrot.slane %v17_v2, %v25_v5  ;;  %v46_v12 = vrot.slane %v37_v3, %v25_v5 }
   0x7   :  { %v30_v14 = vrot.slane %v17_v2, %v29_v6  ;;  %v50_v15 = vrot.slane %v37_v3, %v29_v6 }
   0x8   :  { %v34_v16 = vmul.f32 %v22_v9, %v14_v7  ;;  %v35_v17 = vmul.f32 %v26_v11, %v15_v8 }
   0x9   :  { %v36_v18 = vmul.f32 %v30_v14, %v16_v13 }
   0xa   :  { %v54_v19 = vadd.f32 %v42_v10, %v34_v16  ;;  %v55_v20 = vadd.f32 %v46_v12, %v35_v17 }
   0xb   :  { %v56_v21 = vadd.f32 %v50_v15, %v36_v18 }
   0xc   :  { %v57_v22 = vmax.f32 %v54_v19, 0.0  ;;  %v58_v23 = vmax.f32 %v55_v20, 0.0 }
   0xd   :  { %v59_v24 = vmax.f32 %v56_v21, 0.0 }
   0xe   :  { %60 = vst [vmem:[%s114_s3] sm:$0xff] %v57_v22  ;;  %61 = vst [vmem:[%s114_s3 + $0x8] sm:$0xff] %v58_v23 }
   0xf   :  { %62 = vst [vmem:[%s114_s3 + $0x10] sm:$0xff] %v59_v24 }

// kernel: densenet121_forward.252
= control target key start
LH: loop header
LB: loop body
LE: loop exit
PB: predicated region body
PF: predicated region fallthrough
CT: control target
= control target key end

     0   :  { %s864_s15 = smov 0   ;;  %s866_s16 = smov 0   ;;  %s992_s0 = inlined_call_operand.vmem [shape: bf16[16,1280], index: 0, kind: input, shape index: {}]   ;;  %s993_s1 = inlined_call_operand.vmem [shape: bf16[1280,128], index: 1, kind: input, shape index: {}]   ;;  %s994_s2 = inlined_call_operand.vmem [shape: f32[1,128], index: 2, kind: input, shape index: {}]   ;;  %s995_s3 = inlined_call_operand.vmem [shape: f32[1,128], index: 3, kind: input, shape index: {}]   ;;  %s996_s4 = inlined_call_operand.vmem [shape: f32[16,128], index: 4, kind: output, shape index: {}]  }
   0x1   :  { %s868_s17 = smov 0   ;;  %s870_s18 = smov 0  }
   0x2   :  { %s872_s19 = smov 0  }
   0x3 LB: > { %s26_s20 = sadd.s32 1, %s832_s18  ;;  %p49_p1 = scmp.ne.s32.totalorder %s824_s16, %s820_s15  ;;  %s836_s19 = sphi %s872_s19, %s14_s19   ;;  %s832_s18 = sphi %s870_s18, %s1000_s18   ;;  %s828_s17 = sphi %s868_s17, %s999_s17   ;;  %s824_s16 = sphi %s866_s16, %s998_s16   ;;  %s820_s15 = sphi %s864_s15, %s997_s15  }
   0x4   : > { %p27_p0 = scmp.ge.s32.totalorder %s26_s20, 5  ;;  %p50_p2 = scmp.eq.s32.totalorder %s836_s19, 0 }
   0x5   : > { %s42_s22 = sadd.s32 1, %s824_s16  ;;  %p681_p5 = scmp.ge.s32.totalorder %s836_s19, 5 }
   0x6   : > { %s1002_s20 = smov (%p27_p0, %s26_s20), 0  ;;  %p51_p3 = por %p50_p2, %p49_p1 }
   0x7   : > { %s38_s21 = ssub.s32 %s832_s18, %s1002_s20  ;;  %195 = sbr.rel (%p681_p5) target bundleno = 17 (0x11), region = 24 }
   0x8   : > { %p40_p4 = scmp.eq.s32.totalorder %s38_s21, 0 }
   0xa   : > { %s899_s23 = scalar_select %p40_p4, %s824_s16, %s42_s22  }
   0xc   : > { %198 = sbr.rel (!%p51_p3) target bundleno = 17 (0x11), region = 28  ;;  %s200_s24 = sand.u32 (%p51_p3), 1, %s824_s16  }
   0xd   : > { %s715_s25 = sshll.u32 (%p51_p3), %s832_s18, 3  ;;  %s682_s26 = sshll.u32 (%p51_p3), %s200_s24, 4 }
   0xe   : > { %s208_s29 = scalar_lea.vmem (%p51_p3), %s992_s0, %s715_s25  ;;  %s202_s30 = scalar_lea.vmem (%p51_p3), [#allocation2], %s682_s26 }
   0xf   : > { %v239_v0 = vld [vmem:[%s208_s29] sm:$0xff] (%p51_p3)  ;;  %v241_v1 = vld [vmem:[%s208_s29 + $0x28] sm:$0xff] (%p51_p3) }
  0x10   : > { %240 = vst [vmem:[%s202_s30] sm:$0xff] (%p51_p3), %v239_v0  ;;  %242 = vst [vmem:[%s202_s30 + $0x8] sm:$0xff] (%p51_p3), %v241_v1 }
  0x11 PF: > { %p685_p6 = scmp.ge.s32.totalorder %s836_s19, 1  ;;  %p259_p7 = scmp.lt.s32.totalorder %s836_s19, 6 }
  0x13   : > { %p260_p8 = pnand %p685_p6, %p259_p7 }
  0x14   : > { %s266_s5 = sand.u32 (!%p260_p8), 1, %s820_s15   ;;  %s687_s6 = sshll.u32 (!%p260_p8), %s828_s17, 5 }
  0x15   : > { %263 = sbr.rel (%p260_p8) target bundleno = 282 (0x11a), region = 70  ;;  %s911_s7 = sshll.u32 (!%p260_p8), %s266_s5, 4 }
  0x16   : > { %p311_p9 = scmp.lt.s32.totalorder (!%p260_p8), %s687_s6, 159  ;;  %s268_s12 = scalar_lea.vmem (!%p260_p8), [#allocation2], %s911_s7 }
  0x17   : > { %p689_p10 = scmp.ne.s32.totalorder (!%p260_p8), %s828_s17, 0 }
  0x1a   : > { %s1004_s6 = smov (!%p311_p9, %s687_s6), 159  ;;  %338 = sbr.rel (%p689_p10) target bundleno = 33 (0x21), region = 78 }
  0x1b   : > { %s688_s8 = sshll.u32 %s1004_s6, 2 }
  0x1c   : > { %s916_s11 = scalar_lea.vmem %s993_s1, %s688_s8 }
  0x1f   : > { %v838_v2 = vmov 0.0  }
  0x20   : > { %339 = vst [vmem:[%s996_s4] sm:$0xff] %v838_v2  ;;  %340 = vst [vmem:[%s996_s4 + $0x8] sm:$0xff] %v838_v2 }
  0x21 PF: > { %v779_v3 = vld [vmem:[%s916_s11 + $0x78] sm:$0xff]   ;;  %v781_v5 = vld [vmem:[%s916_s11 + $0x70] sm:$0xff]   ;;  %v783_v7 = vld [vmem:[%s916_s11 + $0x68] sm:$0xff]   ;;  %p708_p11 = scmp.ne.s32.totalorder %s828_s17, 4 }
  0x22   : > { %v780_v4 = vld [vmem:[%s916_s11 + $0x38] sm:$0xff]   ;;  %716 = vmatprep.subr.bf16.mxu0 %v779_v3  ;;  %v782_v6 = vld [vmem:[%s916_s11 + $0x30] sm:$0xff]   ;;  %v784_v8 = vld [vmem:[%s916_s11 + $0x28] sm:$0xff]  }
  0x23   : > { %717 = vmatpush3.bf16.msra.mxu0 %v780_v4  ;;  %v785_v9 = vld [vmem:[%s916_s11 + $0x60] sm:$0xff]   ;;  %v787_v11 = vld [vmem:[%s916_s11 + $0x58] sm:$0xff]   ;;  %v789_v13 = vld [vmem:[%s916_s11 + $0x50] sm:$0xff]  }
  0x24   : > { %718 = vmatprep.subr.bf16.mxu0 %v781_v5  ;;  %v786_v10 = vld [vmem:[%s916_s11 + $0x20] sm:$0xff]   ;;  %v788_v12 = vld [vmem:[%s916_s11 + $0x18] sm:$0xff]   ;;  %v790_v15 = vld [vmem:[%s916_s11 + $0x10] sm:$0xff]  }
  0x25   : > { %v797_v14 = vld [vmem:[%s268_s12 + $0x4] ss:$8 sps:$4 sm:$0xff]   ;;  %v795_v20 = vld [vmem:[%s268_s12] ss:$8 sps:$4 sm:$0xff]  }
  0x26   : > { %515 = vmatprep.mubr.bf16.mxu0 %v797_v14  ;;  %v791_v16 = vld [vmem:[%s916_s11 + $0x48] sm:$0xff]   ;;  %v793_v18 = vld [vmem:[%s916_s11 + $0x40] sm:$0xff]  }
  0x27   : > { %719 = vmatpush3.bf16.msra.mxu0 %v782_v6  ;;  %v792_v17 = vld [vmem:[%s916_s11 + $0x8] sm:$0xff]   ;;  %v794_v19 = vld [vmem:[%s916_s11] sm:$0xff]  }
  0x28   : > { %720 = vmatprep.subr.bf16.mxu0 %v783_v7  ;;  %v341_v22 = vld [vmem:[%s996_s4] sm:$0xff]  ;;  %v342_v27 = vld [vmem:[%s996_s4 + $0x8] sm:$0xff] }
  0x2b   : > { %721 = vmatpush3.bf16.msra.mxu0 %v784_v8 }
  0x2c   : > { %722 = vmatprep.subr.bf16.mxu0 %v785_v9 }
  0x2f   : > { %723 = vmatpush3.bf16.msra.mxu0 %v786_v10 }
  0x30   : > { %724 = vmatprep.subr.bf16.mxu0 %v787_v11 }
  0x33   : > { %725 = vmatpush3.bf16.msra.mxu0 %v788_v12 }
  0x34   : > { %726 = vmatprep.subr.bf16.mxu0 %v789_v13 }
  0x37   : > { %727 = vmatpush3.bf16.msra.mxu0 %v790_v15 }
  0x38   : > { %728 = vmatprep.subr.bf16.mxu0 %v791_v16 }
  0x3b   : > { %729 = vmatpush3.bf16.msra.mxu0 %v792_v17 }
  0x3c   : > { %730 = vmatprep.subr.bf16.mxu0 %v793_v18 }
  0x3f   : > { %731 = vmatpush3.bf16.msra.mxu0 %v794_v19 }
  0x42   : > { %516 = vmatmul.mubr.bf16.vlgmr.msra.gmra.mxu0 %v795_v20 }
 0x102   : > { %v732_v21 = vpop.f32.mrf.mxu0 }
 0x104   : > { %v733_v23 = vpop.f32.mrf.mxu0 }
 0x105   : > { %v734_v24 = vadd.f32 %v733_v23, %v732_v21 }
 0x106   : > { %v735_v25 = vpop.f32.mrf.mxu0 }
 0x107   : > { %v524_v26 = vadd.f32 %v734_v24, %v341_v22 }
 0x108   : > { %v736_v28 = vpop.f32.mrf.mxu0 }
 0x109   : > { %526 = vst [vmem:[%s996_s4] sm:$0xff] %v524_v26  ;;  %v737_v29 = vadd.f32 %v736_v28, %v735_v25  ;;  %531 = sbr.rel (%p708_p11) target bundleno = 282 (0x11a), region = 82 }
 0x10b   : > { %v525_v30 = vadd.f32 %v737_v29, %v342_v27 }
 0x10d   : > { %527 = vst [vmem:[%s996_s4 + $0x8] sm:$0xff] %v525_v30 }
 0x10e   : > { %v709_v32 = vld [vmem:[%s994_s2] ss:$0 sm:$0xff] }
 0x10f   : > { %v710_v33 = vld [vmem:[%s995_s3] ss:$0 sm:$0xff] }
 0x110   : > { %v532_v31 = vld [vmem:[%s996_s4] sm:$0xff] }
 0x111   : > { %v541_v34 = vmul.f32 %v709_v32, %v532_v31 }
 0x113   : > { %v550_v37 = vadd.f32 %v710_v33, %v541_v34 }
 0x114   : > { %v533_v35 = vld [vmem:[%s996_s4 + $0x8] sm:$0xff] }
 0x115   : > { %v542_v36 = vmul.f32 %v709_v32, %v533_v35  ;;  %552 = vst [vmem:[%s996_s4] sm:$0xff] %v550_v37 }
 0x117   : > { %v551_v38 = vadd.f32 %v710_v33, %v542_v36 }
 0x119   : > { %553 = vst [vmem:[%s996_s4 + $0x8] sm:$0xff] %v551_v38 }
 0x11a PF: > { %s14_s19 = sadd.s32 1, %s836_s19   ;;  %s997_s15 = smov %s824_s16 }
 0x11b   : > { %p11_p12 = scmp.ge.s32.totalorder %s14_s19, 7   ;;  %s998_s16 = smov %s899_s23 }
 0x11c   : > { %s999_s17 = smov %s832_s18  ;;  %s1000_s18 = smov %s1002_s20 }
 0x11d   :  { %13 = sbr.rel (!%p11_p12) target bundleno = 3 (0x3), region = 126 }

// kernel: densenet121_forward.254
= control target key start
LH: loop header
LB: loop body
LE: loop exit
PB: predicated region body
PF: predicated region fallthrough
CT: control target
= control target key end

     0   :  { %s866_s15 = smov 0   ;;  %s868_s16 = smov 0   ;;  %s994_s0 = inlined_call_operand.vmem [shape: bf16[16,512], index: 0, kind: input, shape index: {}]   ;;  %s995_s1 = inlined_call_operand.vmem [shape: bf16[512,128], index: 1, kind: input, shape index: {}]   ;;  %s996_s2 = inlined_call_operand.vmem [shape: f32[1,128], index: 2, kind: input, shape index: {}]   ;;  %s997_s3 = inlined_call_operand.vmem [shape: f32[1,128], index: 3, kind: input, shape index: {}]   ;;  %s998_s4 = inlined_call_operand.vmem [shape: f32[16,128], index: 4, kind: output, shape index: {}]  }
   0x1   :  { %s870_s17 = smov 0   ;;  %s872_s18 = smov 0  }
   0x2   :  { %s874_s19 = smov 0  }
   0x3 LB: > { %s26_s20 = sadd.s32 1, %s834_s18  ;;  %p49_p1 = scmp.ne.s32.totalorder %s826_s16, %s822_s15  ;;  %s838_s19 = sphi %s874_s19, %s14_s19   ;;  %s834_s18 = sphi %s872_s18, %s1002_s18   ;;  %s830_s17 = sphi %s870_s17, %s1001_s17   ;;  %s826_s16 = sphi %s868_s16, %s1000_s16   ;;  %s822_s15 = sphi %s866_s15, %s999_s15  }
   0x4   : > { %p27_p0 = scmp.ge.s32.totalorder %s26_s20, 2  ;;  %p50_p2 = scmp.eq.s32.totalorder %s838_s19, 0 }
   0x5   : > { %s42_s22 = sadd.s32 1, %s826_s16  ;;  %p683_p5 = scmp.ge.s32.totalorder %s838_s19, 2 }
   0x6   : > { %s1004_s20 = smov (%p27_p0, %s26_s20), 0  ;;  %p51_p3 = por %p50_p2, %p49_p1 }
   0x7   : > { %s38_s21 = ssub.s32 %s834_s18, %s1004_s20  ;;  %195 = sbr.rel (%p683_p5) target bundleno = 17 (0x11), region = 24 }
   0x8   : > { %p40_p4 = scmp.eq.s32.totalorder %s38_s21, 0 }
   0xa   : > { %s901_s23 = scalar_select %p40_p4, %s826_s16, %s42_s22  }
   0xc   : > { %198 = sbr.rel (!%p51_p3) target bundleno = 17 (0x11), region = 28  ;;  %s200_s24 = sand.u32 (%p51_p3), 1, %s826_s16  }
   0xd   : > { %s717_s25 = sshll.u32 (%p51_p3), %s834_s18, 3  ;;  %s684_s26 = sshll.u32 (%p51_p3), %s200_s24, 4 }
   0xe   : > { %s208_s29 = scalar_lea.vmem (%p51_p3), %s994_s0, %s717_s25  ;;  %s202_s30 = scalar_lea.vmem (%p51_p3), [#allocation2], %s684_s26 }
   0xf   : > { %v239_v0 = vld [vmem:[%s208_s29] sm:$0xff] (%p51_p3)  ;;  %v241_v1 = vld [vmem:[%s208_s29 + $0x10] sm:$0xff] (%p51_p3) }
  0x10   : > { %240 = vst [vmem:[%s202_s30] sm:$0xff] (%p51_p3), %v239_v0  ;;  %242 = vst [vmem:[%s202_s30 + $0x8] sm:$0xff] (%p51_p3), %v241_v1 }
  0x11 PF: > { %p687_p6 = scmp.ge.s32.totalorder %s838_s19, 1  ;;  %p259_p7 = scmp.lt.s32.totalorder %s838_s19, 3 }
  0x13   : > { %p260_p8 = pnand %p687_p6, %p259_p7 }
  0x14   : > { %s266_s5 = sand.u32 (!%p260_p8), 1, %s822_s15   ;;  %s689_s6 = sshll.u32 (!%p260_p8), %s830_s17, 5 }
  0x15   : > { %263 = sbr.rel (%p260_p8) target bundleno = 284 (0x11c), region = 70  ;;  %s913_s7 = sshll.u32 (!%p260_p8), %s266_s5, 4 }
  0x16   : > { %p311_p9 = scmp.lt.s32.totalorder (!%p260_p8), %s689_s6, 63  ;;  %s268_s12 = scalar_lea.vmem (!%p260_p8), [#allocation2], %s913_s7 }
  0x17   : > { %p691_p10 = scmp.ne.s32.totalorder (!%p260_p8), %s830_s17, 0 }
  0x1a   : > { %s1006_s6 = smov (!%p311_p9, %s689_s6), 63  ;;  %338 = sbr.rel (%p691_p10) target bundleno = 33 (0x21), region = 78 }
  0x1b   : > { %s690_s8 = sshll.u32 %s1006_s6, 2 }
  0x1c   : > { %s918_s11 = scalar_lea.vmem %s995_s1, %s690_s8 }
  0x1f   : > { %v840_v2 = vmov 0.0  }
  0x20   : > { %339 = vst [vmem:[%s998_s4] sm:$0xff] %v840_v2  ;;  %340 = vst [vmem:[%s998_s4 + $0x8] sm:$0xff] %v840_v2 }
  0x21 PF: > { %v781_v3 = vld [vmem:[%s918_s11 + $0x78] sm:$0xff]   ;;  %v783_v5 = vld [vmem:[%s918_s11 + $0x70] sm:$0xff]   ;;  %v785_v7 = vld [vmem:[%s918_s11 + $0x68] sm:$0xff]   ;;  %p710_p11 = scmp.ne.s32.totalorder %s830_s17, 1 }
  0x22   : > { %v782_v4 = vld [vmem:[%s918_s11 + $0x38] sm:$0xff]   ;;  %718 = vmatprep.subr.bf16.mxu0 %v781_v3  ;;  %v784_v6 = vld [vmem:[%s918_s11 + $0x30] sm:$0xff]   ;;  %v786_v8 = vld [vmem:[%s918_s11 + $0x28] sm:$0xff]  }
  0x23   : > { %719 = vmatpush3.bf16.msra.mxu0 %v782_v4  ;;  %v787_v9 = vld [vmem:[%s918_s11 + $0x60] sm:$0xff]   ;;  %v789_v11 = vld [vmem:[%s918_s11 + $0x58] sm:$0xff]   ;;  %v791_v13 = vld [vmem:[%s918_s11 + $0x50] sm:$0xff]  }
  0x24   : > { %720 = vmatprep.subr.bf16.mxu0 %v783_v5  ;;  %v788_v10 = vld [vmem:[%s918_s11 + $0x20] sm:$0xff]   ;;  %v790_v12 = vld [vmem:[%s918_s11 + $0x18] sm:$0xff]   ;;  %v792_v15 = vld [vmem:[%s918_s11 + $0x10] sm:$0xff]  }
  0x25   : > { %v799_v14 = vld [vmem:[%s268_s12 + $0x4] ss:$8 sps:$4 sm:$0xff]   ;;  %v797_v20 = vld [vmem:[%s268_s12] ss:$8 sps:$4 sm:$0xff]  }
  0x26   : > { %515 = vmatprep.mubr.bf16.mxu0 %v799_v14  ;;  %v793_v16 = vld [vmem:[%s918_s11 + $0x48] sm:$0xff]   ;;  %v795_v18 = vld [vmem:[%s918_s11 + $0x40] sm:$0xff]  }
  0x27   : > { %721 = vmatpush3.bf16.msra.mxu0 %v784_v6  ;;  %v794_v17 = vld [vmem:[%s918_s11 + $0x8] sm:$0xff]   ;;  %v796_v19 = vld [vmem:[%s918_s11] sm:$0xff]  }
  0x28   : > { %722 = vmatprep.subr.bf16.mxu0 %v785_v7  ;;  %v341_v22 = vld [vmem:[%s998_s4] sm:$0xff]  ;;  %v342_v27 = vld [vmem:[%s998_s4 + $0x8] sm:$0xff] }
  0x2b   : > { %723 = vmatpush3.bf16.msra.mxu0 %v786_v8 }
  0x2c   : > { %724 = vmatprep.subr.bf16.mxu0 %v787_v9 }
  0x2f   : > { %725 = vmatpush3.bf16.msra.mxu0 %v788_v10 }
  0x30   : > { %726 = vmatprep.subr.bf16.mxu0 %v789_v11 }
  0x33   : > { %727 = vmatpush3.bf16.msra.mxu0 %v790_v12 }
  0x34   : > { %728 = vmatprep.subr.bf16.mxu0 %v791_v13 }
  0x37   : > { %729 = vmatpush3.bf16.msra.mxu0 %v792_v15 }
  0x38   : > { %730 = vmatprep.subr.bf16.mxu0 %v793_v16 }
  0x3b   : > { %731 = vmatpush3.bf16.msra.mxu0 %v794_v17 }
  0x3c   : > { %732 = vmatprep.subr.bf16.mxu0 %v795_v18 }
  0x3f   : > { %733 = vmatpush3.bf16.msra.mxu0 %v796_v19 }
  0x42   : > { %516 = vmatmul.mubr.bf16.vlgmr.msra.gmra.mxu0 %v797_v20 }
 0x102   : > { %v734_v21 = vpop.f32.mrf.mxu0 }
 0x104   : > { %v735_v23 = vpop.f32.mrf.mxu0 }
 0x105   : > { %v736_v24 = vadd.f32 %v735_v23, %v734_v21 }
 0x106   : > { %v737_v25 = vpop.f32.mrf.mxu0 }
 0x107   : > { %v524_v26 = vadd.f32 %v736_v24, %v341_v22 }
 0x108   : > { %v738_v28 = vpop.f32.mrf.mxu0 }
 0x109   : > { %526 = vst [vmem:[%s998_s4] sm:$0xff] %v524_v26  ;;  %v739_v29 = vadd.f32 %v738_v28, %v737_v25  ;;  %531 = sbr.rel (%p710_p11) target bundleno = 284 (0x11c), region = 82 }
 0x10b   : > { %v525_v30 = vadd.f32 %v739_v29, %v342_v27 }
 0x10d   : > { %527 = vst [vmem:[%s998_s4 + $0x8] sm:$0xff] %v525_v30 }
 0x10e   : > { %v711_v32 = vld [vmem:[%s996_s2] ss:$0 sm:$0xff] }
 0x10f   : > { %v712_v33 = vld [vmem:[%s997_s3] ss:$0 sm:$0xff] }
 0x110   : > { %v532_v31 = vld [vmem:[%s998_s4] sm:$0xff] }
 0x111   : > { %v541_v34 = vmul.f32 %v711_v32, %v532_v31 }
 0x113   : > { %v550_v37 = vadd.f32 %v712_v33, %v541_v34 }
 0x114   : > { %v533_v35 = vld [vmem:[%s998_s4 + $0x8] sm:$0xff] }
 0x115   : > { %v542_v36 = vmul.f32 %v711_v32, %v533_v35  ;;  %v552_v39 = vmax.f32 %v550_v37, 0.0 }
 0x117   : > { %v551_v38 = vadd.f32 %v712_v33, %v542_v36  ;;  %554 = vst [vmem:[%s998_s4] sm:$0xff] %v552_v39 }
 0x119   : > { %v553_v40 = vmax.f32 %v551_v38, 0.0 }
 0x11b   : > { %555 = vst [vmem:[%s998_s4 + $0x8] sm:$0xff] %v553_v40 }
 0x11c PF: > { %s14_s19 = sadd.s32 1, %s838_s19   ;;  %s999_s15 = smov %s826_s16 }
 0x11d   : > { %p11_p12 = scmp.ge.s32.totalorder %s14_s19, 4   ;;  %s1000_s16 = smov %s901_s23 }
 0x11e   : > { %s1001_s17 = smov %s834_s18  ;;  %s1002_s18 = smov %s1004_s20 }
 0x11f   :  { %13 = sbr.rel (!%p11_p12) target bundleno = 3 (0x3), region = 126 }

// kernel: densenet121_forward.265
= control target key start
LH: loop header
LB: loop body
LE: loop exit
PB: predicated region body
PF: predicated region fallthrough
CT: control target
= control target key end

     0   :  { %v20_v0 = vlaneseq  ;;  %s132_s1 = inlined_call_operand.vmem [shape: f32[1,512], index: 1, kind: input, shape index: {}]   ;;  %s133_s2 = inlined_call_operand.vmem [shape: f32[1,512], index: 2, kind: input, shape index: {}]   ;;  %s134_s0 = inlined_call_operand.vmem [shape: f32[8,512], index: 0, kind: input, shape index: {}]   ;;  %s135_s3 = inlined_call_operand.vmem [shape: f32[8,512], index: 3, kind: output, shape index: {}]  }
   0x1   :  { %v18_v2 = vld [vmem:[%s132_s1] sm:$0xf]  ;;  %v15_v9 = vld [vmem:[%s134_s0 + $0x8] sm:$0xff]  ;;  %v16_v14 = vld [vmem:[%s134_s0 + $0x10] sm:$0xff] }
   0x2   :  { %v21_v1 = vshrl.u32 %v20_v0, 7  ;;  %v44_v3 = vld [vmem:[%s133_s2] sm:$0xf]  ;;  %v17_v15 = vld [vmem:[%s134_s0 + $0x18] sm:$0xff] }
   0x3   :  { %v14_v8 = vld [vmem:[%s134_s0] sm:$0xff] }
   0x4   :  { %v22_v4 = vsub.s32 0, %v21_v1  ;;  %v26_v5 = vsub.s32 1, %v21_v1  ;;  %v30_v6 = vsub.s32 2, %v21_v1  ;;  %v34_v7 = vsub.s32 3, %v21_v1 }
   0x6   :  { %v23_v10 = vrot.slane %v18_v2, %v22_v4  ;;  %v49_v11 = vrot.slane %v44_v3, %v22_v4  ;;  %v27_v12 = vrot.slane %v18_v2, %v26_v5  ;;  %v53_v13 = vrot.slane %v44_v3, %v26_v5 }
   0x7   :  { %v31_v16 = vrot.slane %v18_v2, %v30_v6  ;;  %v57_v17 = vrot.slane %v44_v3, %v30_v6  ;;  %v35_v18 = vrot.slane %v18_v2, %v34_v7  ;;  %v61_v19 = vrot.slane %v44_v3, %v34_v7 }
   0x8   :  { %v40_v20 = vmul.f32 %v23_v10, %v14_v8  ;;  %v41_v21 = vmul.f32 %v27_v12, %v15_v9 }
   0x9   :  { %v42_v22 = vmul.f32 %v31_v16, %v16_v14  ;;  %v43_v23 = vmul.f32 %v35_v18, %v17_v15 }
   0xa   :  { %v66_v24 = vadd.f32 %v49_v11, %v40_v20  ;;  %v67_v25 = vadd.f32 %v53_v13, %v41_v21 }
   0xb   :  { %v68_v26 = vadd.f32 %v57_v17, %v42_v22  ;;  %v69_v27 = vadd.f32 %v61_v19, %v43_v23 }
   0xc   :  { %v70_v28 = vmax.f32 %v66_v24, 0.0  ;;  %v71_v29 = vmax.f32 %v67_v25, 0.0 }
   0xd   :  { %v72_v30 = vmax.f32 %v68_v26, 0.0  ;;  %v73_v31 = vmax.f32 %v69_v27, 0.0 }
   0xe   :  { %74 = vst [vmem:[%s135_s3] sm:$0xff] %v70_v28  ;;  %75 = vst [vmem:[%s135_s3 + $0x8] sm:$0xff] %v71_v29 }
   0xf   :  { %76 = vst [vmem:[%s135_s3 + $0x10] sm:$0xff] %v72_v30  ;;  %77 = vst [vmem:[%s135_s3 + $0x18] sm:$0xff] %v73_v31 }

// kernel: densenet121_forward.277
= control target key start
LH: loop header
LB: loop body
LE: loop exit
PB: predicated region body
PF: predicated region fallthrough
CT: control target
= control target key end

     0   :  { %v21_v0 = vlaneseq  ;;  %s153_s1 = inlined_call_operand.vmem [shape: f32[1,640], index: 1, kind: input, shape index: {}]   ;;  %s154_s2 = inlined_call_operand.vmem [shape: f32[1,640], index: 2, kind: input, shape index: {}]   ;;  %s155_s0 = inlined_call_operand.vmem [shape: f32[8,640], index: 0, kind: input, shape index: {}]   ;;  %s156_s3 = inlined_call_operand.vmem [shape: f32[8,640], index: 3, kind: output, shape index: {}]  }
   0x1   :  { %v19_v2 = vld [vmem:[%s153_s1] sm:$0x1f]  ;;  %v15_v9 = vld [vmem:[%s155_s0 + $0x8] sm:$0xff]  ;;  %v16_v15 = vld [vmem:[%s155_s0 + $0x10] sm:$0xff] }
   0x2   :  { %v22_v1 = vshrl.u32 %v21_v0, 7  ;;  %v51_v3 = vld [vmem:[%s154_s2] sm:$0x1f]  ;;  %v17_v16 = vld [vmem:[%s155_s0 + $0x18] sm:$0xff] }
   0x3   :  { %v14_v8 = vld [vmem:[%s155_s0] sm:$0xff] }
   0x4   :  { %v23_v4 = vsub.s32 0, %v22_v1  ;;  %v27_v5 = vsub.s32 1, %v22_v1  ;;  %v31_v6 = vsub.s32 2, %v22_v1  ;;  %v35_v7 = vsub.s32 3, %v22_v1  ;;  %v18_v21 = vld [vmem:[%s155_s0 + $0x20] sm:$0xff] }
   0x5   :  { %v39_v10 = vsub.s32 4, %v22_v1 }
   0x6   :  { %v24_v11 = vrot.slane %v19_v2, %v23_v4  ;;  %v56_v12 = vrot.slane %v51_v3, %v23_v4  ;;  %v28_v13 = vrot.slane %v19_v2, %v27_v5  ;;  %v60_v14 = vrot.slane %v51_v3, %v27_v5 }
   0x7   :  { %v32_v17 = vrot.slane %v19_v2, %v31_v6  ;;  %v64_v18 = vrot.slane %v51_v3, %v31_v6  ;;  %v36_v19 = vrot.slane %v19_v2, %v35_v7  ;;  %v68_v20 = vrot.slane %v51_v3, %v35_v7 }
   0x8   :  { %v46_v22 = vmul.f32 %v24_v11, %v14_v8  ;;  %v47_v23 = vmul.f32 %v28_v13, %v15_v9  ;;  %v40_v24 = vrot.slane %v19_v2, %v39_v10  ;;  %v72_v25 = vrot.slane %v51_v3, %v39_v10 }
   0x9   :  { %v48_v26 = vmul.f32 %v32_v17, %v16_v15  ;;  %v49_v27 = vmul.f32 %v36_v19, %v17_v16 }
   0xa   :  { %v78_v28 = vadd.f32 %v56_v12, %v46_v22  ;;  %v79_v29 = vadd.f32 %v60_v14, %v47_v23  ;;  %v50_v30 = vmul.f32 %v40_v24, %v18_v21 }
   0xb   :  { %v80_v31 = vadd.f32 %v64_v18, %v48_v26  ;;  %v81_v32 = vadd.f32 %v68_v20, %v49_v27 }
   0xc   :  { %v83_v33 = vmax.f32 %v78_v28, 0.0  ;;  %v84_v34 = vmax.f32 %v79_v29, 0.0  ;;  %v82_v35 = vadd.f32 %v72_v25, %v50_v30 }
   0xd   :  { %v85_v36 = vmax.f32 %v80_v31, 0.0  ;;  %v86_v37 = vmax.f32 %v81_v32, 0.0 }
   0xe   :  { %88 = vst [vmem:[%s156_s3] sm:$0xff] %v83_v33  ;;  %89 = vst [vmem:[%s156_s3 + $0x8] sm:$0xff] %v84_v34  ;;  %v87_v38 = vmax.f32 %v82_v35, 0.0 }
   0xf   :  { %90 = vst [vmem:[%s156_s3 + $0x10] sm:$0xff] %v85_v36  ;;  %91 = vst [vmem:[%s156_s3 + $0x18] sm:$0xff] %v86_v37 }
  0x10   :  { %92 = vst [vmem:[%s156_s3 + $0x20] sm:$0xff] %v87_v38 }

// kernel: densenet121_forward.278
= control target key start
LH: loop header
LB: loop body
LE: loop exit
PB: predicated region body
PF: predicated region fallthrough
CT: control target
= control target key end

     0   :  { %s866_s15 = smov 0   ;;  %s868_s16 = smov 0   ;;  %s994_s0 = inlined_call_operand.vmem [shape: bf16[16,768], index: 0, kind: input, shape index: {}]   ;;  %s995_s1 = inlined_call_operand.vmem [shape: bf16[768,128], index: 1, kind: input, shape index: {}]   ;;  %s996_s2 = inlined_call_operand.vmem [shape: f32[1,128], index: 2, kind: input, shape index: {}]   ;;  %s997_s3 = inlined_call_operand.vmem [shape: f32[1,128], index: 3, kind: input, shape index: {}]   ;;  %s998_s4 = inlined_call_operand.vmem [shape: f32[16,128], index: 4, kind: output, shape index: {}]  }
   0x1   :  { %s870_s17 = smov 0   ;;  %s872_s18 = smov 0  }
   0x2   :  { %s874_s19 = smov 0  }
   0x3 LB: > { %s26_s20 = sadd.s32 1, %s834_s18  ;;  %p49_p1 = scmp.ne.s32.totalorder %s826_s16, %s822_s15  ;;  %s838_s19 = sphi %s874_s19, %s14_s19   ;;  %s834_s18 = sphi %s872_s18, %s1002_s18   ;;  %s830_s17 = sphi %s870_s17, %s1001_s17   ;;  %s826_s16 = sphi %s868_s16, %s1000_s16   ;;  %s822_s15 = sphi %s866_s15, %s999_s15  }
   0x4   : > { %p27_p0 = scmp.ge.s32.totalorder %s26_s20, 3  ;;  %p50_p2 = scmp.eq.s32.totalorder %s838_s19, 0 }
   0x5   : > { %s42_s22 = sadd.s32 1, %s826_s16  ;;  %p683_p5 = scmp.ge.s32.totalorder %s838_s19, 3 }
   0x6   : > { %s1004_s20 = smov (%p27_p0, %s26_s20), 0  ;;  %p51_p3 = por %p50_p2, %p49_p1 }
   0x7   : > { %s38_s21 = ssub.s32 %s834_s18, %s1004_s20  ;;  %195 = sbr.rel (%p683_p5) target bundleno = 17 (0x11), region = 24 }
   0x8   : > { %p40_p4 = scmp.eq.s32.totalorder %s38_s21, 0 }
   0xa   : > { %s901_s23 = scalar_select %p40_p4, %s826_s16, %s42_s22  }
   0xc   : > { %198 = sbr.rel (!%p51_p3) target bundleno = 17 (0x11), region = 28  ;;  %s200_s24 = sand.u32 (%p51_p3), 1, %s826_s16  }
   0xd   : > { %s717_s25 = sshll.u32 (%p51_p3), %s834_s18, 3  ;;  %s684_s26 = sshll.u32 (%p51_p3), %s200_s24, 4 }
   0xe   : > { %s208_s29 = scalar_lea.vmem (%p51_p3), %s994_s0, %s717_s25  ;;  %s202_s30 = scalar_lea.vmem (%p51_p3), [#allocation2], %s684_s26 }
   0xf   : > { %v239_v0 = vld [vmem:[%s208_s29] sm:$0xff] (%p51_p3)  ;;  %v241_v1 = vld [vmem:[%s208_s29 + $0x18] sm:$0xff] (%p51_p3) }
  0x10   : > { %240 = vst [vmem:[%s202_s30] sm:$0xff] (%p51_p3), %v239_v0  ;;  %242 = vst [vmem:[%s202_s30 + $0x8] sm:$0xff] (%p51_p3), %v241_v1 }
  0x11 PF: > { %p687_p6 = scmp.ge.s32.totalorder %s838_s19, 1  ;;  %p259_p7 = scmp.lt.s32.totalorder %s838_s19, 4 }
  0x13   : > { %p260_p8 = pnand %p687_p6, %p259_p7 }
  0x14   : > { %s266_s5 = sand.u32 (!%p260_p8), 1, %s822_s15   ;;  %s689_s6 = sshll.u32 (!%p260_p8), %s830_s17, 5 }
  0x15   : > { %263 = sbr.rel (%p260_p8) target bundleno = 284 (0x11c), region = 70  ;;  %s913_s7 = sshll.u32 (!%p260_p8), %s266_s5, 4 }
  0x16   : > { %p311_p9 = scmp.lt.s32.totalorder (!%p260_p8), %s689_s6, 95  ;;  %s268_s12 = scalar_lea.vmem (!%p260_p8), [#allocation2], %s913_s7 }
  0x17   : > { %p691_p10 = scmp.ne.s32.totalorder (!%p260_p8), %s830_s17, 0 }
  0x1a   : > { %s1006_s6 = smov (!%p311_p9, %s689_s6), 95  ;;  %338 = sbr.rel (%p691_p10) target bundleno = 33 (0x21), region = 78 }
  0x1b   : > { %s690_s8 = sshll.u32 %s1006_s6, 2 }
  0x1c   : > { %s918_s11 = scalar_lea.vmem %s995_s1, %s690_s8 }
  0x1f   : > { %v840_v2 = vmov 0.0  }
  0x20   : > { %339 = vst [vmem:[%s998_s4] sm:$0xff] %v840_v2  ;;  %340 = vst [vmem:[%s998_s4 + $0x8] sm:$0xff] %v840_v2 }
  0x21 PF: > { %v781_v3 = vld [vmem:[%s918_s11 + $0x78] sm:$0xff]   ;;  %v783_v5 = vld [vmem:[%s918_s11 + $0x70] sm:$0xff]   ;;  %v785_v7 = vld [vmem:[%s918_s11 + $0x68] sm:$0xff]   ;;  %p710_p11 = scmp.ne.s32.totalorder %s830_s17, 2 }
  0x22   : > { %v782_v4 = vld [vmem:[%s918_s11 + $0x38] sm:$0xff]   ;;  %718 = vmatprep.subr.bf16.mxu0 %v781_v3  ;;  %v784_v6 = vld [vmem:[%s918_s11 + $0x30] sm:$0xff]   ;;  %v786_v8 = vld [vmem:[%s918_s11 + $0x28] sm:$0xff]  }
  0x23   : > { %719 = vmatpush3.bf16.msra.mxu0 %v782_v4  ;;  %v787_v9 = vld [vmem:[%s918_s11 + $0x60] sm:$0xff]   ;;  %v789_v11 = vld [vmem:[%s918_s11 + $0x58] sm:$0xff]   ;;  %v791_v13 = vld [vmem:[%s918_s11 + $0x50] sm:$0xff]  }
  0x24   : > { %720 = vmatprep.subr.bf16.mxu0 %v783_v5  ;;  %v788_v10 = vld [vmem:[%s918_s11 + $0x20] sm:$0xff]   ;;  %v790_v12 = vld [vmem:[%s918_s11 + $0x18] sm:$0xff]   ;;  %v792_v15 = vld [vmem:[%s918_s11 + $0x10] sm:$0xff]  }
  0x25   : > { %v799_v14 = vld [vmem:[%s268_s12 + $0x4] ss:$8 sps:$4 sm:$0xff]   ;;  %v797_v20 = vld [vmem:[%s268_s12] ss:$8 sps:$4 sm:$0xff]  }
  0x26   : > { %515 = vmatprep.mubr.bf16.mxu0 %v799_v14  ;;  %v793_v16 = vld [vmem:[%s918_s11 + $0x48] sm:$0xff]   ;;  %v795_v18 = vld [vmem:[%s918_s11 + $0x40] sm:$0xff]  }
  0x27   : > { %721 = vmatpush3.bf16.msra.mxu0 %v784_v6  ;;  %v794_v17 = vld [vmem:[%s918_s11 + $0x8] sm:$0xff]   ;;  %v796_v19 = vld [vmem:[%s918_s11] sm:$0xff]  }
  0x28   : > { %722 = vmatprep.subr.bf16.mxu0 %v785_v7  ;;  %v341_v22 = vld [vmem:[%s998_s4] sm:$0xff]  ;;  %v342_v27 = vld [vmem:[%s998_s4 + $0x8] sm:$0xff] }
  0x2b   : > { %723 = vmatpush3.bf16.msra.mxu0 %v786_v8 }
  0x2c   : > { %724 = vmatprep.subr.bf16.mxu0 %v787_v9 }
  0x2f   : > { %725 = vmatpush3.bf16.msra.mxu0 %v788_v10 }
  0x30   : > { %726 = vmatprep.subr.bf16.mxu0 %v789_v11 }
  0x33   : > { %727 = vmatpush3.bf16.msra.mxu0 %v790_v12 }
  0x34   : > { %728 = vmatprep.subr.bf16.mxu0 %v791_v13 }
  0x37   : > { %729 = vmatpush3.bf16.msra.mxu0 %v792_v15 }
  0x38   : > { %730 = vmatprep.subr.bf16.mxu0 %v793_v16 }
  0x3b   : > { %731 = vmatpush3.bf16.msra.mxu0 %v794_v17 }
  0x3c   : > { %732 = vmatprep.subr.bf16.mxu0 %v795_v18 }
  0x3f   : > { %733 = vmatpush3.bf16.msra.mxu0 %v796_v19 }
  0x42   : > { %516 = vmatmul.mubr.bf16.vlgmr.msra.gmra.mxu0 %v797_v20 }
 0x102   : > { %v734_v21 = vpop.f32.mrf.mxu0 }
 0x104   : > { %v735_v23 = vpop.f32.mrf.mxu0 }
 0x105   : > { %v736_v24 = vadd.f32 %v735_v23, %v734_v21 }
 0x106   : > { %v737_v25 = vpop.f32.mrf.mxu0 }
 0x107   : > { %v524_v26 = vadd.f32 %v736_v24, %v341_v22 }
 0x108   : > { %v738_v28 = vpop.f32.mrf.mxu0 }
 0x109   : > { %526 = vst [vmem:[%s998_s4] sm:$0xff] %v524_v26  ;;  %v739_v29 = vadd.f32 %v738_v28, %v737_v25  ;;  %531 = sbr.rel (%p710_p11) target bundleno = 284 (0x11c), region = 82 }
 0x10b   : > { %v525_v30 = vadd.f32 %v739_v29, %v342_v27 }
 0x10d   : > { %527 = vst [vmem:[%s998_s4 + $0x8] sm:$0xff] %v525_v30 }
 0x10e   : > { %v711_v32 = vld [vmem:[%s996_s2] ss:$0 sm:$0xff] }
 0x10f   : > { %v712_v33 = vld [vmem:[%s997_s3] ss:$0 sm:$0xff] }
 0x110   : > { %v532_v31 = vld [vmem:[%s998_s4] sm:$0xff] }
 0x111   : > { %v541_v34 = vmul.f32 %v711_v32, %v532_v31 }
 0x113   : > { %v550_v37 = vadd.f32 %v712_v33, %v541_v34 }
 0x114   : > { %v533_v35 = vld [vmem:[%s998_s4 + $0x8] sm:$0xff] }
 0x115   : > { %v542_v36 = vmul.f32 %v711_v32, %v533_v35  ;;  %v552_v39 = vmax.f32 %v550_v37, 0.0 }
 0x117   : > { %v551_v38 = vadd.f32 %v712_v33, %v542_v36  ;;  %554 = vst [vmem:[%s998_s4] sm:$0xff] %v552_v39 }
 0x119   : > { %v553_v40 = vmax.f32 %v551_v38, 0.0 }
 0x11b   : > { %555 = vst [vmem:[%s998_s4 + $0x8] sm:$0xff] %v553_v40 }
 0x11c PF: > { %s14_s19 = sadd.s32 1, %s838_s19   ;;  %s999_s15 = smov %s826_s16 }
 0x11d   : > { %p11_p12 = scmp.ge.s32.totalorder %s14_s19, 5   ;;  %s1000_s16 = smov %s901_s23 }
 0x11e   : > { %s1001_s17 = smov %s834_s18  ;;  %s1002_s18 = smov %s1004_s20 }
 0x11f   :  { %13 = sbr.rel (!%p11_p12) target bundleno = 3 (0x3), region = 126 }

// kernel: densenet121_forward.289
= control target key start
LH: loop header
LB: loop body
LE: loop exit
PB: predicated region body
PF: predicated region fallthrough
CT: control target
= control target key end

     0   :  { %v22_v0 = vlaneseq  ;;  %s174_s1 = inlined_call_operand.vmem [shape: f32[1,768], index: 1, kind: input, shape index: {}]   ;;  %s175_s2 = inlined_call_operand.vmem [shape: f32[1,768], index: 2, kind: input, shape index: {}]   ;;  %s176_s0 = inlined_call_operand.vmem [shape: f32[8,768], index: 0, kind: input, shape index: {}]   ;;  %s177_s3 = inlined_call_operand.vmem [shape: f32[8,768], index: 3, kind: output, shape index: {}]  }
   0x1   :  { %v20_v2 = vld [vmem:[%s174_s1] sm:$0x3f]  ;;  %v15_v9 = vld [vmem:[%s176_s0 + $0x8] sm:$0xff]  ;;  %v16_v16 = vld [vmem:[%s176_s0 + $0x10] sm:$0xff] }
   0x2   :  { %v23_v1 = vshrl.u32 %v22_v0, 7  ;;  %v58_v3 = vld [vmem:[%s175_s2] sm:$0x3f]  ;;  %v17_v17 = vld [vmem:[%s176_s0 + $0x18] sm:$0xff]  ;;  %v19_v27 = vld [vmem:[%s176_s0 + $0x28] sm:$0xff] }
   0x3   :  { %v14_v8 = vld [vmem:[%s176_s0] sm:$0xff] }
   0x4   :  { %v24_v4 = vsub.s32 0, %v23_v1  ;;  %v28_v5 = vsub.s32 1, %v23_v1  ;;  %v32_v6 = vsub.s32 2, %v23_v1  ;;  %v36_v7 = vsub.s32 3, %v23_v1  ;;  %v18_v22 = vld [vmem:[%s176_s0 + $0x20] sm:$0xff] }
   0x5   :  { %v40_v10 = vsub.s32 4, %v23_v1  ;;  %v44_v11 = vsub.s32 5, %v23_v1 }
   0x6   :  { %v25_v12 = vrot.slane %v20_v2, %v24_v4  ;;  %v63_v13 = vrot.slane %v58_v3, %v24_v4  ;;  %v29_v14 = vrot.slane %v20_v2, %v28_v5  ;;  %v67_v15 = vrot.slane %v58_v3, %v28_v5 }
   0x7   :  { %v33_v18 = vrot.slane %v20_v2, %v32_v6  ;;  %v71_v19 = vrot.slane %v58_v3, %v32_v6  ;;  %v37_v20 = vrot.slane %v20_v2, %v36_v7  ;;  %v75_v21 = vrot.slane %v58_v3, %v36_v7 }
   0x8   :  { %v52_v23 = vmul.f32 %v25_v12, %v14_v8  ;;  %v53_v24 = vmul.f32 %v29_v14, %v15_v9  ;;  %v41_v25 = vrot.slane %v20_v2, %v40_v10  ;;  %v79_v26 = vrot.slane %v58_v3, %v40_v10 }
   0x9   :  { %v54_v28 = vmul.f32 %v33_v18, %v16_v16  ;;  %v55_v29 = vmul.f32 %v37_v20, %v17_v17  ;;  %v45_v30 = vrot.slane %v20_v2, %v44_v11  ;;  %v83_v31 = vrot.slane %v58_v3, %v44_v11 }
   0xa   :  { %v90_v32 = vadd.f32 %v63_v13, %v52_v23  ;;  %v91_v33 = vadd.f32 %v67_v15, %v53_v24  ;;  %v56_v34 = vmul.f32 %v41_v25, %v18_v22 }
   0xb   :  { %v92_v35 = vadd.f32 %v71_v19, %v54_v28  ;;  %v93_v36 = vadd.f32 %v75_v21, %v55_v29  ;;  %v57_v37 = vmul.f32 %v45_v30, %v19_v27 }
   0xc   :  { %v96_v38 = vmax.f32 %v90_v32, 0.0  ;;  %v97_v39 = vmax.f32 %v91_v33, 0.0  ;;  %v94_v40 = vadd.f32 %v79_v26, %v56_v34 }
   0xd   :  { %v98_v41 = vmax.f32 %v92_v35, 0.0  ;;  %v99_v42 = vmax.f32 %v93_v36, 0.0  ;;  %v95_v43 = vadd.f32 %v83_v31, %v57_v37 }
   0xe   :  { %102 = vst [vmem:[%s177_s3] sm:$0xff] %v96_v38  ;;  %103 = vst [vmem:[%s177_s3 + $0x8] sm:$0xff] %v97_v39  ;;  %v100_v44 = vmax.f32 %v94_v40, 0.0 }
   0xf   :  { %104 = vst [vmem:[%s177_s3 + $0x10] sm:$0xff] %v98_v41  ;;  %105 = vst [vmem:[%s177_s3 + $0x18] sm:$0xff] %v99_v42  ;;  %v101_v45 = vmax.f32 %v95_v43, 0.0 }
  0x10   :  { %106 = vst [vmem:[%s177_s3 + $0x20] sm:$0xff] %v100_v44 }
  0x11   :  { %107 = vst [vmem:[%s177_s3 + $0x28] sm:$0xff] %v101_v45 }

// kernel: densenet121_forward.301
= control target key start
LH: loop header
LB: loop body
LE: loop exit
PB: predicated region body
PF: predicated region fallthrough
CT: control target
= control target key end

     0   :  { %v23_v0 = vlaneseq  ;;  %s195_s1 = inlined_call_operand.vmem [shape: f32[1,896], index: 1, kind: input, shape index: {}]   ;;  %s196_s2 = inlined_call_operand.vmem [shape: f32[1,896], index: 2, kind: input, shape index: {}]   ;;  %s197_s0 = inlined_call_operand.vmem [shape: f32[8,896], index: 0, kind: input, shape index: {}]   ;;  %s198_s3 = inlined_call_operand.vmem [shape: f32[8,896], index: 3, kind: output, shape index: {}]  }
   0x1   :  { %v21_v2 = vld [vmem:[%s195_s1] sm:$0xff]  ;;  %v15_v9 = vld [vmem:[%s197_s0 + $0x8] sm:$0xff]  ;;  %v16_v17 = vld [vmem:[%s197_s0 + $0x10] sm:$0xff] }
   0x2   :  { %v24_v1 = vshrl.u32 %v23_v0, 7  ;;  %v65_v3 = vld [vmem:[%s196_s2] sm:$0xff]  ;;  %v17_v18 = vld [vmem:[%s197_s0 + $0x18] sm:$0xff]  ;;  %v19_v28 = vld [vmem:[%s197_s0 + $0x28] sm:$0xff] }
   0x3   :  { %v14_v8 = vld [vmem:[%s197_s0] sm:$0xff]  ;;  %v20_v33 = vld [vmem:[%s197_s0 + $0x30] sm:$0xff] }
   0x4   :  { %v25_v4 = vsub.s32 0, %v24_v1  ;;  %v29_v5 = vsub.s32 1, %v24_v1  ;;  %v33_v6 = vsub.s32 2, %v24_v1  ;;  %v37_v7 = vsub.s32 3, %v24_v1  ;;  %v18_v23 = vld [vmem:[%s197_s0 + $0x20] sm:$0xff] }
   0x5   :  { %v41_v10 = vsub.s32 4, %v24_v1  ;;  %v45_v11 = vsub.s32 5, %v24_v1  ;;  %v49_v12 = vsub.s32 6, %v24_v1 }
   0x6   :  { %v26_v13 = vrot.slane %v21_v2, %v25_v4  ;;  %v70_v14 = vrot.slane %v65_v3, %v25_v4  ;;  %v30_v15 = vrot.slane %v21_v2, %v29_v5  ;;  %v74_v16 = vrot.slane %v65_v3, %v29_v5 }
   0x7   :  { %v34_v19 = vrot.slane %v21_v2, %v33_v6  ;;  %v78_v20 = vrot.slane %v65_v3, %v33_v6  ;;  %v38_v21 = vrot.slane %v21_v2, %v37_v7  ;;  %v82_v22 = vrot.slane %v65_v3, %v37_v7 }
   0x8   :  { %v58_v24 = vmul.f32 %v26_v13, %v14_v8  ;;  %v59_v25 = vmul.f32 %v30_v15, %v15_v9  ;;  %v42_v26 = vrot.slane %v21_v2, %v41_v10  ;;  %v86_v27 = vrot.slane %v65_v3, %v41_v10 }
   0x9   :  { %v60_v29 = vmul.f32 %v34_v19, %v16_v17  ;;  %v61_v30 = vmul.f32 %v38_v21, %v17_v18  ;;  %v46_v31 = vrot.slane %v21_v2, %v45_v11  ;;  %v90_v32 = vrot.slane %v65_v3, %v45_v11 }
   0xa   :  { %v102_v34 = vadd.f32 %v70_v14, %v58_v24  ;;  %v103_v35 = vadd.f32 %v74_v16, %v59_v25  ;;  %v62_v36 = vmul.f32 %v42_v26, %v18_v23  ;;  %v50_v37 = vrot.slane %v21_v2, %v49_v12 }
   0xb   :  { %v104_v38 = vadd.f32 %v78_v20, %v60_v29  ;;  %v105_v39 = vadd.f32 %v82_v22, %v61_v30  ;;  %v63_v40 = vmul.f32 %v46_v31, %v19_v28  ;;  %v94_v41 = vrot.slane %v65_v3, %v49_v12 }
   0xc   :  { %v109_v42 = vmax.f32 %v102_v34, 0.0  ;;  %v110_v43 = vmax.f32 %v103_v35, 0.0  ;;  %v106_v44 = vadd.f32 %v86_v27, %v62_v36  ;;  %v64_v45 = vmul.f32 %v50_v37, %v20_v33 }
   0xd   :  { %v111_v46 = vmax.f32 %v104_v38, 0.0  ;;  %v112_v47 = vmax.f32 %v105_v39, 0.0  ;;  %v107_v48 = vadd.f32 %v90_v32, %v63_v40 }
   0xe   :  { %116 = vst [vmem:[%s198_s3] sm:$0xff] %v109_v42  ;;  %117 = vst [vmem:[%s198_s3 + $0x8] sm:$0xff] %v110_v43  ;;  %v113_v49 = vmax.f32 %v106_v44, 0.0  ;;  %v108_v50 = vadd.f32 %v94_v41, %v64_v45 }
   0xf   :  { %118 = vst [vmem:[%s198_s3 + $0x10] sm:$0xff] %v111_v46  ;;  %119 = vst [vmem:[%s198_s3 + $0x18] sm:$0xff] %v112_v47  ;;  %v114_v51 = vmax.f32 %v107_v48, 0.0 }
  0x10   :  { %120 = vst [vmem:[%s198_s3 + $0x20] sm:$0xff] %v113_v49  ;;  %v115_v52 = vmax.f32 %v108_v50, 0.0 }
  0x11   :  { %121 = vst [vmem:[%s198_s3 + $0x28] sm:$0xff] %v114_v51 }
  0x12   :  { %122 = vst [vmem:[%s198_s3 + $0x30] sm:$0xff] %v115_v52 }

// kernel: densenet121_forward.302
= control target key start
LH: loop header
LB: loop body
LE: loop exit
PB: predicated region body
PF: predicated region fallthrough
CT: control target
= control target key end

     0   :  { %s866_s15 = smov 0   ;;  %s868_s16 = smov 0   ;;  %s994_s0 = inlined_call_operand.vmem [shape: bf16[16,1024], index: 0, kind: input, shape index: {}]   ;;  %s995_s1 = inlined_call_operand.vmem [shape: bf16[1024,128], index: 1, kind: input, shape index: {}]   ;;  %s996_s2 = inlined_call_operand.vmem [shape: f32[1,128], index: 2, kind: input, shape index: {}]   ;;  %s997_s3 = inlined_call_operand.vmem [shape: f32[1,128], index: 3, kind: input, shape index: {}]   ;;  %s998_s4 = inlined_call_operand.vmem [shape: f32[16,128], index: 4, kind: output, shape index: {}]  }
   0x1   :  { %s870_s17 = smov 0   ;;  %s872_s18 = smov 0  }
   0x2   :  { %s874_s19 = smov 0  }
   0x3 LB: > { %s26_s20 = sadd.s32 1, %s834_s18  ;;  %p49_p1 = scmp.ne.s32.totalorder %s826_s16, %s822_s15  ;;  %s838_s19 = sphi %s874_s19, %s14_s19   ;;  %s834_s18 = sphi %s872_s18, %s1002_s18   ;;  %s830_s17 = sphi %s870_s17, %s1001_s17   ;;  %s826_s16 = sphi %s868_s16, %s1000_s16   ;;  %s822_s15 = sphi %s866_s15, %s999_s15  }
   0x4   : > { %p27_p0 = scmp.ge.s32.totalorder %s26_s20, 4  ;;  %p50_p2 = scmp.eq.s32.totalorder %s838_s19, 0 }
   0x5   : > { %s42_s22 = sadd.s32 1, %s826_s16  ;;  %p683_p5 = scmp.ge.s32.totalorder %s838_s19, 4 }
   0x6   : > { %s1004_s20 = smov (%p27_p0, %s26_s20), 0  ;;  %p51_p3 = por %p50_p2, %p49_p1 }
   0x7   : > { %s38_s21 = ssub.s32 %s834_s18, %s1004_s20  ;;  %195 = sbr.rel (%p683_p5) target bundleno = 18 (0x12), region = 24 }
   0x8   : > { %p40_p4 = scmp.eq.s32.totalorder %s38_s21, 0 }
   0xa   : > { %s901_s23 = scalar_select %p40_p4, %s826_s16, %s42_s22  }
   0xc   : > { %198 = sbr.rel (!%p51_p3) target bundleno = 18 (0x12), region = 28  ;;  %s200_s24 = sand.u32 (%p51_p3), 1, %s826_s16  }
   0xd   : > { %s717_s25 = sshll.u32 (%p51_p3), %s834_s18, 3  ;;  %s684_s26 = sshll.u32 (%p51_p3), %s200_s24, 4 }
   0xe   : > { %s208_s29 = scalar_lea.vmem (%p51_p3), %s994_s0, %s717_s25  ;;  %s202_s30 = scalar_lea.vmem (%p51_p3), [#allocation2], %s684_s26 }
   0xf   : > { %v239_v0 = vld [vmem:[%s208_s29] sm:$0xff] (%p51_p3) }
  0x10   : > { %v241_v1 = vld [vmem:[%s208_s29 + $0x20] sm:$0xff] (%p51_p3)  ;;  %240 = vst [vmem:[%s202_s30] sm:$0xff] (%p51_p3), %v239_v0 }
  0x11   : > { %242 = vst [vmem:[%s202_s30 + $0x8] sm:$0xff] %v241_v1 }
  0x12 PF: > { %p687_p6 = scmp.ge.s32.totalorder %s838_s19, 1  ;;  %p259_p7 = scmp.lt.s32.totalorder %s838_s19, 5 }
  0x14   : > { %p260_p8 = pnand %p687_p6, %p259_p7 }
  0x15   : > { %s266_s5 = sand.u32 (!%p260_p8), 1, %s822_s15   ;;  %s689_s6 = sshll.u32 (!%p260_p8), %s830_s17, 5 }
  0x16   : > { %263 = sbr.rel (%p260_p8) target bundleno = 285 (0x11d), region = 70  ;;  %s913_s7 = sshll.u32 (!%p260_p8), %s266_s5, 4 }
  0x17   : > { %p311_p9 = scmp.lt.s32.totalorder (!%p260_p8), %s689_s6, 127  ;;  %s268_s12 = scalar_lea.vmem (!%p260_p8), [#allocation2], %s913_s7 }
  0x18   : > { %p691_p10 = scmp.ne.s32.totalorder (!%p260_p8), %s830_s17, 0 }
  0x1b   : > { %s1006_s6 = smov (!%p311_p9, %s689_s6), 127  ;;  %338 = sbr.rel (%p691_p10) target bundleno = 34 (0x22), region = 78 }
  0x1c   : > { %s690_s8 = sshll.u32 %s1006_s6, 2 }
  0x1d   : > { %s918_s11 = scalar_lea.vmem %s995_s1, %s690_s8 }
  0x20   : > { %v840_v2 = vmov 0.0  }
  0x21   : > { %339 = vst [vmem:[%s998_s4] sm:$0xff] %v840_v2  ;;  %340 = vst [vmem:[%s998_s4 + $0x8] sm:$0xff] %v840_v2 }
  0x22 PF: > { %v781_v3 = vld [vmem:[%s918_s11 + $0x78] sm:$0xff]   ;;  %v783_v5 = vld [vmem:[%s918_s11 + $0x70] sm:$0xff]   ;;  %v785_v7 = vld [vmem:[%s918_s11 + $0x68] sm:$0xff]   ;;  %p710_p11 = scmp.ne.s32.totalorder %s830_s17, 3 }
  0x23   : > { %v782_v4 = vld [vmem:[%s918_s11 + $0x38] sm:$0xff]   ;;  %718 = vmatprep.subr.bf16.mxu0 %v781_v3  ;;  %v784_v6 = vld [vmem:[%s918_s11 + $0x30] sm:$0xff]   ;;  %v786_v8 = vld [vmem:[%s918_s11 + $0x28] sm:$0xff]  }
  0x24   : > { %719 = vmatpush3.bf16.msra.mxu0 %v782_v4  ;;  %v787_v9 = vld [vmem:[%s918_s11 + $0x60] sm:$0xff]   ;;  %v789_v11 = vld [vmem:[%s918_s11 + $0x58] sm:$0xff]   ;;  %v791_v13 = vld [vmem:[%s918_s11 + $0x50] sm:$0xff]  }
  0x25   : > { %720 = vmatprep.subr.bf16.mxu0 %v783_v5  ;;  %v788_v10 = vld [vmem:[%s918_s11 + $0x20] sm:$0xff]   ;;  %v790_v12 = vld [vmem:[%s918_s11 + $0x18] sm:$0xff]   ;;  %v792_v15 = vld [vmem:[%s918_s11 + $0x10] sm:$0xff]  }
  0x26   : > { %v799_v14 = vld [vmem:[%s268_s12 + $0x4] ss:$8 sps:$4 sm:$0xff]   ;;  %v797_v20 = vld [vmem:[%s268_s12] ss:$8 sps:$4 sm:$0xff]  }
  0x27   : > { %515 = vmatprep.mubr.bf16.mxu0 %v799_v14  ;;  %v793_v16 = vld [vmem:[%s918_s11 + $0x48] sm:$0xff]   ;;  %v795_v18 = vld [vmem:[%s918_s11 + $0x40] sm:$0xff]  }
  0x28   : > { %721 = vmatpush3.bf16.msra.mxu0 %v784_v6  ;;  %v794_v17 = vld [vmem:[%s918_s11 + $0x8] sm:$0xff]   ;;  %v796_v19 = vld [vmem:[%s918_s11] sm:$0xff]  }
  0x29   : > { %722 = vmatprep.subr.bf16.mxu0 %v785_v7  ;;  %v341_v22 = vld [vmem:[%s998_s4] sm:$0xff]  ;;  %v342_v27 = vld [vmem:[%s998_s4 + $0x8] sm:$0xff] }
  0x2c   : > { %723 = vmatpush3.bf16.msra.mxu0 %v786_v8 }
  0x2d   : > { %724 = vmatprep.subr.bf16.mxu0 %v787_v9 }
  0x30   : > { %725 = vmatpush3.bf16.msra.mxu0 %v788_v10 }
  0x31   : > { %726 = vmatprep.subr.bf16.mxu0 %v789_v11 }
  0x34   : > { %727 = vmatpush3.bf16.msra.mxu0 %v790_v12 }
  0x35   : > { %728 = vmatprep.subr.bf16.mxu0 %v791_v13 }
  0x38   : > { %729 = vmatpush3.bf16.msra.mxu0 %v792_v15 }
  0x39   : > { %730 = vmatprep.subr.bf16.mxu0 %v793_v16 }
  0x3c   : > { %731 = vmatpush3.bf16.msra.mxu0 %v794_v17 }
  0x3d   : > { %732 = vmatprep.subr.bf16.mxu0 %v795_v18 }
  0x40   : > { %733 = vmatpush3.bf16.msra.mxu0 %v796_v19 }
  0x43   : > { %516 = vmatmul.mubr.bf16.vlgmr.msra.gmra.mxu0 %v797_v20 }
 0x103   : > { %v734_v21 = vpop.f32.mrf.mxu0 }
 0x105   : > { %v735_v23 = vpop.f32.mrf.mxu0 }
 0x106   : > { %v736_v24 = vadd.f32 %v735_v23, %v734_v21 }
 0x107   : > { %v737_v25 = vpop.f32.mrf.mxu0 }
 0x108   : > { %v524_v26 = vadd.f32 %v736_v24, %v341_v22 }
 0x109   : > { %v738_v28 = vpop.f32.mrf.mxu0 }
 0x10a   : > { %526 = vst [vmem:[%s998_s4] sm:$0xff] %v524_v26  ;;  %v739_v29 = vadd.f32 %v738_v28, %v737_v25  ;;  %531 = sbr.rel (%p710_p11) target bundleno = 285 (0x11d), region = 82 }
 0x10c   : > { %v525_v30 = vadd.f32 %v739_v29, %v342_v27 }
 0x10e   : > { %527 = vst [vmem:[%s998_s4 + $0x8] sm:$0xff] %v525_v30 }
 0x10f   : > { %v711_v32 = vld [vmem:[%s996_s2] ss:$0 sm:$0xff] }
 0x110   : > { %v712_v33 = vld [vmem:[%s997_s3] ss:$0 sm:$0xff] }
 0x111   : > { %v532_v31 = vld [vmem:[%s998_s4] sm:$0xff] }
 0x112   : > { %v541_v34 = vmul.f32 %v711_v32, %v532_v31 }
 0x114   : > { %v550_v37 = vadd.f32 %v712_v33, %v541_v34 }
 0x115   : > { %v533_v35 = vld [vmem:[%s998_s4 + $0x8] sm:$0xff] }
 0x116   : > { %v542_v36 = vmul.f32 %v711_v32, %v533_v35  ;;  %v552_v39 = vmax.f32 %v550_v37, 0.0 }
 0x118   : > { %v551_v38 = vadd.f32 %v712_v33, %v542_v36  ;;  %554 = vst [vmem:[%s998_s4] sm:$0xff] %v552_v39 }
 0x11a   : > { %v553_v40 = vmax.f32 %v551_v38, 0.0 }
 0x11c   : > { %555 = vst [vmem:[%s998_s4 + $0x8] sm:$0xff] %v553_v40 }
 0x11d PF: > { %s14_s19 = sadd.s32 1, %s838_s19   ;;  %s999_s15 = smov %s826_s16 }
 0x11e   : > { %p11_p12 = scmp.ge.s32.totalorder %s14_s19, 6   ;;  %s1000_s16 = smov %s901_s23 }
 0x11f   : > { %s1001_s17 = smov %s834_s18  ;;  %s1002_s18 = smov %s1004_s20 }
 0x120   :  { %13 = sbr.rel (!%p11_p12) target bundleno = 3 (0x3), region = 126 }

// kernel: densenet121_forward.313
= control target key start
LH: loop header
LB: loop body
LE: loop exit
PB: predicated region body
PF: predicated region fallthrough
CT: control target
= control target key end

     0   :  { %v24_v0 = vlaneseq  ;;  %s216_s1 = inlined_call_operand.vmem [shape: f32[1,1024], index: 1, kind: input, shape index: {}]   ;;  %s217_s2 = inlined_call_operand.vmem [shape: f32[1,1024], index: 2, kind: input, shape index: {}]   ;;  %s218_s0 = inlined_call_operand.vmem [shape: f32[8,1024], index: 0, kind: input, shape index: {}]   ;;  %s219_s3 = inlined_call_operand.vmem [shape: f32[8,1024], index: 3, kind: output, shape index: {}]  }
   0x1   :  { %v22_v2 = vld [vmem:[%s216_s1] sm:$0xff]  ;;  %v15_v9 = vld [vmem:[%s218_s0 + $0x8] sm:$0xff]  ;;  %v16_v18 = vld [vmem:[%s218_s0 + $0x10] sm:$0xff] }
   0x2   :  { %v25_v1 = vshrl.u32 %v24_v0, 7  ;;  %v72_v3 = vld [vmem:[%s217_s2] sm:$0xff]  ;;  %v17_v19 = vld [vmem:[%s218_s0 + $0x18] sm:$0xff]  ;;  %v19_v29 = vld [vmem:[%s218_s0 + $0x28] sm:$0xff] }
   0x3   :  { %v14_v8 = vld [vmem:[%s218_s0] sm:$0xff]  ;;  %v20_v34 = vld [vmem:[%s218_s0 + $0x30] sm:$0xff]  ;;  %v21_v47 = vld [vmem:[%s218_s0 + $0x38] sm:$0xff] }
   0x4   :  { %v26_v4 = vsub.s32 0, %v25_v1  ;;  %v30_v5 = vsub.s32 1, %v25_v1  ;;  %v34_v6 = vsub.s32 2, %v25_v1  ;;  %v38_v7 = vsub.s32 3, %v25_v1  ;;  %v18_v24 = vld [vmem:[%s218_s0 + $0x20] sm:$0xff] }
   0x5   :  { %v42_v10 = vsub.s32 4, %v25_v1  ;;  %v46_v11 = vsub.s32 5, %v25_v1  ;;  %v50_v12 = vsub.s32 6, %v25_v1  ;;  %v54_v13 = vsub.s32 7, %v25_v1 }
   0x6   :  { %v27_v14 = vrot.slane %v22_v2, %v26_v4  ;;  %v77_v15 = vrot.slane %v72_v3, %v26_v4  ;;  %v31_v16 = vrot.slane %v22_v2, %v30_v5  ;;  %v81_v17 = vrot.slane %v72_v3, %v30_v5 }
   0x7   :  { %v35_v20 = vrot.slane %v22_v2, %v34_v6  ;;  %v85_v21 = vrot.slane %v72_v3, %v34_v6  ;;  %v39_v22 = vrot.slane %v22_v2, %v38_v7  ;;  %v89_v23 = vrot.slane %v72_v3, %v38_v7 }
   0x8   :  { %v64_v25 = vmul.f32 %v27_v14, %v14_v8  ;;  %v65_v26 = vmul.f32 %v31_v16, %v15_v9  ;;  %v43_v27 = vrot.slane %v22_v2, %v42_v10  ;;  %v93_v28 = vrot.slane %v72_v3, %v42_v10 }
   0x9   :  { %v66_v30 = vmul.f32 %v35_v20, %v16_v18  ;;  %v67_v31 = vmul.f32 %v39_v22, %v17_v19  ;;  %v47_v32 = vrot.slane %v22_v2, %v46_v11  ;;  %v97_v33 = vrot.slane %v72_v3, %v46_v11 }
   0xa   :  { %v114_v35 = vadd.f32 %v77_v15, %v64_v25  ;;  %v115_v36 = vadd.f32 %v81_v17, %v65_v26  ;;  %v68_v37 = vmul.f32 %v43_v27, %v18_v24  ;;  %v51_v38 = vrot.slane %v22_v2, %v50_v12 }
   0xb   :  { %v116_v39 = vadd.f32 %v85_v21, %v66_v30  ;;  %v117_v40 = vadd.f32 %v89_v23, %v67_v31  ;;  %v69_v41 = vmul.f32 %v47_v32, %v19_v29  ;;  %v101_v42 = vrot.slane %v72_v3, %v50_v12 }
   0xc   :  { %v122_v43 = vmax.f32 %v114_v35, 0.0  ;;  %v123_v44 = vmax.f32 %v115_v36, 0.0  ;;  %v118_v45 = vadd.f32 %v93_v28, %v68_v37  ;;  %v70_v46 = vmul.f32 %v51_v38, %v20_v34 }
   0xd   :  { %v124_v48 = vmax.f32 %v116_v39, 0.0  ;;  %v125_v49 = vmax.f32 %v117_v40, 0.0  ;;  %v119_v50 = vadd.f32 %v97_v33, %v69_v41  ;;  %v55_v51 = vrot.slane %v22_v2, %v54_v13 }
   0xe   :  { %130 = vst [vmem:[%s219_s3] sm:$0xff] %v122_v43  ;;  %131 = vst [vmem:[%s219_s3 + $0x8] sm:$0xff] %v123_v44  ;;  %v126_v52 = vmax.f32 %v118_v45, 0.0  ;;  %v120_v53 = vadd.f32 %v101_v42, %v70_v46  ;;  %v105_v54 = vrot.slane %v72_v3, %v54_v13 }
   0xf   :  { %132 = vst [vmem:[%s219_s3 + $0x10] sm:$0xff] %v124_v48  ;;  %133 = vst [vmem:[%s219_s3 + $0x18] sm:$0xff] %v125_v49  ;;  %v127_v55 = vmax.f32 %v119_v50, 0.0  ;;  %v71_v56 = vmul.f32 %v55_v51, %v21_v47 }
  0x10   :  { %134 = vst [vmem:[%s219_s3 + $0x20] sm:$0xff] %v126_v52  ;;  %v128_v57 = vmax.f32 %v120_v53, 0.0 }
  0x11   :  { %135 = vst [vmem:[%s219_s3 + $0x28] sm:$0xff] %v127_v55  ;;  %v121_v58 = vadd.f32 %v105_v54, %v71_v56 }
  0x12   :  { %136 = vst [vmem:[%s219_s3 + $0x30] sm:$0xff] %v128_v57 }
  0x13   :  { %v129_v59 = vmax.f32 %v121_v58, 0.0 }
  0x15   :  { %137 = vst [vmem:[%s219_s3 + $0x38] sm:$0xff] %v129_v59 }

// kernel: densenet121_forward.324
= control target key start
LH: loop header
LB: loop body
LE: loop exit
PB: predicated region body
PF: predicated region fallthrough
CT: control target
= control target key end

     0   :  { %s119_s0 = inlined_call_operand.vmem [shape: f32[4,8,512], index: 0, kind: input, shape index: {}]   ;;  %s120_s1 = inlined_call_operand.vmem [shape: f32[8,512], index: 1, kind: output, shape index: {}]  }
   0x1   :  { %v8_v0 = vld [vmem:[%s119_s0] sm:$0xff]  ;;  %v9_v4 = vld [vmem:[%s119_s0 + $0x8] sm:$0xff]  ;;  %v10_v9 = vld [vmem:[%s119_s0 + $0x10] sm:$0xff] }
   0x2   :  { %v12_v1 = vld [vmem:[%s119_s0 + $0x20] sm:$0xff]  ;;  %v13_v5 = vld [vmem:[%s119_s0 + $0x28] sm:$0xff]  ;;  %v14_v12 = vld [vmem:[%s119_s0 + $0x30] sm:$0xff] }
   0x3   :  { %v16_v2 = vld [vmem:[%s119_s0 + $0x40] sm:$0xff]  ;;  %v24_v3 = vadd.f32 %v12_v1, %v8_v0  ;;  %v17_v7 = vld [vmem:[%s119_s0 + $0x48] sm:$0xff]  ;;  %v27_v8 = vadd.f32 %v13_v5, %v9_v4  ;;  %v18_v13 = vld [vmem:[%s119_s0 + $0x50] sm:$0xff]  ;;  %v30_v15 = vadd.f32 %v14_v12, %v10_v9 }
   0x4   :  { %v20_v6 = vld [vmem:[%s119_s0 + $0x60] sm:$0xff]  ;;  %v21_v11 = vld [vmem:[%s119_s0 + $0x68] sm:$0xff]  ;;  %v11_v16 = vld [vmem:[%s119_s0 + $0x18] sm:$0xff] }
   0x5   :  { %v25_v10 = vadd.f32 %v24_v3, %v16_v2  ;;  %v28_v14 = vadd.f32 %v27_v8, %v17_v7  ;;  %v15_v17 = vld [vmem:[%s119_s0 + $0x38] sm:$0xff]  ;;  %v22_v20 = vld [vmem:[%s119_s0 + $0x70] sm:$0xff]  ;;  %v31_v23 = vadd.f32 %v30_v15, %v18_v13 }
   0x6   :  { %v19_v18 = vld [vmem:[%s119_s0 + $0x58] sm:$0xff]  ;;  %v33_v21 = vadd.f32 %v15_v17, %v11_v16 }
   0x7   :  { %v26_v19 = vadd.f32 %v25_v10, %v20_v6  ;;  %v29_v22 = vadd.f32 %v28_v14, %v21_v11  ;;  %v23_v24 = vld [vmem:[%s119_s0 + $0x78] sm:$0xff]  ;;  %v32_v28 = vadd.f32 %v31_v23, %v22_v20 }
   0x8   :  { %v34_v26 = vadd.f32 %v33_v21, %v19_v18 }
   0x9   :  { %v37_v25 = vmul.f32 0.25, %v26_v19  ;;  %v38_v27 = vmul.f32 0.25, %v29_v22  ;;  %v39_v30 = vmul.f32 0.25, %v32_v28 }
   0xa   :  { %v35_v29 = vadd.f32 %v34_v26, %v23_v24 }
   0xb   :  { %41 = vst [vmem:[%s120_s1] sm:$0xff] %v37_v25  ;;  %42 = vst [vmem:[%s120_s1 + $0x8] sm:$0xff] %v38_v27 }
   0xc   :  { %v40_v31 = vmul.f32 0.25, %v35_v29  ;;  %43 = vst [vmem:[%s120_s1 + $0x10] sm:$0xff] %v39_v30 }
   0xe   :  { %44 = vst [vmem:[%s120_s1 + $0x18] sm:$0xff] %v40_v31 }

// kernel: densenet121_forward.323
= control target key start
LH: loop header
LB: loop body
LE: loop exit
PB: predicated region body
PF: predicated region fallthrough
CT: control target
= control target key end

     0   :  { %s1266_s15 = smov 0   ;;  %s1268_s16 = smov 0   ;;  %s1582_s0 = inlined_call_operand.vmem [shape: bf16[16,1024], index: 0, kind: input, shape index: {}]   ;;  %s1583_s1 = inlined_call_operand.vmem [shape: bf16[1024,512], index: 1, kind: input, shape index: {}]   ;;  %s1584_s2 = inlined_call_operand.vmem [shape: f32[1,512], index: 2, kind: input, shape index: {}]   ;;  %s1585_s3 = inlined_call_operand.vmem [shape: f32[1,512], index: 3, kind: input, shape index: {}]   ;;  %s1586_s4 = inlined_call_operand.vmem [shape: f32[16,512], index: 4, kind: output, shape index: {}]  }
   0x1   :  { %s1270_s17 = smov 0   ;;  %s1272_s18 = smov 0  }
   0x2   :  { %s1274_s19 = smov 0   ;;  %s1276_s20 = smov 0  }
   0x3   :  { %s1278_s21 = smov 0   ;;  %s1280_s22 = smov 0  }
   0x4   :  { %s1282_s23 = smov 0   ;;  %s1284_s24 = smov 0  }
   0x5   :  { %s1286_s25 = smov 0  }
   0x6 LB: > { %1590 = sst [smem:[#allocation5_spill]] %s1218_s20  ;;  %s950_s26 = sadd.s32 4294967295, %s1238_s25   ;;  %s1238_s25 = sphi %s1286_s25, %s14_s25   ;;  %s1234_s24 = sphi %s1284_s24, %s1608_s24   ;;  %s1230_s23 = sphi %s1282_s23, %s1607_s23   ;;  %s1226_s22 = sphi %s1280_s22, %s1606_s22   ;;  %s1222_s21 = sphi %s1278_s21, %s1605_s21   ;;  %s1218_s20 = sphi %s1276_s20, %s1598_s20   ;;  %s1214_s19 = sphi %s1274_s19, %s1597_s19   ;;  %s1210_s18 = sphi %s1272_s18, %s1604_s18   ;;  %s1206_s17 = sphi %s1270_s17, %s1603_s17   ;;  %s1202_s16 = sphi %s1268_s16, %s1602_s16   ;;  %s1198_s15 = sphi %s1266_s15, %s1601_s15  }
   0x7   : > { %s26_s27 = sadd.s32 1, %s1230_s23  ;;  %s29_s28 = sadd.s32 1, %s1234_s24 }
   0x8   : > { %p27_p0 = scmp.ge.s32.totalorder %s26_s27, 4  ;;  %s42_s29 = sadd.s32 1, %s1218_s20 }
   0x9   : > { %p49_p1 = scmp.ne.s32.totalorder %s1218_s20, %s1214_s19  ;;  %p50_p2 = scmp.eq.s32.totalorder %s1238_s25, 0 }
   0xa   : > { %s1610_s27 = smov (%p27_p0, %s26_s27), 0  ;;  %s1612_s28 = smov (!%p27_p0, %s29_s28), %s1234_s24 }
   0xb   : > { %1591 = sst [smem:[#allocation6_spill]] %s1610_s27  ;;  %s38_s30 = ssub.s32 %s1230_s23, %s1610_s27 }
   0xc   : > { %p31_p3 = scmp.ge.s32.totalorder %s1612_s28, 2  ;;  %p40_p4 = scmp.eq.s32.totalorder %s38_s30, 0 }
   0xd   : > { %p1333_p5 = por %p50_p2, %p49_p1  ;;  %s70_s6 = sadd.s32 1, %s1210_s18 }
   0xe   : > { %s1614_s28 = smov (%p31_p3, %s1612_s28), 0  ;;  %p77_p6 = scmp.ne.s32.totalorder %s1210_s18, %s1206_s17 }
   0xf   : > { %1593 = sst [smem:[#allocation7_spill]] %s1614_s28  ;;  %s66_s8 = ssub.s32 %s1234_s24, %s1614_s28 }
  0x10   : > { %s1341_s7 = scalar_select %p40_p4, %s1218_s20, %s42_s29  }
  0x11   : > { %s67_s9 = sor.u32 %s66_s8, %s38_s30  ;;  %p148_p7 = scmp.eq.s32.totalorder %s66_s8, 0 }
  0x12   : > { %1594 = sst [smem:[#allocation8_spill]] %s1341_s7  ;;  %p68_p8 = scmp.eq.s32.totalorder %s67_s9, 0 }
  0x13   : > { %p1347_p9 = por %p77_p6, %p50_p2  ;;  %s150_s11 = sadd.s32 1, %s1202_s16 }
  0x14   : > { %p160_p10 = scmp.ne.s32.totalorder %s1202_s16, %s1198_s15  ;;  %p161_p11 = scmp.eq.s32.totalorder %s950_s26, 7 }
  0x15   : > { %s1355_s12 = scalar_select %p68_p8, %s1210_s18, %s70_s6  }
  0x16   : > { %s1358_s13 = scalar_select %p148_p7, %s1202_s16, %s150_s11  }
  0x17   : > { %p1360_p12 = por %p161_p11, %p160_p10  ;;  %p953_p13 = scmp.ge.s32.totalorder %s1238_s25, 8 }
  0x19   : > { %183 = sbr.rel (%p953_p13) target bundleno = 59 (0x3b), region = 16 }
  0x1e   : > { %186 = sbr.rel (!%p1333_p5) target bundleno = 36 (0x24), region = 20  ;;  %s188_s29 = sand.u32 (%p1333_p5), 1, %s1218_s20  }
  0x1f   : > { %s1009_s30 = sshll.u32 (%p1333_p5), %s1230_s23, 3  ;;  %s954_s8 = sshll.u32 (%p1333_p5), %s188_s29, 4 }
  0x20   : > { %s196_s11 = scalar_lea.vmem (%p1333_p5), %s1582_s0, %s1009_s30  ;;  %s190_s26 = scalar_lea.vmem (%p1333_p5), [#allocation2], %s954_s8 }
  0x21   : > { %v227_v0 = vld [vmem:[%s196_s11] sm:$0xff] (%p1333_p5) }
  0x22   : > { %v229_v1 = vld [vmem:[%s196_s11 + $0x20] sm:$0xff] (%p1333_p5)  ;;  %228 = vst [vmem:[%s190_s26] sm:$0xff] (%p1333_p5), %v227_v0 }
  0x23   : > { %230 = vst [vmem:[%s190_s26 + $0x8] sm:$0xff] %v229_v1 }
  0x24 PF: > { %236 = sbr.rel (!%p1347_p9) target bundleno = 59 (0x3b), region = 58  ;;  %s238_s5 = sand.u32 (%p1347_p9), 1, %s1210_s18  }
  0x25   : > { %s959_s28 = sshll.u32 (%p1347_p9), %s1234_s24, 1  ;;  %s957_s27 = sshll.u32 (%p1347_p9), %s238_s5, 8 }
  0x26   : > { %s1010_s29 = sshll.u32 (%p1347_p9), %s1230_s23, 7  ;;  %s1385_s10 = scalar_lea.vmem (%p1347_p9), [#allocation3], %s957_s27 }
  0x27   : > { %s244_s7 = sadd.s32 (%p1347_p9), %s1010_s29, %s959_s28 }
  0x28   : > { %s961_s20 = sshll.u32 (%p1347_p9), %s244_s7, 2 }
  0x29   : > { %s1380_s9 = scalar_lea.vmem %s1583_s1, %s961_s20 }
  0x2a   : > { %v337_v2 = vld [vmem:[%s1380_s9] sm:$0xff]  ;;  %v339_v3 = vld [vmem:[%s1380_s9 + $0x10] sm:$0xff] }
  0x2b   : > { %v341_v4 = vld [vmem:[%s1380_s9 + $0x20] sm:$0xff]  ;;  %338 = vst [vmem:[%s1385_s10] sm:$0xff] %v337_v2  ;;  %340 = vst [vmem:[%s1385_s10 + $0x8] sm:$0xff] %v339_v3  ;;  %v343_v5 = vld [vmem:[%s1380_s9 + $0x30] sm:$0xff] }
  0x2c   : > { %342 = vst [vmem:[%s1385_s10 + $0x10] sm:$0xff] %v341_v4  ;;  %v345_v6 = vld [vmem:[%s1380_s9 + $0x40] sm:$0xff]  ;;  %v347_v7 = vld [vmem:[%s1380_s9 + $0x50] sm:$0xff]  ;;  %344 = vst [vmem:[%s1385_s10 + $0x18] sm:$0xff] %v343_v5 }
  0x2d   : > { %346 = vst [vmem:[%s1385_s10 + $0x20] sm:$0xff] %v345_v6  ;;  %348 = vst [vmem:[%s1385_s10 + $0x28] sm:$0xff] %v347_v7  ;;  %v349_v8 = vld [vmem:[%s1380_s9 + $0x60] sm:$0xff]  ;;  %v351_v9 = vld [vmem:[%s1380_s9 + $0x70] sm:$0xff] }
  0x2e   : > { %v353_v10 = vld [vmem:[%s1380_s9 + $0x80] sm:$0xff]  ;;  %350 = vst [vmem:[%s1385_s10 + $0x30] sm:$0xff] %v349_v8  ;;  %352 = vst [vmem:[%s1385_s10 + $0x38] sm:$0xff] %v351_v9  ;;  %v355_v11 = vld [vmem:[%s1380_s9 + $0x90] sm:$0xff] }
  0x2f   : > { %354 = vst [vmem:[%s1385_s10 + $0x40] sm:$0xff] %v353_v10  ;;  %v357_v12 = vld [vmem:[%s1380_s9 + $0xa0] sm:$0xff]  ;;  %v359_v13 = vld [vmem:[%s1380_s9 + $0xb0] sm:$0xff]  ;;  %356 = vst [vmem:[%s1385_s10 + $0x48] sm:$0xff] %v355_v11 }
  0x30   : > { %358 = vst [vmem:[%s1385_s10 + $0x50] sm:$0xff] %v357_v12  ;;  %360 = vst [vmem:[%s1385_s10 + $0x58] sm:$0xff] %v359_v13  ;;  %v361_v14 = vld [vmem:[%s1380_s9 + $0xc0] sm:$0xff]  ;;  %v363_v15 = vld [vmem:[%s1380_s9 + $0xd0] sm:$0xff] }
  0x31   : > { %v365_v16 = vld [vmem:[%s1380_s9 + $0xe0] sm:$0xff]  ;;  %362 = vst [vmem:[%s1385_s10 + $0x60] sm:$0xff] %v361_v14  ;;  %364 = vst [vmem:[%s1385_s10 + $0x68] sm:$0xff] %v363_v15  ;;  %v367_v17 = vld [vmem:[%s1380_s9 + $0xf0] sm:$0xff] }
  0x32   : > { %366 = vst [vmem:[%s1385_s10 + $0x70] sm:$0xff] %v365_v16  ;;  %v369_v18 = vld [vmem:[%s1380_s9 + $0x100] sm:$0xff]  ;;  %v371_v19 = vld [vmem:[%s1380_s9 + $0x110] sm:$0xff]  ;;  %368 = vst [vmem:[%s1385_s10 + $0x78] sm:$0xff] %v367_v17 }
  0x33   : > { %370 = vst [vmem:[%s1385_s10 + $0x80] sm:$0xff] %v369_v18  ;;  %372 = vst [vmem:[%s1385_s10 + $0x88] sm:$0xff] %v371_v19  ;;  %v373_v20 = vld [vmem:[%s1380_s9 + $0x120] sm:$0xff]  ;;  %v375_v21 = vld [vmem:[%s1380_s9 + $0x130] sm:$0xff] }
  0x34   : > { %v377_v22 = vld [vmem:[%s1380_s9 + $0x140] sm:$0xff]  ;;  %374 = vst [vmem:[%s1385_s10 + $0x90] sm:$0xff] %v373_v20  ;;  %376 = vst [vmem:[%s1385_s10 + $0x98] sm:$0xff] %v375_v21  ;;  %v379_v23 = vld [vmem:[%s1380_s9 + $0x150] sm:$0xff] }
  0x35   : > { %378 = vst [vmem:[%s1385_s10 + $0xa0] sm:$0xff] %v377_v22  ;;  %v381_v24 = vld [vmem:[%s1380_s9 + $0x160] sm:$0xff]  ;;  %v383_v25 = vld [vmem:[%s1380_s9 + $0x170] sm:$0xff]  ;;  %380 = vst [vmem:[%s1385_s10 + $0xa8] sm:$0xff] %v379_v23 }
  0x36   : > { %382 = vst [vmem:[%s1385_s10 + $0xb0] sm:$0xff] %v381_v24  ;;  %384 = vst [vmem:[%s1385_s10 + $0xb8] sm:$0xff] %v383_v25  ;;  %v385_v26 = vld [vmem:[%s1380_s9 + $0x180] sm:$0xff]  ;;  %v387_v27 = vld [vmem:[%s1380_s9 + $0x190] sm:$0xff] }
  0x37   : > { %v389_v28 = vld [vmem:[%s1380_s9 + $0x1a0] sm:$0xff]  ;;  %386 = vst [vmem:[%s1385_s10 + $0xc0] sm:$0xff] %v385_v26  ;;  %388 = vst [vmem:[%s1385_s10 + $0xc8] sm:$0xff] %v387_v27  ;;  %v391_v29 = vld [vmem:[%s1380_s9 + $0x1b0] sm:$0xff] }
  0x38   : > { %390 = vst [vmem:[%s1385_s10 + $0xd0] sm:$0xff] %v389_v28  ;;  %v393_v30 = vld [vmem:[%s1380_s9 + $0x1c0] sm:$0xff]  ;;  %v395_v31 = vld [vmem:[%s1380_s9 + $0x1d0] sm:$0xff]  ;;  %392 = vst [vmem:[%s1385_s10 + $0xd8] sm:$0xff] %v391_v29 }
  0x39   : > { %394 = vst [vmem:[%s1385_s10 + $0xe0] sm:$0xff] %v393_v30  ;;  %396 = vst [vmem:[%s1385_s10 + $0xe8] sm:$0xff] %v395_v31  ;;  %v397_v32 = vld [vmem:[%s1380_s9 + $0x1e0] sm:$0xff]  ;;  %v399_v33 = vld [vmem:[%s1380_s9 + $0x1f0] sm:$0xff] }
  0x3a   : > { %398 = vst [vmem:[%s1385_s10 + $0xf0] sm:$0xff] %v397_v32  ;;  %400 = vst [vmem:[%s1385_s10 + $0xf8] sm:$0xff] %v399_v33 }
  0x3b PF: > { %p962_p0 = scmp.ge.s32.totalorder %s1238_s25, 1  ;;  %p421_p1 = scmp.lt.s32.totalorder %s1238_s25, 9 }
  0x3d   : > { %p422_p2 = pnand %p962_p0, %p421_p1 }
  0x3e   : > { %s428_s20 = sand.u32 (!%p422_p2), 1, %s1214_s19   ;;  %s435_s27 = sand.u32 (!%p422_p2), 1, %s1206_s17  }
  0x3f   : > { %425 = sbr.rel (%p422_p2) target bundleno = 367 (0x16f), region = 104  ;;  %s1452_s28 = sshll.u32 (!%p422_p2), %s428_s20, 4 }
  0x40   : > { %s964_s7 = sshll.u32 (!%p422_p2), %s435_s27, 8  ;;  %s468_s8 = sand.u32 (!%p422_p2), 1, %s1198_s15  }
  0x41   : > { %s966_s11 = sshll.u32 (!%p422_p2), %s1226_s22, 1  ;;  %s965_s26 = sshll.u32 (!%p422_p2), %s468_s8, 5 }
  0x42   : > { %p476_p3 = scmp.lt.s32.totalorder (!%p422_p2), %s966_s11, 3  ;;  %s430_s19 = scalar_lea.vmem (!%p422_p2), [#allocation2], %s1452_s28 }
  0x43   : > { %s1467_s10 = scalar_lea.vmem (!%p422_p2), [#allocation3], %s964_s7  ;;  %s1469_s20 = scalar_lea.vmem (!%p422_p2), [#allocation4], %s965_s26 }
  0x44   : > { %s1616_s11 = smov (!%p476_p3, %s966_s11), 3  ;;  %p968_p4 = scmp.ne.s32.totalorder %s1222_s21, 0 }
  0x45   : > { %s478_s6 = scalar_lea.vmem %s1584_s2, %s1616_s11  ;;  %s483_s17 = scalar_lea.vmem %s1585_s3, %s1616_s11 }
  0x46   : > { %490 = sbr.rel (%p968_p4) target bundleno = 78 (0x4e), region = 116 }
  0x4b   : > { %v1240_v34 = vmov 0.0  }
  0x4c   : > { %491 = vst [vmem:[%s1469_s20] sm:$0xff] %v1240_v34  ;;  %492 = vst [vmem:[%s1469_s20 + $0x8] sm:$0xff] %v1240_v34 }
  0x4d   : > { %493 = vst [vmem:[%s1469_s20 + $0x10] sm:$0xff] %v1240_v34  ;;  %494 = vst [vmem:[%s1469_s20 + $0x18] sm:$0xff] %v1240_v34 }
  0x4e PF: > { %v1101_v35 = vld [vmem:[%s1467_s10 + $0x74] ss:$8 sps:$4 sm:$0xff]   ;;  %v1103_v36 = vld [vmem:[%s1467_s10 + $0x70] ss:$8 sps:$4 sm:$0xff]   ;;  %v1104_v37 = vld [vmem:[%s1467_s10 + $0x64] ss:$8 sps:$4 sm:$0xff]  }
  0x4f   : > { %703 = vmatprep.subr.bf16.mxu0 %v1101_v35  ;;  %v1106_v38 = vld [vmem:[%s1467_s10 + $0x60] ss:$8 sps:$4 sm:$0xff]   ;;  %v1107_v39 = vld [vmem:[%s1467_s10 + $0x54] ss:$8 sps:$4 sm:$0xff]   ;;  %v1109_v40 = vld [vmem:[%s1467_s10 + $0x50] ss:$8 sps:$4 sm:$0xff]  }
  0x50   : > { %704 = vmatpush1.bf16.msra.mxu0 %v1103_v36  ;;  %v1110_v41 = vld [vmem:[%s1467_s10 + $0x44] ss:$8 sps:$4 sm:$0xff]   ;;  %v1112_v42 = vld [vmem:[%s1467_s10 + $0x40] ss:$8 sps:$4 sm:$0xff]   ;;  %v1113_v43 = vld [vmem:[%s1467_s10 + $0x34] ss:$8 sps:$4 sm:$0xff]  }
  0x51   : > { %705 = vmatprep.subr.bf16.mxu0 %v1104_v37  ;;  %v1115_v44 = vld [vmem:[%s1467_s10 + $0x30] ss:$8 sps:$4 sm:$0xff]   ;;  %v1116_v45 = vld [vmem:[%s1467_s10 + $0x24] ss:$8 sps:$4 sm:$0xff]   ;;  %v1118_v46 = vld [vmem:[%s1467_s10 + $0x20] ss:$8 sps:$4 sm:$0xff]  }
  0x52   : > { %v1119_v47 = vld [vmem:[%s1467_s10 + $0x14] ss:$8 sps:$4 sm:$0xff]   ;;  %v1121_v49 = vld [vmem:[%s1467_s10 + $0x10] ss:$8 sps:$4 sm:$0xff]   ;;  %v1122_v50 = vld [vmem:[%s1467_s10 + $0x4] ss:$8 sps:$4 sm:$0xff]  }
  0x53   : > { %v1151_v48 = vld [vmem:[%s430_s19 + $0x4] ss:$8 sps:$4 sm:$0xff]   ;;  %v1124_v51 = vld [vmem:[%s1467_s10] ss:$8 sps:$4 sm:$0xff]   ;;  %v1127_v53 = vld [vmem:[%s1467_s10 + $0xf0] ss:$8 sps:$4 sm:$0xff]  }
  0x54   : > { %706 = vmatpush1.bf16.msra.mxu0 %v1106_v38  ;;  %735 = vmatprep.mubr.bf16.mxu0 %v1151_v48  ;;  %v1125_v52 = vld [vmem:[%s1467_s10 + $0xf4] ss:$8 sps:$4 sm:$0xff]   ;;  %v1128_v54 = vld [vmem:[%s1467_s10 + $0xe4] ss:$8 sps:$4 sm:$0xff]   ;;  %v1130_v55 = vld [vmem:[%s1467_s10 + $0xe0] ss:$8 sps:$4 sm:$0xff]  }
  0x55   : > { %707 = vmatprep.subr.bf16.mxu0 %v1107_v39  ;;  %v1131_v56 = vld [vmem:[%s1467_s10 + $0xd4] ss:$8 sps:$4 sm:$0xff]   ;;  %v1133_v57 = vld [vmem:[%s1467_s10 + $0xd0] ss:$8 sps:$4 sm:$0xff]   ;;  %v1134_v58 = vld [vmem:[%s1467_s10 + $0xc4] ss:$8 sps:$4 sm:$0xff]  }
  0x56   : > { %v1136_v59 = vld [vmem:[%s1467_s10 + $0xc0] ss:$8 sps:$4 sm:$0xff]   ;;  %v1137_v60 = vld [vmem:[%s1467_s10 + $0xb4] ss:$8 sps:$4 sm:$0xff]   ;;  %v1139_v61 = vld [vmem:[%s1467_s10 + $0xb0] ss:$8 sps:$4 sm:$0xff]  }
  0x57   : > { %v1140_v62 = vld [vmem:[%s1467_s10 + $0xa4] ss:$8 sps:$4 sm:$0xff]   ;;  %v1142_v63 = vld [vmem:[%s1467_s10 + $0xa0] ss:$8 sps:$4 sm:$0xff]   ;;  %v1143_v0 = vld [vmem:[%s1467_s10 + $0x94] ss:$8 sps:$4 sm:$0xff]  }
  0x58   : > { %708 = vmatpush1.bf16.msra.mxu0 %v1109_v40  ;;  %v1145_v1 = vld [vmem:[%s1467_s10 + $0x90] ss:$8 sps:$4 sm:$0xff]   ;;  %v1146_v2 = vld [vmem:[%s1467_s10 + $0x84] ss:$8 sps:$4 sm:$0xff]   ;;  %v1148_v3 = vld [vmem:[%s1467_s10 + $0x80] ss:$8 sps:$4 sm:$0xff]  }
  0x59   : > { %709 = vmatprep.subr.bf16.mxu0 %v1110_v41  ;;  %v1149_v4 = vld [vmem:[%s430_s19] ss:$8 sps:$4 sm:$0xff]   ;;  %p1003_p5 = scmp.ne.s32.totalorder %s1222_s21, 3 }
  0x5a   : > { %v495_v5 = vld [vmem:[%s1469_s20] sm:$0xff]  ;;  %v496_v7 = vld [vmem:[%s1469_s20 + $0x8] sm:$0xff]  ;;  %v497_v10 = vld [vmem:[%s1469_s20 + $0x10] sm:$0xff] }
  0x5b   : > { %v498_v13 = vld [vmem:[%s1469_s20 + $0x18] sm:$0xff] }
  0x5c   : > { %710 = vmatpush1.bf16.msra.mxu0 %v1112_v42 }
  0x5d   : > { %711 = vmatprep.subr.bf16.mxu0 %v1113_v43 }
  0x60   : > { %712 = vmatpush1.bf16.msra.mxu0 %v1115_v44 }
  0x61   : > { %713 = vmatprep.subr.bf16.mxu0 %v1116_v45 }
  0x64   : > { %714 = vmatpush1.bf16.msra.mxu0 %v1118_v46 }
  0x65   : > { %715 = vmatprep.subr.bf16.mxu0 %v1119_v47 }
  0x68   : > { %716 = vmatpush1.bf16.msra.mxu0 %v1121_v49 }
  0x69   : > { %717 = vmatprep.subr.bf16.mxu0 %v1122_v50 }
  0x6c   : > { %718 = vmatpush1.bf16.msra.mxu0 %v1124_v51 }
  0x6d   : > { %719 = vmatprep.subr.bf16.mxu0 %v1125_v52 }
  0x70   : > { %720 = vmatpush2.bf16.msra.mxu0 %v1127_v53 }
  0x71   : > { %721 = vmatprep.subr.bf16.mxu0 %v1128_v54 }
  0x74   : > { %722 = vmatpush2.bf16.msra.mxu0 %v1130_v55 }
  0x75   : > { %723 = vmatprep.subr.bf16.mxu0 %v1131_v56 }
  0x78   : > { %724 = vmatpush2.bf16.msra.mxu0 %v1133_v57 }
  0x79   : > { %725 = vmatprep.subr.bf16.mxu0 %v1134_v58 }
  0x7c   : > { %726 = vmatpush2.bf16.msra.mxu0 %v1136_v59 }
  0x7d   : > { %727 = vmatprep.subr.bf16.mxu0 %v1137_v60 }
  0x80   : > { %728 = vmatpush2.bf16.msra.mxu0 %v1139_v61 }
  0x81   : > { %729 = vmatprep.subr.bf16.mxu0 %v1140_v62 }
  0x84   : > { %730 = vmatpush2.bf16.msra.mxu0 %v1142_v63 }
  0x85   : > { %731 = vmatprep.subr.bf16.mxu0 %v1143_v0 }
  0x88   : > { %732 = vmatpush2.bf16.msra.mxu0 %v1145_v1 }
  0x89   : > { %733 = vmatprep.subr.bf16.mxu0 %v1146_v2 }
  0x8c   : > { %734 = vmatpush2.bf16.msra.mxu0 %v1148_v3 }
  0x8f   : > { %736 = vmatmul.mubr.bf16.vlgmr.msra.gmra.mxu0 %v1149_v4 }
 0x14f   : > { %v737_v6 = vpop.f32.mrf.mxu0 }
 0x150   : > { %v746_v8 = vadd.f32 %v737_v6, %v495_v5 }
 0x151   : > { %v739_v9 = vpop.f32.mrf.mxu0 }
 0x152   : > { %750 = vst [vmem:[%s1469_s20] sm:$0xff] %v746_v8  ;;  %v747_v11 = vadd.f32 %v739_v9, %v496_v7 }
 0x153   : > { %v741_v12 = vpop.f32.mrf.mxu0 }
 0x154   : > { %751 = vst [vmem:[%s1469_s20 + $0x8] sm:$0xff] %v747_v11  ;;  %v748_v14 = vadd.f32 %v741_v12, %v497_v10  ;;  %757 = sbr.rel (%p1003_p5) target bundleno = 359 (0x167), region = 120 }
 0x155   : > { %v743_v15 = vpop.f32.mrf.mxu0 }
 0x156   : > { %752 = vst [vmem:[%s1469_s20 + $0x10] sm:$0xff] %v748_v14  ;;  %v749_v16 = vadd.f32 %v743_v15, %v498_v13 }
 0x158   : > { %753 = vst [vmem:[%s1469_s20 + $0x18] sm:$0xff] %v749_v16 }
 0x159   : > { %v764_v17 = vlaneseq  ;;  %v762_v19 = vld [vmem:[%s478_s6] sm:$0x3] }
 0x15a   : > { %v778_v20 = vld [vmem:[%s483_s17] sm:$0x3] }
 0x15b   : > { %v765_v18 = vshrl.u32 %v764_v17, 7  ;;  %v758_v21 = vld [vmem:[%s1469_s20] sm:$0xff]  ;;  %v759_v24 = vld [vmem:[%s1469_s20 + $0x8] sm:$0xff] }
 0x15d   : > { %v766_v22 = vsub.s32 0, %v765_v18  ;;  %v770_v23 = vsub.s32 1, %v765_v18  ;;  %v760_v25 = vld [vmem:[%s1469_s20 + $0x10] sm:$0xff] }
 0x15f   : > { %v761_v26 = vld [vmem:[%s1469_s20 + $0x18] sm:$0xff]  ;;  %v767_v27 = vrot.slane %v762_v19, %v766_v22  ;;  %v783_v28 = vrot.slane %v778_v20, %v766_v22  ;;  %v771_v29 = vrot.slane %v762_v19, %v770_v23  ;;  %v787_v30 = vrot.slane %v778_v20, %v770_v23 }
 0x161   : > { %v774_v31 = vmul.f32 %v767_v27, %v758_v21  ;;  %v775_v32 = vmul.f32 %v771_v29, %v759_v24  ;;  %v776_v33 = vmul.f32 %v767_v27, %v760_v25  ;;  %v777_v34 = vmul.f32 %v771_v29, %v761_v26 }
 0x163   : > { %v790_v35 = vadd.f32 %v783_v28, %v774_v31  ;;  %v791_v36 = vadd.f32 %v787_v30, %v775_v32  ;;  %v792_v37 = vadd.f32 %v783_v28, %v776_v33  ;;  %v793_v38 = vadd.f32 %v787_v30, %v777_v34 }
 0x165   : > { %794 = vst [vmem:[%s1469_s20] sm:$0xff] %v790_v35  ;;  %795 = vst [vmem:[%s1469_s20 + $0x8] sm:$0xff] %v791_v36 }
 0x166   : > { %796 = vst [vmem:[%s1469_s20 + $0x10] sm:$0xff] %v792_v37  ;;  %797 = vst [vmem:[%s1469_s20 + $0x18] sm:$0xff] %v793_v38 }
 0x167 PF: > { %804 = sbr.rel (!%p1360_p12) target bundleno = 367 (0x16f), region = 124  ;;  %s1011_s21 = sshll.u32 (%p1360_p12), %s1226_s22, 4 }
 0x168   : > { %s810_s26 = scalar_lea.vmem (%p1360_p12), %s1586_s4, %s1011_s21 }
 0x16c   : > { %v823_v39 = vld [vmem:[%s1469_s20] sm:$0xff]  ;;  %v825_v40 = vld [vmem:[%s1469_s20 + $0x8] sm:$0xff] }
 0x16d   : > { %v827_v41 = vld [vmem:[%s1469_s20 + $0x10] sm:$0xff]  ;;  %v829_v42 = vld [vmem:[%s1469_s20 + $0x18] sm:$0xff]  ;;  %824 = vst [vmem:[%s810_s26] sm:$0xff] %v823_v39  ;;  %826 = vst [vmem:[%s810_s26 + $0x8] sm:$0xff] %v825_v40 }
 0x16e   : > { %828 = vst [vmem:[%s810_s26 + $0x20] sm:$0xff] %v827_v41  ;;  %830 = vst [vmem:[%s810_s26 + $0x28] sm:$0xff] %v829_v42 }
 0x16f PF: > { %s14_s25 = sadd.s32 1, %s1238_s25   ;;  %s1597_s19 = sld [smem:[#allocation5_spill]] }
 0x170   : > { %p11_p6 = scmp.ge.s32.totalorder %s14_s25, 10   ;;  %s1598_s20 = sld [smem:[#allocation8_spill]] }
 0x171   : > { %s1599_s14 = sld [smem:[#allocation6_spill]]  ;;  %s1601_s15 = smov %s1202_s16 }
 0x172   : > { %s1600_s5 = sld [smem:[#allocation7_spill]]  ;;  %s1602_s16 = smov %s1358_s13 }
 0x173   : > { %s1603_s17 = smov %s1210_s18  ;;  %s1604_s18 = smov %s1355_s12 }
 0x174   : > { %s1605_s21 = smov %s1230_s23  ;;  %s1606_s22 = smov %s1234_s24 }
 0x175   :  { %13 = sbr.rel (!%p11_p6) target bundleno = 6 (0x6), region = 192 }
 0x177   : > { %s1607_s23 = smov %s1599_s14 }
 0x178   : > { %s1608_s24 = smov %s1600_s5 }

// kernel: densenet121_forward.373
= control target key start
LH: loop header
LB: loop body
LE: loop exit
PB: predicated region body
PF: predicated region fallthrough
CT: control target
= control target key end

     0   :  { %v24_v0 = vlaneseq  ;;  %s208_s1 = inlined_call_operand.vmem [shape: f32[1,1024], index: 1, kind: input, shape index: {}]   ;;  %s209_s2 = inlined_call_operand.vmem [shape: f32[1,1024], index: 2, kind: input, shape index: {}]   ;;  %s210_s0 = inlined_call_operand.vmem [shape: f32[8,1024], index: 0, kind: input, shape index: {}]   ;;  %s211_s3 = inlined_call_operand.vmem [shape: f32[8,1024], index: 3, kind: output, shape index: {}]  }
   0x1   :  { %v22_v2 = vld [vmem:[%s208_s1] sm:$0xff]  ;;  %v15_v9 = vld [vmem:[%s210_s0 + $0x8] sm:$0xff]  ;;  %v16_v18 = vld [vmem:[%s210_s0 + $0x10] sm:$0xff] }
   0x2   :  { %v25_v1 = vshrl.u32 %v24_v0, 7  ;;  %v72_v3 = vld [vmem:[%s209_s2] sm:$0xff]  ;;  %v17_v19 = vld [vmem:[%s210_s0 + $0x18] sm:$0xff]  ;;  %v19_v29 = vld [vmem:[%s210_s0 + $0x28] sm:$0xff] }
   0x3   :  { %v14_v8 = vld [vmem:[%s210_s0] sm:$0xff]  ;;  %v20_v34 = vld [vmem:[%s210_s0 + $0x30] sm:$0xff]  ;;  %v21_v43 = vld [vmem:[%s210_s0 + $0x38] sm:$0xff] }
   0x4   :  { %v26_v4 = vsub.s32 0, %v25_v1  ;;  %v30_v5 = vsub.s32 1, %v25_v1  ;;  %v34_v6 = vsub.s32 2, %v25_v1  ;;  %v38_v7 = vsub.s32 3, %v25_v1  ;;  %v18_v24 = vld [vmem:[%s210_s0 + $0x20] sm:$0xff] }
   0x5   :  { %v42_v10 = vsub.s32 4, %v25_v1  ;;  %v46_v11 = vsub.s32 5, %v25_v1  ;;  %v50_v12 = vsub.s32 6, %v25_v1  ;;  %v54_v13 = vsub.s32 7, %v25_v1 }
   0x6   :  { %v27_v14 = vrot.slane %v22_v2, %v26_v4  ;;  %v77_v15 = vrot.slane %v72_v3, %v26_v4  ;;  %v31_v16 = vrot.slane %v22_v2, %v30_v5  ;;  %v81_v17 = vrot.slane %v72_v3, %v30_v5 }
   0x7   :  { %v35_v20 = vrot.slane %v22_v2, %v34_v6  ;;  %v85_v21 = vrot.slane %v72_v3, %v34_v6  ;;  %v39_v22 = vrot.slane %v22_v2, %v38_v7  ;;  %v89_v23 = vrot.slane %v72_v3, %v38_v7 }
   0x8   :  { %v64_v25 = vmul.f32 %v27_v14, %v14_v8  ;;  %v65_v26 = vmul.f32 %v31_v16, %v15_v9  ;;  %v43_v27 = vrot.slane %v22_v2, %v42_v10  ;;  %v93_v28 = vrot.slane %v72_v3, %v42_v10 }
   0x9   :  { %v66_v30 = vmul.f32 %v35_v20, %v16_v18  ;;  %v67_v31 = vmul.f32 %v39_v22, %v17_v19  ;;  %v47_v32 = vrot.slane %v22_v2, %v46_v11  ;;  %v97_v33 = vrot.slane %v72_v3, %v46_v11 }
   0xa   :  { %v114_v35 = vadd.f32 %v77_v15, %v64_v25  ;;  %v115_v36 = vadd.f32 %v81_v17, %v65_v26  ;;  %v68_v37 = vmul.f32 %v43_v27, %v18_v24  ;;  %v51_v38 = vrot.slane %v22_v2, %v50_v12 }
   0xb   :  { %v116_v39 = vadd.f32 %v85_v21, %v66_v30  ;;  %v117_v40 = vadd.f32 %v89_v23, %v67_v31  ;;  %v69_v41 = vmul.f32 %v47_v32, %v19_v29  ;;  %v101_v42 = vrot.slane %v72_v3, %v50_v12 }
   0xc   :  { %122 = vst [vmem:[%s211_s3] sm:$0xff] %v114_v35  ;;  %123 = vst [vmem:[%s211_s3 + $0x8] sm:$0xff] %v115_v36  ;;  %v118_v44 = vadd.f32 %v93_v28, %v68_v37  ;;  %v70_v45 = vmul.f32 %v51_v38, %v20_v34  ;;  %v55_v46 = vrot.slane %v22_v2, %v54_v13 }
   0xd   :  { %v105_v47 = vrot.slane %v72_v3, %v54_v13  ;;  %124 = vst [vmem:[%s211_s3 + $0x10] sm:$0xff] %v116_v39  ;;  %125 = vst [vmem:[%s211_s3 + $0x18] sm:$0xff] %v117_v40  ;;  %v119_v48 = vadd.f32 %v97_v33, %v69_v41 }
   0xe   :  { %126 = vst [vmem:[%s211_s3 + $0x20] sm:$0xff] %v118_v44  ;;  %v120_v49 = vadd.f32 %v101_v42, %v70_v45  ;;  %v71_v50 = vmul.f32 %v55_v46, %v21_v43 }
   0xf   :  { %127 = vst [vmem:[%s211_s3 + $0x28] sm:$0xff] %v119_v48 }
  0x10   :  { %128 = vst [vmem:[%s211_s3 + $0x30] sm:$0xff] %v120_v49  ;;  %v121_v51 = vadd.f32 %v105_v47, %v71_v50 }
  0x12   :  { %129 = vst [vmem:[%s211_s3 + $0x38] sm:$0xff] %v121_v51 }

// kernel: densenet121_forward.374
= control target key start
LH: loop header
LB: loop body
LE: loop exit
PB: predicated region body
PF: predicated region fallthrough
CT: control target
= control target key end

     0   :  { %s94_s0 = inlined_call_operand.vmem [shape: f32[1,8,1024], index: 0, kind: input, shape index: {}]   ;;  %s95_s1 = inlined_call_operand.vmem [shape: f32[8,1024], index: 1, kind: output, shape index: {}]  }
   0x1   :  { %v8_v0 = vld [vmem:[%s94_s0] sm:$0xff]  ;;  %v9_v1 = vld [vmem:[%s94_s0 + $0x8] sm:$0xff]  ;;  %v10_v2 = vld [vmem:[%s94_s0 + $0x10] sm:$0xff] }
   0x2   :  { %24 = vst [vmem:[%s95_s1] sm:$0xff] %v8_v0  ;;  %25 = vst [vmem:[%s95_s1 + $0x8] sm:$0xff] %v9_v1  ;;  %v11_v3 = vld [vmem:[%s94_s0 + $0x18] sm:$0xff]  ;;  %v12_v4 = vld [vmem:[%s94_s0 + $0x20] sm:$0xff] }
   0x3   :  { %26 = vst [vmem:[%s95_s1 + $0x10] sm:$0xff] %v10_v2  ;;  %v13_v5 = vld [vmem:[%s94_s0 + $0x28] sm:$0xff]  ;;  %27 = vst [vmem:[%s95_s1 + $0x18] sm:$0xff] %v11_v3  ;;  %v14_v6 = vld [vmem:[%s94_s0 + $0x30] sm:$0xff] }
   0x4   :  { %28 = vst [vmem:[%s95_s1 + $0x20] sm:$0xff] %v12_v4  ;;  %29 = vst [vmem:[%s95_s1 + $0x28] sm:$0xff] %v13_v5  ;;  %v15_v7 = vld [vmem:[%s94_s0 + $0x38] sm:$0xff] }
   0x5   :  { %30 = vst [vmem:[%s95_s1 + $0x30] sm:$0xff] %v14_v6  ;;  %31 = vst [vmem:[%s95_s1 + $0x38] sm:$0xff] %v15_v7 }

// kernel: densenet121_forward.375
= control target key start
LH: loop header
LB: loop body
LE: loop exit
PB: predicated region body
PF: predicated region fallthrough
CT: control target
= control target key end

     0   :  { %s864_s15 = smov 0   ;;  %s866_s16 = smov 0   ;;  %s992_s0 = inlined_call_operand.vmem [shape: bf16[16,1024], index: 0, kind: input, shape index: {}]   ;;  %s993_s1 = inlined_call_operand.vmem [shape: bf16[1024,128], index: 1, kind: input, shape index: {}]   ;;  %s994_s2 = inlined_call_operand.vmem [shape: f32[1,128], index: 2, kind: input, shape index: {}]   ;;  %s995_s3 = inlined_call_operand.vmem [shape: f32[1,128], index: 3, kind: input, shape index: {}]   ;;  %s996_s4 = inlined_call_operand.vmem [shape: f32[16,128], index: 4, kind: output, shape index: {}]  }
   0x1   :  { %s868_s17 = smov 0   ;;  %s870_s18 = smov 0  }
   0x2   :  { %s872_s19 = smov 0  }
   0x3 LB: > { %s26_s20 = sadd.s32 1, %s832_s18  ;;  %p49_p1 = scmp.ne.s32.totalorder %s824_s16, %s820_s15  ;;  %s836_s19 = sphi %s872_s19, %s14_s19   ;;  %s832_s18 = sphi %s870_s18, %s1000_s18   ;;  %s828_s17 = sphi %s868_s17, %s999_s17   ;;  %s824_s16 = sphi %s866_s16, %s998_s16   ;;  %s820_s15 = sphi %s864_s15, %s997_s15  }
   0x4   : > { %p27_p0 = scmp.ge.s32.totalorder %s26_s20, 4  ;;  %p50_p2 = scmp.eq.s32.totalorder %s836_s19, 0 }
   0x5   : > { %s42_s22 = sadd.s32 1, %s824_s16  ;;  %p681_p5 = scmp.ge.s32.totalorder %s836_s19, 4 }
   0x6   : > { %s1002_s20 = smov (%p27_p0, %s26_s20), 0  ;;  %p51_p3 = por %p50_p2, %p49_p1 }
   0x7   : > { %s38_s21 = ssub.s32 %s832_s18, %s1002_s20  ;;  %195 = sbr.rel (%p681_p5) target bundleno = 18 (0x12), region = 24 }
   0x8   : > { %p40_p4 = scmp.eq.s32.totalorder %s38_s21, 0 }
   0xa   : > { %s899_s23 = scalar_select %p40_p4, %s824_s16, %s42_s22  }
   0xc   : > { %198 = sbr.rel (!%p51_p3) target bundleno = 18 (0x12), region = 28  ;;  %s200_s24 = sand.u32 (%p51_p3), 1, %s824_s16  }
   0xd   : > { %s715_s25 = sshll.u32 (%p51_p3), %s832_s18, 3  ;;  %s682_s26 = sshll.u32 (%p51_p3), %s200_s24, 4 }
   0xe   : > { %s208_s29 = scalar_lea.vmem (%p51_p3), %s992_s0, %s715_s25  ;;  %s202_s30 = scalar_lea.vmem (%p51_p3), [#allocation2], %s682_s26 }
   0xf   : > { %v239_v0 = vld [vmem:[%s208_s29] sm:$0xff] (%p51_p3) }
  0x10   : > { %v241_v1 = vld [vmem:[%s208_s29 + $0x20] sm:$0xff] (%p51_p3)  ;;  %240 = vst [vmem:[%s202_s30] sm:$0xff] (%p51_p3), %v239_v0 }
  0x11   : > { %242 = vst [vmem:[%s202_s30 + $0x8] sm:$0xff] %v241_v1 }
  0x12 PF: > { %p685_p6 = scmp.ge.s32.totalorder %s836_s19, 1  ;;  %p259_p7 = scmp.lt.s32.totalorder %s836_s19, 5 }
  0x14   : > { %p260_p8 = pnand %p685_p6, %p259_p7 }
  0x15   : > { %s266_s5 = sand.u32 (!%p260_p8), 1, %s820_s15   ;;  %s687_s6 = sshll.u32 (!%p260_p8), %s828_s17, 5 }
  0x16   : > { %263 = sbr.rel (%p260_p8) target bundleno = 283 (0x11b), region = 70  ;;  %s911_s7 = sshll.u32 (!%p260_p8), %s266_s5, 4 }
  0x17   : > { %p311_p9 = scmp.lt.s32.totalorder (!%p260_p8), %s687_s6, 127  ;;  %s268_s12 = scalar_lea.vmem (!%p260_p8), [#allocation2], %s911_s7 }
  0x18   : > { %p689_p10 = scmp.ne.s32.totalorder (!%p260_p8), %s828_s17, 0 }
  0x1b   : > { %s1004_s6 = smov (!%p311_p9, %s687_s6), 127  ;;  %338 = sbr.rel (%p689_p10) target bundleno = 34 (0x22), region = 78 }
  0x1c   : > { %s688_s8 = sshll.u32 %s1004_s6, 2 }
  0x1d   : > { %s916_s11 = scalar_lea.vmem %s993_s1, %s688_s8 }
  0x20   : > { %v838_v2 = vmov 0.0  }
  0x21   : > { %339 = vst [vmem:[%s996_s4] sm:$0xff] %v838_v2  ;;  %340 = vst [vmem:[%s996_s4 + $0x8] sm:$0xff] %v838_v2 }
  0x22 PF: > { %v779_v3 = vld [vmem:[%s916_s11 + $0x78] sm:$0xff]   ;;  %v781_v5 = vld [vmem:[%s916_s11 + $0x70] sm:$0xff]   ;;  %v783_v7 = vld [vmem:[%s916_s11 + $0x68] sm:$0xff]   ;;  %p708_p11 = scmp.ne.s32.totalorder %s828_s17, 3 }
  0x23   : > { %v780_v4 = vld [vmem:[%s916_s11 + $0x38] sm:$0xff]   ;;  %716 = vmatprep.subr.bf16.mxu0 %v779_v3  ;;  %v782_v6 = vld [vmem:[%s916_s11 + $0x30] sm:$0xff]   ;;  %v784_v8 = vld [vmem:[%s916_s11 + $0x28] sm:$0xff]  }
  0x24   : > { %717 = vmatpush3.bf16.msra.mxu0 %v780_v4  ;;  %v785_v9 = vld [vmem:[%s916_s11 + $0x60] sm:$0xff]   ;;  %v787_v11 = vld [vmem:[%s916_s11 + $0x58] sm:$0xff]   ;;  %v789_v13 = vld [vmem:[%s916_s11 + $0x50] sm:$0xff]  }
  0x25   : > { %718 = vmatprep.subr.bf16.mxu0 %v781_v5  ;;  %v786_v10 = vld [vmem:[%s916_s11 + $0x20] sm:$0xff]   ;;  %v788_v12 = vld [vmem:[%s916_s11 + $0x18] sm:$0xff]   ;;  %v790_v15 = vld [vmem:[%s916_s11 + $0x10] sm:$0xff]  }
  0x26   : > { %v797_v14 = vld [vmem:[%s268_s12 + $0x4] ss:$8 sps:$4 sm:$0xff]   ;;  %v795_v20 = vld [vmem:[%s268_s12] ss:$8 sps:$4 sm:$0xff]  }
  0x27   : > { %515 = vmatprep.mubr.bf16.mxu0 %v797_v14  ;;  %v791_v16 = vld [vmem:[%s916_s11 + $0x48] sm:$0xff]   ;;  %v793_v18 = vld [vmem:[%s916_s11 + $0x40] sm:$0xff]  }
  0x28   : > { %719 = vmatpush3.bf16.msra.mxu0 %v782_v6  ;;  %v792_v17 = vld [vmem:[%s916_s11 + $0x8] sm:$0xff]   ;;  %v794_v19 = vld [vmem:[%s916_s11] sm:$0xff]  }
  0x29   : > { %720 = vmatprep.subr.bf16.mxu0 %v783_v7  ;;  %v341_v22 = vld [vmem:[%s996_s4] sm:$0xff]  ;;  %v342_v27 = vld [vmem:[%s996_s4 + $0x8] sm:$0xff] }
  0x2c   : > { %721 = vmatpush3.bf16.msra.mxu0 %v784_v8 }
  0x2d   : > { %722 = vmatprep.subr.bf16.mxu0 %v785_v9 }
  0x30   : > { %723 = vmatpush3.bf16.msra.mxu0 %v786_v10 }
  0x31   : > { %724 = vmatprep.subr.bf16.mxu0 %v787_v11 }
  0x34   : > { %725 = vmatpush3.bf16.msra.mxu0 %v788_v12 }
  0x35   : > { %726 = vmatprep.subr.bf16.mxu0 %v789_v13 }
  0x38   : > { %727 = vmatpush3.bf16.msra.mxu0 %v790_v15 }
  0x39   : > { %728 = vmatprep.subr.bf16.mxu0 %v791_v16 }
  0x3c   : > { %729 = vmatpush3.bf16.msra.mxu0 %v792_v17 }
  0x3d   : > { %730 = vmatprep.subr.bf16.mxu0 %v793_v18 }
  0x40   : > { %731 = vmatpush3.bf16.msra.mxu0 %v794_v19 }
  0x43   : > { %516 = vmatmul.mubr.bf16.vlgmr.msra.gmra.mxu0 %v795_v20 }
 0x103   : > { %v732_v21 = vpop.f32.mrf.mxu0 }
 0x105   : > { %v733_v23 = vpop.f32.mrf.mxu0 }
 0x106   : > { %v734_v24 = vadd.f32 %v733_v23, %v732_v21 }
 0x107   : > { %v735_v25 = vpop.f32.mrf.mxu0 }
 0x108   : > { %v524_v26 = vadd.f32 %v734_v24, %v341_v22 }
 0x109   : > { %v736_v28 = vpop.f32.mrf.mxu0 }
 0x10a   : > { %526 = vst [vmem:[%s996_s4] sm:$0xff] %v524_v26  ;;  %v737_v29 = vadd.f32 %v736_v28, %v735_v25  ;;  %531 = sbr.rel (%p708_p11) target bundleno = 283 (0x11b), region = 82 }
 0x10c   : > { %v525_v30 = vadd.f32 %v737_v29, %v342_v27 }
 0x10e   : > { %527 = vst [vmem:[%s996_s4 + $0x8] sm:$0xff] %v525_v30 }
 0x10f   : > { %v709_v32 = vld [vmem:[%s994_s2] ss:$0 sm:$0xff] }
 0x110   : > { %v710_v33 = vld [vmem:[%s995_s3] ss:$0 sm:$0xff] }
 0x111   : > { %v532_v31 = vld [vmem:[%s996_s4] sm:$0xff] }
 0x112   : > { %v541_v34 = vmul.f32 %v709_v32, %v532_v31 }
 0x114   : > { %v550_v37 = vadd.f32 %v710_v33, %v541_v34 }
 0x115   : > { %v533_v35 = vld [vmem:[%s996_s4 + $0x8] sm:$0xff] }
 0x116   : > { %v542_v36 = vmul.f32 %v709_v32, %v533_v35  ;;  %552 = vst [vmem:[%s996_s4] sm:$0xff] %v550_v37 }
 0x118   : > { %v551_v38 = vadd.f32 %v710_v33, %v542_v36 }
 0x11a   : > { %553 = vst [vmem:[%s996_s4 + $0x8] sm:$0xff] %v551_v38 }
 0x11b PF: > { %s14_s19 = sadd.s32 1, %s836_s19   ;;  %s997_s15 = smov %s824_s16 }
 0x11c   : > { %p11_p12 = scmp.ge.s32.totalorder %s14_s19, 6   ;;  %s998_s16 = smov %s899_s23 }
 0x11d   : > { %s999_s17 = smov %s832_s18  ;;  %s1000_s18 = smov %s1002_s20 }
 0x11e   :  { %13 = sbr.rel (!%p11_p12) target bundleno = 3 (0x3), region = 126 }

</bundles_post_ra>
